<compile_context>
chip_gen: v7x
topology: tpu7x:2x2x1
jax: 0.10.0
libtpu: 0.0.40
codegen_flags: <defaults>
</compile_context>

<pallas_src>
import math
import numpy as np
import jax
import jax.numpy as jnp
from jax.experimental import pallas as pl
from jax.experimental.pallas import tpu as pltpu

STAGES = [2, 2]
GROWTH = [4, 4]
BOTTLENECK = 4
REDUCTION = 0.5
NUM_CLASSES = 10
BN_EPS = 1e-5
HALO = 128                      # lane padding on each side of the conv halo scratch


def make_divisible(x, y):
    return int((x // y + 1) * y) if x % y else int(x)


# ----------------------------- host-side constants ----------------------------

def _conv_masks(N, H, W):
    """[9, N*H*W] validity mask per 3x3 tap (kh, kw) for pad-1 conv."""
    h = np.arange(H).reshape(H, 1)
    w = np.arange(W).reshape(1, W)
    rows = []
    for kh in (-1, 0, 1):
        for kw in (-1, 0, 1):
            valid = ((h + kh >= 0) & (h + kh < H) & (w + kw >= 0) & (w + kw < W))
            rows.append(np.tile(valid.reshape(-1), N))
    return jnp.asarray(np.stack(rows).astype(np.float32))


def _pool_select(N, H, W):
    """[N*H*W, N*Ho*Wo] 0/1 matrix selecting the top-left lane of every 2x2 block."""
    Ho, Wo = H // 2, W // 2
    S = np.zeros((N * H * W, N * Ho * Wo), np.float32)
    for n in range(N):
        for ho in range(Ho):
            for wo in range(Wo):
                mo = (n * Ho + ho) * Wo + wo
                mi = (n * H + 2 * ho) * W + 2 * wo
                S[mi, mo] = 1.0
    return jnp.asarray(S)


def _gap_matrix(N, H, W):
    """[N*H*W, N] global-average-pool matrix (1/(H*W) per image block)."""
    P = np.zeros((N * H * W, N), np.float32)
    for n in range(N):
        P[n * H * W:(n + 1) * H * W, n] = 1.0 / (H * W)
    return jnp.asarray(P)


def _max_channels():
    nf = 2 * GROWTH[0]
    cmax = max(nf, 3)
    for s, (n_layers, g) in enumerate(zip(STAGES, GROWTH)):
        cmax = max(cmax, BOTTLENECK * g, nf + n_layers * g)
        nf += n_layers * g
        if s != len(STAGES) - 1:
            nf = make_divisible(math.ceil(nf * REDUCTION), 1)
    return cmax


# --------------------------------- the kernel ---------------------------------

def make_net_kernel(N, H0, W0):
    H1, W1 = H0 // 2, W0 // 2
    M0, M1 = N * H0 * W0, N * H1 * W1
    c_init = 2 * GROWTH[0]
    mid = [BOTTLENECK * g for g in GROWTH]
    nf0 = c_init + STAGES[0] * GROWTH[0]
    out_f = make_divisible(math.ceil(nf0 * REDUCTION), 1)

    def bn_relu(x, g_ref, b_ref):
        """Training-mode BatchNorm (one-pass E[x], E[x^2], biased var) + ReLU on [C, M]."""
        m1 = jnp.mean(x, axis=1, keepdims=True)
        m2 = jnp.mean(x * x, axis=1, keepdims=True)
        inv = jax.lax.rsqrt(m2 - m1 * m1 + BN_EPS)
        return jnp.maximum((x - m1) * inv * g_ref[...] + b_ref[...], 0.0)

    def conv3x3(cscr, x, w_ref, mask_ref, cin, cout, M, Wimg):
        """3x3 / stride 1 / pad 1 conv on a [cin, M] slab via 9 accumulated matmuls.

        x is stored lane-aligned at [HALO, HALO+M) of the zero-bordered scratch; each tap
        reads a lane-shifted window, matmuls with its [cout, cin] weight and is masked per
        tap (out-of-image contributions are exact zeros)."""
        cscr[0:cin, HALO:HALO + M] = x
        acc = jnp.zeros((cout, M), jnp.float32)
        k = 0
        for kh in (-1, 0, 1):
            for kw in (-1, 0, 1):
                off = kh * Wimg + kw
                win = cscr[0:cin, HALO + off:HALO + off + M]
                tap = jnp.dot(w_ref[k], win, preferred_element_type=jnp.float32)
                acc = acc + tap * mask_ref[k:k + 1, :]
                k += 1
        return acc

    def kernel(*refs):
        x_ref, mask0, mask1, sel, gapm, w_init = refs[0:6]
        pos = 6
        stage_layers = []
        for s in range(len(STAGES)):
            ls = []
            for _ in range(STAGES[s]):
                ls.append(refs[pos:pos + 6])
                pos += 6
            stage_layers.append(ls)
        t_g, t_b, t_w, t_mw = refs[pos:pos + 4]
        pos += 4
        nl_g, nl_b, fc_w, fc_b = refs[pos:pos + 4]
        pos += 4
        out_ref, feat, cscr = refs[pos], refs[pos + 1], refs[pos + 2]

        # Zero the halo scratch once: border lanes must read as exact (finite) zeros.
        cscr[...] = jnp.zeros(cscr.shape, cscr.dtype)

        # ---- init_conv: plain 3x3 / pad 1 conv (no BN), 3 -> 2*growth channels.
        feat[0:c_init, 0:M0] = conv3x3(cscr, x_ref[...], w_init, mask0,
                                       3, c_init, M0, W0)
        c = c_init

        # ---- stage 0: _DenseLayer x STAGES[0]
        for (g1, b1, w1, g2, b2, w2) in stage_layers[0]:
            a = bn_relu(feat[0:c, 0:M0], g1, b1)                       # conv_1: BN-ReLU
            a = jnp.dot(w1[...], a, preferred_element_type=jnp.float32)  # 1x1 conv
            a = bn_relu(a, g2, b2)                                     # conv_2: BN-ReLU
            hg = conv3x3(cscr, a, w2, mask0, mid[0], GROWTH[0], M0, W0)  # 3x3 conv
            feat[c:c + GROWTH[0], 0:M0] = hg                           # cat([x_, x], 1)
            c += GROWTH[0]

        # ---- transition 0: BN-ReLU-1x1 conv + mixgb 2x2 pool (sigmoid(mw)-blended max/avg)
        a = bn_relu(feat[0:c, 0:M0], t_g, t_b)
        h = jnp.dot(t_w[...], a, preferred_element_type=jnp.float32)   # [out_f, M0]
        cscr[0:out_f, HALO:HALO + M0] = h
        h00 = cscr[0:out_f, HALO:HALO + M0]
        h01 = cscr[0:out_f, HALO + 1:HALO + 1 + M0]
        h10 = cscr[0:out_f, HALO + W0:HALO + W0 + M0]
        h11 = cscr[0:out_f, HALO + W0 + 1:HALO + W0 + 1 + M0]
        mx = jnp.maximum(jnp.maximum(h00, h01), jnp.maximum(h10, h11))
        av = (h00 + h01 + h10 + h11) * 0.25
        sig = 1.0 / (1.0 + jnp.exp(-t_mw[...]))                        # sigmoid(mw), [1,1]
        blend = mx * sig + av * (1.0 - sig)
        # select the top-left lane of every 2x2 block -> downsampled [out_f, M1]
        feat[0:out_f, 0:M1] = jnp.dot(blend, sel[...],
                                      preferred_element_type=jnp.float32)
        c = out_f

        # ---- stage 1: _DenseLayer x STAGES[1]
        for (g1, b1, w1, g2, b2, w2) in stage_layers[1]:
            a = bn_relu(feat[0:c, 0:M1], g1, b1)
            a = jnp.dot(w1[...], a, preferred_element_type=jnp.float32)
            a = bn_relu(a, g2, b2)
            hg = conv3x3(cscr, a, w2, mask1, mid[1], GROWTH[1], M1, W1)
            feat[c:c + GROWTH[1], 0:M1] = hg
            c += GROWTH[1]

        # ---- tail: norm_last BN-ReLU + global average pool + FC (transposed logits)
        z = bn_relu(feat[0:c, 0:M1], nl_g, nl_b)                       # [C, M1]
        pooled = jnp.dot(z, gapm[...], preferred_element_type=jnp.float32)   # [C, N]
        out_ref[...] = (jnp.dot(fc_w[...], pooled,
                                preferred_element_type=jnp.float32) + fc_b[...])

    return kernel


# -------------------------------- parameters ----------------------------------

def _kaiming(key, shape, fan_n):
    return jax.random.normal(key, shape, jnp.float32) * math.sqrt(2.0 / fan_n)


def init_params(key):
    keys = iter(jax.random.split(key, 64))
    params = {}
    nf = 2 * GROWTH[0]                                                 # 8
    # conv weights stored tap-major: [9, cout, cin]  (tap = (kh, kw) row-major)
    # TODO(synk): porting trained PyTorch weights (cout, cin, kh, kw) needs an explicit permute.
    params["init_conv_w"] = _kaiming(next(keys), (9, nf, 3), 9 * nf)

    for s, (n_layers, g) in enumerate(zip(STAGES, GROWTH)):
        layers = []
        for i in range(n_layers):
            cin = nf + i * g
            m = BOTTLENECK * g
            layers.append(dict(
                bn1_g=jnp.ones((cin, 1), jnp.float32),
                bn1_b=jnp.zeros((cin, 1), jnp.float32),
                conv1_w=_kaiming(next(keys), (m, cin), m),             # [cout, cin] (1x1)
                bn2_g=jnp.ones((m, 1), jnp.float32),
                bn2_b=jnp.zeros((m, 1), jnp.float32),
                conv2_w=_kaiming(next(keys), (9, g, m), 9 * g),        # [9, cout, cin] (3x3)
            ))
        params[f"block{s}"] = layers
        nf += n_layers * g
        if s != len(STAGES) - 1:
            out_f = make_divisible(math.ceil(nf * REDUCTION), 1)
            params[f"trans{s}"] = dict(
                bn_g=jnp.ones((nf, 1), jnp.float32),
                bn_b=jnp.zeros((nf, 1), jnp.float32),
                conv_w=_kaiming(next(keys), (out_f, nf), out_f),
                mw=jnp.full((1, 1), 0.5, jnp.float32),
            )
            nf = out_f

    params["norm_last_g"] = jnp.ones((nf, 1), jnp.float32)
    params["norm_last_b"] = jnp.zeros((nf, 1), jnp.float32)
    params["fc_w"] = (jax.random.normal(next(keys), (NUM_CLASSES, nf), jnp.float32)
                      / math.sqrt(nf))
    params["fc_b"] = jnp.zeros((NUM_CLASSES, 1), jnp.float32)
    return params


# ---------------------------------- forward -----------------------------------

def densenet_cust_forward(params, x_nchw):
    x = x_nchw.astype(jnp.float32)
    N, Cin, H, W = x.shape
    M0 = N * H * W
    H1, W1 = H // 2, W // 2
    M1 = N * H1 * W1

    # channels-on-sublanes / (batch*spatial)-on-lanes slab: [C, N*H*W]
    xt = jnp.transpose(x, (1, 0, 2, 3)).reshape(Cin, M0)

    mask0 = _conv_masks(N, H, W)
    mask1 = _conv_masks(N, H1, W1)
    sel = _pool_select(N, H, W)
    gapm = _gap_matrix(N, H1, W1)

    inputs = [xt, mask0, mask1, sel, gapm, params["init_conv_w"]]
    for s in range(len(STAGES)):
        for lp in params[f"block{s}"]:
            inputs += [lp["bn1_g"], lp["bn1_b"], lp["conv1_w"],
                       lp["bn2_g"], lp["bn2_b"], lp["conv2_w"]]
    tp = params["trans0"]
    inputs += [tp["bn_g"], tp["bn_b"], tp["conv_w"], tp["mw"]]
    inputs += [params["norm_last_g"], params["norm_last_b"],
               params["fc_w"], params["fc_b"]]

    cmax = _max_channels()                                             # 16

    logits_t = pl.pallas_call(
        make_net_kernel(N, H, W),
        out_shape=jax.ShapeDtypeStruct((NUM_CLASSES, N), jnp.float32),
        scratch_shapes=[
            pltpu.VMEM((cmax, M0), jnp.float32),              # growing feature slab
            pltpu.VMEM((cmax, M0 + 2 * HALO), jnp.float32),   # zero-haloed conv scratch
        ],
    )(*inputs)
    return logits_t.T                                                  # [N, NUM_CLASSES]


# ------------------------------------ main -------------------------------------

if __name__ == "__main__":
    root = jax.random.PRNGKey(0)
    pkey, xkey = jax.random.split(root)
    params = init_params(pkey)

    # small CIFAR-like input: batch=2, 3 channels, 16x16 spatial (NCHW)
    x = jax.random.normal(xkey, (2, 3, 16, 16), jnp.float32)

    fwd = jax.jit(lambda inp: densenet_cust_forward(params, inp))
    logits = fwd(x)
    jax.block_until_ready(logits)

    assert logits.shape == (2, NUM_CLASSES), logits.shape
    assert bool(jnp.all(jnp.isfinite(logits)))
    print("KERNEL_OK")
</pallas_src>

<mosaic_0001>
module attributes {stable_mosaic.version = 11 : i64} {
  func.func @kernel(%arg0: memref<3x512xf32, #tpu.memory_space<vmem>>, %arg1: memref<9x512xf32, #tpu.memory_space<vmem>>, %arg2: memref<9x128xf32, #tpu.memory_space<vmem>>, %arg3: memref<512x128xf32, #tpu.memory_space<vmem>>, %arg4: memref<128x2xf32, #tpu.memory_space<vmem>>, %arg5: memref<9x8x3xf32, #tpu.memory_space<vmem>>, %arg6: memref<8x1xf32, #tpu.memory_space<vmem>>, %arg7: memref<8x1xf32, #tpu.memory_space<vmem>>, %arg8: memref<16x8xf32, #tpu.memory_space<vmem>>, %arg9: memref<16x1xf32, #tpu.memory_space<vmem>>, %arg10: memref<16x1xf32, #tpu.memory_space<vmem>>, %arg11: memref<9x4x16xf32, #tpu.memory_space<vmem>>, %arg12: memref<12x1xf32, #tpu.memory_space<vmem>>, %arg13: memref<12x1xf32, #tpu.memory_space<vmem>>, %arg14: memref<16x12xf32, #tpu.memory_space<vmem>>, %arg15: memref<16x1xf32, #tpu.memory_space<vmem>>, %arg16: memref<16x1xf32, #tpu.memory_space<vmem>>, %arg17: memref<9x4x16xf32, #tpu.memory_space<vmem>>, %arg18: memref<8x1xf32, #tpu.memory_space<vmem>>, %arg19: memref<8x1xf32, #tpu.memory_space<vmem>>, %arg20: memref<16x8xf32, #tpu.memory_space<vmem>>, %arg21: memref<16x1xf32, #tpu.memory_space<vmem>>, %arg22: memref<16x1xf32, #tpu.memory_space<vmem>>, %arg23: memref<9x4x16xf32, #tpu.memory_space<vmem>>, %arg24: memref<12x1xf32, #tpu.memory_space<vmem>>, %arg25: memref<12x1xf32, #tpu.memory_space<vmem>>, %arg26: memref<16x12xf32, #tpu.memory_space<vmem>>, %arg27: memref<16x1xf32, #tpu.memory_space<vmem>>, %arg28: memref<16x1xf32, #tpu.memory_space<vmem>>, %arg29: memref<9x4x16xf32, #tpu.memory_space<vmem>>, %arg30: memref<16x1xf32, #tpu.memory_space<vmem>>, %arg31: memref<16x1xf32, #tpu.memory_space<vmem>>, %arg32: memref<8x16xf32, #tpu.memory_space<vmem>>, %arg33: memref<1x1xf32, #tpu.memory_space<vmem>>, %arg34: memref<16x1xf32, #tpu.memory_space<vmem>>, %arg35: memref<16x1xf32, #tpu.memory_space<vmem>>, %arg36: memref<10x16xf32, #tpu.memory_space<vmem>>, %arg37: memref<10x1xf32, #tpu.memory_space<vmem>>, %arg38: memref<10x2xf32, #tpu.memory_space<vmem>>, %arg39: memref<16x512xf32, #tpu.memory_space<vmem>>, %arg40: memref<16x768xf32, #tpu.memory_space<vmem>>) attributes {dimension_semantics = [], scalar_prefetch = 0 : i64, scratch_operands = 2 : i64, tpu.core_type = #tpu.core_type<tc>} {
    %cst = arith.constant 0.000000e+00 : f32
    %0 = vector.broadcast %cst : f32 to vector<16x768xf32>
    %c0 = arith.constant 0 : index
    %c0_0 = arith.constant 0 : index
    %1 = vector.load %arg40[%c0, %c0_0] : memref<16x768xf32, #tpu.memory_space<vmem>>, vector<16x768xf32>
    tpu.vector_store %arg40[%c0, %c0_0], %0 {strides = array<i32>} : memref<16x768xf32, #tpu.memory_space<vmem>>, vector<16x768xf32>,
    %c0_1 = arith.constant 0 : index
    %c0_2 = arith.constant 0 : index
    %2 = vector.load %arg0[%c0_1, %c0_2] : memref<3x512xf32, #tpu.memory_space<vmem>>, vector<3x512xf32>
    %c0_3 = arith.constant 0 : index
    %c128 = arith.constant 128 : index
    %3 = vector.load %arg40[%c0_3, %c128] : memref<16x768xf32, #tpu.memory_space<vmem>>, vector<3x512xf32>
    tpu.vector_store %arg40[%c0_3, %c128], %2 {strides = array<i32>} : memref<16x768xf32, #tpu.memory_space<vmem>>, vector<3x512xf32>,
    %cst_4 = arith.constant 0.000000e+00 : f32
    %4 = vector.broadcast %cst_4 : f32 to vector<8x512xf32>
    %c0_5 = arith.constant 0 : index
    %c111 = arith.constant 111 : index
    %5 = vector.load %arg40[%c0_5, %c111] : memref<16x768xf32, #tpu.memory_space<vmem>>, vector<3x512xf32>
    %c0_6 = arith.constant 0 : index
    %c0_7 = arith.constant 0 : index
    %c0_8 = arith.constant 0 : index
    %6 = vector.load %arg5[%c0_6, %c0_7, %c0_8] : memref<9x8x3xf32, #tpu.memory_space<vmem>>, vector<1x8x3xf32>
    %7 = vector.shape_cast %6 : vector<1x8x3xf32> to vector<8x3xf32>
    %cst_9 = arith.constant dense<0.000000e+00> : vector<8x512xf32>
    %8 = tpu.matmul %7, %5, %cst_9 {dimension_numbers = #tpu.dot_dimension_numbers<[1], [0], [0], [1], [0, 0, 1, 1], [], []>} : vector<8x3xf32>, vector<3x512xf32>, vector<8x512xf32> -> vector<8x512xf32>
    %c0_10 = arith.constant 0 : index
    %c0_11 = arith.constant 0 : index
    %9 = vector.load %arg1[%c0_10, %c0_11] : memref<9x512xf32, #tpu.memory_space<vmem>>, vector<1x512xf32>
    %10 = vector.broadcast %9 : vector<1x512xf32> to vector<8x512xf32>
    %11 = arith.mulf %8, %10 : vector<8x512xf32>
    %12 = arith.addf %4, %11 : vector<8x512xf32>
    %c0_12 = arith.constant 0 : index
    %c112 = arith.constant 112 : index
    %13 = vector.load %arg40[%c0_12, %c112] : memref<16x768xf32, #tpu.memory_space<vmem>>, vector<3x512xf32>
    %c1 = arith.constant 1 : index
    %c0_13 = arith.constant 0 : index
    %c0_14 = arith.constant 0 : index
    %14 = vector.load %arg5[%c1, %c0_13, %c0_14] : memref<9x8x3xf32, #tpu.memory_space<vmem>>, vector<1x8x3xf32>
    %15 = vector.shape_cast %14 : vector<1x8x3xf32> to vector<8x3xf32>
    %cst_15 = arith.constant dense<0.000000e+00> : vector<8x512xf32>
    %16 = tpu.matmul %15, %13, %cst_15 {dimension_numbers = #tpu.dot_dimension_numbers<[1], [0], [0], [1], [0, 0, 1, 1], [], []>} : vector<8x3xf32>, vector<3x512xf32>, vector<8x512xf32> -> vector<8x512xf32>
    %c1_16 = arith.constant 1 : index
    %c0_17 = arith.constant 0 : index
    %17 = vector.load %arg1[%c1_16, %c0_17] : memref<9x512xf32, #tpu.memory_space<vmem>>, vector<1x512xf32>
    %18 = vector.broadcast %17 : vector<1x512xf32> to vector<8x512xf32>
    %19 = arith.mulf %16, %18 : vector<8x512xf32>
    %20 = arith.addf %12, %19 : vector<8x512xf32>
    %c0_18 = arith.constant 0 : index
    %c113 = arith.constant 113 : index
    %21 = vector.load %arg40[%c0_18, %c113] : memref<16x768xf32, #tpu.memory_space<vmem>>, vector<3x512xf32>
    %c2 = arith.constant 2 : index
    %c0_19 = arith.constant 0 : index
    %c0_20 = arith.constant 0 : index
    %22 = vector.load %arg5[%c2, %c0_19, %c0_20] : memref<9x8x3xf32, #tpu.memory_space<vmem>>, vector<1x8x3xf32>
    %23 = vector.shape_cast %22 : vector<1x8x3xf32> to vector<8x3xf32>
    %cst_21 = arith.constant dense<0.000000e+00> : vector<8x512xf32>
    %24 = tpu.matmul %23, %21, %cst_21 {dimension_numbers = #tpu.dot_dimension_numbers<[1], [0], [0], [1], [0, 0, 1, 1], [], []>} : vector<8x3xf32>, vector<3x512xf32>, vector<8x512xf32> -> vector<8x512xf32>
    %c2_22 = arith.constant 2 : index
    %c0_23 = arith.constant 0 : index
    %25 = vector.load %arg1[%c2_22, %c0_23] : memref<9x512xf32, #tpu.memory_space<vmem>>, vector<1x512xf32>
    %26 = vector.broadcast %25 : vector<1x512xf32> to vector<8x512xf32>
    %27 = arith.mulf %24, %26 : vector<8x512xf32>
    %28 = arith.addf %20, %27 : vector<8x512xf32>
    %c0_24 = arith.constant 0 : index
    %c127 = arith.constant 127 : index
    %29 = vector.load %arg40[%c0_24, %c127] : memref<16x768xf32, #tpu.memory_space<vmem>>, vector<3x512xf32>
    %c3 = arith.constant 3 : index
    %c0_25 = arith.constant 0 : index
    %c0_26 = arith.constant 0 : index
    %30 = vector.load %arg5[%c3, %c0_25, %c0_26] : memref<9x8x3xf32, #tpu.memory_space<vmem>>, vector<1x8x3xf32>
    %31 = vector.shape_cast %30 : vector<1x8x3xf32> to vector<8x3xf32>
    %cst_27 = arith.constant dense<0.000000e+00> : vector<8x512xf32>
    %32 = tpu.matmul %31, %29, %cst_27 {dimension_numbers = #tpu.dot_dimension_numbers<[1], [0], [0], [1], [0, 0, 1, 1], [], []>} : vector<8x3xf32>, vector<3x512xf32>, vector<8x512xf32> -> vector<8x512xf32>
    %c3_28 = arith.constant 3 : index
    %c0_29 = arith.constant 0 : index
    %33 = vector.load %arg1[%c3_28, %c0_29] : memref<9x512xf32, #tpu.memory_space<vmem>>, vector<1x512xf32>
    %34 = vector.broadcast %33 : vector<1x512xf32> to vector<8x512xf32>
    %35 = arith.mulf %32, %34 : vector<8x512xf32>
    %36 = arith.addf %28, %35 : vector<8x512xf32>
    %c0_30 = arith.constant 0 : index
    %c128_31 = arith.constant 128 : index
    %37 = vector.load %arg40[%c0_30, %c128_31] : memref<16x768xf32, #tpu.memory_space<vmem>>, vector<3x512xf32>
    %c4 = arith.constant 4 : index
    %c0_32 = arith.constant 0 : index
    %c0_33 = arith.constant 0 : index
    %38 = vector.load %arg5[%c4, %c0_32, %c0_33] : memref<9x8x3xf32, #tpu.memory_space<vmem>>, vector<1x8x3xf32>
    %39 = vector.shape_cast %38 : vector<1x8x3xf32> to vector<8x3xf32>
    %cst_34 = arith.constant dense<0.000000e+00> : vector<8x512xf32>
    %40 = tpu.matmul %39, %37, %cst_34 {dimension_numbers = #tpu.dot_dimension_numbers<[1], [0], [0], [1], [0, 0, 1, 1], [], []>} : vector<8x3xf32>, vector<3x512xf32>, vector<8x512xf32> -> vector<8x512xf32>
    %c4_35 = arith.constant 4 : index
    %c0_36 = arith.constant 0 : index
    %41 = vector.load %arg1[%c4_35, %c0_36] : memref<9x512xf32, #tpu.memory_space<vmem>>, vector<1x512xf32>
    %42 = vector.broadcast %41 : vector<1x512xf32> to vector<8x512xf32>
    %43 = arith.mulf %40, %42 : vector<8x512xf32>
    %44 = arith.addf %36, %43 : vector<8x512xf32>
    %c0_37 = arith.constant 0 : index
    %c129 = arith.constant 129 : index
    %45 = vector.load %arg40[%c0_37, %c129] : memref<16x768xf32, #tpu.memory_space<vmem>>, vector<3x512xf32>
    %c5 = arith.constant 5 : index
    %c0_38 = arith.constant 0 : index
    %c0_39 = arith.constant 0 : index
    %46 = vector.load %arg5[%c5, %c0_38, %c0_39] : memref<9x8x3xf32, #tpu.memory_space<vmem>>, vector<1x8x3xf32>
    %47 = vector.shape_cast %46 : vector<1x8x3xf32> to vector<8x3xf32>
    %cst_40 = arith.constant dense<0.000000e+00> : vector<8x512xf32>
    %48 = tpu.matmul %47, %45, %cst_40 {dimension_numbers = #tpu.dot_dimension_numbers<[1], [0], [0], [1], [0, 0, 1, 1], [], []>} : vector<8x3xf32>, vector<3x512xf32>, vector<8x512xf32> -> vector<8x512xf32>
    %c5_41 = arith.constant 5 : index
    %c0_42 = arith.constant 0 : index
    %49 = vector.load %arg1[%c5_41, %c0_42] : memref<9x512xf32, #tpu.memory_space<vmem>>, vector<1x512xf32>
    %50 = vector.broadcast %49 : vector<1x512xf32> to vector<8x512xf32>
    %51 = arith.mulf %48, %50 : vector<8x512xf32>
    %52 = arith.addf %44, %51 : vector<8x512xf32>
    %c0_43 = arith.constant 0 : index
    %c143 = arith.constant 143 : index
    %53 = vector.load %arg40[%c0_43, %c143] : memref<16x768xf32, #tpu.memory_space<vmem>>, vector<3x512xf32>
    %c6 = arith.constant 6 : index
    %c0_44 = arith.constant 0 : index
    %c0_45 = arith.constant 0 : index
    %54 = vector.load %arg5[%c6, %c0_44, %c0_45] : memref<9x8x3xf32, #tpu.memory_space<vmem>>, vector<1x8x3xf32>
    %55 = vector.shape_cast %54 : vector<1x8x3xf32> to vector<8x3xf32>
    %cst_46 = arith.constant dense<0.000000e+00> : vector<8x512xf32>
    %56 = tpu.matmul %55, %53, %cst_46 {dimension_numbers = #tpu.dot_dimension_numbers<[1], [0], [0], [1], [0, 0, 1, 1], [], []>} : vector<8x3xf32>, vector<3x512xf32>, vector<8x512xf32> -> vector<8x512xf32>
    %c6_47 = arith.constant 6 : index
    %c0_48 = arith.constant 0 : index
    %57 = vector.load %arg1[%c6_47, %c0_48] : memref<9x512xf32, #tpu.memory_space<vmem>>, vector<1x512xf32>
    %58 = vector.broadcast %57 : vector<1x512xf32> to vector<8x512xf32>
    %59 = arith.mulf %56, %58 : vector<8x512xf32>
    %60 = arith.addf %52, %59 : vector<8x512xf32>
    %c0_49 = arith.constant 0 : index
    %c144 = arith.constant 144 : index
    %61 = vector.load %arg40[%c0_49, %c144] : memref<16x768xf32, #tpu.memory_space<vmem>>, vector<3x512xf32>
    %c7 = arith.constant 7 : index
    %c0_50 = arith.constant 0 : index
    %c0_51 = arith.constant 0 : index
    %62 = vector.load %arg5[%c7, %c0_50, %c0_51] : memref<9x8x3xf32, #tpu.memory_space<vmem>>, vector<1x8x3xf32>
    %63 = vector.shape_cast %62 : vector<1x8x3xf32> to vector<8x3xf32>
    %cst_52 = arith.constant dense<0.000000e+00> : vector<8x512xf32>
    %64 = tpu.matmul %63, %61, %cst_52 {dimension_numbers = #tpu.dot_dimension_numbers<[1], [0], [0], [1], [0, 0, 1, 1], [], []>} : vector<8x3xf32>, vector<3x512xf32>, vector<8x512xf32> -> vector<8x512xf32>
    %c7_53 = arith.constant 7 : index
    %c0_54 = arith.constant 0 : index
    %65 = vector.load %arg1[%c7_53, %c0_54] : memref<9x512xf32, #tpu.memory_space<vmem>>, vector<1x512xf32>
    %66 = vector.broadcast %65 : vector<1x512xf32> to vector<8x512xf32>
    %67 = arith.mulf %64, %66 : vector<8x512xf32>
    %68 = arith.addf %60, %67 : vector<8x512xf32>
    %c0_55 = arith.constant 0 : index
    %c145 = arith.constant 145 : index
    %69 = vector.load %arg40[%c0_55, %c145] : memref<16x768xf32, #tpu.memory_space<vmem>>, vector<3x512xf32>
    %c8 = arith.constant 8 : index
    %c0_56 = arith.constant 0 : index
    %c0_57 = arith.constant 0 : index
    %70 = vector.load %arg5[%c8, %c0_56, %c0_57] : memref<9x8x3xf32, #tpu.memory_space<vmem>>, vector<1x8x3xf32>
    %71 = vector.shape_cast %70 : vector<1x8x3xf32> to vector<8x3xf32>
    %cst_58 = arith.constant dense<0.000000e+00> : vector<8x512xf32>
    %72 = tpu.matmul %71, %69, %cst_58 {dimension_numbers = #tpu.dot_dimension_numbers<[1], [0], [0], [1], [0, 0, 1, 1], [], []>} : vector<8x3xf32>, vector<3x512xf32>, vector<8x512xf32> -> vector<8x512xf32>
    %c8_59 = arith.constant 8 : index
    %c0_60 = arith.constant 0 : index
    %73 = vector.load %arg1[%c8_59, %c0_60] : memref<9x512xf32, #tpu.memory_space<vmem>>, vector<1x512xf32>
    %74 = vector.broadcast %73 : vector<1x512xf32> to vector<8x512xf32>
    %75 = arith.mulf %72, %74 : vector<8x512xf32>
    %76 = arith.addf %68, %75 : vector<8x512xf32>
    %c0_61 = arith.constant 0 : index
    %c0_62 = arith.constant 0 : index
    %77 = vector.load %arg39[%c0_61, %c0_62] : memref<16x512xf32, #tpu.memory_space<vmem>>, vector<8x512xf32>
    tpu.vector_store %arg39[%c0_61, %c0_62], %76 {strides = array<i32>} : memref<16x512xf32, #tpu.memory_space<vmem>>, vector<8x512xf32>,
    %c0_63 = arith.constant 0 : index
    %c0_64 = arith.constant 0 : index
    %78 = vector.load %arg39[%c0_63, %c0_64] : memref<16x512xf32, #tpu.memory_space<vmem>>, vector<8x512xf32>
    %cst_65 = arith.constant dense<0.000000e+00> : vector<8xf32>
    %79 = vector.multi_reduction <add>, %78, %cst_65 [1] : vector<8x512xf32> to vector<8xf32>
    %80 = vector.shape_cast %79 : vector<8xf32> to vector<8x1xf32>
    %cst_66 = arith.constant 5.120000e+02 : f32
    %81 = vector.broadcast %cst_66 : f32 to vector<8x1xf32>
    %82 = arith.divf %80, %81 : vector<8x1xf32>
    %83 = arith.mulf %78, %78 : vector<8x512xf32>
    %cst_67 = arith.constant dense<0.000000e+00> : vector<8xf32>
    %84 = vector.multi_reduction <add>, %83, %cst_67 [1] : vector<8x512xf32> to vector<8xf32>
    %85 = vector.shape_cast %84 : vector<8xf32> to vector<8x1xf32>
    %cst_68 = arith.constant 5.120000e+02 : f32
    %86 = vector.broadcast %cst_68 : f32 to vector<8x1xf32>
    %87 = arith.divf %85, %86 : vector<8x1xf32>
    %88 = arith.mulf %82, %82 : vector<8x1xf32>
    %89 = arith.subf %87, %88 : vector<8x1xf32>
    %cst_69 = arith.constant 9.99999974E-6 : f32
    %90 = vector.broadcast %cst_69 : f32 to vector<8x1xf32>
    %91 = arith.addf %89, %90 : vector<8x1xf32>
    %92 = math.rsqrt %91 : vector<8x1xf32>
    %93 = vector.broadcast %82 : vector<8x1xf32> to vector<8x512xf32>
    %94 = arith.subf %78, %93 : vector<8x512xf32>
    %95 = vector.broadcast %92 : vector<8x1xf32> to vector<8x512xf32>
    %96 = arith.mulf %94, %95 : vector<8x512xf32>
    %c0_70 = arith.constant 0 : index
    %c0_71 = arith.constant 0 : index
    %97 = vector.load %arg6[%c0_70, %c0_71] : memref<8x1xf32, #tpu.memory_space<vmem>>, vector<8x1xf32>
    %98 = vector.broadcast %97 : vector<8x1xf32> to vector<8x512xf32>
    %99 = arith.mulf %96, %98 : vector<8x512xf32>
    %c0_72 = arith.constant 0 : index
    %c0_73 = arith.constant 0 : index
    %100 = vector.load %arg7[%c0_72, %c0_73] : memref<8x1xf32, #tpu.memory_space<vmem>>, vector<8x1xf32>
    %101 = vector.broadcast %100 : vector<8x1xf32> to vector<8x512xf32>
    %102 = arith.addf %99, %101 : vector<8x512xf32>
    %cst_74 = arith.constant 0.000000e+00 : f32
    %103 = vector.broadcast %cst_74 : f32 to vector<8x512xf32>
    %104 = arith.maximumf %102, %103 : vector<8x512xf32>
    %c0_75 = arith.constant 0 : index
    %c0_76 = arith.constant 0 : index
    %105 = vector.load %arg8[%c0_75, %c0_76] : memref<16x8xf32, #tpu.memory_space<vmem>>, vector<16x8xf32>
    %cst_77 = arith.constant dense<0.000000e+00> : vector<16x512xf32>
    %106 = tpu.matmul %105, %104, %cst_77 {dimension_numbers = #tpu.dot_dimension_numbers<[1], [0], [0], [1], [0, 0, 1, 1], [], []>} : vector<16x8xf32>, vector<8x512xf32>, vector<16x512xf32> -> vector<16x512xf32>
    %cst_78 = arith.constant dense<0.000000e+00> : vector<16xf32>
    %107 = vector.multi_reduction <add>, %106, %cst_78 [1] : vector<16x512xf32> to vector<16xf32>
    %108 = vector.shape_cast %107 : vector<16xf32> to vector<16x1xf32>
    %cst_79 = arith.constant 5.120000e+02 : f32
    %109 = vector.broadcast %cst_79 : f32 to vector<16x1xf32>
    %110 = arith.divf %108, %109 : vector<16x1xf32>
    %111 = arith.mulf %106, %106 : vector<16x512xf32>
    %cst_80 = arith.constant dense<0.000000e+00> : vector<16xf32>
    %112 = vector.multi_reduction <add>, %111, %cst_80 [1] : vector<16x512xf32> to vector<16xf32>
    %113 = vector.shape_cast %112 : vector<16xf32> to vector<16x1xf32>
    %cst_81 = arith.constant 5.120000e+02 : f32
    %114 = vector.broadcast %cst_81 : f32 to vector<16x1xf32>
    %115 = arith.divf %113, %114 : vector<16x1xf32>
    %116 = arith.mulf %110, %110 : vector<16x1xf32>
    %117 = arith.subf %115, %116 : vector<16x1xf32>
    %cst_82 = arith.constant 9.99999974E-6 : f32
    %118 = vector.broadcast %cst_82 : f32 to vector<16x1xf32>
    %119 = arith.addf %117, %118 : vector<16x1xf32>
    %120 = math.rsqrt %119 : vector<16x1xf32>
    %121 = vector.broadcast %110 : vector<16x1xf32> to vector<16x512xf32>
    %122 = arith.subf %106, %121 : vector<16x512xf32>
    %123 = vector.broadcast %120 : vector<16x1xf32> to vector<16x512xf32>
    %124 = arith.mulf %122, %123 : vector<16x512xf32>
    %c0_83 = arith.constant 0 : index
    %c0_84 = arith.constant 0 : index
    %125 = vector.load %arg9[%c0_83, %c0_84] : memref<16x1xf32, #tpu.memory_space<vmem>>, vector<16x1xf32>
    %126 = vector.broadcast %125 : vector<16x1xf32> to vector<16x512xf32>
    %127 = arith.mulf %124, %126 : vector<16x512xf32>
    %c0_85 = arith.constant 0 : index
    %c0_86 = arith.constant 0 : index
    %128 = vector.load %arg10[%c0_85, %c0_86] : memref<16x1xf32, #tpu.memory_space<vmem>>, vector<16x1xf32>
    %129 = vector.broadcast %128 : vector<16x1xf32> to vector<16x512xf32>
    %130 = arith.addf %127, %129 : vector<16x512xf32>
    %cst_87 = arith.constant 0.000000e+00 : f32
    %131 = vector.broadcast %cst_87 : f32 to vector<16x512xf32>
    %132 = arith.maximumf %130, %131 : vector<16x512xf32>
    %c0_88 = arith.constant 0 : index
    %c128_89 = arith.constant 128 : index
    %133 = vector.load %arg40[%c0_88, %c128_89] : memref<16x768xf32, #tpu.memory_space<vmem>>, vector<16x512xf32>
    tpu.vector_store %arg40[%c0_88, %c128_89], %132 {strides = array<i32>} : memref<16x768xf32, #tpu.memory_space<vmem>>, vector<16x512xf32>,
    %cst_90 = arith.constant 0.000000e+00 : f32
    %134 = vector.broadcast %cst_90 : f32 to vector<4x512xf32>
    %c0_91 = arith.constant 0 : index
    %c111_92 = arith.constant 111 : index
    %135 = vector.load %arg40[%c0_91, %c111_92] : memref<16x768xf32, #tpu.memory_space<vmem>>, vector<16x512xf32>
    %c0_93 = arith.constant 0 : index
    %c0_94 = arith.constant 0 : index
    %c0_95 = arith.constant 0 : index
    %136 = vector.load %arg11[%c0_93, %c0_94, %c0_95] : memref<9x4x16xf32, #tpu.memory_space<vmem>>, vector<1x4x16xf32>
    %137 = vector.shape_cast %136 : vector<1x4x16xf32> to vector<4x16xf32>
    %cst_96 = arith.constant dense<0.000000e+00> : vector<4x512xf32>
    %138 = tpu.matmul %137, %135, %cst_96 {dimension_numbers = #tpu.dot_dimension_numbers<[1], [0], [0], [1], [0, 0, 1, 1], [], []>} : vector<4x16xf32>, vector<16x512xf32>, vector<4x512xf32> -> vector<4x512xf32>
    %c0_97 = arith.constant 0 : index
    %c0_98 = arith.constant 0 : index
    %139 = vector.load %arg1[%c0_97, %c0_98] : memref<9x512xf32, #tpu.memory_space<vmem>>, vector<1x512xf32>
    %140 = vector.broadcast %139 : vector<1x512xf32> to vector<4x512xf32>
    %141 = arith.mulf %138, %140 : vector<4x512xf32>
    %142 = arith.addf %134, %141 : vector<4x512xf32>
    %c0_99 = arith.constant 0 : index
    %c112_100 = arith.constant 112 : index
    %143 = vector.load %arg40[%c0_99, %c112_100] : memref<16x768xf32, #tpu.memory_space<vmem>>, vector<16x512xf32>
    %c1_101 = arith.constant 1 : index
    %c0_102 = arith.constant 0 : index
    %c0_103 = arith.constant 0 : index
    %144 = vector.load %arg11[%c1_101, %c0_102, %c0_103] : memref<9x4x16xf32, #tpu.memory_space<vmem>>, vector<1x4x16xf32>
    %145 = vector.shape_cast %144 : vector<1x4x16xf32> to vector<4x16xf32>
    %cst_104 = arith.constant dense<0.000000e+00> : vector<4x512xf32>
    %146 = tpu.matmul %145, %143, %cst_104 {dimension_numbers = #tpu.dot_dimension_numbers<[1], [0], [0], [1], [0, 0, 1, 1], [], []>} : vector<4x16xf32>, vector<16x512xf32>, vector<4x512xf32> -> vector<4x512xf32>
    %c1_105 = arith.constant 1 : index
    %c0_106 = arith.constant 0 : index
    %147 = vector.load %arg1[%c1_105, %c0_106] : memref<9x512xf32, #tpu.memory_space<vmem>>, vector<1x512xf32>
    %148 = vector.broadcast %147 : vector<1x512xf32> to vector<4x512xf32>
    %149 = arith.mulf %146, %148 : vector<4x512xf32>
    %150 = arith.addf %142, %149 : vector<4x512xf32>
    %c0_107 = arith.constant 0 : index
    %c113_108 = arith.constant 113 : index
    %151 = vector.load %arg40[%c0_107, %c113_108] : memref<16x768xf32, #tpu.memory_space<vmem>>, vector<16x512xf32>
    %c2_109 = arith.constant 2 : index
    %c0_110 = arith.constant 0 : index
    %c0_111 = arith.constant 0 : index
    %152 = vector.load %arg11[%c2_109, %c0_110, %c0_111] : memref<9x4x16xf32, #tpu.memory_space<vmem>>, vector<1x4x16xf32>
    %153 = vector.shape_cast %152 : vector<1x4x16xf32> to vector<4x16xf32>
    %cst_112 = arith.constant dense<0.000000e+00> : vector<4x512xf32>
    %154 = tpu.matmul %153, %151, %cst_112 {dimension_numbers = #tpu.dot_dimension_numbers<[1], [0], [0], [1], [0, 0, 1, 1], [], []>} : vector<4x16xf32>, vector<16x512xf32>, vector<4x512xf32> -> vector<4x512xf32>
    %c2_113 = arith.constant 2 : index
    %c0_114 = arith.constant 0 : index
    %155 = vector.load %arg1[%c2_113, %c0_114] : memref<9x512xf32, #tpu.memory_space<vmem>>, vector<1x512xf32>
    %156 = vector.broadcast %155 : vector<1x512xf32> to vector<4x512xf32>
    %157 = arith.mulf %154, %156 : vector<4x512xf32>
    %158 = arith.addf %150, %157 : vector<4x512xf32>
    %c0_115 = arith.constant 0 : index
    %c127_116 = arith.constant 127 : index
    %159 = vector.load %arg40[%c0_115, %c127_116] : memref<16x768xf32, #tpu.memory_space<vmem>>, vector<16x512xf32>
    %c3_117 = arith.constant 3 : index
    %c0_118 = arith.constant 0 : index
    %c0_119 = arith.constant 0 : index
    %160 = vector.load %arg11[%c3_117, %c0_118, %c0_119] : memref<9x4x16xf32, #tpu.memory_space<vmem>>, vector<1x4x16xf32>
    %161 = vector.shape_cast %160 : vector<1x4x16xf32> to vector<4x16xf32>
    %cst_120 = arith.constant dense<0.000000e+00> : vector<4x512xf32>
    %162 = tpu.matmul %161, %159, %cst_120 {dimension_numbers = #tpu.dot_dimension_numbers<[1], [0], [0], [1], [0, 0, 1, 1], [], []>} : vector<4x16xf32>, vector<16x512xf32>, vector<4x512xf32> -> vector<4x512xf32>
    %c3_121 = arith.constant 3 : index
    %c0_122 = arith.constant 0 : index
    %163 = vector.load %arg1[%c3_121, %c0_122] : memref<9x512xf32, #tpu.memory_space<vmem>>, vector<1x512xf32>
    %164 = vector.broadcast %163 : vector<1x512xf32> to vector<4x512xf32>
    %165 = arith.mulf %162, %164 : vector<4x512xf32>
    %166 = arith.addf %158, %165 : vector<4x512xf32>
    %c0_123 = arith.constant 0 : index
    %c128_124 = arith.constant 128 : index
    %167 = vector.load %arg40[%c0_123, %c128_124] : memref<16x768xf32, #tpu.memory_space<vmem>>, vector<16x512xf32>
    %c4_125 = arith.constant 4 : index
    %c0_126 = arith.constant 0 : index
    %c0_127 = arith.constant 0 : index
    %168 = vector.load %arg11[%c4_125, %c0_126, %c0_127] : memref<9x4x16xf32, #tpu.memory_space<vmem>>, vector<1x4x16xf32>
    %169 = vector.shape_cast %168 : vector<1x4x16xf32> to vector<4x16xf32>
    %cst_128 = arith.constant dense<0.000000e+00> : vector<4x512xf32>
    %170 = tpu.matmul %169, %167, %cst_128 {dimension_numbers = #tpu.dot_dimension_numbers<[1], [0], [0], [1], [0, 0, 1, 1], [], []>} : vector<4x16xf32>, vector<16x512xf32>, vector<4x512xf32> -> vector<4x512xf32>
    %c4_129 = arith.constant 4 : index
    %c0_130 = arith.constant 0 : index
    %171 = vector.load %arg1[%c4_129, %c0_130] : memref<9x512xf32, #tpu.memory_space<vmem>>, vector<1x512xf32>
    %172 = vector.broadcast %171 : vector<1x512xf32> to vector<4x512xf32>
    %173 = arith.mulf %170, %172 : vector<4x512xf32>
    %174 = arith.addf %166, %173 : vector<4x512xf32>
    %c0_131 = arith.constant 0 : index
    %c129_132 = arith.constant 129 : index
    %175 = vector.load %arg40[%c0_131, %c129_132] : memref<16x768xf32, #tpu.memory_space<vmem>>, vector<16x512xf32>
    %c5_133 = arith.constant 5 : index
    %c0_134 = arith.constant 0 : index
    %c0_135 = arith.constant 0 : index
    %176 = vector.load %arg11[%c5_133, %c0_134, %c0_135] : memref<9x4x16xf32, #tpu.memory_space<vmem>>, vector<1x4x16xf32>
    %177 = vector.shape_cast %176 : vector<1x4x16xf32> to vector<4x16xf32>
    %cst_136 = arith.constant dense<0.000000e+00> : vector<4x512xf32>
    %178 = tpu.matmul %177, %175, %cst_136 {dimension_numbers = #tpu.dot_dimension_numbers<[1], [0], [0], [1], [0, 0, 1, 1], [], []>} : vector<4x16xf32>, vector<16x512xf32>, vector<4x512xf32> -> vector<4x512xf32>
    %c5_137 = arith.constant 5 : index
    %c0_138 = arith.constant 0 : index
    %179 = vector.load %arg1[%c5_137, %c0_138] : memref<9x512xf32, #tpu.memory_space<vmem>>, vector<1x512xf32>
    %180 = vector.broadcast %179 : vector<1x512xf32> to vector<4x512xf32>
    %181 = arith.mulf %178, %180 : vector<4x512xf32>
    %182 = arith.addf %174, %181 : vector<4x512xf32>
    %c0_139 = arith.constant 0 : index
    %c143_140 = arith.constant 143 : index
    %183 = vector.load %arg40[%c0_139, %c143_140] : memref<16x768xf32, #tpu.memory_space<vmem>>, vector<16x512xf32>
    %c6_141 = arith.constant 6 : index
    %c0_142 = arith.constant 0 : index
    %c0_143 = arith.constant 0 : index
    %184 = vector.load %arg11[%c6_141, %c0_142, %c0_143] : memref<9x4x16xf32, #tpu.memory_space<vmem>>, vector<1x4x16xf32>
    %185 = vector.shape_cast %184 : vector<1x4x16xf32> to vector<4x16xf32>
    %cst_144 = arith.constant dense<0.000000e+00> : vector<4x512xf32>
    %186 = tpu.matmul %185, %183, %cst_144 {dimension_numbers = #tpu.dot_dimension_numbers<[1], [0], [0], [1], [0, 0, 1, 1], [], []>} : vector<4x16xf32>, vector<16x512xf32>, vector<4x512xf32> -> vector<4x512xf32>
    %c6_145 = arith.constant 6 : index
    %c0_146 = arith.constant 0 : index
    %187 = vector.load %arg1[%c6_145, %c0_146] : memref<9x512xf32, #tpu.memory_space<vmem>>, vector<1x512xf32>
    %188 = vector.broadcast %187 : vector<1x512xf32> to vector<4x512xf32>
    %189 = arith.mulf %186, %188 : vector<4x512xf32>
    %190 = arith.addf %182, %189 : vector<4x512xf32>
    %c0_147 = arith.constant 0 : index
    %c144_148 = arith.constant 144 : index
    %191 = vector.load %arg40[%c0_147, %c144_148] : memref<16x768xf32, #tpu.memory_space<vmem>>, vector<16x512xf32>
    %c7_149 = arith.constant 7 : index
    %c0_150 = arith.constant 0 : index
    %c0_151 = arith.constant 0 : index
    %192 = vector.load %arg11[%c7_149, %c0_150, %c0_151] : memref<9x4x16xf32, #tpu.memory_space<vmem>>, vector<1x4x16xf32>
    %193 = vector.shape_cast %192 : vector<1x4x16xf32> to vector<4x16xf32>
    %cst_152 = arith.constant dense<0.000000e+00> : vector<4x512xf32>
    %194 = tpu.matmul %193, %191, %cst_152 {dimension_numbers = #tpu.dot_dimension_numbers<[1], [0], [0], [1], [0, 0, 1, 1], [], []>} : vector<4x16xf32>, vector<16x512xf32>, vector<4x512xf32> -> vector<4x512xf32>
    %c7_153 = arith.constant 7 : index
    %c0_154 = arith.constant 0 : index
    %195 = vector.load %arg1[%c7_153, %c0_154] : memref<9x512xf32, #tpu.memory_space<vmem>>, vector<1x512xf32>
    %196 = vector.broadcast %195 : vector<1x512xf32> to vector<4x512xf32>
    %197 = arith.mulf %194, %196 : vector<4x512xf32>
    %198 = arith.addf %190, %197 : vector<4x512xf32>
    %c0_155 = arith.constant 0 : index
    %c145_156 = arith.constant 145 : index
    %199 = vector.load %arg40[%c0_155, %c145_156] : memref<16x768xf32, #tpu.memory_space<vmem>>, vector<16x512xf32>
    %c8_157 = arith.constant 8 : index
    %c0_158 = arith.constant 0 : index
    %c0_159 = arith.constant 0 : index
    %200 = vector.load %arg11[%c8_157, %c0_158, %c0_159] : memref<9x4x16xf32, #tpu.memory_space<vmem>>, vector<1x4x16xf32>
    %201 = vector.shape_cast %200 : vector<1x4x16xf32> to vector<4x16xf32>
    %cst_160 = arith.constant dense<0.000000e+00> : vector<4x512xf32>
    %202 = tpu.matmul %201, %199, %cst_160 {dimension_numbers = #tpu.dot_dimension_numbers<[1], [0], [0], [1], [0, 0, 1, 1], [], []>} : vector<4x16xf32>, vector<16x512xf32>, vector<4x512xf32> -> vector<4x512xf32>
    %c8_161 = arith.constant 8 : index
    %c0_162 = arith.constant 0 : index
    %203 = vector.load %arg1[%c8_161, %c0_162] : memref<9x512xf32, #tpu.memory_space<vmem>>, vector<1x512xf32>
    %204 = vector.broadcast %203 : vector<1x512xf32> to vector<4x512xf32>
    %205 = arith.mulf %202, %204 : vector<4x512xf32>
    %206 = arith.addf %198, %205 : vector<4x512xf32>
    %c8_163 = arith.constant 8 : index
    %c0_164 = arith.constant 0 : index
    %207 = vector.load %arg39[%c8_163, %c0_164] : memref<16x512xf32, #tpu.memory_space<vmem>>, vector<4x512xf32>
    tpu.vector_store %arg39[%c8_163, %c0_164], %206 {strides = array<i32>} : memref<16x512xf32, #tpu.memory_space<vmem>>, vector<4x512xf32>,
    %c0_165 = arith.constant 0 : index
    %c0_166 = arith.constant 0 : index
    %208 = vector.load %arg39[%c0_165, %c0_166] : memref<16x512xf32, #tpu.memory_space<vmem>>, vector<12x512xf32>
    %cst_167 = arith.constant dense<0.000000e+00> : vector<12xf32>
    %209 = vector.multi_reduction <add>, %208, %cst_167 [1] : vector<12x512xf32> to vector<12xf32>
    %210 = vector.shape_cast %209 : vector<12xf32> to vector<12x1xf32>
    %cst_168 = arith.constant 5.120000e+02 : f32
    %211 = vector.broadcast %cst_168 : f32 to vector<12x1xf32>
    %212 = arith.divf %210, %211 : vector<12x1xf32>
    %213 = arith.mulf %208, %208 : vector<12x512xf32>
    %cst_169 = arith.constant dense<0.000000e+00> : vector<12xf32>
    %214 = vector.multi_reduction <add>, %213, %cst_169 [1] : vector<12x512xf32> to vector<12xf32>
    %215 = vector.shape_cast %214 : vector<12xf32> to vector<12x1xf32>
    %cst_170 = arith.constant 5.120000e+02 : f32
    %216 = vector.broadcast %cst_170 : f32 to vector<12x1xf32>
    %217 = arith.divf %215, %216 : vector<12x1xf32>
    %218 = arith.mulf %212, %212 : vector<12x1xf32>
    %219 = arith.subf %217, %218 : vector<12x1xf32>
    %cst_171 = arith.constant 9.99999974E-6 : f32
    %220 = vector.broadcast %cst_171 : f32 to vector<12x1xf32>
    %221 = arith.addf %219, %220 : vector<12x1xf32>
    %222 = math.rsqrt %221 : vector<12x1xf32>
    %223 = vector.broadcast %212 : vector<12x1xf32> to vector<12x512xf32>
    %224 = arith.subf %208, %223 : vector<12x512xf32>
    %225 = vector.broadcast %222 : vector<12x1xf32> to vector<12x512xf32>
    %226 = arith.mulf %224, %225 : vector<12x512xf32>
    %c0_172 = arith.constant 0 : index
    %c0_173 = arith.constant 0 : index
    %227 = vector.load %arg12[%c0_172, %c0_173] : memref<12x1xf32, #tpu.memory_space<vmem>>, vector<12x1xf32>
    %228 = vector.broadcast %227 : vector<12x1xf32> to vector<12x512xf32>
    %229 = arith.mulf %226, %228 : vector<12x512xf32>
    %c0_174 = arith.constant 0 : index
    %c0_175 = arith.constant 0 : index
    %230 = vector.load %arg13[%c0_174, %c0_175] : memref<12x1xf32, #tpu.memory_space<vmem>>, vector<12x1xf32>
    %231 = vector.broadcast %230 : vector<12x1xf32> to vector<12x512xf32>
    %232 = arith.addf %229, %231 : vector<12x512xf32>
    %cst_176 = arith.constant 0.000000e+00 : f32
    %233 = vector.broadcast %cst_176 : f32 to vector<12x512xf32>
    %234 = arith.maximumf %232, %233 : vector<12x512xf32>
    %c0_177 = arith.constant 0 : index
    %c0_178 = arith.constant 0 : index
    %235 = vector.load %arg14[%c0_177, %c0_178] : memref<16x12xf32, #tpu.memory_space<vmem>>, vector<16x12xf32>
    %cst_179 = arith.constant dense<0.000000e+00> : vector<16x512xf32>
    %236 = tpu.matmul %235, %234, %cst_179 {dimension_numbers = #tpu.dot_dimension_numbers<[1], [0], [0], [1], [0, 0, 1, 1], [], []>} : vector<16x12xf32>, vector<12x512xf32>, vector<16x512xf32> -> vector<16x512xf32>
    %cst_180 = arith.constant dense<0.000000e+00> : vector<16xf32>
    %237 = vector.multi_reduction <add>, %236, %cst_180 [1] : vector<16x512xf32> to vector<16xf32>
    %238 = vector.shape_cast %237 : vector<16xf32> to vector<16x1xf32>
    %cst_181 = arith.constant 5.120000e+02 : f32
    %239 = vector.broadcast %cst_181 : f32 to vector<16x1xf32>
    %240 = arith.divf %238, %239 : vector<16x1xf32>
    %241 = arith.mulf %236, %236 : vector<16x512xf32>
    %cst_182 = arith.constant dense<0.000000e+00> : vector<16xf32>
    %242 = vector.multi_reduction <add>, %241, %cst_182 [1] : vector<16x512xf32> to vector<16xf32>
    %243 = vector.shape_cast %242 : vector<16xf32> to vector<16x1xf32>
    %cst_183 = arith.constant 5.120000e+02 : f32
    %244 = vector.broadcast %cst_183 : f32 to vector<16x1xf32>
    %245 = arith.divf %243, %244 : vector<16x1xf32>
    %246 = arith.mulf %240, %240 : vector<16x1xf32>
    %247 = arith.subf %245, %246 : vector<16x1xf32>
    %cst_184 = arith.constant 9.99999974E-6 : f32
    %248 = vector.broadcast %cst_184 : f32 to vector<16x1xf32>
    %249 = arith.addf %247, %248 : vector<16x1xf32>
    %250 = math.rsqrt %249 : vector<16x1xf32>
    %251 = vector.broadcast %240 : vector<16x1xf32> to vector<16x512xf32>
    %252 = arith.subf %236, %251 : vector<16x512xf32>
    %253 = vector.broadcast %250 : vector<16x1xf32> to vector<16x512xf32>
    %254 = arith.mulf %252, %253 : vector<16x512xf32>
    %c0_185 = arith.constant 0 : index
    %c0_186 = arith.constant 0 : index
    %255 = vector.load %arg15[%c0_185, %c0_186] : memref<16x1xf32, #tpu.memory_space<vmem>>, vector<16x1xf32>
    %256 = vector.broadcast %255 : vector<16x1xf32> to vector<16x512xf32>
    %257 = arith.mulf %254, %256 : vector<16x512xf32>
    %c0_187 = arith.constant 0 : index
    %c0_188 = arith.constant 0 : index
    %258 = vector.load %arg16[%c0_187, %c0_188] : memref<16x1xf32, #tpu.memory_space<vmem>>, vector<16x1xf32>
    %259 = vector.broadcast %258 : vector<16x1xf32> to vector<16x512xf32>
    %260 = arith.addf %257, %259 : vector<16x512xf32>
    %cst_189 = arith.constant 0.000000e+00 : f32
    %261 = vector.broadcast %cst_189 : f32 to vector<16x512xf32>
    %262 = arith.maximumf %260, %261 : vector<16x512xf32>
    %c0_190 = arith.constant 0 : index
    %c128_191 = arith.constant 128 : index
    %263 = vector.load %arg40[%c0_190, %c128_191] : memref<16x768xf32, #tpu.memory_space<vmem>>, vector<16x512xf32>
    tpu.vector_store %arg40[%c0_190, %c128_191], %262 {strides = array<i32>} : memref<16x768xf32, #tpu.memory_space<vmem>>, vector<16x512xf32>,
    %cst_192 = arith.constant 0.000000e+00 : f32
    %264 = vector.broadcast %cst_192 : f32 to vector<4x512xf32>
    %c0_193 = arith.constant 0 : index
    %c111_194 = arith.constant 111 : index
    %265 = vector.load %arg40[%c0_193, %c111_194] : memref<16x768xf32, #tpu.memory_space<vmem>>, vector<16x512xf32>
    %c0_195 = arith.constant 0 : index
    %c0_196 = arith.constant 0 : index
    %c0_197 = arith.constant 0 : index
    %266 = vector.load %arg17[%c0_195, %c0_196, %c0_197] : memref<9x4x16xf32, #tpu.memory_space<vmem>>, vector<1x4x16xf32>
    %267 = vector.shape_cast %266 : vector<1x4x16xf32> to vector<4x16xf32>
    %cst_198 = arith.constant dense<0.000000e+00> : vector<4x512xf32>
    %268 = tpu.matmul %267, %265, %cst_198 {dimension_numbers = #tpu.dot_dimension_numbers<[1], [0], [0], [1], [0, 0, 1, 1], [], []>} : vector<4x16xf32>, vector<16x512xf32>, vector<4x512xf32> -> vector<4x512xf32>
    %c0_199 = arith.constant 0 : index
    %c0_200 = arith.constant 0 : index
    %269 = vector.load %arg1[%c0_199, %c0_200] : memref<9x512xf32, #tpu.memory_space<vmem>>, vector<1x512xf32>
    %270 = vector.broadcast %269 : vector<1x512xf32> to vector<4x512xf32>
    %271 = arith.mulf %268, %270 : vector<4x512xf32>
    %272 = arith.addf %264, %271 : vector<4x512xf32>
    %c0_201 = arith.constant 0 : index
    %c112_202 = arith.constant 112 : index
    %273 = vector.load %arg40[%c0_201, %c112_202] : memref<16x768xf32, #tpu.memory_space<vmem>>, vector<16x512xf32>
    %c1_203 = arith.constant 1 : index
    %c0_204 = arith.constant 0 : index
    %c0_205 = arith.constant 0 : index
    %274 = vector.load %arg17[%c1_203, %c0_204, %c0_205] : memref<9x4x16xf32, #tpu.memory_space<vmem>>, vector<1x4x16xf32>
    %275 = vector.shape_cast %274 : vector<1x4x16xf32> to vector<4x16xf32>
    %cst_206 = arith.constant dense<0.000000e+00> : vector<4x512xf32>
    %276 = tpu.matmul %275, %273, %cst_206 {dimension_numbers = #tpu.dot_dimension_numbers<[1], [0], [0], [1], [0, 0, 1, 1], [], []>} : vector<4x16xf32>, vector<16x512xf32>, vector<4x512xf32> -> vector<4x512xf32>
    %c1_207 = arith.constant 1 : index
    %c0_208 = arith.constant 0 : index
    %277 = vector.load %arg1[%c1_207, %c0_208] : memref<9x512xf32, #tpu.memory_space<vmem>>, vector<1x512xf32>
    %278 = vector.broadcast %277 : vector<1x512xf32> to vector<4x512xf32>
    %279 = arith.mulf %276, %278 : vector<4x512xf32>
    %280 = arith.addf %272, %279 : vector<4x512xf32>
    %c0_209 = arith.constant 0 : index
    %c113_210 = arith.constant 113 : index
    %281 = vector.load %arg40[%c0_209, %c113_210] : memref<16x768xf32, #tpu.memory_space<vmem>>, vector<16x512xf32>
    %c2_211 = arith.constant 2 : index
    %c0_212 = arith.constant 0 : index
    %c0_213 = arith.constant 0 : index
    %282 = vector.load %arg17[%c2_211, %c0_212, %c0_213] : memref<9x4x16xf32, #tpu.memory_space<vmem>>, vector<1x4x16xf32>
    %283 = vector.shape_cast %282 : vector<1x4x16xf32> to vector<4x16xf32>
    %cst_214 = arith.constant dense<0.000000e+00> : vector<4x512xf32>
    %284 = tpu.matmul %283, %281, %cst_214 {dimension_numbers = #tpu.dot_dimension_numbers<[1], [0], [0], [1], [0, 0, 1, 1], [], []>} : vector<4x16xf32>, vector<16x512xf32>, vector<4x512xf32> -> vector<4x512xf32>
    %c2_215 = arith.constant 2 : index
    %c0_216 = arith.constant 0 : index
    %285 = vector.load %arg1[%c2_215, %c0_216] : memref<9x512xf32, #tpu.memory_space<vmem>>, vector<1x512xf32>
    %286 = vector.broadcast %285 : vector<1x512xf32> to vector<4x512xf32>
    %287 = arith.mulf %284, %286 : vector<4x512xf32>
    %288 = arith.addf %280, %287 : vector<4x512xf32>
    %c0_217 = arith.constant 0 : index
    %c127_218 = arith.constant 127 : index
    %289 = vector.load %arg40[%c0_217, %c127_218] : memref<16x768xf32, #tpu.memory_space<vmem>>, vector<16x512xf32>
    %c3_219 = arith.constant 3 : index
    %c0_220 = arith.constant 0 : index
    %c0_221 = arith.constant 0 : index
    %290 = vector.load %arg17[%c3_219, %c0_220, %c0_221] : memref<9x4x16xf32, #tpu.memory_space<vmem>>, vector<1x4x16xf32>
    %291 = vector.shape_cast %290 : vector<1x4x16xf32> to vector<4x16xf32>
    %cst_222 = arith.constant dense<0.000000e+00> : vector<4x512xf32>
    %292 = tpu.matmul %291, %289, %cst_222 {dimension_numbers = #tpu.dot_dimension_numbers<[1], [0], [0], [1], [0, 0, 1, 1], [], []>} : vector<4x16xf32>, vector<16x512xf32>, vector<4x512xf32> -> vector<4x512xf32>
    %c3_223 = arith.constant 3 : index
    %c0_224 = arith.constant 0 : index
    %293 = vector.load %arg1[%c3_223, %c0_224] : memref<9x512xf32, #tpu.memory_space<vmem>>, vector<1x512xf32>
    %294 = vector.broadcast %293 : vector<1x512xf32> to vector<4x512xf32>
    %295 = arith.mulf %292, %294 : vector<4x512xf32>
    %296 = arith.addf %288, %295 : vector<4x512xf32>
    %c0_225 = arith.constant 0 : index
    %c128_226 = arith.constant 128 : index
    %297 = vector.load %arg40[%c0_225, %c128_226] : memref<16x768xf32, #tpu.memory_space<vmem>>, vector<16x512xf32>
    %c4_227 = arith.constant 4 : index
    %c0_228 = arith.constant 0 : index
    %c0_229 = arith.constant 0 : index
    %298 = vector.load %arg17[%c4_227, %c0_228, %c0_229] : memref<9x4x16xf32, #tpu.memory_space<vmem>>, vector<1x4x16xf32>
    %299 = vector.shape_cast %298 : vector<1x4x16xf32> to vector<4x16xf32>
    %cst_230 = arith.constant dense<0.000000e+00> : vector<4x512xf32>
    %300 = tpu.matmul %299, %297, %cst_230 {dimension_numbers = #tpu.dot_dimension_numbers<[1], [0], [0], [1], [0, 0, 1, 1], [], []>} : vector<4x16xf32>, vector<16x512xf32>, vector<4x512xf32> -> vector<4x512xf32>
    %c4_231 = arith.constant 4 : index
    %c0_232 = arith.constant 0 : index
    %301 = vector.load %arg1[%c4_231, %c0_232] : memref<9x512xf32, #tpu.memory_space<vmem>>, vector<1x512xf32>
    %302 = vector.broadcast %301 : vector<1x512xf32> to vector<4x512xf32>
    %303 = arith.mulf %300, %302 : vector<4x512xf32>
    %304 = arith.addf %296, %303 : vector<4x512xf32>
    %c0_233 = arith.constant 0 : index
    %c129_234 = arith.constant 129 : index
    %305 = vector.load %arg40[%c0_233, %c129_234] : memref<16x768xf32, #tpu.memory_space<vmem>>, vector<16x512xf32>
    %c5_235 = arith.constant 5 : index
    %c0_236 = arith.constant 0 : index
    %c0_237 = arith.constant 0 : index
    %306 = vector.load %arg17[%c5_235, %c0_236, %c0_237] : memref<9x4x16xf32, #tpu.memory_space<vmem>>, vector<1x4x16xf32>
    %307 = vector.shape_cast %306 : vector<1x4x16xf32> to vector<4x16xf32>
    %cst_238 = arith.constant dense<0.000000e+00> : vector<4x512xf32>
    %308 = tpu.matmul %307, %305, %cst_238 {dimension_numbers = #tpu.dot_dimension_numbers<[1], [0], [0], [1], [0, 0, 1, 1], [], []>} : vector<4x16xf32>, vector<16x512xf32>, vector<4x512xf32> -> vector<4x512xf32>
    %c5_239 = arith.constant 5 : index
    %c0_240 = arith.constant 0 : index
    %309 = vector.load %arg1[%c5_239, %c0_240] : memref<9x512xf32, #tpu.memory_space<vmem>>, vector<1x512xf32>
    %310 = vector.broadcast %309 : vector<1x512xf32> to vector<4x512xf32>
    %311 = arith.mulf %308, %310 : vector<4x512xf32>
    %312 = arith.addf %304, %311 : vector<4x512xf32>
    %c0_241 = arith.constant 0 : index
    %c143_242 = arith.constant 143 : index
    %313 = vector.load %arg40[%c0_241, %c143_242] : memref<16x768xf32, #tpu.memory_space<vmem>>, vector<16x512xf32>
    %c6_243 = arith.constant 6 : index
    %c0_244 = arith.constant 0 : index
    %c0_245 = arith.constant 0 : index
    %314 = vector.load %arg17[%c6_243, %c0_244, %c0_245] : memref<9x4x16xf32, #tpu.memory_space<vmem>>, vector<1x4x16xf32>
    %315 = vector.shape_cast %314 : vector<1x4x16xf32> to vector<4x16xf32>
    %cst_246 = arith.constant dense<0.000000e+00> : vector<4x512xf32>
    %316 = tpu.matmul %315, %313, %cst_246 {dimension_numbers = #tpu.dot_dimension_numbers<[1], [0], [0], [1], [0, 0, 1, 1], [], []>} : vector<4x16xf32>, vector<16x512xf32>, vector<4x512xf32> -> vector<4x512xf32>
    %c6_247 = arith.constant 6 : index
    %c0_248 = arith.constant 0 : index
    %317 = vector.load %arg1[%c6_247, %c0_248] : memref<9x512xf32, #tpu.memory_space<vmem>>, vector<1x512xf32>
    %318 = vector.broadcast %317 : vector<1x512xf32> to vector<4x512xf32>
    %319 = arith.mulf %316, %318 : vector<4x512xf32>
    %320 = arith.addf %312, %319 : vector<4x512xf32>
    %c0_249 = arith.constant 0 : index
    %c144_250 = arith.constant 144 : index
    %321 = vector.load %arg40[%c0_249, %c144_250] : memref<16x768xf32, #tpu.memory_space<vmem>>, vector<16x512xf32>
    %c7_251 = arith.constant 7 : index
    %c0_252 = arith.constant 0 : index
    %c0_253 = arith.constant 0 : index
    %322 = vector.load %arg17[%c7_251, %c0_252, %c0_253] : memref<9x4x16xf32, #tpu.memory_space<vmem>>, vector<1x4x16xf32>
    %323 = vector.shape_cast %322 : vector<1x4x16xf32> to vector<4x16xf32>
    %cst_254 = arith.constant dense<0.000000e+00> : vector<4x512xf32>
    %324 = tpu.matmul %323, %321, %cst_254 {dimension_numbers = #tpu.dot_dimension_numbers<[1], [0], [0], [1], [0, 0, 1, 1], [], []>} : vector<4x16xf32>, vector<16x512xf32>, vector<4x512xf32> -> vector<4x512xf32>
    %c7_255 = arith.constant 7 : index
    %c0_256 = arith.constant 0 : index
    %325 = vector.load %arg1[%c7_255, %c0_256] : memref<9x512xf32, #tpu.memory_space<vmem>>, vector<1x512xf32>
    %326 = vector.broadcast %325 : vector<1x512xf32> to vector<4x512xf32>
    %327 = arith.mulf %324, %326 : vector<4x512xf32>
    %328 = arith.addf %320, %327 : vector<4x512xf32>
    %c0_257 = arith.constant 0 : index
    %c145_258 = arith.constant 145 : index
    %329 = vector.load %arg40[%c0_257, %c145_258] : memref<16x768xf32, #tpu.memory_space<vmem>>, vector<16x512xf32>
    %c8_259 = arith.constant 8 : index
    %c0_260 = arith.constant 0 : index
    %c0_261 = arith.constant 0 : index
    %330 = vector.load %arg17[%c8_259, %c0_260, %c0_261] : memref<9x4x16xf32, #tpu.memory_space<vmem>>, vector<1x4x16xf32>
    %331 = vector.shape_cast %330 : vector<1x4x16xf32> to vector<4x16xf32>
    %cst_262 = arith.constant dense<0.000000e+00> : vector<4x512xf32>
    %332 = tpu.matmul %331, %329, %cst_262 {dimension_numbers = #tpu.dot_dimension_numbers<[1], [0], [0], [1], [0, 0, 1, 1], [], []>} : vector<4x16xf32>, vector<16x512xf32>, vector<4x512xf32> -> vector<4x512xf32>
    %c8_263 = arith.constant 8 : index
    %c0_264 = arith.constant 0 : index
    %333 = vector.load %arg1[%c8_263, %c0_264] : memref<9x512xf32, #tpu.memory_space<vmem>>, vector<1x512xf32>
    %334 = vector.broadcast %333 : vector<1x512xf32> to vector<4x512xf32>
    %335 = arith.mulf %332, %334 : vector<4x512xf32>
    %336 = arith.addf %328, %335 : vector<4x512xf32>
    %c12 = arith.constant 12 : index
    %c0_265 = arith.constant 0 : index
    %337 = vector.load %arg39[%c12, %c0_265] : memref<16x512xf32, #tpu.memory_space<vmem>>, vector<4x512xf32>
    tpu.vector_store %arg39[%c12, %c0_265], %336 {strides = array<i32>} : memref<16x512xf32, #tpu.memory_space<vmem>>, vector<4x512xf32>,
    %c0_266 = arith.constant 0 : index
    %c0_267 = arith.constant 0 : index
    %338 = vector.load %arg39[%c0_266, %c0_267] : memref<16x512xf32, #tpu.memory_space<vmem>>, vector<16x512xf32>
    %cst_268 = arith.constant dense<0.000000e+00> : vector<16xf32>
    %339 = vector.multi_reduction <add>, %338, %cst_268 [1] : vector<16x512xf32> to vector<16xf32>
    %340 = vector.shape_cast %339 : vector<16xf32> to vector<16x1xf32>
    %cst_269 = arith.constant 5.120000e+02 : f32
    %341 = vector.broadcast %cst_269 : f32 to vector<16x1xf32>
    %342 = arith.divf %340, %341 : vector<16x1xf32>
    %343 = arith.mulf %338, %338 : vector<16x512xf32>
    %cst_270 = arith.constant dense<0.000000e+00> : vector<16xf32>
    %344 = vector.multi_reduction <add>, %343, %cst_270 [1] : vector<16x512xf32> to vector<16xf32>
    %345 = vector.shape_cast %344 : vector<16xf32> to vector<16x1xf32>
    %cst_271 = arith.constant 5.120000e+02 : f32
    %346 = vector.broadcast %cst_271 : f32 to vector<16x1xf32>
    %347 = arith.divf %345, %346 : vector<16x1xf32>
    %348 = arith.mulf %342, %342 : vector<16x1xf32>
    %349 = arith.subf %347, %348 : vector<16x1xf32>
    %cst_272 = arith.constant 9.99999974E-6 : f32
    %350 = vector.broadcast %cst_272 : f32 to vector<16x1xf32>
    %351 = arith.addf %349, %350 : vector<16x1xf32>
    %352 = math.rsqrt %351 : vector<16x1xf32>
    %353 = vector.broadcast %342 : vector<16x1xf32> to vector<16x512xf32>
    %354 = arith.subf %338, %353 : vector<16x512xf32>
    %355 = vector.broadcast %352 : vector<16x1xf32> to vector<16x512xf32>
    %356 = arith.mulf %354, %355 : vector<16x512xf32>
    %c0_273 = arith.constant 0 : index
    %c0_274 = arith.constant 0 : index
    %357 = vector.load %arg30[%c0_273, %c0_274] : memref<16x1xf32, #tpu.memory_space<vmem>>, vector<16x1xf32>
    %358 = vector.broadcast %357 : vector<16x1xf32> to vector<16x512xf32>
    %359 = arith.mulf %356, %358 : vector<16x512xf32>
    %c0_275 = arith.constant 0 : index
    %c0_276 = arith.constant 0 : index
    %360 = vector.load %arg31[%c0_275, %c0_276] : memref<16x1xf32, #tpu.memory_space<vmem>>, vector<16x1xf32>
    %361 = vector.broadcast %360 : vector<16x1xf32> to vector<16x512xf32>
    %362 = arith.addf %359, %361 : vector<16x512xf32>
    %cst_277 = arith.constant 0.000000e+00 : f32
    %363 = vector.broadcast %cst_277 : f32 to vector<16x512xf32>
    %364 = arith.maximumf %362, %363 : vector<16x512xf32>
    %c0_278 = arith.constant 0 : index
    %c0_279 = arith.constant 0 : index
    %365 = vector.load %arg32[%c0_278, %c0_279] : memref<8x16xf32, #tpu.memory_space<vmem>>, vector<8x16xf32>
    %cst_280 = arith.constant dense<0.000000e+00> : vector<8x512xf32>
    %366 = tpu.matmul %365, %364, %cst_280 {dimension_numbers = #tpu.dot_dimension_numbers<[1], [0], [0], [1], [0, 0, 1, 1], [], []>} : vector<8x16xf32>, vector<16x512xf32>, vector<8x512xf32> -> vector<8x512xf32>
    %c0_281 = arith.constant 0 : index
    %c128_282 = arith.constant 128 : index
    %367 = vector.load %arg40[%c0_281, %c128_282] : memref<16x768xf32, #tpu.memory_space<vmem>>, vector<8x512xf32>
    tpu.vector_store %arg40[%c0_281, %c128_282], %366 {strides = array<i32>} : memref<16x768xf32, #tpu.memory_space<vmem>>, vector<8x512xf32>,
    %c0_283 = arith.constant 0 : index
    %c128_284 = arith.constant 128 : index
    %368 = vector.load %arg40[%c0_283, %c128_284] : memref<16x768xf32, #tpu.memory_space<vmem>>, vector<8x512xf32>
    %c0_285 = arith.constant 0 : index
    %c129_286 = arith.constant 129 : index
    %369 = vector.load %arg40[%c0_285, %c129_286] : memref<16x768xf32, #tpu.memory_space<vmem>>, vector<8x512xf32>
    %c0_287 = arith.constant 0 : index
    %c144_288 = arith.constant 144 : index
    %370 = vector.load %arg40[%c0_287, %c144_288] : memref<16x768xf32, #tpu.memory_space<vmem>>, vector<8x512xf32>
    %c0_289 = arith.constant 0 : index
    %c145_290 = arith.constant 145 : index
    %371 = vector.load %arg40[%c0_289, %c145_290] : memref<16x768xf32, #tpu.memory_space<vmem>>, vector<8x512xf32>
    %372 = arith.maximumf %368, %369 : vector<8x512xf32>
    %373 = arith.maximumf %370, %371 : vector<8x512xf32>
    %374 = arith.maximumf %372, %373 : vector<8x512xf32>
    %375 = arith.addf %368, %369 : vector<8x512xf32>
    %376 = arith.addf %375, %370 : vector<8x512xf32>
    %377 = arith.addf %376, %371 : vector<8x512xf32>
    %cst_291 = arith.constant 2.500000e-01 : f32
    %378 = vector.broadcast %cst_291 : f32 to vector<8x512xf32>
    %379 = arith.mulf %377, %378 : vector<8x512xf32>
    %c0_292 = arith.constant 0 : index
    %c0_293 = arith.constant 0 : index
    %380 = vector.load %arg33[%c0_292, %c0_293] : memref<1x1xf32, #tpu.memory_space<vmem>>, vector<1x1xf32>
    %cst_294 = arith.constant 0.000000e+00 : f32
    %381 = vector.broadcast %cst_294 : f32 to vector<1x1xf32>
    %382 = arith.subf %381, %380 : vector<1x1xf32>
    %383 = math.exp %382 : vector<1x1xf32>
    %cst_295 = arith.constant 1.000000e+00 : f32
    %384 = vector.broadcast %cst_295 : f32 to vector<1x1xf32>
    %385 = arith.addf %384, %383 : vector<1x1xf32>
    %cst_296 = arith.constant 1.000000e+00 : f32
    %386 = vector.broadcast %cst_296 : f32 to vector<1x1xf32>
    %387 = arith.divf %386, %385 : vector<1x1xf32>
    %388 = vector.broadcast %387 : vector<1x1xf32> to vector<8x512xf32>
    %389 = arith.mulf %374, %388 : vector<8x512xf32>
    %cst_297 = arith.constant 1.000000e+00 : f32
    %390 = vector.broadcast %cst_297 : f32 to vector<1x1xf32>
    %391 = arith.subf %390, %387 : vector<1x1xf32>
    %392 = vector.broadcast %391 : vector<1x1xf32> to vector<8x512xf32>
    %393 = arith.mulf %379, %392 : vector<8x512xf32>
    %394 = arith.addf %389, %393 : vector<8x512xf32>
    %c0_298 = arith.constant 0 : index
    %c0_299 = arith.constant 0 : index
    %395 = vector.load %arg3[%c0_298, %c0_299] : memref<512x128xf32, #tpu.memory_space<vmem>>, vector<512x128xf32>
    %cst_300 = arith.constant dense<0.000000e+00> : vector<8x128xf32>
    %396 = tpu.matmul %394, %395, %cst_300 {dimension_numbers = #tpu.dot_dimension_numbers<[1], [0], [0], [1], [0, 0, 1, 1], [], []>} : vector<8x512xf32>, vector<512x128xf32>, vector<8x128xf32> -> vector<8x128xf32>
    %c0_301 = arith.constant 0 : index
    %c0_302 = arith.constant 0 : index
    %397 = vector.load %arg39[%c0_301, %c0_302] : memref<16x512xf32, #tpu.memory_space<vmem>>, vector<8x128xf32>
    tpu.vector_store %arg39[%c0_301, %c0_302], %396 {strides = array<i32>} : memref<16x512xf32, #tpu.memory_space<vmem>>, vector<8x128xf32>,
    %c0_303 = arith.constant 0 : index
    %c0_304 = arith.constant 0 : index
    %398 = vector.load %arg39[%c0_303, %c0_304] : memref<16x512xf32, #tpu.memory_space<vmem>>, vector<8x128xf32>
    %cst_305 = arith.constant dense<0.000000e+00> : vector<8xf32>
    %399 = vector.multi_reduction <add>, %398, %cst_305 [1] : vector<8x128xf32> to vector<8xf32>
    %400 = vector.shape_cast %399 : vector<8xf32> to vector<8x1xf32>
    %cst_306 = arith.constant 1.280000e+02 : f32
    %401 = vector.broadcast %cst_306 : f32 to vector<8x1xf32>
    %402 = arith.divf %400, %401 : vector<8x1xf32>
    %403 = arith.mulf %398, %398 : vector<8x128xf32>
    %cst_307 = arith.constant dense<0.000000e+00> : vector<8xf32>
    %404 = vector.multi_reduction <add>, %403, %cst_307 [1] : vector<8x128xf32> to vector<8xf32>
    %405 = vector.shape_cast %404 : vector<8xf32> to vector<8x1xf32>
    %cst_308 = arith.constant 1.280000e+02 : f32
    %406 = vector.broadcast %cst_308 : f32 to vector<8x1xf32>
    %407 = arith.divf %405, %406 : vector<8x1xf32>
    %408 = arith.mulf %402, %402 : vector<8x1xf32>
    %409 = arith.subf %407, %408 : vector<8x1xf32>
    %cst_309 = arith.constant 9.99999974E-6 : f32
    %410 = vector.broadcast %cst_309 : f32 to vector<8x1xf32>
    %411 = arith.addf %409, %410 : vector<8x1xf32>
    %412 = math.rsqrt %411 : vector<8x1xf32>
    %413 = vector.broadcast %402 : vector<8x1xf32> to vector<8x128xf32>
    %414 = arith.subf %398, %413 : vector<8x128xf32>
    %415 = vector.broadcast %412 : vector<8x1xf32> to vector<8x128xf32>
    %416 = arith.mulf %414, %415 : vector<8x128xf32>
    %c0_310 = arith.constant 0 : index
    %c0_311 = arith.constant 0 : index
    %417 = vector.load %arg18[%c0_310, %c0_311] : memref<8x1xf32, #tpu.memory_space<vmem>>, vector<8x1xf32>
    %418 = vector.broadcast %417 : vector<8x1xf32> to vector<8x128xf32>
    %419 = arith.mulf %416, %418 : vector<8x128xf32>
    %c0_312 = arith.constant 0 : index
    %c0_313 = arith.constant 0 : index
    %420 = vector.load %arg19[%c0_312, %c0_313] : memref<8x1xf32, #tpu.memory_space<vmem>>, vector<8x1xf32>
    %421 = vector.broadcast %420 : vector<8x1xf32> to vector<8x128xf32>
    %422 = arith.addf %419, %421 : vector<8x128xf32>
    %cst_314 = arith.constant 0.000000e+00 : f32
    %423 = vector.broadcast %cst_314 : f32 to vector<8x128xf32>
    %424 = arith.maximumf %422, %423 : vector<8x128xf32>
    %c0_315 = arith.constant 0 : index
    %c0_316 = arith.constant 0 : index
    %425 = vector.load %arg20[%c0_315, %c0_316] : memref<16x8xf32, #tpu.memory_space<vmem>>, vector<16x8xf32>
    %cst_317 = arith.constant dense<0.000000e+00> : vector<16x128xf32>
    %426 = tpu.matmul %425, %424, %cst_317 {dimension_numbers = #tpu.dot_dimension_numbers<[1], [0], [0], [1], [0, 0, 1, 1], [], []>} : vector<16x8xf32>, vector<8x128xf32>, vector<16x128xf32> -> vector<16x128xf32>
    %cst_318 = arith.constant dense<0.000000e+00> : vector<16xf32>
    %427 = vector.multi_reduction <add>, %426, %cst_318 [1] : vector<16x128xf32> to vector<16xf32>
    %428 = vector.shape_cast %427 : vector<16xf32> to vector<16x1xf32>
    %cst_319 = arith.constant 1.280000e+02 : f32
    %429 = vector.broadcast %cst_319 : f32 to vector<16x1xf32>
    %430 = arith.divf %428, %429 : vector<16x1xf32>
    %431 = arith.mulf %426, %426 : vector<16x128xf32>
    %cst_320 = arith.constant dense<0.000000e+00> : vector<16xf32>
    %432 = vector.multi_reduction <add>, %431, %cst_320 [1] : vector<16x128xf32> to vector<16xf32>
    %433 = vector.shape_cast %432 : vector<16xf32> to vector<16x1xf32>
    %cst_321 = arith.constant 1.280000e+02 : f32
    %434 = vector.broadcast %cst_321 : f32 to vector<16x1xf32>
    %435 = arith.divf %433, %434 : vector<16x1xf32>
    %436 = arith.mulf %430, %430 : vector<16x1xf32>
    %437 = arith.subf %435, %436 : vector<16x1xf32>
    %cst_322 = arith.constant 9.99999974E-6 : f32
    %438 = vector.broadcast %cst_322 : f32 to vector<16x1xf32>
    %439 = arith.addf %437, %438 : vector<16x1xf32>
    %440 = math.rsqrt %439 : vector<16x1xf32>
    %441 = vector.broadcast %430 : vector<16x1xf32> to vector<16x128xf32>
    %442 = arith.subf %426, %441 : vector<16x128xf32>
    %443 = vector.broadcast %440 : vector<16x1xf32> to vector<16x128xf32>
    %444 = arith.mulf %442, %443 : vector<16x128xf32>
    %c0_323 = arith.constant 0 : index
    %c0_324 = arith.constant 0 : index
    %445 = vector.load %arg21[%c0_323, %c0_324] : memref<16x1xf32, #tpu.memory_space<vmem>>, vector<16x1xf32>
    %446 = vector.broadcast %445 : vector<16x1xf32> to vector<16x128xf32>
    %447 = arith.mulf %444, %446 : vector<16x128xf32>
    %c0_325 = arith.constant 0 : index
    %c0_326 = arith.constant 0 : index
    %448 = vector.load %arg22[%c0_325, %c0_326] : memref<16x1xf32, #tpu.memory_space<vmem>>, vector<16x1xf32>
    %449 = vector.broadcast %448 : vector<16x1xf32> to vector<16x128xf32>
    %450 = arith.addf %447, %449 : vector<16x128xf32>
    %cst_327 = arith.constant 0.000000e+00 : f32
    %451 = vector.broadcast %cst_327 : f32 to vector<16x128xf32>
    %452 = arith.maximumf %450, %451 : vector<16x128xf32>
    %c0_328 = arith.constant 0 : index
    %c128_329 = arith.constant 128 : index
    %453 = vector.load %arg40[%c0_328, %c128_329] : memref<16x768xf32, #tpu.memory_space<vmem>>, vector<16x128xf32>
    tpu.vector_store %arg40[%c0_328, %c128_329], %452 {strides = array<i32>} : memref<16x768xf32, #tpu.memory_space<vmem>>, vector<16x128xf32>,
    %cst_330 = arith.constant 0.000000e+00 : f32
    %454 = vector.broadcast %cst_330 : f32 to vector<4x128xf32>
    %c0_331 = arith.constant 0 : index
    %c119 = arith.constant 119 : index
    %455 = vector.load %arg40[%c0_331, %c119] : memref<16x768xf32, #tpu.memory_space<vmem>>, vector<16x128xf32>
    %c0_332 = arith.constant 0 : index
    %c0_333 = arith.constant 0 : index
    %c0_334 = arith.constant 0 : index
    %456 = vector.load %arg23[%c0_332, %c0_333, %c0_334] : memref<9x4x16xf32, #tpu.memory_space<vmem>>, vector<1x4x16xf32>
    %457 = vector.shape_cast %456 : vector<1x4x16xf32> to vector<4x16xf32>
    %cst_335 = arith.constant dense<0.000000e+00> : vector<4x128xf32>
    %458 = tpu.matmul %457, %455, %cst_335 {dimension_numbers = #tpu.dot_dimension_numbers<[1], [0], [0], [1], [0, 0, 1, 1], [], []>} : vector<4x16xf32>, vector<16x128xf32>, vector<4x128xf32> -> vector<4x128xf32>
    %c0_336 = arith.constant 0 : index
    %c0_337 = arith.constant 0 : index
    %459 = vector.load %arg2[%c0_336, %c0_337] : memref<9x128xf32, #tpu.memory_space<vmem>>, vector<1x128xf32>
    %460 = vector.broadcast %459 : vector<1x128xf32> to vector<4x128xf32>
    %461 = arith.mulf %458, %460 : vector<4x128xf32>
    %462 = arith.addf %454, %461 : vector<4x128xf32>
    %c0_338 = arith.constant 0 : index
    %c120 = arith.constant 120 : index
    %463 = vector.load %arg40[%c0_338, %c120] : memref<16x768xf32, #tpu.memory_space<vmem>>, vector<16x128xf32>
    %c1_339 = arith.constant 1 : index
    %c0_340 = arith.constant 0 : index
    %c0_341 = arith.constant 0 : index
    %464 = vector.load %arg23[%c1_339, %c0_340, %c0_341] : memref<9x4x16xf32, #tpu.memory_space<vmem>>, vector<1x4x16xf32>
    %465 = vector.shape_cast %464 : vector<1x4x16xf32> to vector<4x16xf32>
    %cst_342 = arith.constant dense<0.000000e+00> : vector<4x128xf32>
    %466 = tpu.matmul %465, %463, %cst_342 {dimension_numbers = #tpu.dot_dimension_numbers<[1], [0], [0], [1], [0, 0, 1, 1], [], []>} : vector<4x16xf32>, vector<16x128xf32>, vector<4x128xf32> -> vector<4x128xf32>
    %c1_343 = arith.constant 1 : index
    %c0_344 = arith.constant 0 : index
    %467 = vector.load %arg2[%c1_343, %c0_344] : memref<9x128xf32, #tpu.memory_space<vmem>>, vector<1x128xf32>
    %468 = vector.broadcast %467 : vector<1x128xf32> to vector<4x128xf32>
    %469 = arith.mulf %466, %468 : vector<4x128xf32>
    %470 = arith.addf %462, %469 : vector<4x128xf32>
    %c0_345 = arith.constant 0 : index
    %c121 = arith.constant 121 : index
    %471 = vector.load %arg40[%c0_345, %c121] : memref<16x768xf32, #tpu.memory_space<vmem>>, vector<16x128xf32>
    %c2_346 = arith.constant 2 : index
    %c0_347 = arith.constant 0 : index
    %c0_348 = arith.constant 0 : index
    %472 = vector.load %arg23[%c2_346, %c0_347, %c0_348] : memref<9x4x16xf32, #tpu.memory_space<vmem>>, vector<1x4x16xf32>
    %473 = vector.shape_cast %472 : vector<1x4x16xf32> to vector<4x16xf32>
    %cst_349 = arith.constant dense<0.000000e+00> : vector<4x128xf32>
    %474 = tpu.matmul %473, %471, %cst_349 {dimension_numbers = #tpu.dot_dimension_numbers<[1], [0], [0], [1], [0, 0, 1, 1], [], []>} : vector<4x16xf32>, vector<16x128xf32>, vector<4x128xf32> -> vector<4x128xf32>
    %c2_350 = arith.constant 2 : index
    %c0_351 = arith.constant 0 : index
    %475 = vector.load %arg2[%c2_350, %c0_351] : memref<9x128xf32, #tpu.memory_space<vmem>>, vector<1x128xf32>
    %476 = vector.broadcast %475 : vector<1x128xf32> to vector<4x128xf32>
    %477 = arith.mulf %474, %476 : vector<4x128xf32>
    %478 = arith.addf %470, %477 : vector<4x128xf32>
    %c0_352 = arith.constant 0 : index
    %c127_353 = arith.constant 127 : index
    %479 = vector.load %arg40[%c0_352, %c127_353] : memref<16x768xf32, #tpu.memory_space<vmem>>, vector<16x128xf32>
    %c3_354 = arith.constant 3 : index
    %c0_355 = arith.constant 0 : index
    %c0_356 = arith.constant 0 : index
    %480 = vector.load %arg23[%c3_354, %c0_355, %c0_356] : memref<9x4x16xf32, #tpu.memory_space<vmem>>, vector<1x4x16xf32>
    %481 = vector.shape_cast %480 : vector<1x4x16xf32> to vector<4x16xf32>
    %cst_357 = arith.constant dense<0.000000e+00> : vector<4x128xf32>
    %482 = tpu.matmul %481, %479, %cst_357 {dimension_numbers = #tpu.dot_dimension_numbers<[1], [0], [0], [1], [0, 0, 1, 1], [], []>} : vector<4x16xf32>, vector<16x128xf32>, vector<4x128xf32> -> vector<4x128xf32>
    %c3_358 = arith.constant 3 : index
    %c0_359 = arith.constant 0 : index
    %483 = vector.load %arg2[%c3_358, %c0_359] : memref<9x128xf32, #tpu.memory_space<vmem>>, vector<1x128xf32>
    %484 = vector.broadcast %483 : vector<1x128xf32> to vector<4x128xf32>
    %485 = arith.mulf %482, %484 : vector<4x128xf32>
    %486 = arith.addf %478, %485 : vector<4x128xf32>
    %c0_360 = arith.constant 0 : index
    %c128_361 = arith.constant 128 : index
    %487 = vector.load %arg40[%c0_360, %c128_361] : memref<16x768xf32, #tpu.memory_space<vmem>>, vector<16x128xf32>
    %c4_362 = arith.constant 4 : index
    %c0_363 = arith.constant 0 : index
    %c0_364 = arith.constant 0 : index
    %488 = vector.load %arg23[%c4_362, %c0_363, %c0_364] : memref<9x4x16xf32, #tpu.memory_space<vmem>>, vector<1x4x16xf32>
    %489 = vector.shape_cast %488 : vector<1x4x16xf32> to vector<4x16xf32>
    %cst_365 = arith.constant dense<0.000000e+00> : vector<4x128xf32>
    %490 = tpu.matmul %489, %487, %cst_365 {dimension_numbers = #tpu.dot_dimension_numbers<[1], [0], [0], [1], [0, 0, 1, 1], [], []>} : vector<4x16xf32>, vector<16x128xf32>, vector<4x128xf32> -> vector<4x128xf32>
    %c4_366 = arith.constant 4 : index
    %c0_367 = arith.constant 0 : index
    %491 = vector.load %arg2[%c4_366, %c0_367] : memref<9x128xf32, #tpu.memory_space<vmem>>, vector<1x128xf32>
    %492 = vector.broadcast %491 : vector<1x128xf32> to vector<4x128xf32>
    %493 = arith.mulf %490, %492 : vector<4x128xf32>
    %494 = arith.addf %486, %493 : vector<4x128xf32>
    %c0_368 = arith.constant 0 : index
    %c129_369 = arith.constant 129 : index
    %495 = vector.load %arg40[%c0_368, %c129_369] : memref<16x768xf32, #tpu.memory_space<vmem>>, vector<16x128xf32>
    %c5_370 = arith.constant 5 : index
    %c0_371 = arith.constant 0 : index
    %c0_372 = arith.constant 0 : index
    %496 = vector.load %arg23[%c5_370, %c0_371, %c0_372] : memref<9x4x16xf32, #tpu.memory_space<vmem>>, vector<1x4x16xf32>
    %497 = vector.shape_cast %496 : vector<1x4x16xf32> to vector<4x16xf32>
    %cst_373 = arith.constant dense<0.000000e+00> : vector<4x128xf32>
    %498 = tpu.matmul %497, %495, %cst_373 {dimension_numbers = #tpu.dot_dimension_numbers<[1], [0], [0], [1], [0, 0, 1, 1], [], []>} : vector<4x16xf32>, vector<16x128xf32>, vector<4x128xf32> -> vector<4x128xf32>
    %c5_374 = arith.constant 5 : index
    %c0_375 = arith.constant 0 : index
    %499 = vector.load %arg2[%c5_374, %c0_375] : memref<9x128xf32, #tpu.memory_space<vmem>>, vector<1x128xf32>
    %500 = vector.broadcast %499 : vector<1x128xf32> to vector<4x128xf32>
    %501 = arith.mulf %498, %500 : vector<4x128xf32>
    %502 = arith.addf %494, %501 : vector<4x128xf32>
    %c0_376 = arith.constant 0 : index
    %c135 = arith.constant 135 : index
    %503 = vector.load %arg40[%c0_376, %c135] : memref<16x768xf32, #tpu.memory_space<vmem>>, vector<16x128xf32>
    %c6_377 = arith.constant 6 : index
    %c0_378 = arith.constant 0 : index
    %c0_379 = arith.constant 0 : index
    %504 = vector.load %arg23[%c6_377, %c0_378, %c0_379] : memref<9x4x16xf32, #tpu.memory_space<vmem>>, vector<1x4x16xf32>
    %505 = vector.shape_cast %504 : vector<1x4x16xf32> to vector<4x16xf32>
    %cst_380 = arith.constant dense<0.000000e+00> : vector<4x128xf32>
    %506 = tpu.matmul %505, %503, %cst_380 {dimension_numbers = #tpu.dot_dimension_numbers<[1], [0], [0], [1], [0, 0, 1, 1], [], []>} : vector<4x16xf32>, vector<16x128xf32>, vector<4x128xf32> -> vector<4x128xf32>
    %c6_381 = arith.constant 6 : index
    %c0_382 = arith.constant 0 : index
    %507 = vector.load %arg2[%c6_381, %c0_382] : memref<9x128xf32, #tpu.memory_space<vmem>>, vector<1x128xf32>
    %508 = vector.broadcast %507 : vector<1x128xf32> to vector<4x128xf32>
    %509 = arith.mulf %506, %508 : vector<4x128xf32>
    %510 = arith.addf %502, %509 : vector<4x128xf32>
    %c0_383 = arith.constant 0 : index
    %c136 = arith.constant 136 : index
    %511 = vector.load %arg40[%c0_383, %c136] : memref<16x768xf32, #tpu.memory_space<vmem>>, vector<16x128xf32>
    %c7_384 = arith.constant 7 : index
    %c0_385 = arith.constant 0 : index
    %c0_386 = arith.constant 0 : index
    %512 = vector.load %arg23[%c7_384, %c0_385, %c0_386] : memref<9x4x16xf32, #tpu.memory_space<vmem>>, vector<1x4x16xf32>
    %513 = vector.shape_cast %512 : vector<1x4x16xf32> to vector<4x16xf32>
    %cst_387 = arith.constant dense<0.000000e+00> : vector<4x128xf32>
    %514 = tpu.matmul %513, %511, %cst_387 {dimension_numbers = #tpu.dot_dimension_numbers<[1], [0], [0], [1], [0, 0, 1, 1], [], []>} : vector<4x16xf32>, vector<16x128xf32>, vector<4x128xf32> -> vector<4x128xf32>
    %c7_388 = arith.constant 7 : index
    %c0_389 = arith.constant 0 : index
    %515 = vector.load %arg2[%c7_388, %c0_389] : memref<9x128xf32, #tpu.memory_space<vmem>>, vector<1x128xf32>
    %516 = vector.broadcast %515 : vector<1x128xf32> to vector<4x128xf32>
    %517 = arith.mulf %514, %516 : vector<4x128xf32>
    %518 = arith.addf %510, %517 : vector<4x128xf32>
    %c0_390 = arith.constant 0 : index
    %c137 = arith.constant 137 : index
    %519 = vector.load %arg40[%c0_390, %c137] : memref<16x768xf32, #tpu.memory_space<vmem>>, vector<16x128xf32>
    %c8_391 = arith.constant 8 : index
    %c0_392 = arith.constant 0 : index
    %c0_393 = arith.constant 0 : index
    %520 = vector.load %arg23[%c8_391, %c0_392, %c0_393] : memref<9x4x16xf32, #tpu.memory_space<vmem>>, vector<1x4x16xf32>
    %521 = vector.shape_cast %520 : vector<1x4x16xf32> to vector<4x16xf32>
    %cst_394 = arith.constant dense<0.000000e+00> : vector<4x128xf32>
    %522 = tpu.matmul %521, %519, %cst_394 {dimension_numbers = #tpu.dot_dimension_numbers<[1], [0], [0], [1], [0, 0, 1, 1], [], []>} : vector<4x16xf32>, vector<16x128xf32>, vector<4x128xf32> -> vector<4x128xf32>
    %c8_395 = arith.constant 8 : index
    %c0_396 = arith.constant 0 : index
    %523 = vector.load %arg2[%c8_395, %c0_396] : memref<9x128xf32, #tpu.memory_space<vmem>>, vector<1x128xf32>
    %524 = vector.broadcast %523 : vector<1x128xf32> to vector<4x128xf32>
    %525 = arith.mulf %522, %524 : vector<4x128xf32>
    %526 = arith.addf %518, %525 : vector<4x128xf32>
    %c8_397 = arith.constant 8 : index
    %c0_398 = arith.constant 0 : index
    %527 = vector.load %arg39[%c8_397, %c0_398] : memref<16x512xf32, #tpu.memory_space<vmem>>, vector<4x128xf32>
    tpu.vector_store %arg39[%c8_397, %c0_398], %526 {strides = array<i32>} : memref<16x512xf32, #tpu.memory_space<vmem>>, vector<4x128xf32>,
    %c0_399 = arith.constant 0 : index
    %c0_400 = arith.constant 0 : index
    %528 = vector.load %arg39[%c0_399, %c0_400] : memref<16x512xf32, #tpu.memory_space<vmem>>, vector<12x128xf32>
    %cst_401 = arith.constant dense<0.000000e+00> : vector<12xf32>
    %529 = vector.multi_reduction <add>, %528, %cst_401 [1] : vector<12x128xf32> to vector<12xf32>
    %530 = vector.shape_cast %529 : vector<12xf32> to vector<12x1xf32>
    %cst_402 = arith.constant 1.280000e+02 : f32
    %531 = vector.broadcast %cst_402 : f32 to vector<12x1xf32>
    %532 = arith.divf %530, %531 : vector<12x1xf32>
    %533 = arith.mulf %528, %528 : vector<12x128xf32>
    %cst_403 = arith.constant dense<0.000000e+00> : vector<12xf32>
    %534 = vector.multi_reduction <add>, %533, %cst_403 [1] : vector<12x128xf32> to vector<12xf32>
    %535 = vector.shape_cast %534 : vector<12xf32> to vector<12x1xf32>
    %cst_404 = arith.constant 1.280000e+02 : f32
    %536 = vector.broadcast %cst_404 : f32 to vector<12x1xf32>
    %537 = arith.divf %535, %536 : vector<12x1xf32>
    %538 = arith.mulf %532, %532 : vector<12x1xf32>
    %539 = arith.subf %537, %538 : vector<12x1xf32>
    %cst_405 = arith.constant 9.99999974E-6 : f32
    %540 = vector.broadcast %cst_405 : f32 to vector<12x1xf32>
    %541 = arith.addf %539, %540 : vector<12x1xf32>
    %542 = math.rsqrt %541 : vector<12x1xf32>
    %543 = vector.broadcast %532 : vector<12x1xf32> to vector<12x128xf32>
    %544 = arith.subf %528, %543 : vector<12x128xf32>
    %545 = vector.broadcast %542 : vector<12x1xf32> to vector<12x128xf32>
    %546 = arith.mulf %544, %545 : vector<12x128xf32>
    %c0_406 = arith.constant 0 : index
    %c0_407 = arith.constant 0 : index
    %547 = vector.load %arg24[%c0_406, %c0_407] : memref<12x1xf32, #tpu.memory_space<vmem>>, vector<12x1xf32>
    %548 = vector.broadcast %547 : vector<12x1xf32> to vector<12x128xf32>
    %549 = arith.mulf %546, %548 : vector<12x128xf32>
    %c0_408 = arith.constant 0 : index
    %c0_409 = arith.constant 0 : index
    %550 = vector.load %arg25[%c0_408, %c0_409] : memref<12x1xf32, #tpu.memory_space<vmem>>, vector<12x1xf32>
    %551 = vector.broadcast %550 : vector<12x1xf32> to vector<12x128xf32>
    %552 = arith.addf %549, %551 : vector<12x128xf32>
    %cst_410 = arith.constant 0.000000e+00 : f32
    %553 = vector.broadcast %cst_410 : f32 to vector<12x128xf32>
    %554 = arith.maximumf %552, %553 : vector<12x128xf32>
    %c0_411 = arith.constant 0 : index
    %c0_412 = arith.constant 0 : index
    %555 = vector.load %arg26[%c0_411, %c0_412] : memref<16x12xf32, #tpu.memory_space<vmem>>, vector<16x12xf32>
    %cst_413 = arith.constant dense<0.000000e+00> : vector<16x128xf32>
    %556 = tpu.matmul %555, %554, %cst_413 {dimension_numbers = #tpu.dot_dimension_numbers<[1], [0], [0], [1], [0, 0, 1, 1], [], []>} : vector<16x12xf32>, vector<12x128xf32>, vector<16x128xf32> -> vector<16x128xf32>
    %cst_414 = arith.constant dense<0.000000e+00> : vector<16xf32>
    %557 = vector.multi_reduction <add>, %556, %cst_414 [1] : vector<16x128xf32> to vector<16xf32>
    %558 = vector.shape_cast %557 : vector<16xf32> to vector<16x1xf32>
    %cst_415 = arith.constant 1.280000e+02 : f32
    %559 = vector.broadcast %cst_415 : f32 to vector<16x1xf32>
    %560 = arith.divf %558, %559 : vector<16x1xf32>
    %561 = arith.mulf %556, %556 : vector<16x128xf32>
    %cst_416 = arith.constant dense<0.000000e+00> : vector<16xf32>
    %562 = vector.multi_reduction <add>, %561, %cst_416 [1] : vector<16x128xf32> to vector<16xf32>
    %563 = vector.shape_cast %562 : vector<16xf32> to vector<16x1xf32>
    %cst_417 = arith.constant 1.280000e+02 : f32
    %564 = vector.broadcast %cst_417 : f32 to vector<16x1xf32>
    %565 = arith.divf %563, %564 : vector<16x1xf32>
    %566 = arith.mulf %560, %560 : vector<16x1xf32>
    %567 = arith.subf %565, %566 : vector<16x1xf32>
    %cst_418 = arith.constant 9.99999974E-6 : f32
    %568 = vector.broadcast %cst_418 : f32 to vector<16x1xf32>
    %569 = arith.addf %567, %568 : vector<16x1xf32>
    %570 = math.rsqrt %569 : vector<16x1xf32>
    %571 = vector.broadcast %560 : vector<16x1xf32> to vector<16x128xf32>
    %572 = arith.subf %556, %571 : vector<16x128xf32>
    %573 = vector.broadcast %570 : vector<16x1xf32> to vector<16x128xf32>
    %574 = arith.mulf %572, %573 : vector<16x128xf32>
    %c0_419 = arith.constant 0 : index
    %c0_420 = arith.constant 0 : index
    %575 = vector.load %arg27[%c0_419, %c0_420] : memref<16x1xf32, #tpu.memory_space<vmem>>, vector<16x1xf32>
    %576 = vector.broadcast %575 : vector<16x1xf32> to vector<16x128xf32>
    %577 = arith.mulf %574, %576 : vector<16x128xf32>
    %c0_421 = arith.constant 0 : index
    %c0_422 = arith.constant 0 : index
    %578 = vector.load %arg28[%c0_421, %c0_422] : memref<16x1xf32, #tpu.memory_space<vmem>>, vector<16x1xf32>
    %579 = vector.broadcast %578 : vector<16x1xf32> to vector<16x128xf32>
    %580 = arith.addf %577, %579 : vector<16x128xf32>
    %cst_423 = arith.constant 0.000000e+00 : f32
    %581 = vector.broadcast %cst_423 : f32 to vector<16x128xf32>
    %582 = arith.maximumf %580, %581 : vector<16x128xf32>
    %c0_424 = arith.constant 0 : index
    %c128_425 = arith.constant 128 : index
    %583 = vector.load %arg40[%c0_424, %c128_425] : memref<16x768xf32, #tpu.memory_space<vmem>>, vector<16x128xf32>
    tpu.vector_store %arg40[%c0_424, %c128_425], %582 {strides = array<i32>} : memref<16x768xf32, #tpu.memory_space<vmem>>, vector<16x128xf32>,
    %cst_426 = arith.constant 0.000000e+00 : f32
    %584 = vector.broadcast %cst_426 : f32 to vector<4x128xf32>
    %c0_427 = arith.constant 0 : index
    %c119_428 = arith.constant 119 : index
    %585 = vector.load %arg40[%c0_427, %c119_428] : memref<16x768xf32, #tpu.memory_space<vmem>>, vector<16x128xf32>
    %c0_429 = arith.constant 0 : index
    %c0_430 = arith.constant 0 : index
    %c0_431 = arith.constant 0 : index
    %586 = vector.load %arg29[%c0_429, %c0_430, %c0_431] : memref<9x4x16xf32, #tpu.memory_space<vmem>>, vector<1x4x16xf32>
    %587 = vector.shape_cast %586 : vector<1x4x16xf32> to vector<4x16xf32>
    %cst_432 = arith.constant dense<0.000000e+00> : vector<4x128xf32>
    %588 = tpu.matmul %587, %585, %cst_432 {dimension_numbers = #tpu.dot_dimension_numbers<[1], [0], [0], [1], [0, 0, 1, 1], [], []>} : vector<4x16xf32>, vector<16x128xf32>, vector<4x128xf32> -> vector<4x128xf32>
    %c0_433 = arith.constant 0 : index
    %c0_434 = arith.constant 0 : index
    %589 = vector.load %arg2[%c0_433, %c0_434] : memref<9x128xf32, #tpu.memory_space<vmem>>, vector<1x128xf32>
    %590 = vector.broadcast %589 : vector<1x128xf32> to vector<4x128xf32>
    %591 = arith.mulf %588, %590 : vector<4x128xf32>
    %592 = arith.addf %584, %591 : vector<4x128xf32>
    %c0_435 = arith.constant 0 : index
    %c120_436 = arith.constant 120 : index
    %593 = vector.load %arg40[%c0_435, %c120_436] : memref<16x768xf32, #tpu.memory_space<vmem>>, vector<16x128xf32>
    %c1_437 = arith.constant 1 : index
    %c0_438 = arith.constant 0 : index
    %c0_439 = arith.constant 0 : index
    %594 = vector.load %arg29[%c1_437, %c0_438, %c0_439] : memref<9x4x16xf32, #tpu.memory_space<vmem>>, vector<1x4x16xf32>
    %595 = vector.shape_cast %594 : vector<1x4x16xf32> to vector<4x16xf32>
    %cst_440 = arith.constant dense<0.000000e+00> : vector<4x128xf32>
    %596 = tpu.matmul %595, %593, %cst_440 {dimension_numbers = #tpu.dot_dimension_numbers<[1], [0], [0], [1], [0, 0, 1, 1], [], []>} : vector<4x16xf32>, vector<16x128xf32>, vector<4x128xf32> -> vector<4x128xf32>
    %c1_441 = arith.constant 1 : index
    %c0_442 = arith.constant 0 : index
    %597 = vector.load %arg2[%c1_441, %c0_442] : memref<9x128xf32, #tpu.memory_space<vmem>>, vector<1x128xf32>
    %598 = vector.broadcast %597 : vector<1x128xf32> to vector<4x128xf32>
    %599 = arith.mulf %596, %598 : vector<4x128xf32>
    %600 = arith.addf %592, %599 : vector<4x128xf32>
    %c0_443 = arith.constant 0 : index
    %c121_444 = arith.constant 121 : index
    %601 = vector.load %arg40[%c0_443, %c121_444] : memref<16x768xf32, #tpu.memory_space<vmem>>, vector<16x128xf32>
    %c2_445 = arith.constant 2 : index
    %c0_446 = arith.constant 0 : index
    %c0_447 = arith.constant 0 : index
    %602 = vector.load %arg29[%c2_445, %c0_446, %c0_447] : memref<9x4x16xf32, #tpu.memory_space<vmem>>, vector<1x4x16xf32>
    %603 = vector.shape_cast %602 : vector<1x4x16xf32> to vector<4x16xf32>
    %cst_448 = arith.constant dense<0.000000e+00> : vector<4x128xf32>
    %604 = tpu.matmul %603, %601, %cst_448 {dimension_numbers = #tpu.dot_dimension_numbers<[1], [0], [0], [1], [0, 0, 1, 1], [], []>} : vector<4x16xf32>, vector<16x128xf32>, vector<4x128xf32> -> vector<4x128xf32>
    %c2_449 = arith.constant 2 : index
    %c0_450 = arith.constant 0 : index
    %605 = vector.load %arg2[%c2_449, %c0_450] : memref<9x128xf32, #tpu.memory_space<vmem>>, vector<1x128xf32>
    %606 = vector.broadcast %605 : vector<1x128xf32> to vector<4x128xf32>
    %607 = arith.mulf %604, %606 : vector<4x128xf32>
    %608 = arith.addf %600, %607 : vector<4x128xf32>
    %c0_451 = arith.constant 0 : index
    %c127_452 = arith.constant 127 : index
    %609 = vector.load %arg40[%c0_451, %c127_452] : memref<16x768xf32, #tpu.memory_space<vmem>>, vector<16x128xf32>
    %c3_453 = arith.constant 3 : index
    %c0_454 = arith.constant 0 : index
    %c0_455 = arith.constant 0 : index
    %610 = vector.load %arg29[%c3_453, %c0_454, %c0_455] : memref<9x4x16xf32, #tpu.memory_space<vmem>>, vector<1x4x16xf32>
    %611 = vector.shape_cast %610 : vector<1x4x16xf32> to vector<4x16xf32>
    %cst_456 = arith.constant dense<0.000000e+00> : vector<4x128xf32>
    %612 = tpu.matmul %611, %609, %cst_456 {dimension_numbers = #tpu.dot_dimension_numbers<[1], [0], [0], [1], [0, 0, 1, 1], [], []>} : vector<4x16xf32>, vector<16x128xf32>, vector<4x128xf32> -> vector<4x128xf32>
    %c3_457 = arith.constant 3 : index
    %c0_458 = arith.constant 0 : index
    %613 = vector.load %arg2[%c3_457, %c0_458] : memref<9x128xf32, #tpu.memory_space<vmem>>, vector<1x128xf32>
    %614 = vector.broadcast %613 : vector<1x128xf32> to vector<4x128xf32>
    %615 = arith.mulf %612, %614 : vector<4x128xf32>
    %616 = arith.addf %608, %615 : vector<4x128xf32>
    %c0_459 = arith.constant 0 : index
    %c128_460 = arith.constant 128 : index
    %617 = vector.load %arg40[%c0_459, %c128_460] : memref<16x768xf32, #tpu.memory_space<vmem>>, vector<16x128xf32>
    %c4_461 = arith.constant 4 : index
    %c0_462 = arith.constant 0 : index
    %c0_463 = arith.constant 0 : index
    %618 = vector.load %arg29[%c4_461, %c0_462, %c0_463] : memref<9x4x16xf32, #tpu.memory_space<vmem>>, vector<1x4x16xf32>
    %619 = vector.shape_cast %618 : vector<1x4x16xf32> to vector<4x16xf32>
    %cst_464 = arith.constant dense<0.000000e+00> : vector<4x128xf32>
    %620 = tpu.matmul %619, %617, %cst_464 {dimension_numbers = #tpu.dot_dimension_numbers<[1], [0], [0], [1], [0, 0, 1, 1], [], []>} : vector<4x16xf32>, vector<16x128xf32>, vector<4x128xf32> -> vector<4x128xf32>
    %c4_465 = arith.constant 4 : index
    %c0_466 = arith.constant 0 : index
    %621 = vector.load %arg2[%c4_465, %c0_466] : memref<9x128xf32, #tpu.memory_space<vmem>>, vector<1x128xf32>
    %622 = vector.broadcast %621 : vector<1x128xf32> to vector<4x128xf32>
    %623 = arith.mulf %620, %622 : vector<4x128xf32>
    %624 = arith.addf %616, %623 : vector<4x128xf32>
    %c0_467 = arith.constant 0 : index
    %c129_468 = arith.constant 129 : index
    %625 = vector.load %arg40[%c0_467, %c129_468] : memref<16x768xf32, #tpu.memory_space<vmem>>, vector<16x128xf32>
    %c5_469 = arith.constant 5 : index
    %c0_470 = arith.constant 0 : index
    %c0_471 = arith.constant 0 : index
    %626 = vector.load %arg29[%c5_469, %c0_470, %c0_471] : memref<9x4x16xf32, #tpu.memory_space<vmem>>, vector<1x4x16xf32>
    %627 = vector.shape_cast %626 : vector<1x4x16xf32> to vector<4x16xf32>
    %cst_472 = arith.constant dense<0.000000e+00> : vector<4x128xf32>
    %628 = tpu.matmul %627, %625, %cst_472 {dimension_numbers = #tpu.dot_dimension_numbers<[1], [0], [0], [1], [0, 0, 1, 1], [], []>} : vector<4x16xf32>, vector<16x128xf32>, vector<4x128xf32> -> vector<4x128xf32>
    %c5_473 = arith.constant 5 : index
    %c0_474 = arith.constant 0 : index
    %629 = vector.load %arg2[%c5_473, %c0_474] : memref<9x128xf32, #tpu.memory_space<vmem>>, vector<1x128xf32>
    %630 = vector.broadcast %629 : vector<1x128xf32> to vector<4x128xf32>
    %631 = arith.mulf %628, %630 : vector<4x128xf32>
    %632 = arith.addf %624, %631 : vector<4x128xf32>
    %c0_475 = arith.constant 0 : index
    %c135_476 = arith.constant 135 : index
    %633 = vector.load %arg40[%c0_475, %c135_476] : memref<16x768xf32, #tpu.memory_space<vmem>>, vector<16x128xf32>
    %c6_477 = arith.constant 6 : index
    %c0_478 = arith.constant 0 : index
    %c0_479 = arith.constant 0 : index
    %634 = vector.load %arg29[%c6_477, %c0_478, %c0_479] : memref<9x4x16xf32, #tpu.memory_space<vmem>>, vector<1x4x16xf32>
    %635 = vector.shape_cast %634 : vector<1x4x16xf32> to vector<4x16xf32>
    %cst_480 = arith.constant dense<0.000000e+00> : vector<4x128xf32>
    %636 = tpu.matmul %635, %633, %cst_480 {dimension_numbers = #tpu.dot_dimension_numbers<[1], [0], [0], [1], [0, 0, 1, 1], [], []>} : vector<4x16xf32>, vector<16x128xf32>, vector<4x128xf32> -> vector<4x128xf32>
    %c6_481 = arith.constant 6 : index
    %c0_482 = arith.constant 0 : index
    %637 = vector.load %arg2[%c6_481, %c0_482] : memref<9x128xf32, #tpu.memory_space<vmem>>, vector<1x128xf32>
    %638 = vector.broadcast %637 : vector<1x128xf32> to vector<4x128xf32>
    %639 = arith.mulf %636, %638 : vector<4x128xf32>
    %640 = arith.addf %632, %639 : vector<4x128xf32>
    %c0_483 = arith.constant 0 : index
    %c136_484 = arith.constant 136 : index
    %641 = vector.load %arg40[%c0_483, %c136_484] : memref<16x768xf32, #tpu.memory_space<vmem>>, vector<16x128xf32>
    %c7_485 = arith.constant 7 : index
    %c0_486 = arith.constant 0 : index
    %c0_487 = arith.constant 0 : index
    %642 = vector.load %arg29[%c7_485, %c0_486, %c0_487] : memref<9x4x16xf32, #tpu.memory_space<vmem>>, vector<1x4x16xf32>
    %643 = vector.shape_cast %642 : vector<1x4x16xf32> to vector<4x16xf32>
    %cst_488 = arith.constant dense<0.000000e+00> : vector<4x128xf32>
    %644 = tpu.matmul %643, %641, %cst_488 {dimension_numbers = #tpu.dot_dimension_numbers<[1], [0], [0], [1], [0, 0, 1, 1], [], []>} : vector<4x16xf32>, vector<16x128xf32>, vector<4x128xf32> -> vector<4x128xf32>
    %c7_489 = arith.constant 7 : index
    %c0_490 = arith.constant 0 : index
    %645 = vector.load %arg2[%c7_489, %c0_490] : memref<9x128xf32, #tpu.memory_space<vmem>>, vector<1x128xf32>
    %646 = vector.broadcast %645 : vector<1x128xf32> to vector<4x128xf32>
    %647 = arith.mulf %644, %646 : vector<4x128xf32>
    %648 = arith.addf %640, %647 : vector<4x128xf32>
    %c0_491 = arith.constant 0 : index
    %c137_492 = arith.constant 137 : index
    %649 = vector.load %arg40[%c0_491, %c137_492] : memref<16x768xf32, #tpu.memory_space<vmem>>, vector<16x128xf32>
    %c8_493 = arith.constant 8 : index
    %c0_494 = arith.constant 0 : index
    %c0_495 = arith.constant 0 : index
    %650 = vector.load %arg29[%c8_493, %c0_494, %c0_495] : memref<9x4x16xf32, #tpu.memory_space<vmem>>, vector<1x4x16xf32>
    %651 = vector.shape_cast %650 : vector<1x4x16xf32> to vector<4x16xf32>
    %cst_496 = arith.constant dense<0.000000e+00> : vector<4x128xf32>
    %652 = tpu.matmul %651, %649, %cst_496 {dimension_numbers = #tpu.dot_dimension_numbers<[1], [0], [0], [1], [0, 0, 1, 1], [], []>} : vector<4x16xf32>, vector<16x128xf32>, vector<4x128xf32> -> vector<4x128xf32>
    %c8_497 = arith.constant 8 : index
    %c0_498 = arith.constant 0 : index
    %653 = vector.load %arg2[%c8_497, %c0_498] : memref<9x128xf32, #tpu.memory_space<vmem>>, vector<1x128xf32>
    %654 = vector.broadcast %653 : vector<1x128xf32> to vector<4x128xf32>
    %655 = arith.mulf %652, %654 : vector<4x128xf32>
    %656 = arith.addf %648, %655 : vector<4x128xf32>
    %c12_499 = arith.constant 12 : index
    %c0_500 = arith.constant 0 : index
    %657 = vector.load %arg39[%c12_499, %c0_500] : memref<16x512xf32, #tpu.memory_space<vmem>>, vector<4x128xf32>
    tpu.vector_store %arg39[%c12_499, %c0_500], %656 {strides = array<i32>} : memref<16x512xf32, #tpu.memory_space<vmem>>, vector<4x128xf32>,
    %c0_501 = arith.constant 0 : index
    %c0_502 = arith.constant 0 : index
    %658 = vector.load %arg39[%c0_501, %c0_502] : memref<16x512xf32, #tpu.memory_space<vmem>>, vector<16x128xf32>
    %cst_503 = arith.constant dense<0.000000e+00> : vector<16xf32>
    %659 = vector.multi_reduction <add>, %658, %cst_503 [1] : vector<16x128xf32> to vector<16xf32>
    %660 = vector.shape_cast %659 : vector<16xf32> to vector<16x1xf32>
    %cst_504 = arith.constant 1.280000e+02 : f32
    %661 = vector.broadcast %cst_504 : f32 to vector<16x1xf32>
    %662 = arith.divf %660, %661 : vector<16x1xf32>
    %663 = arith.mulf %658, %658 : vector<16x128xf32>
    %cst_505 = arith.constant dense<0.000000e+00> : vector<16xf32>
    %664 = vector.multi_reduction <add>, %663, %cst_505 [1] : vector<16x128xf32> to vector<16xf32>
    %665 = vector.shape_cast %664 : vector<16xf32> to vector<16x1xf32>
    %cst_506 = arith.constant 1.280000e+02 : f32
    %666 = vector.broadcast %cst_506 : f32 to vector<16x1xf32>
    %667 = arith.divf %665, %666 : vector<16x1xf32>
    %668 = arith.mulf %662, %662 : vector<16x1xf32>
    %669 = arith.subf %667, %668 : vector<16x1xf32>
    %cst_507 = arith.constant 9.99999974E-6 : f32
    %670 = vector.broadcast %cst_507 : f32 to vector<16x1xf32>
    %671 = arith.addf %669, %670 : vector<16x1xf32>
    %672 = math.rsqrt %671 : vector<16x1xf32>
    %673 = vector.broadcast %662 : vector<16x1xf32> to vector<16x128xf32>
    %674 = arith.subf %658, %673 : vector<16x128xf32>
    %675 = vector.broadcast %672 : vector<16x1xf32> to vector<16x128xf32>
    %676 = arith.mulf %674, %675 : vector<16x128xf32>
    %c0_508 = arith.constant 0 : index
    %c0_509 = arith.constant 0 : index
    %677 = vector.load %arg34[%c0_508, %c0_509] : memref<16x1xf32, #tpu.memory_space<vmem>>, vector<16x1xf32>
    %678 = vector.broadcast %677 : vector<16x1xf32> to vector<16x128xf32>
    %679 = arith.mulf %676, %678 : vector<16x128xf32>
    %c0_510 = arith.constant 0 : index
    %c0_511 = arith.constant 0 : index
    %680 = vector.load %arg35[%c0_510, %c0_511] : memref<16x1xf32, #tpu.memory_space<vmem>>, vector<16x1xf32>
    %681 = vector.broadcast %680 : vector<16x1xf32> to vector<16x128xf32>
    %682 = arith.addf %679, %681 : vector<16x128xf32>
    %cst_512 = arith.constant 0.000000e+00 : f32
    %683 = vector.broadcast %cst_512 : f32 to vector<16x128xf32>
    %684 = arith.maximumf %682, %683 : vector<16x128xf32>
    %c0_513 = arith.constant 0 : index
    %c0_514 = arith.constant 0 : index
    %685 = vector.load %arg4[%c0_513, %c0_514] : memref<128x2xf32, #tpu.memory_space<vmem>>, vector<128x2xf32>
    %cst_515 = arith.constant dense<0.000000e+00> : vector<16x2xf32>
    %686 = tpu.matmul %684, %685, %cst_515 {dimension_numbers = #tpu.dot_dimension_numbers<[1], [0], [0], [1], [0, 0, 1, 1], [], []>} : vector<16x128xf32>, vector<128x2xf32>, vector<16x2xf32> -> vector<16x2xf32>
    %c0_516 = arith.constant 0 : index
    %c0_517 = arith.constant 0 : index
    %687 = vector.load %arg36[%c0_516, %c0_517] : memref<10x16xf32, #tpu.memory_space<vmem>>, vector<10x16xf32>
    %cst_518 = arith.constant dense<0.000000e+00> : vector<10x2xf32>
    %688 = tpu.matmul %687, %686, %cst_518 {dimension_numbers = #tpu.dot_dimension_numbers<[1], [0], [0], [1], [0, 0, 1, 1], [], []>} : vector<10x16xf32>, vector<16x2xf32>, vector<10x2xf32> -> vector<10x2xf32>
    %c0_519 = arith.constant 0 : index
    %c0_520 = arith.constant 0 : index
    %689 = vector.load %arg37[%c0_519, %c0_520] : memref<10x1xf32, #tpu.memory_space<vmem>>, vector<10x1xf32>
    %690 = vector.broadcast %689 : vector<10x1xf32> to vector<10x2xf32>
    %691 = arith.addf %688, %690 : vector<10x2xf32>
    %c0_521 = arith.constant 0 : index
    %c0_522 = arith.constant 0 : index
    %692 = vector.load %arg38[%c0_521, %c0_522] : memref<10x2xf32, #tpu.memory_space<vmem>>, vector<10x2xf32>
    tpu.vector_store %arg38[%c0_521, %c0_522], %691 {strides = array<i32>} : memref<10x2xf32, #tpu.memory_space<vmem>>, vector<10x2xf32>,
    return
  }
}

</mosaic_0001>

<bundles_post_ra>
// kernel: _lambda_.1
= control target key start
LH: loop header
LB: loop body
LE: loop exit
PB: predicated region body
PF: predicated region fallthrough
CT: control target
= control target key end

     0   :  { %s11362_s6 = smov 1   ;;  %s11363_s10 = smov 2   ;;  %s13237_s0 = inlined_call_operand.smem [shape: u32[39], index: -1, kind: input, shape index: {}] }
   0x1   :  { %s11434_s5 = sld [smem:[%s13237_s0]]   ;;  %s11364_s14 = smov 3  }
   0x2   :  { %s11439_s9 = sld [smem:[%s13237_s0 + %s11362_s6]]   ;;  %s11365_s18 = smov 4  }
   0x3   :  { %s11444_s13 = sld [smem:[%s13237_s0 + %s11363_s10]]   ;;  %s11366_s22 = smov 5  }
   0x4   :  { %s11449_s17 = sld [smem:[%s13237_s0 + %s11364_s14]]   ;;  %s11367_s26 = smov 6  }
   0x5   :  { %s11454_s21 = sld [smem:[%s13237_s0 + %s11365_s18]]   ;;  %s11368_s30 = smov 7  }
   0x6   :  { %s11459_s25 = sld [smem:[%s13237_s0 + %s11366_s22]]   ;;  %s11369_s4 = smov 8  }
   0x7   :  { %s11464_s29 = sld [smem:[%s13237_s0 + %s11367_s26]]   ;;  %s11370_s10 = smov 9  }
   0x8   :  { %s11469_s3 = sld [smem:[%s13237_s0 + %s11368_s30]]   ;;  %s11371_s15 = smov 10  }
   0x9   :  { %13257 = sst [smem:[#allocation19_spill]] %s11444_s13  ;;  %s11372_s20 = smov 11  }
   0xa   :  { %s11474_s8 = sld [smem:[%s13237_s0 + %s11369_s4]]   ;;  %s11373_s26 = smov 12  }
   0xb   :  { %13258 = sst [smem:[#allocation20_spill]] %s11454_s21  ;;  %s11374_s1 = smov 13  }
   0xc   :  { %s11479_s14 = sld [smem:[%s13237_s0 + %s11370_s10]]   ;;  %s11375_s7 = smov 14  }
   0xd   :  { %s11484_s19 = sld [smem:[%s13237_s0 + %s11371_s15]]   ;;  %s11376_s15 = smov 15  }
   0xe   :  { %s11489_s24 = sld [smem:[%s13237_s0 + %s11372_s20]]   ;;  %s11377_s22 = smov 16  }
   0xf   :  { %s11494_s30 = sld [smem:[%s13237_s0 + %s11373_s26]]   ;;  %s11378_s28 = smov 17  }
  0x10   :  { %s11499_s6 = sld [smem:[%s13237_s0 + %s11374_s1]]   ;;  %s11395_s10 = smov 34  }
  0x11   :  { %s11504_s12 = sld [smem:[%s13237_s0 + %s11375_s7]]   ;;  %s11379_s7 = smov 18  }
  0x12   :  { %s11509_s20 = sld [smem:[%s13237_s0 + %s11376_s15]]   ;;  %s11380_s15 = smov 19  }
  0x13   :  { %s11514_s27 = sld [smem:[%s13237_s0 + %s11377_s22]]   ;;  %s11381_s22 = smov 20  }
  0x14   :  { %13259 = sst [smem:[#allocation21_spill]] %s11489_s24  ;;  %s11396_s16 = smov 35  }
  0x15   :  { %13260 = sst [smem:[#allocation22_spill]] %s11494_s30  ;;  %s11397_s23 = smov 36  }
  0x16   :  { %13261 = sst [smem:[#allocation23_spill]] %s11499_s6  ;;  %s11398_s1 = smov 37  }
  0x17   :  { %s11519_s4 = sld [smem:[%s13237_s0 + %s11378_s28]]   ;;  %s11382_s28 = smov 21  }
  0x18   :  { %13262 = sst [smem:[#allocation24_spill]] %s11509_s20 }
  0x19   :  { %13263 = sst [smem:[#allocation25_spill]] %s11514_s27 }
  0x1a   :  { %s11524_s21 = sld [smem:[%s13237_s0 + %s11379_s7]]   ;;  %s11383_s7 = smov 22  }
  0x1b   :  { %s11529_s13 = sld [smem:[%s13237_s0 + %s11380_s15]]   ;;  %s11384_s15 = smov 23  }
  0x1c   :  { %s11534_s27 = sld [smem:[%s13237_s0 + %s11381_s22]]   ;;  %s11385_s22 = smov 24  }
  0x1d   :  { %13264 = sst [smem:[#allocation26_spill]] %s11519_s4 }
  0x1e   :  { %s11539_s4 = sld [smem:[%s13237_s0 + %s11382_s28]]   ;;  %s11386_s28 = smov 25  }
  0x1f   :  { %s11554_s20 = sld [smem:[%s13237_s0 + %s11385_s22]]   ;;  %s11389_s22 = smov 28  }
  0x20   :  { %13265 = sst [smem:[#allocation27_spill]] %s11524_s21 }
  0x21   :  { %13266 = sst [smem:[#allocation28_spill]] %s11529_s13 }
  0x22   :  { %s11544_s21 = sld [smem:[%s13237_s0 + %s11383_s7]]   ;;  %s11387_s7 = smov 26  }
  0x23   :  { %s11549_s13 = sld [smem:[%s13237_s0 + %s11384_s15]]   ;;  %s11388_s15 = smov 27  }
  0x24   :  { %13267 = sst [smem:[#allocation29_spill]] %s11539_s4 }
  0x25   :  { %13270 = sst [smem:[#allocation32_spill]] %s11554_s20 }
  0x26   :  { %s11559_s4 = sld [smem:[%s13237_s0 + %s11386_s28]]   ;;  %s11390_s28 = smov 29  }
  0x27   :  { %s11574_s20 = sld [smem:[%s13237_s0 + %s11389_s22]]   ;;  %s11393_s22 = smov 32  }
  0x28   :  { %13268 = sst [smem:[#allocation30_spill]] %s11544_s21 }
  0x29   :  { %13269 = sst [smem:[#allocation31_spill]] %s11549_s13 }
  0x2a   :  { %s11564_s21 = sld [smem:[%s13237_s0 + %s11387_s7]]   ;;  %s11391_s7 = smov 30  }
  0x2b   :  { %s11569_s13 = sld [smem:[%s13237_s0 + %s11388_s15]]   ;;  %s11392_s15 = smov 31  }
  0x2c   :  { %13271 = sst [smem:[#allocation33_spill]] %s11559_s4 }
  0x2d   :  { %13273 = sst [smem:[#allocation35_spill]] %s11574_s20 }
  0x2e   :  { %s11579_s4 = sld [smem:[%s13237_s0 + %s11390_s28]]   ;;  %s11394_s28 = smov 33  }
  0x2f   :  { %s11584_s6 = sld [smem:[%s13237_s0 + %s11391_s7]]  }
  0x30   :  { %s11594_s20 = sld [smem:[%s13237_s0 + %s11393_s22]]  }
  0x31   :  { %13272 = sst [smem:[#allocation34_spill]] %s11569_s13 }
  0x32   :  { %s11589_s13 = sld [smem:[%s13237_s0 + %s11392_s15]]  }
  0x33   :  { %s11612_s24 = sld [smem:[%s13237_s0 + %s11397_s23]]  }
  0x34   :  { %13274 = sst [smem:[#allocation36_spill]] %s11579_s4 }
  0x35   :  { %13275 = sst [smem:[#allocation37_spill]] %s11584_s6 }
  0x36   :  { %s9671_s4 = sld [smem:[%s13237_s0 + %s11394_s28]]  }
  0x37   :  { %s11602_s6 = sld [smem:[%s13237_s0 + %s11395_s10]]   ;;  %s11399_s10 = smov 38  }
  0x38   :  { %13276 = sst [smem:[#allocation38_spill]] %s11589_s13 }
  0x39   :  { %s11607_s13 = sld [smem:[%s13237_s0 + %s11396_s16]]  }
  0x3a   :  { %s11617_s30 = sld [smem:[%s13237_s0 + %s11398_s1]]  }
  0x3c   :  { %v82_v0 = vstv %s9671_s4 }
  0x3d   :  { %13277 = sst [smem:[#allocation39_spill]] %s11602_s6  ;;  %83 = vst [vmem:[#allocation4] sm:$0x1] %v82_v0 }
  0x3e   :  { %s11622_s6 = sld [smem:[%s13237_s0 + %s11399_s10]]  }
  0x3f   :  { %84 = vsyncpa [#allocation6], 0 }
  0x40   :  { %85 = vsyncpa [#allocation8], 0 }
  0x41   :  { %86 = vsyncpa [#allocation11], 0 }
  0x42   :  { %87 = vsyncpa [#allocation14], 0  ;;  %s11400_s16 = smov [#allocation7]   ;;  %s11401_s18 = smov [#allocation10]  }
  0x43   :  { %s131_s15 = sshll.u32 %s11400_s16, 4  ;;  %s175_s23 = sshll.u32 %s11401_s18, 4  ;;  %s132_s15 = int_to_ptr.vmem [resolvable:$true] %s131_s15  ;;  %s11624_s23 = int_to_ptr.vmem [resolvable:$true] %s175_s23 }
  0x44   :  { %s11222_s22 = scalar_lea.hbm %s11504_s12, 256 }
  0x45   :  { %p11223_p0 = scmp.ne.s32.totalorder %s11504_s12, %s11222_s22  ;;  %p11226_p1 = scmp.lt.u32.totalorder %s11222_s22, %s11504_s12 }
  0x47   :  { %p11228_p2 = pnand %p11226_p1, %p11223_p0 }
  0x49   :  { %11231 = shalt.err (!%p11228_p2)
}
  0x4a   :  { %s11232_s0 = scalar_lea.vmem %s132_s15, 256  ;;  %p11237_p4 = scmp.lt.s32.totalorder %s132_s15, %s132_s15 }
  0x4b   :  { %p11233_p3 = scmp.ne.s32.totalorder %s132_s15, %s11232_s0  ;;  %p11238_p5 = scmp.lt.s32.totalorder %s11232_s0, %s11232_s0 }
  0x4d   :  { %p11239_p6 = por %p11238_p5, %p11237_p4 }
  0x4f   :  { %p11240_p7 = pnand %p11239_p6, %p11233_p3 }
  0x51   :  { %11243 = shalt.err (!%p11240_p7)
}
  0x52   :  { %s11402_s4 = smov 128   ;;  %s11403_s26 = smov 8  }
  0x53   :  { %137 = dma.hbm_to_vmem [thread:$0]  %s11504_s12, 256, %s132_s15, [#allocation8], %s11402_s4, %s11402_s4, %s11403_s26  }
  0x54   :  { %s11244_s1 = scalar_lea.hbm %s11564_s21, 256 }
  0x55   :  { %p11245_p8 = scmp.ne.s32.totalorder %s11564_s21, %s11244_s1  ;;  %p11248_p9 = scmp.lt.u32.totalorder %s11244_s1, %s11564_s21 }
  0x57   :  { %p11250_p10 = pnand %p11248_p9, %p11245_p8 }
  0x59   :  { %11253 = shalt.err (!%p11250_p10)
}
  0x5a   :  { %s11254_s28 = scalar_lea.vmem %s11624_s23, 256  ;;  %p11259_p12 = scmp.lt.s32.totalorder %s11624_s23, %s11624_s23 }
  0x5b   :  { %p11255_p11 = scmp.ne.s32.totalorder %s11624_s23, %s11254_s28  ;;  %p11260_p13 = scmp.lt.s32.totalorder %s11254_s28, %s11254_s28 }
  0x5d   :  { %p11261_p0 = por %p11260_p13, %p11259_p12 }
  0x5f   :  { %p11262_p1 = pnand %p11261_p0, %p11255_p11 }
  0x61   :  { %11265 = shalt.err (!%p11262_p1)
}
  0x62   :  { %181 = dma.hbm_to_vmem [thread:$0]  %s11564_s21, 256, %s11624_s23, [#allocation11], %s11402_s4, %s11402_s4, %s11403_s26  }
  0x63   :  { %s11404_s12 = smov [#allocation5]   ;;  %s11405_s10 = smov [#allocation9]  }
  0x64   :  { %s99_s2 = sshll.u32 %s11404_s12, 4  ;;  %s153_s7 = sshll.u32 %s11405_s10, 4  ;;  %s100_s2 = int_to_ptr.vmem [resolvable:$true] %s99_s2  ;;  %s11645_s7 = int_to_ptr.vmem [resolvable:$true] %s153_s7 }
  0x65   :  { %s11266_s11 = scalar_lea.hbm %s11449_s17, 8192 }
  0x66   :  { %p11267_p2 = scmp.ne.s32.totalorder %s11449_s17, %s11266_s11  ;;  %p11270_p3 = scmp.lt.u32.totalorder %s11266_s11, %s11449_s17 }
  0x68   :  { %p11272_p4 = pnand %p11270_p3, %p11267_p2 }
  0x6a   :  { %11275 = shalt.err (!%p11272_p4)
}
  0x6b   :  { %s11276_s16 = scalar_lea.vmem %s100_s2, 8192  ;;  %p11281_p6 = scmp.lt.s32.totalorder %s100_s2, %s100_s2 }
  0x6c   :  { %p11277_p5 = scmp.ne.s32.totalorder %s100_s2, %s11276_s16  ;;  %p11282_p7 = scmp.lt.s32.totalorder %s11276_s16, %s11276_s16 }
  0x6e   :  { %p11283_p8 = por %p11282_p7, %p11281_p6 }
  0x70   :  { %p11284_p9 = pnand %p11283_p8, %p11277_p5 }
  0x72   :  { %11287 = shalt.err (!%p11284_p9)
}
  0x73   :  { %105 = dma.hbm_to_vmem [thread:$0]  %s11449_s17, 8192, %s100_s2, [#allocation6], %s11402_s4, %s11402_s4, %s11403_s26  }
  0x74   :  { %s11288_s21 = scalar_lea.hbm %s11534_s27, 256 }
  0x75   :  { %p11289_p10 = scmp.ne.s32.totalorder %s11534_s27, %s11288_s21  ;;  %p11292_p11 = scmp.lt.u32.totalorder %s11288_s21, %s11534_s27 }
  0x77   :  { %p11294_p12 = pnand %p11292_p11, %p11289_p10 }
  0x79   :  { %11297 = shalt.err (!%p11294_p12)
}
  0x7a   :  { %s11298_s15 = scalar_lea.vmem %s11645_s7, 256  ;;  %p11303_p0 = scmp.lt.s32.totalorder %s11645_s7, %s11645_s7 }
  0x7b   :  { %p11299_p13 = scmp.ne.s32.totalorder %s11645_s7, %s11298_s15  ;;  %p11304_p1 = scmp.lt.s32.totalorder %s11298_s15, %s11298_s15 }
  0x7d   :  { %p11305_p2 = por %p11304_p1, %p11303_p0 }
  0x7f   :  { %p11306_p3 = pnand %p11305_p2, %p11299_p13 }
  0x81   :  { %11309 = shalt.err (!%p11306_p3)
}
  0x82   :  { %159 = dma.hbm_to_vmem [thread:$0]  %s11534_s27, 256, %s11645_s7, [#allocation8], %s11402_s4, %s11402_s4, %s11403_s26  }
  0x83   :  { %s11406_s17 = smov [#allocation12]   ;;  %s11407_s23 = smov [#allocation13]  }
  0x84   :  { %s198_s18 = sshll.u32 %s11406_s17, 4  ;;  %s213_s22 = sshll.u32 %s11407_s23, 4  ;;  %s199_s18 = int_to_ptr.vmem [resolvable:$true] %s198_s18  ;;  %s11666_s22 = int_to_ptr.vmem [resolvable:$true] %s213_s22 }
  0x85   :  { %s11310_s0 = scalar_lea.hbm %s11594_s20, 128 }
  0x86   :  { %p11311_p4 = scmp.ne.s32.totalorder %s11594_s20, %s11310_s0  ;;  %p11314_p5 = scmp.lt.u32.totalorder %s11310_s0, %s11594_s20 }
  0x88   :  { %p11316_p6 = pnand %p11314_p5, %p11311_p4 }
  0x8a   :  { %11319 = shalt.err (!%p11316_p6)
}
  0x8b   :  { %s11320_s1 = scalar_lea.vmem %s199_s18, 128  ;;  %p11325_p8 = scmp.lt.s32.totalorder %s199_s18, %s199_s18 }
  0x8c   :  { %p11321_p7 = scmp.ne.s32.totalorder %s199_s18, %s11320_s1  ;;  %p11326_p9 = scmp.lt.s32.totalorder %s11320_s1, %s11320_s1 }
  0x8e   :  { %p11327_p10 = por %p11326_p9, %p11325_p8 }
  0x90   :  { %p11328_p11 = pnand %p11327_p10, %p11321_p7 }
  0x92   :  { %11331 = shalt.err (!%p11328_p11)
}
  0x93   :  { %201 = dma.hbm_to_vmem [thread:$0]  %s11594_s20, 128, %s199_s18, [#allocation11]  }
  0x94   :  { %s11332_s27 = scalar_lea.hbm %s11612_s24, 256 }
  0x95   :  { %p11333_p12 = scmp.ne.s32.totalorder %s11612_s24, %s11332_s27  ;;  %p11336_p13 = scmp.lt.u32.totalorder %s11332_s27, %s11612_s24 }
  0x97   :  { %p11338_p0 = pnand %p11336_p13, %p11333_p12 }
  0x99   :  { %11341 = shalt.err (!%p11338_p0)
}
  0x9a   :  { %s11342_s28 = scalar_lea.vmem %s11666_s22, 256  ;;  %p11347_p2 = scmp.lt.s32.totalorder %s11666_s22, %s11666_s22 }
  0x9b   :  { %p11343_p1 = scmp.ne.s32.totalorder %s11666_s22, %s11342_s28  ;;  %p11348_p3 = scmp.lt.s32.totalorder %s11342_s28, %s11342_s28 }
  0x9d   :  { %p11349_p4 = por %p11348_p3, %p11347_p2 }
  0x9f   :  { %p11350_p5 = pnand %p11349_p4, %p11343_p1 }
  0xa1   :  { %11353 = shalt.err (!%p11350_p5)
}
  0xa2   :  { %219 = dma.hbm_to_vmem [thread:$0]  %s11612_s24, 256, %s11666_s22, [#allocation14], %s11402_s4, %s11402_s4, %s11403_s26  }
  0xa3   :  { %11354 = dma.done.wait [#allocation6], 8192  }
  0xa4   :  { %11355 = vsyncadd [#allocation6], 4294959104 }
  0xa5   :  { %11356 = dma.done.wait [#allocation8], 512  }
  0xa6   :  { %11357 = vsyncadd [#allocation8], 4294966784 }
  0xa7   :  { %11358 = dma.done.wait [#allocation11], 384  }
  0xa8   :  { %11359 = vsyncadd [#allocation11], 4294966912 }
  0xa9   :  { %11360 = dma.done.wait [#allocation14], 256  }
  0xaa   :  { %11361 = vsyncadd [#allocation14], 4294967040  ;;  %v11408_v1 = vmov 0.0   ;;  %v252_v2 = vld [vmem:[%s11434_s5] sm:$0x77]  ;;  %s11409_s24 = smov 17  }
  0xab   :  { %240 = vst [vmem:[#allocation3] sm:$0xff] %v11408_v1  ;;  %241 = vst [vmem:[#allocation3 + $0x8] sm:$0xff] %v11408_v1  ;;  %367 = vmatprep.mubr.f32.mxu1 %v11408_v1  ;;  %567 = vmatprep.mubr.f32.mxu0 %v11408_v1  ;;  %v253_v3 = vld [vmem:[%s11434_s5 + $0x8] sm:$0x77]  ;;  %v256_v5 = vcombine.high %v252_v2, %v252_v2  ;;  %s11410_s20 = smov 16   ;;  %s11411_s5 = smov 15  }
  0xac   :  { %242 = vst [vmem:[#allocation3 + $0x10] sm:$0xff] %v11408_v1  ;;  %243 = vst [vmem:[#allocation3 + $0x18] sm:$0xff] %v11408_v1  ;;  %v257_v6 = vcombine.high %v253_v3, %v253_v3  ;;  %s11412_s4 = smov 1   ;;  %s11413_s12 = smov 127   ;;  %vm285_vm0 = vcmask 138240   ;;  %vm294_vm1 = vcmask 1042432  }
  0xad   :  { %244 = vst [vmem:[#allocation3 + $0x20] sm:$0xff] %v11408_v1  ;;  %245 = vst [vmem:[#allocation3 + $0x28] sm:$0xff] %v11408_v1  ;;  %s11414_s2 = smov 113   ;;  %s11415_s10 = smov 112   ;;  %v269_v25 = vld [vmem:[%s11459_s25] sm:$0xff]  ;;  %vm290_vm2 = vcmask 23552  }
  0xae   :  { %260 = vst [vmem:[#allocation3 + $0x8] sm:$0x7] %v252_v2  ;;  %262 = vst [vmem:[#allocation3 + $0x18] sm:$0x7] %v253_v3  ;;  %s11416_s7 = smov 111   ;;  %vm487_vm3 = vcmask 130048  }
  0xaf   :  { %261 = vst [vmem:[#allocation3 + $0x10] sm:$0x7] %v256_v5  ;;  %263 = vst [vmem:[#allocation3 + $0x20] sm:$0x7] %v257_v6  ;;  %v9683_v36 = vld [vmem:[%s11459_s25 + $0x8] sm:$0xff]  ;;  %vm688_vm4 = vcmask 121856  }
  0xb0   :  { %v9691_v42 = vld [vmem:[%s11459_s25 + $0x10] sm:$0xff]  ;;  %vm889_vm5 = vcmask 7168   ;;  %v9699_v52 = vld [vmem:[%s11459_s25 + $0x18] sm:$0xff]  ;;  %v9707_v58 = vld [vmem:[%s11459_s25 + $0x20] sm:$0xff]  ;;  %vm1286_vm6 = vcmask 1039360   ;;  %vm1487_vm7 = vcmask 924672  }
  0xb1   :  { %v9715_v63 = vld [vmem:[%s11459_s25 + $0x28] sm:$0xff]  ;;  %vm1688_vm8 = vcmask 916480   ;;  %vm1889_vm9 = vcmask 908288   ;;  %vm2141_vm10 = vcmask 64512   ;;  %vm4351_vm11 = vcmask 1043456   ;;  %s13290_s11 = sld [smem:[#allocation26_spill]] }
  0xb2   :  { %v264_v4 = vld [vmem:[#allocation3] sm:$0x7]  ;;  %vm11418_vm12 = vmmov 1   ;;  %vm4461_vm14 = vcmask 97280   ;;  %s13297_s16 = sld [smem:[#allocation28_spill]]  ;;  %s13298_s21 = sld [smem:[#allocation27_spill]] }
  0xb3   :  { %275 = vrot.lane.b32.xlu1 %v264_v4, %s11409_s24  ;;  %vm12377_vm13 = vmpackc.low %vm4351_vm11, %vm11418_vm12  ;;  %s13299_s15 = sld [smem:[#allocation29_spill]]  ;;  %s13300_s17 = sld [smem:[#allocation30_spill]]  ;;  %vm11421_vm15 = vmmov 0  }
  0xb4   :  { %v1268_v15 = vld [vmem:[#allocation3 + $0x28] sm:$0x7]  ;;  %s11420_s18 = smov 9   ;;  %s11422_s23 = smov 7  }
  0xb5   :  { %v11696_v7 = vld [vmem:[#allocation3 + $0x8] sm:$0x7]  ;;  %v11698_v8 = vld [vmem:[#allocation3 + $0x18] sm:$0x7]  ;;  %s13301_s22 = sld [smem:[#allocation32_spill]]  ;;  %s11423_s0 = smov 121  }
  0xb6   :  { %277 = vrot.lane.b32.xlu0 %v11696_v7, %s11409_s24  ;;  %v11708_v9 = vld [vmem:[#allocation3 + $0x10] sm:$0x7]  ;;  %v11710_v10 = vld [vmem:[#allocation3 + $0x20] sm:$0x7]  ;;  %v1266_v11 = vld [vmem:[#allocation3 + $0x18] sm:$0x7] }
  0xb7   :  { %477 = vrot.lane.b32.xlu1 %v264_v4, %s11410_s20  ;;  %v1267_v12 = vld [vmem:[#allocation3 + $0x20] sm:$0x7]  ;;  %v1265_v13 = vld [vmem:[#allocation3 + $0x10] sm:$0x7]  ;;  %v1264_v14 = vld [vmem:[#allocation3 + $0x8] sm:$0x7] }
  0xb8   :  { %s11424_s1 = smov 120   ;;  %s11425_s27 = smov 119  }
  0xb9   :  { %s13302_s28 = sld [smem:[#allocation31_spill]] }
  0xba   :  { %483 = vrot.lane.b32.xlu0 %v11698_v8, %s11410_s20 }
  0xbb   :  { %281 = vrot.lane.b32.xlu1 %v11698_v8, %s11409_s24 }
  0xbe   :  { %279 = vrot.lane.b32.xlu0 %v11708_v9, %s11409_s24 }
  0xbf   :  { %479 = vrot.lane.b32.xlu1 %v11696_v7, %s11410_s20 }
  0xc2   :  { %283 = vrot.lane.b32.xlu0 %v11710_v10, %s11409_s24 }
  0xc3   :  { %485 = vrot.lane.b32.xlu1 %v11710_v10, %s11410_s20 }
  0xc6   :  { %481 = vrot.lane.b32.xlu0 %v11708_v9, %s11410_s20 }
  0xc7   :  { %682 = vrot.lane.b32.xlu1 %v11708_v9, %s11411_s5 }
  0xca   :  { %680 = vrot.lane.b32.xlu0 %v11696_v7, %s11411_s5 }
  0xcb   :  { %684 = vrot.lane.b32.xlu1 %v11698_v8, %s11411_s5 }
  0xce   :  { %678 = vrot.lane.b32.xlu0 %v264_v4, %s11411_s5 }
  0xcf   :  { %881 = vrot.lane.b32.xlu1 %v11696_v7, %s11412_s4 }
  0xd2   :  { %686 = vrot.lane.b32.xlu0 %v11710_v10, %s11411_s5 }
  0xd3   :  { %879 = vrot.lane.b32.xlu1 %v264_v4, %s11412_s4 }
  0xd6   :  { %883 = vrot.lane.b32.xlu0 %v11708_v9, %s11412_s4 }
  0xd7   :  { %887 = vrot.lane.b32.xlu1 %v11710_v10, %s11412_s4 }
  0xda   :  { %885 = vrot.lane.b32.xlu0 %v11698_v8, %s11412_s4 }
  0xdb   :  { %1280 = vrot.lane.b32.xlu1 %v1266_v11, %s11413_s12 }
  0xde   :  { %1278 = vrot.lane.b32.xlu0 %v1265_v13, %s11413_s12 }
  0xdf   :  { %1282 = vrot.lane.b32.xlu1 %v1267_v12, %s11413_s12 }
  0xe2   :  { %1276 = vrot.lane.b32.xlu0 %v1264_v14, %s11413_s12 }
  0xe3   :  { %1479 = vrot.lane.b32.xlu1 %v1265_v13, %s11414_s2 }
  0xe6   :  { %1284 = vrot.lane.b32.xlu0 %v1268_v15, %s11413_s12 }
  0xe7   :  { %1477 = vrot.lane.b32.xlu1 %v1264_v14, %s11414_s2 }
  0xea   :  { %1481 = vrot.lane.b32.xlu0 %v1266_v11, %s11414_s2 }
  0xeb   :  { %1485 = vrot.lane.b32.xlu1 %v1268_v15, %s11414_s2 }
  0xee   :  { %1483 = vrot.lane.b32.xlu0 %v1267_v12, %s11414_s2 }
  0xef   :  { %1682 = vrot.lane.b32.xlu1 %v1266_v11, %s11415_s10 }
  0xf2   :  { %1680 = vrot.lane.b32.xlu0 %v1265_v13, %s11415_s10 }
  0xf3   :  { %1684 = vrot.lane.b32.xlu1 %v1267_v12, %s11415_s10 }
  0xf6   :  { %1678 = vrot.lane.b32.xlu0 %v1264_v14, %s11415_s10 }
  0xf7   :  { %1881 = vrot.lane.b32.xlu1 %v1265_v13, %s11416_s7 }
  0xfa   :  { %1686 = vrot.lane.b32.xlu0 %v1268_v15, %s11415_s10 }
  0xfb   :  { %1879 = vrot.lane.b32.xlu1 %v1264_v14, %s11416_s7 }
  0xfe   :  { %1883 = vrot.lane.b32.xlu0 %v1266_v11, %s11416_s7 }
  0xff   :  { %1887 = vrot.lane.b32.xlu1 %v1268_v15, %s11416_s7 }
 0x102   :  { %1885 = vrot.lane.b32.xlu0 %v1267_v12, %s11416_s7 }
 0x125   :  { %v276_v16 = vpop.permute.xlu1 %275 }
 0x128   :  { %v278_v18 = vpop.permute.xlu0 %277 }
 0x129   :  { %v478_v17 = vpop.permute.xlu1 %477  ;;  %v286_v26 = vsel %vm285_vm0, %v276_v16, %v278_v18 }
 0x12c   :  { %v484_v20 = vpop.permute.xlu0 %483 }
 0x12d   :  { %v282_v19 = vpop.permute.xlu1 %281 }
 0x130   :  { %v280_v22 = vpop.permute.xlu0 %279 }
 0x131   :  { %v480_v21 = vpop.permute.xlu1 %479  ;;  %v287_v24 = vsel %vm285_vm0, %v278_v18, %v280_v22  ;;  %v288_v30 = vsel %vm285_vm0, %v280_v22, %v282_v19 }
 0x132   :  { %9677 = vmatprep.subr.msk.mxu1 %vm294_vm1, %v287_v24  ;;  %v488_v37 = vsel %vm487_vm3, %v478_v17, %v480_v21 }
 0x133   :  { %9678 = vmatpush1.msk.msra.mxu1 %vm294_vm1, %v286_v26 }
 0x134   :  { %v284_v27 = vpop.permute.xlu0 %283  ;;  %9679 = vmatmul.mubr.msk.f32.vlgmr.msra.gmra.mrb[0].mxu1 %vm290_vm2, %v269_v25 }
 0x135   :  { %v486_v23 = vpop.permute.xlu1 %485  ;;  %v289_v28 = vsel %vm285_vm0, %v282_v19, %v284_v27  ;;  %438 = vmatprep.mubr.f32.mxu1 %v11408_v1 }
 0x136   :  { %9680 = vmatprep.subr.msk.mxu1 %vm294_vm1, %v289_v28  ;;  %v491_v31 = vsel %vm487_vm3, %v484_v20, %v486_v23  ;;  %v9739_v28 = vld [vmem:[%s11459_s25 + $0x40] sm:$0xff] }
 0x137   :  { %9681 = vmatpush1.msk.msra.mxu1 %vm294_vm1, %v288_v30 }
 0x138   :  { %v482_v32 = vpop.permute.xlu0 %481  ;;  %9687 = vmatprep.subr.msk.mxu1 %vm294_vm1, %v491_v31  ;;  %9682 = vmatmul.mubr.msk.f32.vlgmr.msra.gmra.mrb[2].mxu1 %vm290_vm2, %v269_v25 }
 0x139   :  { %v683_v29 = vpop.permute.xlu1 %682  ;;  %v490_v33 = vsel %vm487_vm3, %v482_v32, %v484_v20  ;;  %v489_v34 = vsel %vm487_vm3, %v480_v21, %v482_v32  ;;  %638 = vmatprep.mubr.f32.mxu1 %v11408_v1  ;;  %v9731_v20 = vld [vmem:[%s11459_s25 + $0x38] sm:$0xff] }
 0x13a   :  { %9684 = vmatprep.subr.msk.mxu0 %vm294_vm1, %v489_v34  ;;  %9688 = vmatpush1.msk.msra.mxu1 %vm294_vm1, %v490_v33  ;;  %v11417_v34 = vmov 0  }
 0x13b   :  { %9685 = vmatpush1.msk.msra.mxu0 %vm294_vm1, %v488_v37  ;;  %10610 = vset.pattern.permute.xlu1 %v11417_v34 }
 0x13c   :  { %v681_v38 = vpop.permute.xlu0 %680  ;;  %9686 = vmatmul.mubr.msk.f32.vlgmr.msra.gmra.mrb[0].mxu0 %vm290_vm2, %v9683_v36  ;;  %9689 = vmatmul.mubr.msk.f32.vlgmr.msra.gmra.mrb[4].mxu1 %vm290_vm2, %v9683_v36 }
 0x13d   :  { %v685_v35 = vpop.permute.xlu1 %684  ;;  %v690_v39 = vsel %vm688_vm4, %v681_v38, %v683_v29  ;;  %768 = vmatprep.mubr.f32.mxu0 %v11408_v1  ;;  %839 = vmatprep.mubr.f32.mxu1 %v11408_v1 }
 0x13e   :  { %9692 = vmatprep.subr.msk.mxu0 %vm294_vm1, %v690_v39  ;;  %v691_v48 = vsel %vm688_vm4, %v683_v29, %v685_v35  ;;  %10609 = vset.pattern.permute.xlu0 %v11417_v34 }
 0x140   :  { %v679_v41 = vpop.permute.xlu0 %678 }
 0x141   :  { %v882_v40 = vpop.permute.xlu1 %881  ;;  %v689_v43 = vsel %vm688_vm4, %v679_v41, %v681_v38 }
 0x142   :  { %9693 = vmatpush1.msk.msra.mxu0 %vm294_vm1, %v689_v43 }
 0x143   :  { %9694 = vmatmul.mubr.msk.f32.vlgmr.msra.gmra.mrb[2].mxu0 %vm290_vm2, %v9691_v42 }
 0x144   :  { %v687_v45 = vpop.permute.xlu0 %686  ;;  %969 = vmatprep.mubr.f32.mxu0 %v11408_v1 }
 0x145   :  { %v880_v44 = vpop.permute.xlu1 %879  ;;  %v692_v46 = vsel %vm688_vm4, %v685_v35, %v687_v45  ;;  %v447_v35 = vlaneseq }
 0x146   :  { %9695 = vmatprep.subr.msk.mxu1 %vm294_vm1, %v692_v46  ;;  %v890_v53 = vsel %vm889_vm5, %v880_v44, %v882_v40  ;;  %v9690_v44 = vld [vmem:[%s11439_s9 + $0x1] ss:$8 sm:$0xf] }
 0x147   :  { %9696 = vmatpush1.msk.msra.mxu1 %vm294_vm1, %v691_v48  ;;  %v448_v36 = vshrl.u32 %v447_v35, 7 }
 0x148   :  { %v884_v49 = vpop.permute.xlu0 %883  ;;  %9697 = vmatmul.mubr.msk.f32.vlgmr.msra.gmra.mrb[6].mxu1 %vm290_vm2, %v9691_v42 }
 0x149   :  { %v888_v47 = vpop.permute.xlu1 %887  ;;  %v891_v50 = vsel %vm889_vm5, %v882_v40, %v884_v49  ;;  %1040 = vmatprep.mubr.f32.mxu1 %v11408_v1  ;;  %v11875_v37 = vsub.s32 0, %v448_v36  ;;  %v11877_v38 = vsub.s32 2, %v448_v36  ;;  %v445_v40 = vld [vmem:[%s11439_s9] ss:$8 sm:$0xf]  ;;  %v11880_v41 = vsub.s32 1, %v448_v36 }
 0x14a   :  { %9700 = vmatprep.subr.msk.mxu0 %vm294_vm1, %v891_v50  ;;  %v11882_v42 = vsub.s32 3, %v448_v36 }
 0x14b   :  { %9701 = vmatpush1.msk.msra.mxu0 %vm294_vm1, %v890_v53  ;;  %v450_v45 = vrot.slane %v445_v40, %v11875_v37  ;;  %v458_v46 = vrot.slane %v445_v40, %v11877_v38  ;;  %v651_v50 = vrot.slane %v9690_v44, %v11875_v37  ;;  %v655_v53 = vrot.slane %v9690_v44, %v11880_v41 }
 0x14c   :  { %v886_v54 = vpop.permute.xlu0 %885  ;;  %9708 = vmatprep.subr.msk.mxu0 %vm294_vm1, %v11708_v9  ;;  %9702 = vmatmul.mubr.msk.f32.vlgmr.msra.gmra.mrb[4].mxu0 %vm290_vm2, %v9699_v52  ;;  %v9723_v9 = vld [vmem:[%s11459_s25 + $0x30] sm:$0xff]  ;;  %s13278_s25 = sld [smem:[#allocation22_spill]] }
 0x14d   :  { %v1281_v51 = vpop.permute.xlu1 %1280  ;;  %v892_v55 = vsel %vm889_vm5, %v884_v49, %v886_v54  ;;  %v893_v56 = vsel %vm889_vm5, %v886_v54, %v888_v47  ;;  %9709 = vmatpush1.msk.msra.mxu0 %vm294_vm1, %v11696_v7  ;;  %1155 = vmatprep.mubr.f32.mxu0 %v11408_v1  ;;  %v454_v47 = vrot.slane %v445_v40, %v11880_v41 }
 0x14e   :  { %9703 = vmatprep.subr.msk.mxu1 %vm294_vm1, %v893_v56  ;;  %v462_v49 = vrot.slane %v445_v40, %v11882_v42  ;;  %v663_v54 = vrot.slane %v9690_v44, %v11882_v42 }
 0x14f   :  { %9704 = vmatpush1.msk.msra.mxu1 %vm294_vm1, %v892_v55 }
 0x150   :  { %v1279_v59 = vpop.permute.xlu0 %1278  ;;  %9710 = vmatmul.mubr.msk.f32.vlgmr.msra.gmra.mrb[6].mxu0 %vm290_vm2, %v9707_v58  ;;  %9705 = vmatmul.mubr.msk.f32.vlgmr.msra.gmra.mrb[8].mxu1 %vm290_vm2, %v9699_v52  ;;  %v659_v52 = vrot.slane %v9690_v44, %v11877_v38 }
 0x151   :  { %v1283_v57 = vpop.permute.xlu1 %1282  ;;  %v1288_v60 = vsel %vm1286_vm6, %v1279_v59, %v1281_v51  ;;  %9711 = vmatprep.subr.msk.mxu1 %vm294_vm1, %v11710_v10  ;;  %1226 = vmatprep.mubr.f32.mxu1 %v11408_v1 }
 0x152   :  { %9716 = vmatprep.subr.msk.mxu0 %vm294_vm1, %v1288_v60  ;;  %9712 = vmatpush1.msk.msra.mxu1 %vm294_vm1, %v11698_v8  ;;  %v1289_v6 = vsel %vm1286_vm6, %v1281_v51, %v1283_v57 }
 0x153   :  { %1366 = vmatprep.mubr.f32.mxu0 %v11408_v1 }
 0x154   :  { %v1277_v62 = vpop.permute.xlu0 %1276  ;;  %9713 = vmatmul.mubr.msk.f32.vlgmr.msra.gmra.mrb[10].mxu1 %vm290_vm2, %v9707_v58 }
 0x155   :  { %v1480_v61 = vpop.permute.xlu1 %1479  ;;  %v1287_v0 = vsel %vm1286_vm6, %v1277_v62, %v1279_v59  ;;  %1437 = vmatprep.mubr.f32.mxu1 %v11408_v1 }
 0x156   :  { %9717 = vmatpush1.msk.msra.mxu0 %vm294_vm1, %v1287_v0 }
 0x157   :  { %9718 = vmatmul.mubr.msk.f32.vlgmr.msra.gmra.mrb[8].mxu0 %vm290_vm2, %v9715_v63 }
 0x158   :  { %v1285_v3 = vpop.permute.xlu0 %1284  ;;  %1567 = vmatprep.mubr.f32.mxu0 %v11408_v1 }
 0x159   :  { %v1478_v2 = vpop.permute.xlu1 %1477  ;;  %v1290_v4 = vsel %vm1286_vm6, %v1283_v57, %v1285_v3 }
 0x15a   :  { %9719 = vmatprep.subr.msk.mxu1 %vm294_vm1, %v1290_v4  ;;  %v1488_v11 = vsel %vm1487_vm7, %v1478_v2, %v1480_v61 }
 0x15b   :  { %9720 = vmatpush1.msk.msra.mxu1 %vm294_vm1, %v1289_v6 }
 0x15c   :  { %v1482_v7 = vpop.permute.xlu0 %1481  ;;  %9721 = vmatmul.mubr.msk.f32.vlgmr.msra.gmra.mrb[12].mxu1 %vm290_vm2, %v9715_v63  ;;  %v9698_v63 = vld [vmem:[%s11439_s9 + $0x2] ss:$8 sm:$0xf] }
 0x15d   :  { %v1486_v5 = vpop.permute.xlu1 %1485  ;;  %v1489_v8 = vsel %vm1487_vm7, %v1480_v61, %v1482_v7  ;;  %1638 = vmatprep.mubr.f32.mxu1 %v11408_v1 }
 0x15e   :  { %9724 = vmatprep.subr.msk.mxu0 %vm294_vm1, %v1489_v8  ;;  %v852_v8 = vrot.slane %v9698_v63, %v11875_v37 }
 0x15f   :  { %9725 = vmatpush1.msk.msra.mxu0 %vm294_vm1, %v1488_v11 }
 0x160   :  { %v1484_v12 = vpop.permute.xlu0 %1483  ;;  %9726 = vmatmul.mubr.msk.f32.vlgmr.msra.gmra.mrb[10].mxu0 %vm290_vm2, %v9723_v9 }
 0x161   :  { %v1683_v10 = vpop.permute.xlu1 %1682  ;;  %v1490_v13 = vsel %vm1487_vm7, %v1482_v7, %v1484_v12  ;;  %v1491_v14 = vsel %vm1487_vm7, %v1484_v12, %v1486_v5  ;;  %1768 = vmatprep.mubr.f32.mxu0 %v11408_v1 }
 0x162   :  { %9727 = vmatprep.subr.msk.mxu1 %vm294_vm1, %v1491_v14 }
 0x163   :  { %9728 = vmatpush1.msk.msra.mxu1 %vm294_vm1, %v1490_v13 }
 0x164   :  { %v1681_v16 = vpop.permute.xlu0 %1680  ;;  %9729 = vmatmul.mubr.msk.f32.vlgmr.msra.gmra.mrb[14].mxu1 %vm290_vm2, %v9723_v9 }
 0x165   :  { %v1685_v15 = vpop.permute.xlu1 %1684  ;;  %v1690_v17 = vsel %vm1688_vm8, %v1681_v16, %v1683_v10  ;;  %1839 = vmatprep.mubr.f32.mxu1 %v11408_v1 }
 0x166   :  { %9732 = vmatprep.subr.msk.mxu0 %vm294_vm1, %v1690_v17  ;;  %v1691_v24 = vsel %vm1688_vm8, %v1683_v10, %v1685_v15  ;;  %v856_v10 = vrot.slane %v9698_v63, %v11880_v41  ;;  %v9706_v17 = vld [vmem:[%s11439_s9 + $0x3] ss:$8 sm:$0xf] }
 0x167   :  { %v1065_v36 = vrot.slane %v9706_v17, %v11882_v42 }
 0x168   :  { %v1679_v18 = vpop.permute.xlu0 %1678 }
 0x169   :  { %v1882_v19 = vpop.permute.xlu1 %1881  ;;  %v1689_v21 = vsel %vm1688_vm8, %v1679_v18, %v1681_v16  ;;  %v864_v18 = vrot.slane %v9698_v63, %v11882_v42 }
 0x16a   :  { %9733 = vmatpush1.msk.msra.mxu0 %vm294_vm1, %v1689_v21  ;;  %v1053_v21 = vrot.slane %v9706_v17, %v11875_v37 }
 0x16b   :  { %9734 = vmatmul.mubr.msk.f32.vlgmr.msra.gmra.mrb[12].mxu0 %vm290_vm2, %v9731_v20 }
 0x16c   :  { %v1687_v22 = vpop.permute.xlu0 %1686  ;;  %1969 = vmatprep.mubr.f32.mxu0 %v11408_v1 }
 0x16d   :  { %v1692_v23 = vsel %vm1688_vm8, %v1685_v15, %v1687_v22  ;;  %v1880_v25 = vpop.permute.xlu1 %1879  ;;  %v860_v15 = vrot.slane %v9698_v63, %v11877_v38 }
 0x16e   :  { %9735 = vmatprep.subr.msk.mxu1 %vm294_vm1, %v1692_v23  ;;  %v1890_v29 = vsel %vm1889_vm9, %v1880_v25, %v1882_v19  ;;  %v9714_v25 = vld [vmem:[%s11439_s9 + $0x4] ss:$8 sm:$0xf] }
 0x16f   :  { %9736 = vmatpush1.msk.msra.mxu1 %vm294_vm1, %v1691_v24  ;;  %v1057_v24 = vrot.slane %v9706_v17, %v11880_v41  ;;  %v1243_v35 = vrot.slane %v9714_v25, %v11880_v41 }
 0x170   :  { %v1884_v26 = vpop.permute.xlu0 %1883  ;;  %9737 = vmatmul.mubr.msk.f32.vlgmr.msra.gmra.mrb[16].mxu1 %vm290_vm2, %v9731_v20 }
 0x171   :  { %v1891_v27 = vsel %vm1889_vm9, %v1882_v19, %v1884_v26  ;;  %2040 = vmatprep.mubr.f32.mxu1 %v11408_v1  ;;  %v1888_v30 = vpop.permute.xlu1 %1887 }
 0x172   :  { %9740 = vmatprep.subr.msk.mxu0 %vm294_vm1, %v1891_v27 }
 0x173   :  { %9741 = vmatpush1.msk.msra.mxu0 %vm294_vm1, %v1890_v29 }
 0x174   :  { %v1886_v31 = vpop.permute.xlu0 %1885  ;;  %9742 = vmatmul.mubr.msk.f32.vlgmr.msra.gmra.mrb[14].mxu0 %vm290_vm2, %v9739_v28 }
 0x175   :  { %v1892_v32 = vsel %vm1889_vm9, %v1884_v26, %v1886_v31  ;;  %v1893_v33 = vsel %vm1889_vm9, %v1886_v31, %v1888_v30  ;;  %2538 = vmatprep.mubr.f32.mxu0 %v11408_v1 }
 0x176   :  { %9743 = vmatprep.subr.msk.mxu1 %vm294_vm1, %v1893_v33  ;;  %v1061_v33 = vrot.slane %v9706_v17, %v11877_v38 }
 0x177   :  { %9744 = vmatpush1.msk.msra.mxu1 %vm294_vm1, %v1892_v32  ;;  %v1239_v32 = vrot.slane %v9714_v25, %v11875_v37  ;;  %vm7677_vm1 = vcmask 56320  }
 0x178   :  { %9745 = vmatmul.mubr.msk.f32.vlgmr.msra.gmra.mrb[18].mxu1 %vm290_vm2, %v9739_v28  ;;  %vm8050_vm2 = vcmask 990208  }
 0x179   :  { %2212 = vmatprep.mubr.f32.mxu1 %v11408_v1 }
 0x207   :  { %v369_v39 = vpop.f32.mrb[0].mxu1 }
 0x208   :  { %v371_v43 = vpop.f32.mrb[1].mxu1  ;;  %v467_v55 = vmul.f32 %v450_v45, %v369_v39 }
 0x209   :  { %v468_v58 = vmul.f32 %v454_v47, %v371_v43 }
 0x20b   :  { %v440_v48 = vpop.f32.mrb[2].mxu1 }
 0x20c   :  { %v442_v51 = vpop.f32.mrb[3].mxu1  ;;  %v469_v56 = vmul.f32 %v458_v46, %v440_v48  ;;  %v9722_v48 = vld [vmem:[%s11439_s9 + $0x5] ss:$8 sm:$0xf] }
 0x20d   :  { %v470_v59 = vmul.f32 %v462_v49, %v442_v51 }
 0x20f   :  { %v569_v57 = vpop.f32.mrb[0].mxu0  ;;  %v640_v60 = vpop.f32.mrb[4].mxu1 }
 0x210   :  { %v668_v61 = vmul.f32 %v651_v50, %v569_v57  ;;  %v571_v62 = vpop.f32.mrb[1].mxu0  ;;  %v670_v0 = vmul.f32 %v659_v52, %v640_v60  ;;  %v642_v2 = vpop.f32.mrb[5].mxu1  ;;  %v1247_v50 = vrot.slane %v9714_v25, %v11877_v38  ;;  %v1450_v57 = vrot.slane %v9722_v48, %v11875_v37 }
 0x211   :  { %v669_v3 = vmul.f32 %v655_v53, %v571_v62  ;;  %v671_v4 = vmul.f32 %v663_v54, %v642_v2  ;;  %v1251_v53 = vrot.slane %v9714_v25, %v11882_v42  ;;  %v1454_v60 = vrot.slane %v9722_v48, %v11880_v41 }
 0x212   :  { %v672_v5 = vadd.f32 %v668_v61, %v467_v55  ;;  %v674_v6 = vadd.f32 %v670_v0, %v469_v56 }
 0x213   :  { %v673_v7 = vadd.f32 %v669_v3, %v468_v58  ;;  %v675_v9 = vadd.f32 %v671_v4, %v470_v59 }
 0x216   :  { %v770_v11 = vpop.f32.mrb[2].mxu0 }
 0x217   :  { %v869_v12 = vmul.f32 %v852_v8, %v770_v11  ;;  %v772_v13 = vpop.f32.mrb[3].mxu0 }
 0x218   :  { %v870_v14 = vmul.f32 %v856_v10, %v772_v13  ;;  %v9730_v10 = vld [vmem:[%s11439_s9 + $0x6] ss:$8 sm:$0xf] }
 0x219   :  { %v873_v16 = vadd.f32 %v869_v12, %v672_v5  ;;  %v1655_v17 = vrot.slane %v9730_v10, %v11880_v41  ;;  %v1663_v25 = vrot.slane %v9730_v10, %v11882_v42 }
 0x21a   :  { %v874_v19 = vadd.f32 %v870_v14, %v673_v7  ;;  %v1458_v7 = vrot.slane %v9722_v48, %v11877_v38 }
 0x21b   :  { %v841_v20 = vpop.f32.mrb[6].mxu1 }
 0x21c   :  { %v871_v22 = vmul.f32 %v860_v15, %v841_v20  ;;  %v843_v23 = vpop.f32.mrb[7].mxu1  ;;  %v1651_v15 = vrot.slane %v9730_v10, %v11875_v37 }
 0x21d   :  { %v872_v26 = vmul.f32 %v864_v18, %v843_v23  ;;  %v1659_v23 = vrot.slane %v9730_v10, %v11877_v38 }
 0x21e   :  { %v875_v27 = vadd.f32 %v871_v22, %v674_v6 }
 0x21f   :  { %v971_v28 = vpop.f32.mrb[4].mxu0  ;;  %v876_v29 = vadd.f32 %v872_v26, %v675_v9  ;;  %v1462_v9 = vrot.slane %v9722_v48, %v11882_v42  ;;  %v9746_v48 = vld [vmem:[%s11439_s9 + $0x20] ss:$8 sm:$0xf] }
 0x220   :  { %v1070_v30 = vmul.f32 %v1053_v21, %v971_v28  ;;  %v973_v31 = vpop.f32.mrb[5].mxu0 }
 0x221   :  { %v1071_v34 = vmul.f32 %v1057_v24, %v973_v31  ;;  %v9738_v31 = vld [vmem:[%s11439_s9 + $0x7] ss:$8 sm:$0xf] }
 0x222   :  { %v1074_v39 = vadd.f32 %v1070_v30, %v873_v16 }
 0x223   :  { %v1075_v40 = vadd.f32 %v1071_v34, %v874_v19  ;;  %v1157_v43 = vpop.f32.mrb[6].mxu0  ;;  %v1042_v44 = vpop.f32.mrb[8].mxu1 }
 0x224   :  { %v1256_v45 = vmul.f32 %v1239_v32, %v1157_v43  ;;  %v1159_v46 = vpop.f32.mrb[7].mxu0  ;;  %v1072_v47 = vmul.f32 %v1061_v33, %v1042_v44  ;;  %v1044_v49 = vpop.f32.mrb[9].mxu1 }
 0x225   :  { %v1257_v51 = vmul.f32 %v1243_v35, %v1159_v46  ;;  %v1073_v52 = vmul.f32 %v1065_v36, %v1044_v49  ;;  %v1852_v35 = vrot.slane %v9738_v31, %v11875_v37  ;;  %v1856_v36 = vrot.slane %v9738_v31, %v11880_v41 }
 0x226   :  { %v1260_v54 = vadd.f32 %v1256_v45, %v1074_v39  ;;  %v1076_v55 = vadd.f32 %v1072_v47, %v875_v27  ;;  %v1860_v45 = vrot.slane %v9738_v31, %v11877_v38  ;;  %v1864_v47 = vrot.slane %v9738_v31, %v11882_v42 }
 0x227   :  { %v1261_v56 = vadd.f32 %v1257_v51, %v1075_v40  ;;  %v1077_v58 = vadd.f32 %v1073_v52, %v876_v29  ;;  %v1228_v59 = vpop.f32.mrb[10].mxu1 }
 0x228   :  { %v1258_v61 = vmul.f32 %v1247_v50, %v1228_v59  ;;  %v1230_v62 = vpop.f32.mrb[11].mxu1 }
 0x229   :  { %v1259_v63 = vmul.f32 %v1251_v53, %v1230_v62  ;;  %v2053_v53 = vrot.slane %v9746_v48, %v11875_v37 }
 0x22a   :  { %v1368_v0 = vpop.f32.mrb[8].mxu0  ;;  %v1262_v2 = vadd.f32 %v1258_v61, %v1076_v55  ;;  %v2057_v55 = vrot.slane %v9746_v48, %v11880_v41  ;;  %v2061_v61 = vrot.slane %v9746_v48, %v11877_v38 }
 0x22b   :  { %v1467_v3 = vmul.f32 %v1450_v57, %v1368_v0  ;;  %v1370_v4 = vpop.f32.mrb[9].mxu0  ;;  %v1263_v5 = vadd.f32 %v1259_v63, %v1077_v58  ;;  %v2065_v63 = vrot.slane %v9746_v48, %v11882_v42 }
 0x22c   :  { %v1468_v6 = vmul.f32 %v1454_v60, %v1370_v4 }
 0x22d   :  { %v1471_v8 = vadd.f32 %v1467_v3, %v1260_v54 }
 0x22e   :  { %v1472_v11 = vadd.f32 %v1468_v6, %v1261_v56 }
 0x22f   :  { %v1439_v12 = vpop.f32.mrb[12].mxu1 }
 0x230   :  { %v1469_v13 = vmul.f32 %v1458_v7, %v1439_v12  ;;  %v1441_v14 = vpop.f32.mrb[13].mxu1 }
 0x231   :  { %v1470_v16 = vmul.f32 %v1462_v9, %v1441_v14 }
 0x232   :  { %v1473_v18 = vadd.f32 %v1469_v13, %v1262_v2 }
 0x233   :  { %v1474_v19 = vadd.f32 %v1470_v16, %v1263_v5  ;;  %v1569_v20 = vpop.f32.mrb[10].mxu0 }
 0x234   :  { %v1668_v21 = vmul.f32 %v1651_v15, %v1569_v20  ;;  %v1571_v22 = vpop.f32.mrb[11].mxu0  ;;  %v2115_v20 = vld [vmem:[%s11464_s29] sm:$0xff]  ;;  %s13279_s29 = sld [smem:[#allocation21_spill]] }
 0x235   :  { %v1669_v24 = vmul.f32 %v1655_v17, %v1571_v22 }
 0x236   :  { %v1672_v26 = vadd.f32 %v1668_v21, %v1471_v8  ;;  %v2358_v21 = vld [vmem:[%s11479_s14] sm:$0xff] }
 0x237   :  { %v1673_v27 = vadd.f32 %v1669_v24, %v1472_v11  ;;  %v1640_v28 = vpop.f32.mrb[14].mxu1 }
 0x238   :  { %v1670_v29 = vmul.f32 %v1659_v23, %v1640_v28  ;;  %v1642_v30 = vpop.f32.mrb[15].mxu1 }
 0x239   :  { %v1671_v32 = vmul.f32 %v1663_v25, %v1642_v30 }
 0x23a   :  { %v1674_v33 = vadd.f32 %v1670_v29, %v1473_v18 }
 0x23b   :  { %v1675_v34 = vadd.f32 %v1671_v32, %v1474_v19  ;;  %v2125_v19 = vld [vmem:[%s11469_s3] sm:$0xff]  ;;  %s13284_s3 = sld [smem:[#allocation23_spill]] }
 0x23e   :  { %v1770_v39 = vpop.f32.mrb[12].mxu0 }
 0x23f   :  { %v1869_v40 = vmul.f32 %v1852_v35, %v1770_v39  ;;  %v1772_v43 = vpop.f32.mrb[13].mxu0 }
 0x240   :  { %v1870_v44 = vmul.f32 %v1856_v36, %v1772_v43 }
 0x241   :  { %v1873_v46 = vadd.f32 %v1869_v40, %v1672_v26 }
 0x242   :  { %v1874_v49 = vadd.f32 %v1870_v44, %v1673_v27 }
 0x243   :  { %v1841_v50 = vpop.f32.mrb[16].mxu1 }
 0x244   :  { %v1871_v51 = vmul.f32 %v1860_v45, %v1841_v50  ;;  %v1843_v52 = vpop.f32.mrb[17].mxu1 }
 0x245   :  { %v1872_v54 = vmul.f32 %v1864_v47, %v1843_v52 }
 0x246   :  { %v1875_v56 = vadd.f32 %v1871_v51, %v1674_v33 }
 0x247   :  { %v1876_v57 = vadd.f32 %v1872_v54, %v1675_v34  ;;  %v1971_v58 = vpop.f32.mrb[14].mxu0  ;;  %v2139_v54 = vld [vmem:[%s11474_s8] sm:$0xff] }
 0x248   :  { %v2070_v59 = vmul.f32 %v2053_v53, %v1971_v58  ;;  %v1973_v60 = vpop.f32.mrb[15].mxu0 }
 0x249   :  { %v2071_v62 = vmul.f32 %v2057_v55, %v1973_v60 }
 0x24a   :  { %v2074_v0 = vadd.f32 %v2070_v59, %v1873_v46 }
 0x24b   :  { %v2075_v2 = vadd.f32 %v2071_v62, %v1874_v49  ;;  %v2042_v3 = vpop.f32.mrb[18].mxu1 }
 0x24c   :  { %2078 = vst [vmem:[#allocation2] sm:$0xff] %v2074_v0  ;;  %v2072_v4 = vmul.f32 %v2061_v61, %v2042_v3  ;;  %v2044_v5 = vpop.f32.mrb[19].mxu1  ;;  %v2093_v6 = vmul.f32 %v2074_v0, %v2074_v0 }
 0x24d   :  { %2079 = vst [vmem:[#allocation2 + $0x8] sm:$0xff] %v2075_v2  ;;  %v2073_v7 = vmul.f32 %v2065_v63, %v2044_v5  ;;  %v2086_v8 = vadd.f32 %v2075_v2, %v2074_v0  ;;  %v2094_v9 = vmul.f32 %v2075_v2, %v2075_v2 }
 0x24e   :  { %v2076_v10 = vadd.f32 %v2072_v4, %v1875_v56 }
 0x24f   :  { %v2077_v11 = vadd.f32 %v2073_v7, %v1876_v57  ;;  %v2097_v12 = vadd.f32 %v2094_v9, %v2093_v6  ;;  %v2140_v57 = vld [vmem:[%s11474_s8 + $0x8] sm:$0xff]  ;;  %s13285_s8 = sld [smem:[#allocation24_spill]] }
 0x250   :  { %2080 = vst [vmem:[#allocation2 + $0x10] sm:$0xff] %v2076_v10  ;;  %v2087_v13 = vadd.f32 %v2086_v8, %v2076_v10  ;;  %v2095_v14 = vmul.f32 %v2076_v10, %v2076_v10 }
 0x251   :  { %2081 = vst [vmem:[#allocation2 + $0x18] sm:$0xff] %v2077_v11  ;;  %v2096_v15 = vmul.f32 %v2077_v11, %v2077_v11 }
 0x252   :  { %v11928_v16 = vadd.f32 %v2087_v13, %v2077_v11  ;;  %v2098_v17 = vadd.f32 %v2097_v12, %v2095_v14 }
 0x254   :  { %2089 = vadd.xlane.f32.xlu0 %v11928_v16  ;;  %v11931_v18 = vadd.f32 %v2098_v17, %v2096_v15 }
 0x256   :  { %2100 = vadd.xlane.f32.xlu1 %v11931_v18 }
 0x267   :  { %2128 = vperm.xlu1 %10610, %v2125_v19  }
 0x26a   :  { %2118 = vperm.xlu0 %10609, %v2115_v20  }
 0x26b   :  { %2362 = vperm.xlu1 %10610, %v2358_v21  }
 0x2e1   :  { %v2090_v22 = vpop.xlane.xlu0 %2089 }
 0x2e2   :  { %v2092_v23 = vmul.f32 0.001953125, %v2090_v22 }
 0x2e3   :  { %v2101_v24 = vpop.xlane.xlu1 %2100 }
 0x2e4   :  { %v2102_v25 = vmul.f32 0.001953125, %v2101_v24  ;;  %v2103_v26 = vmul.f32 %v2092_v23, %v2092_v23  ;;  %v2107_v29 = vsub.f32 %v2074_v0, %v2092_v23  ;;  %v2109_v30 = vsub.f32 %v2076_v10, %v2092_v23 }
 0x2e5   :  { %v2108_v31 = vsub.f32 %v2075_v2, %v2092_v23  ;;  %v2110_v32 = vsub.f32 %v2077_v11, %v2092_v23 }
 0x2e6   :  { %v2104_v27 = vsub.f32 %v2102_v25, %v2103_v26  ;;  %v2378_v25 = vld [vmem:[%s11484_s19] sm:$0xff]  ;;  %v2359_v26 = vld [vmem:[%s11479_s14 + $0x8] sm:$0xff]  ;;  %s13288_s14 = sld [smem:[#allocation25_spill]] }
 0x2e7   :  { %v2129_v47 = vpop.permute.xlu1 %2128 }
 0x2e8   :  { %v2105_v28 = vadd.f32 1e-05, %v2104_v27  ;;  %v2379_v27 = vld [vmem:[%s11484_s19 + $0x8] sm:$0xff]  ;;  %s13289_s19 = sld [smem:[#allocation37_spill]] }
 0x2e9   :  { %v2119_v34 = vpop.permute.xlu0 %2118 }
 0x2ea   :  { %11173 = vrsqrt.f32 %v2105_v28 }
 0x2eb   :  { %v2363_v28 = vpop.permute.xlu1 %2362 }
 0x2f4   :  { %v11174_v33 = vpop.eup %11173 }
 0x2f5   :  { %v2111_v35 = vmul.f32 %v11174_v33, %v2107_v29  ;;  %v2113_v36 = vmul.f32 %v11174_v33, %v2109_v30  ;;  %v2112_v39 = vmul.f32 %v11174_v33, %v2108_v31  ;;  %v2114_v40 = vmul.f32 %v11174_v33, %v2110_v32 }
 0x2f7   :  { %v2121_v43 = vmul.f32 %v2119_v34, %v2111_v35  ;;  %v2123_v44 = vmul.f32 %v2119_v34, %v2113_v36  ;;  %v2122_v45 = vmul.f32 %v2119_v34, %v2112_v39  ;;  %v2124_v46 = vmul.f32 %v2119_v34, %v2114_v40 }
 0x2f9   :  { %v2132_v48 = vadd.f32 %v2129_v47, %v2122_v45  ;;  %v2131_v49 = vadd.f32 %v2129_v47, %v2121_v43  ;;  %v2134_v50 = vadd.f32 %v2129_v47, %v2124_v46  ;;  %v2133_v51 = vadd.f32 %v2129_v47, %v2123_v44 }
 0x2fb   :  { %v2136_v52 = vmax.f32 %v2132_v48, 0.0  ;;  %v2135_v53 = vmax.f32 %v2131_v49, 0.0  ;;  %v2138_v55 = vmax.f32 %v2134_v50, 0.0  ;;  %v2137_v56 = vmax.f32 %v2133_v51, 0.0 }
 0x2fd   :  { %2148 = vmatprep.subr.mxu1 %v2136_v52 }
 0x2fe   :  { %2149 = vmatpush1.msra.mxu1 %v2135_v53 }
 0x2ff   :  { %9747 = vmatmul.mubr.msk.f32.vlgmr.msra.gmra.mrb[20].mxu1 %vm2141_vm10, %v2139_v54  ;;  %2225 = vmatprep.subr.mxu1 %v2138_v55 }
 0x300   :  { %2226 = vmatpush1.msra.mxu1 %v2137_v56  ;;  %2218 = vmatprep.mubr.f32.mxu1 %v11408_v1 }
 0x303   :  { %9748 = vmatmul.mubr.msk.f32.gmra.mrb[22].mxu1 %vm2141_vm10, %v2140_v57 }
 0x304   :  { %2289 = vmatprep.mubr.f32.mxu1 %v11408_v1 }
 0x307   :  { %9749 = vmatmul.mubr.msk.f32.vlgmr.msra.gmra.mrb[24].mxu1 %vm2141_vm10, %v2139_v54 }
 0x308   :  { %2295 = vmatprep.mubr.f32.mxu1 %v11408_v1 }
 0x30b   :  { %9750 = vmatmul.mubr.msk.f32.gmra.mrb[26].mxu1 %vm2141_vm10, %v2140_v57 }
 0x30c   :  { %2609 = vmatprep.mubr.f32.mxu1 %v11408_v1 }
 0x3d2   :  { %v2214_v58 = vpop.f32.mrb[20].mxu1 }
 0x3d3   :  { %v2314_v59 = vmul.f32 %v2214_v58, %v2214_v58  ;;  %v2216_v60 = vpop.f32.mrb[21].mxu1 }
 0x3d4   :  { %v2302_v61 = vadd.f32 %v2216_v60, %v2214_v58  ;;  %v2315_v62 = vmul.f32 %v2216_v60, %v2216_v60 }
 0x3d6   :  { %v11947_v63 = vpop.f32.mrb[22].mxu1  ;;  %v2322_v0 = vadd.f32 %v2315_v62, %v2314_v59 }
 0x3d7   :  { %v2318_v2 = vmul.f32 %v11947_v63, %v11947_v63  ;;  %v11951_v3 = vpop.f32.mrb[23].mxu1 }
 0x3d8   :  { %v2307_v4 = vadd.f32 %v11951_v3, %v11947_v63  ;;  %v2319_v5 = vmul.f32 %v11951_v3, %v11951_v3 }
 0x3da   :  { %v2291_v6 = vpop.f32.mrb[24].mxu1  ;;  %v2327_v7 = vadd.f32 %v2319_v5, %v2318_v2  ;;  %v12000_v2 = vld [vmem:[#allocation3] sm:$0xff] }
 0x3db   :  { %v2316_v8 = vmul.f32 %v2291_v6, %v2291_v6  ;;  %v2293_v9 = vpop.f32.mrb[25].mxu1  ;;  %v2303_v10 = vadd.f32 %v2302_v61, %v2291_v6 }
 0x3dc   :  { %v2317_v11 = vmul.f32 %v2293_v9, %v2293_v9 }
 0x3dd   :  { %v2304_v12 = vadd.f32 %v2303_v10, %v2293_v9  ;;  %v2323_v13 = vadd.f32 %v2322_v0, %v2316_v8 }
 0x3de   :  { %v11957_v14 = vpop.f32.mrb[26].mxu1 }
 0x3df   :  { %v2320_v15 = vmul.f32 %v11957_v14, %v11957_v14  ;;  %2305 = vadd.xlane.f32.xlu1 %v2304_v12  ;;  %v11961_v17 = vpop.f32.mrb[27].mxu1  ;;  %v2324_v19 = vadd.f32 %v2323_v13, %v2317_v11  ;;  %v2308_v20 = vadd.f32 %v2307_v4, %v11957_v14 }
 0x3e0   :  { %v2321_v21 = vmul.f32 %v11961_v17, %v11961_v17 }
 0x3e1   :  { %v2309_v22 = vadd.f32 %v2308_v20, %v11961_v17  ;;  %v2328_v23 = vadd.f32 %v2327_v7, %v2320_v15 }
 0x3e3   :  { %2325 = vadd.xlane.f32.xlu1 %v2324_v19  ;;  %2310 = vadd.xlane.f32.xlu0 %v2309_v22  ;;  %v2329_v24 = vadd.f32 %v2328_v23, %v2321_v21 }
 0x3f4   :  { %2382 = vperm.xlu1 %10610, %v2378_v25  }
 0x3f9   :  { %2367 = vperm.xlu0 %10609, %v2359_v26  }
 0x3fd   :  { %10612 = vrot.lane.b32.xlu0 %v11408_v1, %s11409_s24 }
 0x401   :  { %10622 = vrot.lane.b32.xlu0 %v11408_v1, %s11411_s5 }
 0x418   :  { %2330 = vadd.xlane.f32.xlu1 %v2329_v24 }
 0x429   :  { %2387 = vperm.xlu1 %10610, %v2379_v27  }
 0x42d   :  { %10617 = vrot.lane.b32.xlu1 %v11408_v1, %s11410_s20 }
 0x431   :  { %10627 = vrot.lane.b32.xlu1 %v11408_v1, %s11412_s4 }
 0x46c   :  { %v2306_v29 = vpop.xlane.xlu1 %2305 }
 0x46d   :  { %v2312_v30 = vmul.f32 0.001953125, %v2306_v29 }
 0x46f   :  { %v2334_v32 = vmul.f32 %v2312_v30, %v2312_v30  ;;  %v2342_v36 = vsub.f32 %v2214_v58, %v2312_v30  ;;  %v2343_v39 = vsub.f32 %v2216_v60, %v2312_v30  ;;  %v2344_v40 = vsub.f32 %v2291_v6, %v2312_v30 }
 0x470   :  { %v2326_v31 = vpop.xlane.xlu1 %2325  ;;  %v2345_v43 = vsub.f32 %v2293_v9, %v2312_v30  ;;  %v2311_v5 = vpop.xlane.xlu0 %2310 }
 0x471   :  { %v2332_v33 = vmul.f32 0.001953125, %v2326_v31  ;;  %v2313_v6 = vmul.f32 0.001953125, %v2311_v5 }
 0x473   :  { %v2336_v34 = vsub.f32 %v2332_v33, %v2334_v32  ;;  %v2335_v9 = vmul.f32 %v2313_v6, %v2313_v6  ;;  %v2346_v12 = vsub.f32 %v11947_v63, %v2313_v6  ;;  %v2347_v13 = vsub.f32 %v11951_v3, %v2313_v6 }
 0x474   :  { %v2383_v52 = vpop.permute.xlu1 %2382  ;;  %v2348_v15 = vsub.f32 %v11957_v14, %v2313_v6  ;;  %v2349_v19 = vsub.f32 %v11961_v17, %v2313_v6 }
 0x475   :  { %v2338_v35 = vadd.f32 1e-05, %v2336_v34 }
 0x477   :  { %11175 = vrsqrt.f32 %v2338_v35 }
 0x478   :  { %v2368_v25 = vpop.permute.xlu0 %2367 }
 0x481   :  { %v11176_v44 = vpop.eup %11175 }
 0x482   :  { %v2350_v45 = vmul.f32 %v11176_v44, %v2342_v36  ;;  %v2351_v46 = vmul.f32 %v11176_v44, %v2343_v39  ;;  %v2352_v47 = vmul.f32 %v11176_v44, %v2344_v40  ;;  %v2353_v48 = vmul.f32 %v11176_v44, %v2345_v43 }
 0x484   :  { %v2370_v49 = vmul.f32 %v2363_v28, %v2350_v45  ;;  %v2371_v1 = vmul.f32 %v2363_v28, %v2351_v46  ;;  %v2372_v50 = vmul.f32 %v2363_v28, %v2352_v47  ;;  %v2373_v51 = vmul.f32 %v2363_v28, %v2353_v48  ;;  %v4411_v48 = vld [vmem:[%s13278_s25] sm:$0xff] }
 0x486   :  { %v2390_v53 = vadd.f32 %v2383_v52, %v2370_v49  ;;  %v2391_v54 = vadd.f32 %v2383_v52, %v2371_v1  ;;  %v2392_v55 = vadd.f32 %v2383_v52, %v2372_v50  ;;  %v2393_v56 = vadd.f32 %v2383_v52, %v2373_v51  ;;  %v10613_v51 = vpop.permute.xlu0 %10612 }
 0x488   :  { %v11978_v57 = vmax.f32 %v2390_v53, 0.0  ;;  %v11980_v58 = vmax.f32 %v2391_v54, 0.0  ;;  %v11982_v59 = vmax.f32 %v2392_v55, 0.0  ;;  %v11984_v60 = vmax.f32 %v2393_v56, 0.0 }
 0x48a   :  { %v10631_v61 = vpack.i.bf16 %v11980_v58, %v11978_v57  ;;  %v10646_v62 = vpack.i.bf16 %v11984_v60, %v11982_v59  ;;  %v10671_v0 = vpack.i.bf16 %v11982_v59, %v11980_v58  ;;  %v12004_v4 = vpack.i.bf16 %v12000_v2, %v11984_v60  ;;  %v12074_v53 = vpop.permute.xlu0 %10622 }
 0x48c   :  { %10632 = vrot.lane.b32.xlu1 %v10631_v61, %s11409_s24  ;;  %10647 = vrot.lane.b32.xlu0 %v10646_v62, %s11410_s20 }
 0x490   :  { %10637 = vrot.lane.b32.xlu1 %v10646_v62, %s11409_s24  ;;  %10652 = vrot.lane.b32.xlu0 %v10631_v61, %s11411_s5 }
 0x494   :  { %10642 = vrot.lane.b32.xlu1 %v10631_v61, %s11410_s20  ;;  %10667 = vrot.lane.b32.xlu0 %v10646_v62, %s11412_s4 }
 0x498   :  { %10657 = vrot.lane.b32.xlu1 %v10646_v62, %s11411_s5  ;;  %10672 = vrot.lane.b32.xlu0 %v10671_v0, %s11413_s12 }
 0x49c   :  { %10662 = vrot.lane.b32.xlu1 %v10631_v61, %s11412_s4  ;;  %10687 = vrot.lane.b32.xlu0 %v12004_v4, %s11414_s2 }
 0x4a0   :  { %10677 = vrot.lane.b32.xlu1 %v12004_v4, %s11413_s12  ;;  %10692 = vrot.lane.b32.xlu0 %v10671_v0, %s11415_s10 }
 0x4a4   :  { %10682 = vrot.lane.b32.xlu1 %v10671_v0, %s11414_s2 }
 0x4a5   :  { %v2331_v7 = vpop.xlane.xlu1 %2330 }
 0x4a6   :  { %v2333_v8 = vmul.f32 0.001953125, %v2331_v7 }
 0x4a8   :  { %v2337_v10 = vsub.f32 %v2333_v8, %v2335_v9  ;;  %10697 = vrot.lane.b32.xlu1 %v12004_v4, %s11415_s10  ;;  %v10624_v8 = vunpack.i.l.bf16 %v12074_v53 }
 0x4a9   :  { %v2388_v30 = vpop.permute.xlu1 %2387 }
 0x4aa   :  { %v2339_v11 = vadd.f32 1e-05, %v2337_v10 }
 0x4ac   :  { %11177 = vrsqrt.f32 %v2339_v11  ;;  %10702 = vrot.lane.b32.xlu1 %v10671_v0, %s11416_s7 }
 0x4ad   :  { %v12069_v49 = vpop.permute.xlu1 %10617 }
 0x4b1   :  { %v12071_v1 = vpop.permute.xlu1 %10627 }
 0x4b6   :  { %v11178_v20 = vpop.eup %11177 }
 0x4b7   :  { %v2354_v21 = vmul.f32 %v11178_v20, %v2346_v12  ;;  %v2355_v22 = vmul.f32 %v11178_v20, %v2347_v13  ;;  %v2356_v23 = vmul.f32 %v11178_v20, %v2348_v15  ;;  %v2357_v24 = vmul.f32 %v11178_v20, %v2349_v19 }
 0x4b8   :  { %v10615_v19 = vunpack.i.h.bf16 %v10613_v51 }
 0x4b9   :  { %v2374_v26 = vmul.f32 %v2368_v25, %v2354_v21  ;;  %v2375_v27 = vmul.f32 %v2368_v25, %v2355_v22  ;;  %v2376_v28 = vmul.f32 %v2368_v25, %v2356_v23  ;;  %v2377_v29 = vmul.f32 %v2368_v25, %v2357_v24 }
 0x4ba   :  { %v10620_v24 = vunpack.i.h.bf16 %v12069_v49  ;;  %v10619_v25 = vunpack.i.l.bf16 %v12069_v49 }
 0x4bb   :  { %v2394_v31 = vadd.f32 %v2388_v30, %v2374_v26  ;;  %v2395_v32 = vadd.f32 %v2388_v30, %v2375_v27  ;;  %v2396_v63 = vadd.f32 %v2388_v30, %v2376_v28  ;;  %v2397_v33 = vadd.f32 %v2388_v30, %v2377_v29 }
 0x4bc   :  { %v10630_v26 = vunpack.i.h.bf16 %v12071_v1  ;;  %v10625_v27 = vunpack.i.h.bf16 %v12074_v53  ;;  %v10629_v28 = vunpack.i.l.bf16 %v12071_v1 }
 0x4bd   :  { %v12020_v3 = vmax.f32 %v2394_v31, 0.0  ;;  %v12022_v14 = vmax.f32 %v2395_v32, 0.0  ;;  %v12024_v17 = vmax.f32 %v2396_v63, 0.0  ;;  %v12026_v34 = vmax.f32 %v2397_v33, 0.0 }
 0x4bf   :  { %v10711_v35 = vpack.i.bf16 %v12026_v34, %v12024_v17  ;;  %v10706_v36 = vpack.i.bf16 %v12022_v14, %v12020_v3  ;;  %v10751_v39 = vpack.i.bf16 %v12020_v3, %v11978_v57  ;;  %v10746_v40 = vpack.i.bf16 %v12024_v17, %v12022_v14 }
 0x4c0   :  { %v10756_v47 = vpack.i.bf16 %v12000_v2, %v12026_v34 }
 0x4c1   :  { %10712 = vrot.lane.b32.xlu0 %v10711_v35, %s11409_s24  ;;  %10707 = vrot.lane.b32.xlu1 %v10706_v36, %s11409_s24 }
 0x4c5   :  { %10717 = vrot.lane.b32.xlu0 %v10706_v36, %s11410_s20  ;;  %10722 = vrot.lane.b32.xlu1 %v10711_v35, %s11410_s20 }
 0x4c9   :  { %10732 = vrot.lane.b32.xlu0 %v10711_v35, %s11411_s5  ;;  %10727 = vrot.lane.b32.xlu1 %v10706_v36, %s11411_s5 }
 0x4cd   :  { %10737 = vrot.lane.b32.xlu0 %v10706_v36, %s11412_s4  ;;  %10742 = vrot.lane.b32.xlu1 %v10711_v35, %s11412_s4 }
 0x4d1   :  { %10752 = vrot.lane.b32.xlu0 %v10751_v39, %s11413_s12  ;;  %10747 = vrot.lane.b32.xlu1 %v10746_v40, %s11413_s12 }
 0x4d5   :  { %10757 = vrot.lane.b32.xlu0 %v10756_v47, %s11413_s12  ;;  %10767 = vrot.lane.b32.xlu1 %v10751_v39, %s11414_s2 }
 0x4d9   :  { %10762 = vrot.lane.b32.xlu0 %v10746_v40, %s11414_s2  ;;  %10772 = vrot.lane.b32.xlu1 %v10756_v47, %s11414_s2 }
 0x4dd   :  { %10782 = vrot.lane.b32.xlu0 %v10751_v39, %s11415_s10  ;;  %10777 = vrot.lane.b32.xlu1 %v10746_v40, %s11415_s10 }
 0x4e1   :  { %10787 = vrot.lane.b32.xlu0 %v10756_v47, %s11415_s10  ;;  %10802 = vrot.lane.b32.xlu1 %v10751_v39, %s11416_s7 }
 0x4e5   :  { %10792 = vrot.lane.b32.xlu0 %v10746_v40, %s11416_s7  ;;  %10807 = vrot.lane.b32.xlu1 %v10756_v47, %s11416_s7 }
 0x4e9   :  { %10797 = vrot.lane.b32.xlu0 %v12004_v4, %s11416_s7  ;;  %4415 = vperm.xlu1 %10610, %v4411_v48  }
 0x4fe   :  { %v10633_v50 = vpop.permute.xlu1 %10632  ;;  %v10648_v55 = vpop.permute.xlu0 %10647 }
 0x4ff   :  { %v10635_v9 = vunpack.i.h.bf16 %v10633_v50  ;;  %v10634_v10 = vunpack.i.l.bf16 %v10633_v50  ;;  %v10650_v11 = vunpack.i.h.bf16 %v10648_v55  ;;  %v10649_v12 = vunpack.i.l.bf16 %v10648_v55 }
 0x501   :  { %v2456_v33 = vsel %vm285_vm0, %v10634_v10, %v10635_v9  ;;  %v12114_v35 = vsel %vm487_vm3, %v10649_v12, %v10650_v11 }
 0x502   :  { %v10638_v52 = vpop.permute.xlu1 %10637  ;;  %v12079_v61 = vpop.permute.xlu0 %10652 }
 0x503   :  { %v10639_v13 = vunpack.i.l.bf16 %v10638_v52  ;;  %v10654_v15 = vunpack.i.l.bf16 %v12079_v61  ;;  %v10640_v20 = vunpack.i.h.bf16 %v10638_v52  ;;  %v10655_v21 = vunpack.i.h.bf16 %v12079_v61 }
 0x505   :  { %v2457_v32 = vsel %vm285_vm0, %v10635_v9, %v10639_v13  ;;  %v12110_v63 = vsel %vm688_vm4, %v10624_v8, %v10654_v15  ;;  %v2458_v48 = vsel %vm285_vm0, %v10639_v13, %v10640_v20  ;;  %v12120_v49 = vsel %vm688_vm4, %v10654_v15, %v10655_v21 }
 0x506   :  { %v10643_v54 = vpop.permute.xlu1 %10642  ;;  %v12083_v0 = vpop.permute.xlu0 %10667 }
 0x507   :  { %v10645_v30 = vunpack.i.h.bf16 %v10643_v54  ;;  %v10644_v31 = vunpack.i.l.bf16 %v10643_v54  ;;  %v10670_v36 = vunpack.i.h.bf16 %v12083_v0  ;;  %v10669_v39 = vunpack.i.l.bf16 %v12083_v0 }
 0x508   :  { %4349 = vadd.xlane.f32.xlu0 %v11928_v16 }
 0x509   :  { %v2668_v55 = vsel %vm487_vm3, %v10619_v25, %v10644_v31  ;;  %v2670_v61 = vsel %vm487_vm3, %v10645_v30, %v10649_v12  ;;  %v2669_v8 = vsel %vm487_vm3, %v10644_v31, %v10645_v30 }
 0x50a   :  { %v12077_v56 = vpop.permute.xlu1 %10657  ;;  %v12087_v5 = vpop.permute.xlu0 %10672 }
 0x50b   :  { %v10660_v30 = vunpack.i.h.bf16 %v12077_v56  ;;  %v10675_v31 = vunpack.i.h.bf16 %v12087_v5 }
 0x50c   :  { %4374 = vadd.xlane.f32.xlu0 %v11931_v18  ;;  %v10614_v18 = vunpack.i.l.bf16 %v10613_v51 }
 0x50e   :  { %v12081_v62 = vpop.permute.xlu1 %10662  ;;  %v12091_v16 = vpop.permute.xlu0 %10687  ;;  %v2455_v29 = vsel %vm285_vm0, %v10614_v18, %v10634_v10  ;;  %v10659_v18 = vunpack.i.l.bf16 %v12077_v56  ;;  %v2424_v56 = vld [vmem:[%s13279_s29] sm:$0xf] }
 0x512   :  { %v12085_v4 = vpop.permute.xlu1 %10677  ;;  %v12098_v22 = vpop.permute.xlu0 %10692 }
 0x516   :  { %v12089_v6 = vpop.permute.xlu1 %10682 }
 0x51a   :  { %v12093_v7 = vpop.permute.xlu1 %10697 }
 0x51e   :  { %v12100_v23 = vpop.permute.xlu1 %10702 }
 0x533   :  { %v10708_v40 = vpop.permute.xlu1 %10707  ;;  %v10713_v47 = vpop.permute.xlu0 %10712 }
 0x534   :  { %v10710_v50 = vunpack.i.h.bf16 %v10708_v40  ;;  %v10709_v51 = vunpack.i.l.bf16 %v10708_v40  ;;  %v10715_v52 = vunpack.i.h.bf16 %v10713_v47  ;;  %v10714_v54 = vunpack.i.l.bf16 %v10713_v47 }
 0x536   :  { %v2459_v9 = vsel %vm285_vm0, %v10615_v19, %v10709_v51  ;;  %v2461_v10 = vsel %vm285_vm0, %v10710_v50, %v10714_v54  ;;  %v2460_v11 = vsel %vm285_vm0, %v10709_v51, %v10710_v50  ;;  %v2462_v13 = vsel %vm285_vm0, %v10714_v54, %v10715_v52 }
 0x537   :  { %v10723_v15 = vpop.permute.xlu1 %10722  ;;  %v10718_v20 = vpop.permute.xlu0 %10717  ;;  %v10221_v40 = vpack.c.bf16 %v2460_v11, %v2456_v33  ;;  %v10225_v47 = vpack.c.bf16 %v2462_v13, %v2458_v48  ;;  %v10223_v46 = vpack.c.bf16 %v2459_v9, %v2455_v29  ;;  %v10227_v25 = vpack.c.bf16 %v2461_v10, %v2457_v32 }
 0x538   :  { %v10725_v12 = vunpack.i.h.bf16 %v10723_v15  ;;  %v10724_v45 = vunpack.i.l.bf16 %v10723_v15  ;;  %v10720_v44 = vunpack.i.h.bf16 %v10718_v20  ;;  %v10719_v43 = vunpack.i.l.bf16 %v10718_v20 }
 0x539   :  { %v12132_v19 = vsel %vm688_vm4, %v10655_v21, %v10659_v18  ;;  %10222 = vmatprep.subr.bf16.mxu0 %v10221_v40  ;;  %10226 = vmatprep.subr.bf16.mxu1 %v10225_v47  ;;  %v12138_v33 = vsel %vm889_vm5, %v10669_v39, %v10670_v36  ;;  %v10674_v29 = vunpack.i.l.bf16 %v12087_v5  ;;  %v10665_v20 = vunpack.i.h.bf16 %v12081_v62 }
 0x53a   :  { %v2674_v32 = vsel %vm487_vm3, %v10720_v44, %v10724_v45  ;;  %v2672_v48 = vsel %vm487_vm3, %v10620_v24, %v10719_v43  ;;  %10224 = vmatpush1.bf16.msra.mxu0 %v10223_v46  ;;  %10228 = vmatpush1.bf16.msra.mxu1 %v10227_v25  ;;  %v2673_v21 = vsel %vm487_vm3, %v10719_v43, %v10720_v44  ;;  %v10664_v24 = vunpack.i.l.bf16 %v12081_v62 }
 0x53b   :  { %v10728_v50 = vpop.permute.xlu1 %10727  ;;  %v10733_v51 = vpop.permute.xlu0 %10732  ;;  %v10229_v52 = vpack.c.bf16 %v2673_v21, %v2669_v8  ;;  %v2675_v54 = vsel %vm487_vm3, %v10724_v45, %v10725_v12  ;;  %v10231_v9 = vpack.c.bf16 %v2672_v48, %v2668_v55  ;;  %v10235_v10 = vpack.c.bf16 %v2674_v32, %v2670_v61 }
 0x53c   :  { %v10730_v36 = vunpack.i.h.bf16 %v10728_v50  ;;  %v10729_v11 = vunpack.i.l.bf16 %v10728_v50  ;;  %v10735_v13 = vunpack.i.h.bf16 %v10733_v51  ;;  %v10734_v15 = vunpack.i.l.bf16 %v10733_v51 }
 0x53d   :  { %9751 = vmatmul.mubr.msk.f32.vlgmr.msra.gmra.mrb[16].mxu0 %vm487_vm3, %v2424_v56  ;;  %9752 = vmatmul.mubr.msk.f32.vlgmr.msra.gmra.mrb[28].mxu1 %vm487_vm3, %v2424_v56  ;;  %v10233_v43 = vpack.c.bf16 %v2675_v54, %v12114_v35  ;;  %v2884_v44 = vsel %vm688_vm4, %v10659_v18, %v10660_v30  ;;  %v10690_v45 = vunpack.i.h.bf16 %v12091_v16  ;;  %v10689_v61 = vunpack.i.l.bf16 %v12091_v16  ;;  %v9753_v18 = vld [vmem:[%s13279_s29 + $0x4] sm:$0xf] }
 0x53e   :  { %v2885_v46 = vsel %vm688_vm4, %v10625_v27, %v10729_v11  ;;  %v2887_v55 = vsel %vm688_vm4, %v10730_v36, %v10734_v15  ;;  %10230 = vmatprep.subr.bf16.mxu0 %v10229_v52  ;;  %2751 = vmatprep.mubr.f32.mxu0 %v12000_v2  ;;  %v2886_v62 = vsel %vm688_vm4, %v10729_v11, %v10730_v36  ;;  %v9757_v11 = vld [vmem:[%s13279_s29 + $0x8] sm:$0xf] }
 0x53f   :  { %10234 = vmatprep.subr.bf16.mxu1 %v10233_v43  ;;  %10232 = vmatpush1.bf16.msra.mxu0 %v10231_v9  ;;  %v10743_v35 = vpop.permute.xlu1 %10742  ;;  %v10738_v8 = vpop.permute.xlu0 %10737  ;;  %v10237_v40 = vpack.c.bf16 %v2886_v62, %v12120_v49  ;;  %v2888_v53 = vsel %vm688_vm4, %v10734_v15, %v10735_v13  ;;  %v10239_v27 = vpack.c.bf16 %v2885_v46, %v12110_v63  ;;  %v10680_v9 = vunpack.i.h.bf16 %v12085_v4  ;;  %v9761_v62 = vld [vmem:[%s13279_s29 + $0xc] sm:$0xf] }
 0x540   :  { %10236 = vmatpush1.bf16.msra.mxu1 %v10235_v10  ;;  %v10745_v47 = vunpack.i.h.bf16 %v10743_v35  ;;  %v10744_v25 = vunpack.i.l.bf16 %v10743_v35  ;;  %v10740_v12 = vunpack.i.h.bf16 %v10738_v8  ;;  %v10739_v30 = vunpack.i.l.bf16 %v10738_v8  ;;  %2822 = vmatprep.mubr.f32.mxu1 %v12000_v2 }
 0x541   :  { %v3094_v32 = vsel %vm889_vm5, %v10629_v28, %v10664_v24  ;;  %10238 = vmatprep.subr.bf16.mxu0 %v10237_v40  ;;  %v10241_v48 = vpack.c.bf16 %v2888_v53, %v2884_v44  ;;  %v10243_v56 = vpack.c.bf16 %v2887_v55, %v12132_v19  ;;  %v3095_v49 = vsel %vm889_vm5, %v10664_v24, %v10665_v20 }
 0x542   :  { %v3100_v21 = vsel %vm889_vm5, %v10740_v12, %v10744_v25  ;;  %v3098_v63 = vsel %vm889_vm5, %v10630_v26, %v10739_v30  ;;  %9754 = vmatmul.mubr.msk.f32.vlgmr.msra.gmra.mrb[18].mxu0 %vm487_vm3, %v9753_v18  ;;  %v3099_v50 = vsel %vm889_vm5, %v10739_v30, %v10740_v12  ;;  %v3101_v51 = vsel %vm889_vm5, %v10744_v25, %v10745_v47 }
 0x543   :  { %v3096_v28 = vsel %vm889_vm5, %v10665_v20, %v10669_v39  ;;  %v10679_v19 = vunpack.i.l.bf16 %v12085_v4  ;;  %9755 = vmatmul.mubr.msk.f32.vlgmr.msra.gmra.mrb[30].mxu1 %vm487_vm3, %v9753_v18  ;;  %10242 = vmatprep.subr.bf16.mxu1 %v10241_v48  ;;  %v10748_v52 = vpop.permute.xlu1 %10747  ;;  %v10753_v1 = vpop.permute.xlu0 %10752  ;;  %v10245_v54 = vpack.c.bf16 %v3099_v50, %v3095_v49  ;;  %v10249_v26 = vpack.c.bf16 %v3101_v51, %v12138_v33  ;;  %v9765_v49 = vld [vmem:[%s13279_s29 + $0x10] sm:$0xf] }
 0x544   :  { %10240 = vmatpush1.bf16.msra.mxu0 %v10239_v27  ;;  %10244 = vmatpush1.bf16.msra.mxu1 %v10243_v56  ;;  %v10750_v10 = vunpack.i.h.bf16 %v10748_v52  ;;  %v10749_v36 = vunpack.i.l.bf16 %v10748_v52  ;;  %v10247_v0 = vpack.c.bf16 %v3098_v63, %v3094_v32  ;;  %v10685_v39 = vunpack.i.h.bf16 %v12089_v6 }
 0x545   :  { %v10755_v13 = vunpack.i.h.bf16 %v10753_v1  ;;  %2964 = vmatprep.mubr.f32.mxu0 %v12000_v2  ;;  %3035 = vmatprep.mubr.f32.mxu1 %v12000_v2  ;;  %v10251_v15 = vpack.c.bf16 %v3100_v21, %v3096_v28  ;;  %v10754_v20 = vunpack.i.l.bf16 %v10753_v1  ;;  %v3506_v4 = vsel %vm1286_vm6, %v10675_v31, %v10679_v19 }
 0x546   :  { %10246 = vmatprep.subr.bf16.mxu0 %v10245_v54  ;;  %10250 = vmatprep.subr.bf16.mxu1 %v10249_v26  ;;  %v3505_v43 = vsel %vm1286_vm6, %v10674_v29, %v10675_v31  ;;  %v12201_v44 = vsel %vm1487_vm7, %v10689_v61, %v10690_v45  ;;  %v3509_v35 = vsel %vm1286_vm6, %v10749_v36, %v10750_v10  ;;  %v10684_v18 = vunpack.i.l.bf16 %v12089_v6 }
 0x547   :  { %9758 = vmatmul.mubr.msk.f32.vlgmr.msra.gmra.mrb[20].mxu0 %vm487_vm3, %v9757_v11  ;;  %9759 = vmatmul.mubr.msk.f32.vlgmr.msra.gmra.mrb[32].mxu1 %vm487_vm3, %v9757_v11  ;;  %v10768_v33 = vpop.permute.xlu1 %10767  ;;  %v10758_v24 = vpop.permute.xlu0 %10757  ;;  %v3507_v8 = vsel %vm1286_vm6, %v10679_v19, %v10680_v9  ;;  %v12210_v31 = vsel %vm1487_vm7, %v10685_v39, %v10689_v61  ;;  %v3508_v40 = vsel %vm1286_vm6, %v10755_v13, %v10749_v36  ;;  %v10695_v47 = vunpack.i.h.bf16 %v12098_v22  ;;  %v9769_v36 = vld [vmem:[%s13279_s29 + $0x14] sm:$0xf] }
 0x548   :  { %10248 = vmatpush1.bf16.msra.mxu0 %v10247_v0  ;;  %10252 = vmatpush1.bf16.msra.mxu1 %v10251_v15  ;;  %v10760_v46 = vunpack.i.h.bf16 %v10758_v24  ;;  %v10759_v55 = vunpack.i.l.bf16 %v10758_v24  ;;  %v10769_v45 = vunpack.i.l.bf16 %v10768_v33  ;;  %v13280_v53 = vpack.c.bf16 %v12022_v14, %v11980_v58 }
 0x549   :  { %v13281_v27 = vpack.c.bf16 %v12026_v34, %v11984_v60  ;;  %v3504_v6 = vsel %vm1286_vm6, %v10754_v20, %v10674_v29  ;;  %3177 = vmatprep.mubr.f32.mxu0 %v12000_v2  ;;  %3248 = vmatprep.mubr.f32.mxu1 %v12000_v2  ;;  %v10770_v14 = vunpack.i.h.bf16 %v10768_v33  ;;  %v10261_v61 = vpack.c.bf16 %v3509_v35, %v3505_v43 }
 0x54a   :  { %10254 = vmatprep.subr.bf16.mxu0 %v13280_v53  ;;  %v3510_v16 = vsel %vm1286_vm6, %v10750_v10, %v10759_v55  ;;  %v3511_v58 = vsel %vm1286_vm6, %v10759_v55, %v10760_v46  ;;  %v13282_v29 = vpack.c.bf16 %v12020_v3, %v11978_v57  ;;  %v13283_v12 = vpack.c.bf16 %v12024_v17, %v11982_v59 }
 0x54b   :  { %10258 = vmatprep.subr.bf16.mxu1 %v13281_v27  ;;  %9762 = vmatmul.mubr.msk.f32.vlgmr.msra.gmra.mrb[22].mxu0 %vm487_vm3, %v9761_v62  ;;  %v10773_v60 = vpop.permute.xlu1 %10772  ;;  %v10763_v34 = vpop.permute.xlu0 %10762  ;;  %v10265_v5 = vpack.c.bf16 %v3511_v58, %v3507_v8  ;;  %v10267_v25 = vpack.c.bf16 %v3510_v16, %v3506_v4  ;;  %v10694_v21 = vunpack.i.l.bf16 %v12098_v22  ;;  %v3717_v63 = vsel %vm1487_vm7, %v10769_v45, %v10684_v18 }
 0x54c   :  { %9763 = vmatmul.mubr.msk.f32.vlgmr.msra.gmra.mrb[34].mxu1 %vm487_vm3, %v9761_v62  ;;  %10256 = vmatpush1.bf16.msra.mxu0 %v13282_v29  ;;  %v10775_v30 = vunpack.i.h.bf16 %v10773_v60  ;;  %v10774_v32 = vunpack.i.l.bf16 %v10773_v60  ;;  %v10765_v48 = vunpack.i.h.bf16 %v10763_v34  ;;  %v10764_v56 = vunpack.i.l.bf16 %v10763_v34  ;;  %v9773_v62 = vld [vmem:[%s13279_s29 + $0x18] sm:$0xf] }
 0x54d   :  { %10260 = vmatpush1.bf16.msra.mxu1 %v13283_v12  ;;  %10262 = vmatprep.subr.bf16.mxu0 %v10261_v61  ;;  %v10263_v50 = vpack.c.bf16 %v3508_v40, %v3504_v6  ;;  %v3718_v57 = vsel %vm1487_vm7, %v10684_v18, %v10685_v39  ;;  %v10699_v11 = vunpack.i.l.bf16 %v12093_v7  ;;  %v3931_v13 = vsel %vm1688_vm8, %v10694_v21, %v10695_v47 }
 0x54e   :  { %3354 = vmatprep.mubr.f32.mxu0 %v12000_v2  ;;  %v3723_v3 = vsel %vm1487_vm7, %v10765_v48, %v10774_v32  ;;  %v3721_v59 = vsel %vm1487_vm7, %v10770_v14, %v10764_v56  ;;  %3425 = vmatprep.mubr.f32.mxu1 %v12000_v2  ;;  %v3722_v17 = vsel %vm1487_vm7, %v10764_v56, %v10765_v48  ;;  %v10700_v15 = vunpack.i.h.bf16 %v12093_v7  ;;  %v9777_v14 = vld [vmem:[%s13279_s29 + $0x1c] sm:$0xf] }
 0x54f   :  { %10266 = vmatprep.subr.bf16.mxu1 %v10265_v5  ;;  %9766 = vmatmul.mubr.msk.f32.vlgmr.msra.gmra.mrb[24].mxu0 %vm487_vm3, %v9765_v49  ;;  %v10778_v51 = vpop.permute.xlu1 %10777  ;;  %v10783_v28 = vpop.permute.xlu0 %10782  ;;  %v10269_v19 = vpack.c.bf16 %v3722_v17, %v3718_v57  ;;  %v3724_v52 = vsel %vm1487_vm7, %v10774_v32, %v10775_v30  ;;  %v10271_v1 = vpack.c.bf16 %v3721_v59, %v3717_v63  ;;  %v10705_v8 = vunpack.i.h.bf16 %v12100_v23  ;;  %v9781_v63 = vld [vmem:[%s13279_s29 + $0x20] sm:$0xf] }
 0x550   :  { %9767 = vmatmul.mubr.msk.f32.vlgmr.msra.gmra.mrb[36].mxu1 %vm487_vm3, %v9765_v49  ;;  %10264 = vmatpush1.bf16.msra.mxu0 %v10263_v50  ;;  %v10780_v54 = vunpack.i.h.bf16 %v10778_v51  ;;  %v10779_v26 = vunpack.i.l.bf16 %v10778_v51  ;;  %v10785_v9 = vunpack.i.h.bf16 %v10783_v28  ;;  %v10784_v10 = vunpack.i.l.bf16 %v10783_v28  ;;  %v2616_v17 = vld [vmem:[%s11439_s9] ss:$8 sm:$0xf]  ;;  %v9756_v51 = vld [vmem:[%s11439_s9 + $0x1] ss:$8 sm:$0xf] }
 0x551   :  { %10268 = vmatpush1.bf16.msra.mxu1 %v10267_v25  ;;  %3587 = vmatprep.mubr.f32.mxu0 %v12000_v2  ;;  %v10273_v0 = vpack.c.bf16 %v3724_v52, %v12201_v44  ;;  %v10275_v39 = vpack.c.bf16 %v3723_v3, %v12210_v31  ;;  %v3932_v35 = vsel %vm1688_vm8, %v10695_v47, %v10699_v11  ;;  %v10704_v18 = vunpack.i.l.bf16 %v12100_v23 }
 0x552   :  { %3658 = vmatprep.mubr.f32.mxu1 %v12000_v2  ;;  %v3934_v20 = vsel %vm1688_vm8, %v10785_v9, %v10779_v26  ;;  %v3930_v4 = vsel %vm1688_vm8, %v10784_v10, %v10694_v21  ;;  %10270 = vmatprep.subr.bf16.mxu0 %v10269_v19  ;;  %v3935_v33 = vsel %vm1688_vm8, %v10779_v26, %v10780_v54 }
 0x553   :  { %9770 = vmatmul.mubr.msk.f32.vlgmr.msra.gmra.mrb[26].mxu0 %vm487_vm3, %v9769_v36  ;;  %v10803_v24 = vpop.permute.xlu1 %10802  ;;  %v10788_v43 = vpop.permute.xlu0 %10787  ;;  %v10277_v44 = vpack.c.bf16 %v3935_v33, %v3931_v13  ;;  %10274 = vmatprep.subr.bf16.mxu1 %v10273_v0  ;;  %v10279_v7 = vpack.c.bf16 %v3934_v20, %v3930_v4  ;;  %v3933_v45 = vsel %vm1688_vm8, %v10699_v11, %v10700_v15  ;;  %v9760_v13 = vld [vmem:[%s11439_s9 + $0x2] ss:$8 sm:$0xf] }
 0x554   :  { %9771 = vmatmul.mubr.msk.f32.vlgmr.msra.gmra.mrb[38].mxu1 %vm487_vm3, %v9769_v36  ;;  %10272 = vmatpush1.bf16.msra.mxu0 %v10271_v1  ;;  %v10790_v46 = vunpack.i.h.bf16 %v10788_v43  ;;  %v10789_v55 = vunpack.i.l.bf16 %v10788_v43  ;;  %v10804_v31 = vunpack.i.l.bf16 %v10803_v24  ;;  %v10805_v6 = vunpack.i.h.bf16 %v10803_v24 }
 0x555   :  { %10276 = vmatpush1.bf16.msra.mxu1 %v10275_v39  ;;  %3800 = vmatprep.mubr.f32.mxu0 %v12000_v2  ;;  %v4144_v34 = vsel %vm1889_vm9, %v10704_v18, %v10705_v8  ;;  %v2621_v19 = vrot.slane %v2616_v17, %v11875_v37  ;;  %v2629_v26 = vrot.slane %v2616_v17, %v11877_v38 }
 0x556   :  { %v3936_v40 = vsel %vm1688_vm8, %v10780_v54, %v10789_v55  ;;  %3871 = vmatprep.mubr.f32.mxu1 %v12000_v2  ;;  %10278 = vmatprep.subr.bf16.mxu0 %v10277_v44  ;;  %v3937_v22 = vsel %vm1688_vm8, %v10789_v55, %v10790_v46  ;;  %v4143_v61 = vsel %vm1889_vm9, %v10804_v31, %v10704_v18 }
 0x557   :  { %9774 = vmatmul.mubr.msk.f32.vlgmr.msra.gmra.mrb[28].mxu0 %vm487_vm3, %v9773_v62  ;;  %v10808_v53 = vpop.permute.xlu1 %10807  ;;  %v10793_v27 = vpop.permute.xlu0 %10792  ;;  %v10281_v47 = vpack.c.bf16 %v3937_v22, %v3933_v45  ;;  %v10283_v23 = vpack.c.bf16 %v3936_v40, %v3932_v35  ;;  %v2625_v54 = vrot.slane %v2616_v17, %v11880_v41  ;;  %v2834_v10 = vrot.slane %v9756_v51, %v11875_v37  ;;  %v9764_v45 = vld [vmem:[%s11439_s9 + $0x3] ss:$8 sm:$0xf] }
 0x558   :  { %9775 = vmatmul.mubr.msk.f32.vlgmr.msra.gmra.mrb[40].mxu1 %vm487_vm3, %v9773_v62  ;;  %10280 = vmatpush1.bf16.msra.mxu0 %v10279_v7  ;;  %v10795_v16 = vunpack.i.h.bf16 %v10793_v27  ;;  %v10794_v58 = vunpack.i.l.bf16 %v10793_v27  ;;  %v10809_v60 = vunpack.i.l.bf16 %v10808_v53  ;;  %v10810_v5 = vunpack.i.h.bf16 %v10808_v53 }
 0x559   :  { %4013 = vmatprep.mubr.f32.mxu0 %v12000_v2  ;;  %10282 = vmatprep.subr.bf16.mxu1 %v10281_v47  ;;  %v2633_v36 = vrot.slane %v2616_v17, %v11882_v42  ;;  %v2838_v11 = vrot.slane %v9756_v51, %v11880_v41  ;;  %v2846_v39 = vrot.slane %v9756_v51, %v11882_v42 }
 0x55a   :  { %v4147_v25 = vsel %vm1889_vm9, %v10805_v6, %v10794_v58  ;;  %10284 = vmatpush1.bf16.msra.mxu1 %v10283_v23  ;;  %4084 = vmatprep.mubr.f32.mxu1 %v12000_v2  ;;  %v4148_v29 = vsel %vm1889_vm9, %v10794_v58, %v10795_v16  ;;  %v4149_v49 = vsel %vm1889_vm9, %v10795_v16, %v10809_v60 }
 0x55b   :  { %9778 = vmatmul.mubr.msk.f32.vlgmr.msra.gmra.mrb[30].mxu0 %vm487_vm3, %v9777_v14  ;;  %v10798_v12 = vpop.permute.xlu0 %10797  ;;  %v10285_v30 = vpack.c.bf16 %v4148_v29, %v4144_v34  ;;  %v10287_v32 = vpack.c.bf16 %v4147_v25, %v4143_v61  ;;  %v4150_v57 = vsel %vm1889_vm9, %v10809_v60, %v10810_v5  ;;  %v3047_v7 = vrot.slane %v9760_v13, %v11875_v37 }
 0x55c   :  { %v10800_v48 = vunpack.i.h.bf16 %v10798_v12  ;;  %v10799_v56 = vunpack.i.l.bf16 %v10798_v12  ;;  %4226 = vmatprep.mubr.f32.mxu0 %v12000_v2  ;;  %v3055_v35 = vrot.slane %v9760_v13, %v11877_v38  ;;  %v3051_v31 = vrot.slane %v9760_v13, %v11880_v41  ;;  %v9768_v12 = vld [vmem:[%s11439_s9 + $0x4] ss:$8 sm:$0xf] }
 0x55d   :  { %9779 = vmatmul.mubr.msk.f32.vlgmr.msra.gmra.mrb[42].mxu1 %vm487_vm3, %v9777_v14  ;;  %10286 = vmatprep.subr.bf16.mxu0 %v10285_v30  ;;  %v3059_v40 = vrot.slane %v9760_v13, %v11882_v42  ;;  %v3260_v60 = vrot.slane %v9764_v45, %v11875_v37  ;;  %v3268_v34 = vrot.slane %v9764_v45, %v11877_v38 }
 0x55e   :  { %v4145_v21 = vsel %vm1889_vm9, %v10705_v8, %v10799_v56  ;;  %10288 = vmatpush1.bf16.msra.mxu0 %v10287_v32  ;;  %v4146_v50 = vsel %vm1889_vm9, %v10799_v56, %v10800_v48  ;;  %4297 = vmatprep.mubr.f32.mxu1 %v12000_v2  ;;  %v3264_v25 = vrot.slane %v9764_v45, %v11880_v41 }
 0x55f   :  { %v10289_v3 = vpack.c.bf16 %v4150_v57, %v4146_v50  ;;  %v10291_v59 = vpack.c.bf16 %v4149_v49, %v4145_v21  ;;  %v3272_v29 = vrot.slane %v9764_v45, %v11882_v42  ;;  %v3445_v17 = vrot.slane %v9768_v12, %v11877_v38 }
 0x561   :  { %9782 = vmatmul.mubr.msk.f32.vlgmr.msra.gmra.mrb[32].mxu0 %vm487_vm3, %v9781_v63  ;;  %10290 = vmatprep.subr.bf16.mxu1 %v10289_v3 }
 0x562   :  { %10292 = vmatpush1.bf16.msra.mxu1 %v10291_v59  ;;  %4544 = vmatprep.mubr.f32.mxu0 %v12000_v2  ;;  %v3437_v59 = vrot.slane %v9768_v12, %v11875_v37 }
 0x565   :  { %9783 = vmatmul.mubr.msk.f32.vlgmr.msra.gmra.mrb[44].mxu1 %vm487_vm3, %v9781_v63 }
 0x566   :  { %4621 = vmatprep.mubr.f32.mxu1 %v12000_v2  ;;  %v2842_v2 = vrot.slane %v9756_v51, %v11877_v38 }
 0x610   :  { %v2540_v28 = vpop.f32.mrb[16].mxu0  ;;  %v2611_v52 = vpop.f32.mrb[28].mxu1 }
 0x611   :  { %v2542_v1 = vpop.f32.mrb[17].mxu0  ;;  %v2613_v9 = vpop.f32.mrb[29].mxu1  ;;  %v2638_v0 = vmul.f32 %v2621_v19, %v2540_v28  ;;  %v2640_v4 = vmul.f32 %v2629_v26, %v2611_v52  ;;  %v3441_v19 = vrot.slane %v9768_v12, %v11880_v41  ;;  %v3449_v52 = vrot.slane %v9768_v12, %v11882_v42 }
 0x612   :  { %v2639_v15 = vmul.f32 %v2625_v54, %v2542_v1  ;;  %v2641_v43 = vmul.f32 %v2633_v36, %v2613_v9  ;;  %v9772_v1 = vld [vmem:[%s11439_s9 + $0x5] ss:$8 sm:$0xf] }
 0x615   :  { %v2753_v20 = vpop.f32.mrb[18].mxu0 }
 0x616   :  { %v2851_v33 = vmul.f32 %v2834_v10, %v2753_v20  ;;  %v2755_v24 = vpop.f32.mrb[19].mxu0  ;;  %v2824_v44 = vpop.f32.mrb[30].mxu1  ;;  %v3678_v20 = vrot.slane %v9772_v1, %v11877_v38 }
 0x617   :  { %v2852_v46 = vmul.f32 %v2838_v11, %v2755_v24  ;;  %v2853_v55 = vmul.f32 %v2842_v2, %v2824_v44  ;;  %v2826_v62 = vpop.f32.mrb[31].mxu1  ;;  %v3674_v24 = vrot.slane %v9772_v1, %v11880_v41  ;;  %v9776_v44 = vld [vmem:[%s11439_s9 + $0x6] ss:$8 sm:$0xf] }
 0x618   :  { %v2855_v8 = vadd.f32 %v2851_v33, %v2638_v0  ;;  %v2854_v18 = vmul.f32 %v2846_v39, %v2826_v62 }
 0x619   :  { %v2856_v22 = vadd.f32 %v2852_v46, %v2639_v15  ;;  %v2857_v53 = vadd.f32 %v2853_v55, %v2640_v4  ;;  %v3670_v15 = vrot.slane %v9772_v1, %v11875_v37 }
 0x61a   :  { %v2858_v27 = vadd.f32 %v2854_v18, %v2641_v43  ;;  %v2966_v47 = vpop.f32.mrb[20].mxu0  ;;  %v3037_v23 = vpop.f32.mrb[32].mxu1  ;;  %v3682_v43 = vrot.slane %v9772_v1, %v11882_v42 }
 0x61b   :  { %v3064_v6 = vmul.f32 %v3047_v7, %v2966_v47  ;;  %v2968_v16 = vpop.f32.mrb[21].mxu0  ;;  %v3066_v58 = vmul.f32 %v3055_v35, %v3037_v23  ;;  %v3039_v14 = vpop.f32.mrb[33].mxu1  ;;  %v3891_v47 = vrot.slane %v9776_v44, %v11877_v38  ;;  %v3887_v23 = vrot.slane %v9776_v44, %v11880_v41 }
 0x61c   :  { %v3065_v61 = vmul.f32 %v3051_v31, %v2968_v16  ;;  %v3067_v5 = vmul.f32 %v3059_v40, %v3039_v14  ;;  %v3895_v14 = vrot.slane %v9776_v44, %v11882_v42 }
 0x61d   :  { %v3068_v30 = vadd.f32 %v3064_v6, %v2855_v8  ;;  %v3070_v32 = vadd.f32 %v3066_v58, %v2857_v53  ;;  %v9780_v6 = vld [vmem:[%s11439_s9 + $0x7] ss:$8 sm:$0xf] }
 0x61e   :  { %v3069_v48 = vadd.f32 %v3065_v61, %v2856_v22  ;;  %v3071_v56 = vadd.f32 %v3067_v5, %v2858_v27  ;;  %v3179_v49 = vpop.f32.mrb[22].mxu0  ;;  %v3883_v22 = vrot.slane %v9776_v44, %v11875_v37  ;;  %v4096_v12 = vrot.slane %v9780_v6, %v11875_v37 }
 0x61f   :  { %v3250_v21 = vpop.f32.mrb[34].mxu1  ;;  %v3277_v63 = vmul.f32 %v3260_v60, %v3179_v49  ;;  %v3181_v57 = vpop.f32.mrb[23].mxu0 }
 0x620   :  { %v3279_v50 = vmul.f32 %v3268_v34, %v3250_v21  ;;  %v3252_v3 = vpop.f32.mrb[35].mxu1  ;;  %v3278_v51 = vmul.f32 %v3264_v25, %v3181_v57 }
 0x621   :  { %v3280_v28 = vmul.f32 %v3272_v29, %v3252_v3  ;;  %v3281_v54 = vadd.f32 %v3277_v63, %v3068_v30  ;;  %v4104_v63 = vrot.slane %v9780_v6, %v11877_v38 }
 0x622   :  { %v3283_v26 = vadd.f32 %v3279_v50, %v3070_v32  ;;  %v3282_v9 = vadd.f32 %v3278_v51, %v3069_v48  ;;  %v3356_v36 = vpop.f32.mrb[24].mxu0 }
 0x623   :  { %v3284_v10 = vadd.f32 %v3280_v28, %v3071_v56  ;;  %v3427_v11 = vpop.f32.mrb[36].mxu1  ;;  %v3454_v2 = vmul.f32 %v3437_v59, %v3356_v36  ;;  %v3358_v39 = vpop.f32.mrb[25].mxu0  ;;  %v4100_v56 = vrot.slane %v9780_v6, %v11880_v41  ;;  %v4108_v59 = vrot.slane %v9780_v6, %v11882_v42 }
 0x624   :  { %v3456_v0 = vmul.f32 %v3445_v17, %v3427_v11  ;;  %v3429_v13 = vpop.f32.mrb[37].mxu1  ;;  %v3455_v4 = vmul.f32 %v3441_v19, %v3358_v39  ;;  %v9784_v17 = vld [vmem:[%s11439_s9 + $0x20] ss:$8 sm:$0xf] }
 0x625   :  { %v3457_v33 = vmul.f32 %v3449_v52, %v3429_v13  ;;  %v3458_v46 = vadd.f32 %v3454_v2, %v3281_v54  ;;  %v4313_v2 = vrot.slane %v9784_v17, %v11880_v41 }
 0x626   :  { %v3460_v55 = vadd.f32 %v3456_v0, %v3283_v26  ;;  %v3459_v62 = vadd.f32 %v3455_v4, %v3282_v9  ;;  %v3589_v35 = vpop.f32.mrb[26].mxu0  ;;  %v4317_v4 = vrot.slane %v9784_v17, %v11877_v38 }
 0x627   :  { %v3461_v7 = vadd.f32 %v3457_v33, %v3284_v10  ;;  %v3660_v8 = vpop.f32.mrb[38].mxu1  ;;  %v3687_v18 = vmul.f32 %v3670_v15, %v3589_v35  ;;  %v3591_v40 = vpop.f32.mrb[27].mxu0  ;;  %v4309_v10 = vrot.slane %v9784_v17, %v11875_v37 }
 0x628   :  { %v3689_v31 = vmul.f32 %v3678_v20, %v3660_v8  ;;  %v3662_v45 = vpop.f32.mrb[39].mxu1  ;;  %v3688_v53 = vmul.f32 %v3674_v24, %v3591_v40  ;;  %v4321_v24 = vrot.slane %v9784_v17, %v11882_v42 }
 0x629   :  { %v3690_v27 = vmul.f32 %v3682_v43, %v3662_v45  ;;  %v3691_v16 = vadd.f32 %v3687_v18, %v3458_v46 }
 0x62a   :  { %v3693_v58 = vadd.f32 %v3689_v31, %v3460_v55  ;;  %v3692_v60 = vadd.f32 %v3688_v53, %v3459_v62  ;;  %v3802_v61 = vpop.f32.mrb[28].mxu0 }
 0x62b   :  { %v3694_v34 = vadd.f32 %v3690_v27, %v3461_v7  ;;  %v3900_v5 = vmul.f32 %v3883_v22, %v3802_v61  ;;  %v3873_v25 = vpop.f32.mrb[40].mxu1  ;;  %v3804_v29 = vpop.f32.mrb[29].mxu0 }
 0x62c   :  { %v3902_v30 = vmul.f32 %v3891_v47, %v3873_v25  ;;  %v3901_v32 = vmul.f32 %v3887_v23, %v3804_v29  ;;  %v3875_v48 = vpop.f32.mrb[41].mxu1 }
 0x62d   :  { %v3904_v49 = vadd.f32 %v3900_v5, %v3691_v16  ;;  %v3903_v21 = vmul.f32 %v3895_v14, %v3875_v48  ;;  %v4431_v48 = vld [vmem:[%s13284_s3] sm:$0xff] }
 0x62e   :  { %v3906_v50 = vadd.f32 %v3902_v30, %v3693_v58  ;;  %v3905_v57 = vadd.f32 %v3901_v32, %v3692_v60  ;;  %v4015_v3 = vpop.f32.mrb[30].mxu0 }
 0x62f   :  { %v3907_v51 = vadd.f32 %v3903_v21, %v3694_v34  ;;  %v4113_v28 = vmul.f32 %v4096_v12, %v4015_v3  ;;  %v4017_v19 = vpop.f32.mrb[31].mxu0  ;;  %v4690_v21 = vld [vmem:[%s13285_s8] sm:$0xff] }
 0x630   :  { %v4114_v52 = vmul.f32 %v4100_v56, %v4017_v19  ;;  %v4086_v1 = vpop.f32.mrb[42].mxu1  ;;  %v4432_v56 = vld [vmem:[%s13284_s3 + $0x8] sm:$0xf] }
 0x631   :  { %v4117_v54 = vadd.f32 %v4113_v28, %v3904_v49  ;;  %v4115_v26 = vmul.f32 %v4104_v63, %v4086_v1  ;;  %v4088_v9 = vpop.f32.mrb[43].mxu1  ;;  %v4412_v49 = vld [vmem:[%s13278_s25 + $0x8] sm:$0xf]  ;;  %v4350_v63 = vpop.xlane.xlu0 %4349 }
 0x632   :  { %v4118_v36 = vadd.f32 %v4114_v52, %v3905_v57  ;;  %v4116_v11 = vmul.f32 %v4108_v59, %v4088_v9  ;;  %v4361_v57 = vmul.f32 0.001953125, %v4350_v63 }
 0x633   :  { %v4119_v0 = vadd.f32 %v4115_v26, %v3906_v50 }
 0x634   :  { %v4120_v39 = vadd.f32 %v4116_v11, %v3907_v51  ;;  %v4228_v13 = vpop.f32.mrb[32].mxu0  ;;  %v4387_v59 = vmul.f32 %v4361_v57, %v4361_v57  ;;  %v4416_v51 = vpop.permute.xlu1 %4415  ;;  %v11214_v11 = vld [vmem:[#allocation2] sm:$0xff] }
 0x635   :  { %v4326_v15 = vmul.f32 %v4309_v10, %v4228_v13  ;;  %v4230_v20 = vpop.f32.mrb[33].mxu0  ;;  %v4375_v50 = vpop.xlane.xlu0 %4374  ;;  %v11216_v13 = vld [vmem:[#allocation2 + $0x10] sm:$0xff] }
 0x636   :  { %v4327_v33 = vmul.f32 %v4313_v2, %v4230_v20  ;;  %v4385_v3 = vmul.f32 0.001953125, %v4375_v50  ;;  %v4395_v2 = vsub.f32 %v11214_v11, %v4361_v57  ;;  %v11217_v20 = vld [vmem:[#allocation2 + $0x18] sm:$0xff] }
 0x637   :  { %v4330_v43 = vadd.f32 %v4326_v15, %v4117_v54  ;;  %v4397_v15 = vsub.f32 %v11216_v13, %v4361_v57 }
 0x638   :  { %v4331_v44 = vadd.f32 %v4327_v33, %v4118_v36  ;;  %v4299_v46 = vpop.f32.mrb[44].mxu1  ;;  %v4389_v17 = vsub.f32 %v4385_v3, %v4387_v59 }
 0x639   :  { %4334 = vst [vmem:[#allocation2 + $0x20] sm:$0xf] %v4330_v43  ;;  %v4328_v55 = vmul.f32 %v4317_v4, %v4299_v46  ;;  %v4301_v62 = vpop.f32.mrb[45].mxu1  ;;  %v4398_v4 = vsub.f32 %v11217_v20, %v4361_v57 }
 0x63a   :  { %4335 = vst [vmem:[#allocation2 + $0x28] sm:$0xf] %v4331_v44  ;;  %v4329_v7 = vmul.f32 %v4321_v24, %v4301_v62  ;;  %v4391_v28 = vadd.f32 1e-05, %v4389_v17 }
 0x63b   :  { %v4332_v35 = vadd.f32 %v4328_v55, %v4119_v0  ;;  %v11215_v0 = vld [vmem:[#allocation2 + $0x8] sm:$0xff] }
 0x63c   :  { %v4333_v8 = vadd.f32 %v4329_v7, %v4120_v39  ;;  %11179 = vrsqrt.f32 %v4391_v28  ;;  %v4396_v39 = vsub.f32 %v11215_v0, %v4361_v57 }
 0x63d   :  { %4336 = vst [vmem:[#allocation2 + $0x30] sm:$0xf] %v4332_v35 }
 0x63e   :  { %4337 = vst [vmem:[#allocation2 + $0x38] sm:$0xf] %v4333_v8 }
 0x640   :  { %v12340_v18 = vld [vmem:[#allocation2 + $0x20] sm:$0xf] }
 0x641   :  { %v12342_v31 = vld [vmem:[#allocation2 + $0x28] sm:$0xf]  ;;  %v4352_v40 = vsel %vm4351_vm11, %v12340_v18, 0.0  ;;  %v4367_v45 = vmul.f32 %v12340_v18, %v12340_v18 }
 0x642   :  { %v4353_v22 = vsel %vm4351_vm11, %v12342_v31, 0.0  ;;  %v4368_v53 = vmul.f32 %v12342_v31, %v12342_v31 }
 0x643   :  { %v4354_v27 = vadd.f32 %v4353_v22, %v4352_v40  ;;  %v4376_v47 = vsel %vm4351_vm11, %v4367_v45, 0.0 }
 0x644   :  { %v12353_v23 = vld [vmem:[#allocation2 + $0x30] sm:$0xf]  ;;  %v4377_v6 = vsel %vm4351_vm11, %v4368_v53, 0.0 }
 0x645   :  { %v12356_v16 = vld [vmem:[#allocation2 + $0x38] sm:$0xf]  ;;  %v4355_v58 = vsel %vm4351_vm11, %v12353_v23, 0.0  ;;  %v4369_v14 = vmul.f32 %v12353_v23, %v12353_v23  ;;  %v4378_v60 = vadd.f32 %v4377_v6, %v4376_v47 }
 0x646   :  { %v4356_v34 = vadd.f32 %v4355_v58, %v4354_v27  ;;  %v4357_v61 = vsel %vm4351_vm11, %v12356_v16, 0.0  ;;  %v4370_v5 = vmul.f32 %v12356_v16, %v12356_v16  ;;  %v11180_v36 = vpop.eup %11179 }
 0x647   :  { %v4379_v25 = vsel %vm4351_vm11, %v4369_v14, 0.0  ;;  %v4403_v33 = vmul.f32 %v11180_v36, %v4395_v2  ;;  %v4404_v24 = vmul.f32 %v11180_v36, %v4396_v39  ;;  %v4405_v43 = vmul.f32 %v11180_v36, %v4397_v15 }
 0x648   :  { %v4358_v29 = vadd.f32 %v4357_v61, %v4356_v34  ;;  %v4380_v12 = vadd.f32 %v4379_v25, %v4378_v60  ;;  %v4381_v30 = vsel %vm4351_vm11, %v4370_v5, 0.0  ;;  %v4406_v44 = vmul.f32 %v11180_v36, %v4398_v4 }
 0x649   :  { %v4423_v40 = vmul.f32 %v4416_v51, %v4403_v33  ;;  %v4424_v45 = vmul.f32 %v4416_v51, %v4404_v24  ;;  %v4425_v22 = vmul.f32 %v4416_v51, %v4405_v43 }
 0x64a   :  { %4359 = vadd.xlane.f32.xlu1 %v4358_v29  ;;  %v4382_v32 = vadd.f32 %v4381_v30, %v4380_v12  ;;  %v4426_v53 = vmul.f32 %v4416_v51, %v4406_v44 }
 0x64c   :  { %4383 = vadd.xlane.f32.xlu0 %v4382_v32 }
 0x65b   :  { %4435 = vperm.xlu1 %10610, %v4431_v48  }
 0x65f   :  { %4440 = vperm.xlu1 %10610, %v4432_v56  }
 0x662   :  { %4420 = vperm.xlu0 %10609, %v4412_v49  }
 0x663   :  { %4694 = vperm.xlu1 %10610, %v4690_v21  }
 0x6d7   :  { %v4360_v19 = vpop.xlane.xlu1 %4359 }
 0x6d8   :  { %v4362_v52 = vmul.f32 0.001953125, %v4360_v19 }
 0x6d9   :  { %v4384_v1 = vpop.xlane.xlu0 %4383 }
 0x6da   :  { %v4386_v54 = vmul.f32 0.001953125, %v4384_v1  ;;  %v4388_v26 = vmul.f32 %v4362_v52, %v4362_v52  ;;  %v4399_v55 = vsub.f32 %v12340_v18, %v4362_v52  ;;  %v4400_v62 = vsub.f32 %v12342_v31, %v4362_v52  ;;  %v12391_v1 = vld [vmem:[#allocation3] sm:$0xff] }
 0x6db   :  { %v4436_v46 = vpop.permute.xlu1 %4435  ;;  %v4401_v7 = vsub.f32 %v12353_v23, %v4362_v52  ;;  %v4402_v35 = vsub.f32 %v12356_v16, %v4362_v52  ;;  %v4459_v52 = vld [vmem:[#allocation7] sm:$0xff] }
 0x6dc   :  { %v4390_v9 = vsub.f32 %v4386_v54, %v4388_v26  ;;  %v4443_v14 = vadd.f32 %v4436_v46, %v4423_v40  ;;  %v4444_v60 = vadd.f32 %v4436_v46, %v4424_v45  ;;  %v4445_v34 = vadd.f32 %v4436_v46, %v4425_v22  ;;  %v4460_v54 = vld [vmem:[#allocation7 + $0x8] sm:$0xff] }
 0x6dd   :  { %v4446_v61 = vadd.f32 %v4436_v46, %v4426_v53 }
 0x6de   :  { %v4392_v10 = vadd.f32 1e-05, %v4390_v9  ;;  %v4451_v48 = vmax.f32 %v4443_v14, 0.0  ;;  %v4452_v56 = vmax.f32 %v4444_v60, 0.0  ;;  %v4453_v49 = vmax.f32 %v4445_v34, 0.0  ;;  %v4691_v14 = vld [vmem:[%s13285_s8 + $0x8] sm:$0xff] }
 0x6df   :  { %v4441_v29 = vpop.permute.xlu1 %4440  ;;  %v4454_v21 = vmax.f32 %v4446_v61, 0.0  ;;  %v10811_v60 = vpack.i.bf16 %v12391_v1, %v12391_v1 }
 0x6e0   :  { %11181 = vrsqrt.f32 %v4392_v10 }
 0x6e1   :  { %v4421_v18 = vpop.permute.xlu0 %4420 }
 0x6e3   :  { %v4695_v34 = vpop.permute.xlu1 %4694 }
 0x6ea   :  { %v11182_v8 = vpop.eup %11181 }
 0x6eb   :  { %v4407_v27 = vmul.f32 %v11182_v8, %v4399_v55  ;;  %v4408_v47 = vmul.f32 %v11182_v8, %v4400_v62  ;;  %v4409_v6 = vmul.f32 %v11182_v8, %v4401_v7  ;;  %v4410_v58 = vmul.f32 %v11182_v8, %v4402_v35 }
 0x6ed   :  { %v4427_v5 = vmul.f32 %v4421_v18, %v4407_v27  ;;  %v4428_v31 = vmul.f32 %v4421_v18, %v4408_v47  ;;  %v4429_v25 = vmul.f32 %v4421_v18, %v4409_v6  ;;  %v4430_v23 = vmul.f32 %v4421_v18, %v4410_v58  ;;  %v4710_v6 = vld [vmem:[%s13288_s14] sm:$0xff]  ;;  %v4711_v58 = vld [vmem:[%s13288_s14 + $0x8] sm:$0xff] }
 0x6ef   :  { %v4447_v16 = vadd.f32 %v4441_v29, %v4427_v5  ;;  %v4449_v12 = vadd.f32 %v4441_v29, %v4429_v25  ;;  %v4448_v30 = vadd.f32 %v4441_v29, %v4428_v31  ;;  %v4450_v32 = vadd.f32 %v4441_v29, %v4430_v23 }
 0x6f1   :  { %v4455_v63 = vmax.f32 %v4447_v16, 0.0  ;;  %v4457_v50 = vmax.f32 %v4449_v12, 0.0  ;;  %v4456_v57 = vmax.f32 %v4448_v30, 0.0  ;;  %v4458_v3 = vmax.f32 %v4450_v32, 0.0 }
 0x6f3   :  { %v10293_v17 = vpack.c.bf16 %v4456_v57, %v4452_v56  ;;  %v10299_v51 = vpack.c.bf16 %v4458_v3, %v4454_v21  ;;  %v10296_v28 = vpack.c.bf16 %v4455_v63, %v4451_v48  ;;  %v10302_v19 = vpack.c.bf16 %v4457_v50, %v4453_v49 }
 0x6f5   :  { %10295 = vmatprep.subr.msk.bf16.mxu0 %vm12377_vm13, %v10293_v17  ;;  %10301 = vmatprep.subr.msk.bf16.mxu1 %vm12377_vm13, %v10299_v51 }
 0x6f6   :  { %10298 = vmatpush1.bf16.msk.msra.mxu0 %vm12377_vm13, %v10296_v28  ;;  %10304 = vmatpush1.bf16.msk.msra.mxu1 %vm12377_vm13, %v10302_v19 }
 0x6f9   :  { %9787 = vmatmul.mubr.msk.f32.vlgmr.msra.gmra.mrb[34].mxu0 %vm4461_vm14, %v4459_v52  ;;  %9791 = vmatmul.mubr.msk.f32.vlgmr.msra.gmra.mrb[46].mxu1 %vm4461_vm14, %v4459_v52 }
 0x6fa   :  { %4550 = vmatprep.mubr.f32.mxu0 %v12391_v1  ;;  %4627 = vmatprep.mubr.f32.mxu1 %v12391_v1 }
 0x6fd   :  { %9788 = vmatmul.mubr.msk.f32.gmra.mrb[36].mxu0 %vm4461_vm14, %v4460_v54  ;;  %9792 = vmatmul.mubr.msk.f32.gmra.mrb[48].mxu1 %vm4461_vm14, %v4460_v54 }
 0x6fe   :  { %4870 = vmatprep.mubr.f32.mxu0 %v12391_v1  ;;  %4941 = vmatprep.mubr.f32.mxu1 %v12391_v1 }
 0x7cc   :  { %v12399_v26 = vpop.f32.mrb[34].mxu0  ;;  %v12401_v9 = vpop.f32.mrb[46].mxu1 }
 0x7cd   :  { %v4646_v10 = vmul.f32 %v12399_v26, %v12399_v26  ;;  %v12405_v36 = vpop.f32.mrb[35].mxu0  ;;  %v12407_v11 = vpop.f32.mrb[47].mxu1  ;;  %v4648_v39 = vmul.f32 %v12401_v9, %v12401_v9 }
 0x7ce   :  { %v4634_v2 = vadd.f32 %v12405_v36, %v12399_v26  ;;  %v4647_v0 = vmul.f32 %v12405_v36, %v12405_v36  ;;  %v4649_v7 = vmul.f32 %v12407_v11, %v12407_v11 }
 0x7d0   :  { %v12415_v13 = vpop.f32.mrb[36].mxu0  ;;  %v12417_v15 = vpop.f32.mrb[48].mxu1  ;;  %v4635_v20 = vadd.f32 %v4634_v2, %v12401_v9  ;;  %v4654_v4 = vadd.f32 %v4647_v0, %v4646_v10 }
 0x7d1   :  { %v4650_v33 = vmul.f32 %v12415_v13, %v12415_v13  ;;  %v12422_v24 = vpop.f32.mrb[37].mxu0  ;;  %v12424_v43 = vpop.f32.mrb[49].mxu1  ;;  %v4652_v55 = vmul.f32 %v12417_v15, %v12417_v15 }
 0x7d2   :  { %v4639_v44 = vadd.f32 %v12422_v24, %v12415_v13  ;;  %v4651_v46 = vmul.f32 %v12422_v24, %v12422_v24  ;;  %v4636_v62 = vadd.f32 %v4635_v20, %v12407_v11  ;;  %v4655_v35 = vadd.f32 %v4654_v4, %v4648_v39 }
 0x7d3   :  { %v4653_v45 = vmul.f32 %v12424_v43, %v12424_v43 }
 0x7d4   :  { %v4659_v8 = vadd.f32 %v4651_v46, %v4650_v33  ;;  %v4640_v40 = vadd.f32 %v4639_v44, %v12417_v15  ;;  %4637 = vadd.xlane.f32.xlu0 %v4636_v62  ;;  %v4656_v22 = vadd.f32 %v4655_v35, %v4649_v7 }
 0x7d6   :  { %v4660_v53 = vadd.f32 %v4659_v8, %v4652_v55  ;;  %v4641_v27 = vadd.f32 %v4640_v40, %v12424_v43 }
 0x7d8   :  { %4657 = vadd.xlane.f32.xlu0 %v4656_v22  ;;  %4642 = vadd.xlane.f32.xlu1 %v4641_v27  ;;  %v4661_v47 = vadd.f32 %v4660_v53, %v4653_v45 }
 0x7dc   :  { %4662 = vadd.xlane.f32.xlu0 %v4661_v47 }
 0x7e9   :  { %4714 = vperm.xlu1 %10610, %v4710_v6  }
 0x7ed   :  { %4719 = vperm.xlu1 %10610, %v4711_v58  }
 0x7f1   :  { %10817 = vrot.lane.b32.xlu1 %v10811_v60, %s11410_s20 }
 0x7f2   :  { %4699 = vperm.xlu0 %10609, %v4691_v14  }
 0x7f5   :  { %10827 = vrot.lane.b32.xlu1 %v10811_v60, %s11412_s4 }
 0x7f6   :  { %10812 = vrot.lane.b32.xlu0 %v10811_v60, %s11409_s24 }
 0x7fa   :  { %10822 = vrot.lane.b32.xlu0 %v10811_v60, %s11411_s5 }
 0x861   :  { %v4638_v61 = vpop.xlane.xlu0 %4637 }
 0x862   :  { %v4644_v18 = vmul.f32 0.001953125, %v4638_v61 }
 0x864   :  { %v4666_v25 = vmul.f32 %v4644_v18, %v4644_v18  ;;  %v4674_v21 = vsub.f32 %v12399_v26, %v4644_v18  ;;  %v4675_v63 = vsub.f32 %v12405_v36, %v4644_v18  ;;  %v4676_v50 = vsub.f32 %v12401_v9, %v4644_v18 }
 0x865   :  { %v4658_v5 = vpop.xlane.xlu0 %4657  ;;  %v4643_v31 = vpop.xlane.xlu1 %4642  ;;  %v4677_v57 = vsub.f32 %v12407_v11, %v4644_v18 }
 0x866   :  { %v4664_v23 = vmul.f32 0.001953125, %v4658_v5  ;;  %v4645_v29 = vmul.f32 0.001953125, %v4643_v31 }
 0x868   :  { %v4668_v16 = vsub.f32 %v4664_v23, %v4666_v25  ;;  %v4667_v12 = vmul.f32 %v4645_v29, %v4645_v29  ;;  %v4678_v20 = vsub.f32 %v12415_v13, %v4645_v29  ;;  %v4679_v26 = vsub.f32 %v12422_v24, %v4645_v29 }
 0x869   :  { %v4663_v30 = vpop.xlane.xlu0 %4662  ;;  %v4715_v0 = vpop.permute.xlu1 %4714  ;;  %v4680_v36 = vsub.f32 %v12417_v15, %v4645_v29  ;;  %v4681_v9 = vsub.f32 %v12424_v43, %v4645_v29 }
 0x86a   :  { %v4670_v32 = vadd.f32 1e-05, %v4668_v16  ;;  %v4665_v48 = vmul.f32 0.001953125, %v4663_v30 }
 0x86c   :  { %11183 = vrsqrt.f32 %v4670_v32  ;;  %v4669_v56 = vsub.f32 %v4665_v48, %v4667_v12 }
 0x86d   :  { %v4720_v53 = vpop.permute.xlu1 %4719 }
 0x86e   :  { %v4671_v49 = vadd.f32 1e-05, %v4669_v56 }
 0x870   :  { %11185 = vrsqrt.f32 %v4671_v49 }
 0x871   :  { %v4700_v24 = vpop.permute.xlu0 %4699 }
 0x876   :  { %v11184_v3 = vpop.eup %11183 }
 0x877   :  { %v4682_v17 = vmul.f32 %v11184_v3, %v4674_v21  ;;  %v4683_v51 = vmul.f32 %v11184_v3, %v4675_v63  ;;  %v4684_v28 = vmul.f32 %v11184_v3, %v4676_v50  ;;  %v4685_v19 = vmul.f32 %v11184_v3, %v4677_v57  ;;  %v6746_v21 = vld [vmem:[%s13289_s19] sm:$0xff]  ;;  %v12538_v50 = vld [vmem:[#allocation2 + $0x8] sm:$0xff] }
 0x878   :  { %v12536_v63 = vld [vmem:[#allocation2] sm:$0xff] }
 0x879   :  { %v4702_v52 = vmul.f32 %v4695_v34, %v4682_v17  ;;  %v4703_v54 = vmul.f32 %v4695_v34, %v4683_v51  ;;  %v4704_v10 = vmul.f32 %v4695_v34, %v4684_v28  ;;  %v4705_v2 = vmul.f32 %v4695_v34, %v4685_v19  ;;  %v12546_v51 = vld [vmem:[#allocation2 + $0x10] sm:$0xff] }
 0x87a   :  { %v11186_v39 = vpop.eup %11185  ;;  %v6690_v57 = vadd.f32 %v12538_v50, %v12536_v63  ;;  %v6702_v3 = vmul.f32 %v12536_v63, %v12536_v63  ;;  %v6703_v17 = vmul.f32 %v12538_v50, %v12538_v50  ;;  %v6704_v19 = vmul.f32 %v12546_v51, %v12546_v51 }
 0x87b   :  { %v4722_v11 = vadd.f32 %v4715_v0, %v4702_v52  ;;  %v4723_v4 = vadd.f32 %v4715_v0, %v4703_v54  ;;  %v4724_v33 = vadd.f32 %v4715_v0, %v4704_v10  ;;  %v4725_v44 = vadd.f32 %v4715_v0, %v4705_v2  ;;  %v12551_v54 = vld [vmem:[#allocation2 + $0x18] sm:$0xff] }
 0x87c   :  { %v4686_v46 = vmul.f32 %v11186_v39, %v4678_v20  ;;  %v4687_v55 = vmul.f32 %v11186_v39, %v4679_v26  ;;  %v4688_v62 = vmul.f32 %v11186_v39, %v4680_v36  ;;  %v4689_v7 = vmul.f32 %v11186_v39, %v4681_v9  ;;  %v12556_v20 = vpop.permute.xlu0 %10812  ;;  %v12558_v26 = vpop.permute.xlu1 %10817 }
 0x87d   :  { %v12456_v35 = vmax.f32 %v4722_v11, 0.0  ;;  %v12458_v8 = vmax.f32 %v4723_v4, 0.0  ;;  %v12460_v40 = vmax.f32 %v4724_v33, 0.0  ;;  %v12462_v13 = vmax.f32 %v4725_v44, 0.0 }
 0x87e   :  { %v4706_v15 = vmul.f32 %v4700_v24, %v4686_v46  ;;  %v4707_v45 = vmul.f32 %v4700_v24, %v4687_v55  ;;  %v4708_v43 = vmul.f32 %v4700_v24, %v4688_v62  ;;  %v4709_v22 = vmul.f32 %v4700_v24, %v4689_v7 }
 0x87f   :  { %v10836_v27 = vpack.i.bf16 %v12462_v13, %v12460_v40  ;;  %v10831_v47 = vpack.i.bf16 %v12458_v8, %v12456_v35  ;;  %v10871_v6 = vpack.i.bf16 %v12460_v40, %v12458_v8  ;;  %v10876_v56 = vpack.i.bf16 %v12391_v1, %v12462_v13 }
 0x880   :  { %v4726_v58 = vadd.f32 %v4720_v53, %v4706_v15  ;;  %v4727_v14 = vadd.f32 %v4720_v53, %v4707_v45  ;;  %v4728_v60 = vadd.f32 %v4720_v53, %v4708_v43  ;;  %v4729_v34 = vadd.f32 %v4720_v53, %v4709_v22  ;;  %v12560_v36 = vpop.permute.xlu0 %10822  ;;  %v12562_v9 = vpop.permute.xlu1 %10827 }
 0x881   :  { %10837 = vrot.lane.b32.xlu1 %v10836_v27, %s11409_s24  ;;  %10832 = vrot.lane.b32.xlu0 %v10831_v47, %s11409_s24  ;;  %v6691_v28 = vadd.f32 %v6690_v57, %v12546_v51  ;;  %v6710_v52 = vadd.f32 %v6703_v17, %v6702_v3  ;;  %v6705_v2 = vmul.f32 %v12551_v54, %v12551_v54  ;;  %v10825_v57 = vunpack.i.h.bf16 %v12560_v36 }
 0x882   :  { %v12472_v61 = vmax.f32 %v4726_v58, 0.0  ;;  %v12474_v18 = vmax.f32 %v4727_v14, 0.0  ;;  %v12476_v5 = vmax.f32 %v4728_v60, 0.0  ;;  %v12478_v31 = vmax.f32 %v4729_v34, 0.0 }
 0x883   :  { %v6692_v10 = vadd.f32 %v6691_v28, %v12551_v54  ;;  %v6711_v0 = vadd.f32 %v6710_v52, %v6704_v19  ;;  %v10815_v14 = vunpack.i.h.bf16 %v12556_v20  ;;  %v10814_v60 = vunpack.i.l.bf16 %v12556_v20 }
 0x884   :  { %4743 = vst [vmem:[#allocation3 + $0x40] sm:$0xff] %v12474_v18  ;;  %v10911_v25 = vpack.i.bf16 %v12478_v31, %v12476_v5  ;;  %v10916_v23 = vpack.i.bf16 %v12474_v18, %v12472_v61  ;;  %v10951_v29 = vpack.i.bf16 %v12472_v61, %v12456_v35  ;;  %v10946_v16 = vpack.i.bf16 %v12476_v5, %v12474_v18 }
 0x885   :  { %10842 = vrot.lane.b32.xlu1 %v10831_v47, %s11410_s20  ;;  %10847 = vrot.lane.b32.xlu0 %v10836_v27, %s11410_s20  ;;  %v10956_v49 = vpack.i.bf16 %v12391_v1, %v12478_v31  ;;  %v6712_v39 = vadd.f32 %v6711_v0, %v6705_v2  ;;  %v10819_v34 = vunpack.i.l.bf16 %v12558_v26  ;;  %v10824_v3 = vunpack.i.l.bf16 %v12560_v36 }
 0x889   :  { %10857 = vrot.lane.b32.xlu1 %v10836_v27, %s11411_s5  ;;  %10852 = vrot.lane.b32.xlu0 %v10831_v47, %s11411_s5 }
 0x88d   :  { %10862 = vrot.lane.b32.xlu1 %v10831_v47, %s11412_s4  ;;  %10867 = vrot.lane.b32.xlu0 %v10836_v27, %s11412_s4  ;;  %v10820_v27 = vunpack.i.h.bf16 %v12558_v26 }
 0x891   :  { %10877 = vrot.lane.b32.xlu1 %v10876_v56, %s11413_s12  ;;  %10872 = vrot.lane.b32.xlu0 %v10871_v6, %s11413_s12 }
 0x895   :  { %10882 = vrot.lane.b32.xlu1 %v10871_v6, %s11414_s2  ;;  %10887 = vrot.lane.b32.xlu0 %v10876_v56, %s11414_s2 }
 0x899   :  { %10897 = vrot.lane.b32.xlu1 %v10876_v56, %s11415_s10  ;;  %10892 = vrot.lane.b32.xlu0 %v10871_v6, %s11415_s10 }
 0x89d   :  { %10902 = vrot.lane.b32.xlu1 %v10871_v6, %s11416_s7  ;;  %10912 = vrot.lane.b32.xlu0 %v10911_v25, %s11409_s24 }
 0x8a1   :  { %10917 = vrot.lane.b32.xlu0 %v10916_v23, %s11410_s20  ;;  %10907 = vrot.lane.b32.xlu1 %v10916_v23, %s11409_s24  ;;  %s13303_s24 = sld [smem:[#allocation19_spill]] }
 0x8a5   :  { %10932 = vrot.lane.b32.xlu0 %v10911_v25, %s11411_s5  ;;  %10922 = vrot.lane.b32.xlu1 %v10911_v25, %s11410_s20  ;;  %s13304_s20 = sld [smem:[#allocation33_spill]] }
 0x8a9   :  { %10937 = vrot.lane.b32.xlu0 %v10916_v23, %s11412_s4  ;;  %10927 = vrot.lane.b32.xlu1 %v10916_v23, %s11411_s5  ;;  %s13305_s5 = sld [smem:[#allocation34_spill]] }
 0x8ad   :  { %10952 = vrot.lane.b32.xlu0 %v10951_v29, %s11413_s12  ;;  %10942 = vrot.lane.b32.xlu1 %v10911_v25, %s11412_s4 }
 0x8b1   :  { %10957 = vrot.lane.b32.xlu0 %v10956_v49, %s11413_s12  ;;  %10947 = vrot.lane.b32.xlu1 %v10946_v16, %s11413_s12 }
 0x8b5   :  { %10962 = vrot.lane.b32.xlu0 %v10946_v16, %s11414_s2  ;;  %10967 = vrot.lane.b32.xlu1 %v10951_v29, %s11414_s2 }
 0x8b9   :  { %10982 = vrot.lane.b32.xlu0 %v10951_v29, %s11415_s10  ;;  %10972 = vrot.lane.b32.xlu1 %v10956_v49, %s11414_s2  ;;  %s13306_s2 = sld [smem:[#allocation35_spill]] }
 0x8bd   :  { %10987 = vrot.lane.b32.xlu0 %v10956_v49, %s11415_s10  ;;  %10977 = vrot.lane.b32.xlu1 %v10946_v16, %s11415_s10 }
 0x8c1   :  { %10992 = vrot.lane.b32.xlu0 %v10946_v16, %s11416_s7  ;;  %11002 = vrot.lane.b32.xlu1 %v10951_v29, %s11416_s7 }
 0x8c5   :  { %10997 = vrot.lane.b32.xlu0 %v10876_v56, %s11416_s7  ;;  %11007 = vrot.lane.b32.xlu1 %v10956_v49, %s11416_s7 }
 0x8c9   :  { %6750 = vperm.xlu1 %10610, %v6746_v21  }
 0x8e4   :  { %6693 = vadd.xlane.f32.xlu0 %v6692_v10 }
 0x8e8   :  { %6713 = vadd.xlane.f32.xlu0 %v6712_v39 }
 0x8f3   :  { %v10833_v11 = vpop.permute.xlu0 %10832  ;;  %v10838_v4 = vpop.permute.xlu1 %10837 }
 0x8f4   :  { %v10835_v47 = vunpack.i.h.bf16 %v10833_v11  ;;  %v10834_v6 = vunpack.i.l.bf16 %v10833_v11  ;;  %v10839_v58 = vunpack.i.l.bf16 %v10838_v4  ;;  %v10840_v25 = vunpack.i.h.bf16 %v10838_v4 }
 0x8f6   :  { %v4787_v19 = vsel %vm285_vm0, %v10814_v60, %v10834_v6  ;;  %v4789_v52 = vsel %vm285_vm0, %v10835_v47, %v10839_v58  ;;  %v4790_v20 = vsel %vm285_vm0, %v10839_v58, %v10840_v25 }
 0x8f7   :  { %v10848_v33 = vpop.permute.xlu0 %10847  ;;  %v10843_v44 = vpop.permute.xlu1 %10842 }
 0x8f8   :  { %v10849_v29 = vunpack.i.l.bf16 %v10848_v33  ;;  %v10845_v16 = vunpack.i.h.bf16 %v10843_v44  ;;  %v10844_v56 = vunpack.i.l.bf16 %v10843_v44  ;;  %v10850_v10 = vunpack.i.h.bf16 %v10848_v33 }
 0x8f9   :  { %v4788_v33 = vsel %vm285_vm0, %v10834_v6, %v10835_v47 }
 0x8fa   :  { %v12601_v11 = vsel %vm487_vm3, %v10845_v16, %v10849_v29  ;;  %v12604_v4 = vsel %vm487_vm3, %v10819_v34, %v10844_v56  ;;  %v5001_v25 = vsel %vm487_vm3, %v10844_v56, %v10845_v16  ;;  %v5003_v34 = vsel %vm487_vm3, %v10849_v29, %v10850_v10 }
 0x8fb   :  { %v12564_v46 = vpop.permute.xlu0 %10852  ;;  %v12566_v55 = vpop.permute.xlu1 %10857 }
 0x8fc   :  { %v10854_v2 = vunpack.i.l.bf16 %v12564_v46  ;;  %v10855_v0 = vunpack.i.h.bf16 %v12564_v46  ;;  %v10859_v39 = vunpack.i.l.bf16 %v12566_v55  ;;  %v10860_v58 = vunpack.i.h.bf16 %v12566_v55 }
 0x8fe   :  { %v12608_v12 = vsel %vm688_vm4, %v10824_v3, %v10854_v2 }
 0x8ff   :  { %v12568_v62 = vpop.permute.xlu0 %10867  ;;  %v12570_v7 = vpop.permute.xlu1 %10862 }
 0x900   :  { %v10869_v23 = vunpack.i.l.bf16 %v12568_v62 }
 0x903   :  { %v12572_v24 = vpop.permute.xlu0 %10872  ;;  %v12574_v15 = vpop.permute.xlu1 %10877 }
 0x907   :  { %v12576_v45 = vpop.permute.xlu0 %10887  ;;  %v12578_v43 = vpop.permute.xlu1 %10882 }
 0x90b   :  { %v12580_v22 = vpop.permute.xlu0 %10892  ;;  %v12582_v53 = vpop.permute.xlu1 %10897 }
 0x90f   :  { %v10913_v49 = vpop.permute.xlu0 %10912  ;;  %v12589_v21 = vpop.permute.xlu1 %10902 }
 0x910   :  { %v10915_v17 = vunpack.i.h.bf16 %v10913_v49  ;;  %v10914_v28 = vunpack.i.l.bf16 %v10913_v49 }
 0x912   :  { %v4794_v26 = vsel %vm285_vm0, %v10914_v28, %v10915_v17  ;;  %v12614_v17 = vsel %vm688_vm4, %v10855_v0, %v10859_v39 }
 0x913   :  { %v10918_v44 = vpop.permute.xlu0 %10917  ;;  %v10908_v60 = vpop.permute.xlu1 %10907  ;;  %v10309_v49 = vpack.c.bf16 %v4794_v26, %v4790_v20 }
 0x914   :  { %v10920_v48 = vunpack.i.h.bf16 %v10918_v44  ;;  %v10919_v32 = vunpack.i.l.bf16 %v10918_v44  ;;  %v10910_v46 = vunpack.i.h.bf16 %v10908_v60  ;;  %v10909_v30 = vunpack.i.l.bf16 %v10908_v60 }
 0x915   :  { %10310 = vmatprep.subr.bf16.mxu1 %v10309_v49 }
 0x916   :  { %v4793_v20 = vsel %vm285_vm0, %v10910_v46, %v10914_v28  ;;  %v4791_v47 = vsel %vm285_vm0, %v10815_v14, %v10909_v30  ;;  %v4792_v6 = vsel %vm285_vm0, %v10909_v30, %v10910_v46  ;;  %v5005_v49 = vsel %vm487_vm3, %v10919_v32, %v10920_v48  ;;  %v4756_v46 = vld [vmem:[%s13290_s11] sm:$0xf] }
 0x917   :  { %v10933_v26 = vpop.permute.xlu0 %10932  ;;  %v10923_v3 = vpop.permute.xlu1 %10922  ;;  %v10305_v44 = vpack.c.bf16 %v4792_v6, %v4788_v33  ;;  %v10311_v60 = vpack.c.bf16 %v4793_v20, %v4789_v52  ;;  %v10307_v55 = vpack.c.bf16 %v4791_v47, %v4787_v19  ;;  %v10865_v28 = vunpack.i.h.bf16 %v12570_v7 }
 0x918   :  { %v10935_v16 = vunpack.i.h.bf16 %v10933_v26  ;;  %v10934_v56 = vunpack.i.l.bf16 %v10933_v26  ;;  %v10925_v29 = vunpack.i.h.bf16 %v10923_v3  ;;  %v10924_v10 = vunpack.i.l.bf16 %v10923_v3 }
 0x919   :  { %v5004_v14 = vsel %vm487_vm3, %v10820_v27, %v10919_v32  ;;  %10306 = vmatprep.subr.bf16.mxu0 %v10305_v44  ;;  %10312 = vmatpush1.bf16.msra.mxu1 %v10311_v60  ;;  %v10313_v30 = vpack.c.bf16 %v5005_v49, %v5001_v25  ;;  %v5216_v52 = vsel %vm688_vm4, %v10859_v39, %v10860_v58  ;;  %v10864_v47 = vunpack.i.l.bf16 %v12570_v7 }
 0x91a   :  { %v5006_v33 = vsel %vm487_vm3, %v10920_v48, %v10924_v10  ;;  %10308 = vmatpush1.bf16.msra.mxu0 %v10307_v55  ;;  %v5007_v19 = vsel %vm487_vm3, %v10924_v10, %v10925_v29  ;;  %v5220_v20 = vsel %vm688_vm4, %v10934_v56, %v10935_v16  ;;  %v5214_v27 = vsel %vm688_vm4, %v10854_v2, %v10855_v0 }
 0x91b   :  { %v10938_v6 = vpop.permute.xlu0 %10937  ;;  %v10928_v26 = vpop.permute.xlu1 %10927  ;;  %10314 = vmatprep.subr.bf16.mxu0 %v10313_v30  ;;  %v10317_v3 = vpack.c.bf16 %v5007_v19, %v5003_v34  ;;  %v10319_v32 = vpack.c.bf16 %v5006_v33, %v12601_v11  ;;  %v10870_v25 = vunpack.i.h.bf16 %v12568_v62  ;;  %v10315_v39 = vpack.c.bf16 %v5004_v14, %v12604_v4  ;;  %v9795_v4 = vld [vmem:[%s13290_s11 + $0x4] sm:$0xf] }
 0x91c   :  { %v10930_v48 = vunpack.i.h.bf16 %v10928_v26  ;;  %v10929_v44 = vunpack.i.l.bf16 %v10928_v26  ;;  %9794 = vmatmul.mubr.msk.f32.vlgmr.msra.gmra.mrb[50].mxu1 %vm487_vm3, %v4756_v46  ;;  %v12635_v58 = vsel %vm889_vm5, %v10865_v28, %v10869_v23  ;;  %v10940_v7 = vunpack.i.h.bf16 %v10938_v6 }
 0x91d   :  { %v10939_v60 = vunpack.i.l.bf16 %v10938_v6  ;;  %9793 = vmatmul.mubr.msk.f32.vlgmr.msra.gmra.mrb[38].mxu0 %vm487_vm3, %v4756_v46  ;;  %10318 = vmatprep.subr.bf16.mxu1 %v10317_v3  ;;  %v10325_v11 = vpack.c.bf16 %v5220_v20, %v5216_v52  ;;  %v10875_v2 = vunpack.i.h.bf16 %v12572_v24  ;;  %v10879_v62 = vunpack.i.l.bf16 %v12574_v15 }
 0x91e   :  { %v5219_v0 = vsel %vm688_vm4, %v10930_v48, %v10934_v56  ;;  %v5217_v34 = vsel %vm688_vm4, %v10825_v57, %v10929_v44  ;;  %10316 = vmatpush1.bf16.msra.mxu0 %v10315_v39  ;;  %10320 = vmatpush1.bf16.msra.mxu1 %v10319_v32  ;;  %v10830_v55 = vunpack.i.h.bf16 %v12562_v9  ;;  %v13291_v49 = vunpack.i.l.bf16 %v12562_v9 }
 0x91f   :  { %v12649_v29 = vpop.permute.xlu0 %10952  ;;  %v10943_v10 = vpop.permute.xlu1 %10942  ;;  %10326 = vmatprep.subr.bf16.mxu1 %v10325_v11  ;;  %5083 = vmatprep.mubr.f32.mxu0 %v12391_v1  ;;  %v5218_v56 = vsel %vm688_vm4, %v10929_v44, %v10930_v48  ;;  %v10327_v36 = vpack.c.bf16 %v5219_v0, %v12614_v17  ;;  %v10323_v30 = vpack.c.bf16 %v5217_v34, %v12608_v12  ;;  %v10874_v46 = vunpack.i.l.bf16 %v12572_v24 }
 0x920   :  { %v5426_v16 = vsel %vm889_vm5, %v13291_v49, %v10864_v47  ;;  %v10945_v57 = vunpack.i.h.bf16 %v10943_v10  ;;  %v10944_v14 = vunpack.i.l.bf16 %v10943_v10  ;;  %5154 = vmatprep.mubr.f32.mxu1 %v12391_v1  ;;  %v5427_v9 = vsel %vm889_vm5, %v10864_v47, %v10865_v28  ;;  %v9799_v47 = vld [vmem:[%s13290_s11 + $0x8] sm:$0xf] }
 0x921   :  { %9796 = vmatmul.mubr.msk.f32.vlgmr.msra.gmra.mrb[40].mxu0 %vm487_vm3, %v9795_v4  ;;  %9797 = vmatmul.mubr.msk.f32.vlgmr.msra.gmra.mrb[52].mxu1 %vm487_vm3, %v9795_v4  ;;  %v10321_v33 = vpack.c.bf16 %v5218_v56, %v5214_v27  ;;  %v5431_v19 = vsel %vm889_vm5, %v10939_v60, %v10940_v7  ;;  %v5429_v17 = vsel %vm889_vm5, %v10869_v23, %v10870_v25  ;;  %v10880_v52 = vunpack.i.h.bf16 %v12574_v15 }
 0x922   :  { %v12666_v20 = vsel %vm1286_vm6, %v10875_v2, %v10879_v62  ;;  %v5430_v12 = vsel %vm889_vm5, %v10830_v55, %v10939_v60  ;;  %v5432_v28 = vsel %vm889_vm5, %v10940_v7, %v10944_v14  ;;  %10328 = vmatpush1.bf16.msra.mxu1 %v10327_v36  ;;  %5296 = vmatprep.mubr.f32.mxu0 %v12391_v1  ;;  %v10890_v6 = vunpack.i.h.bf16 %v12576_v45 }
 0x923   :  { %10322 = vmatprep.subr.bf16.mxu0 %v10321_v33  ;;  %v10958_v26 = vpop.permute.xlu0 %10957  ;;  %v10948_v23 = vpop.permute.xlu1 %10947  ;;  %v10329_v3 = vpack.c.bf16 %v5431_v19, %v5427_v9  ;;  %5367 = vmatprep.mubr.f32.mxu1 %v12391_v1  ;;  %v5433_v32 = vsel %vm889_vm5, %v10944_v14, %v10945_v57  ;;  %v10335_v27 = vpack.c.bf16 %v5432_v28, %v12635_v58  ;;  %v10889_v7 = vunpack.i.l.bf16 %v12576_v45 }
 0x924   :  { %10324 = vmatpush1.bf16.msra.mxu0 %v10323_v30  ;;  %v10960_v25 = vunpack.i.h.bf16 %v10958_v26  ;;  %v10959_v48 = vunpack.i.l.bf16 %v10958_v26  ;;  %v10950_v44 = vunpack.i.h.bf16 %v10948_v23  ;;  %v10949_v39 = vunpack.i.l.bf16 %v10948_v23 }
 0x925   :  { %v10885_v60 = vunpack.i.h.bf16 %v12578_v43  ;;  %v10884_v11 = vunpack.i.l.bf16 %v12578_v43  ;;  %10330 = vmatprep.subr.bf16.mxu0 %v10329_v3  ;;  %9801 = vmatmul.mubr.msk.f32.vlgmr.msra.gmra.mrb[54].mxu1 %vm487_vm3, %v9799_v47  ;;  %v10333_v0 = vpack.c.bf16 %v5433_v32, %v5429_v17  ;;  %v10895_v34 = vunpack.i.h.bf16 %v12580_v22 }
 0x926   :  { %v10899_v4 = vunpack.i.l.bf16 %v12582_v53  ;;  %v10331_v58 = vpack.c.bf16 %v5430_v12, %v5426_v16  ;;  %5580 = vmatprep.mubr.f32.mxu1 %v12391_v1  ;;  %v5837_v45 = vsel %vm1286_vm6, %v10874_v46, %v10875_v2  ;;  %v10894_v55 = vunpack.i.l.bf16 %v12580_v22  ;;  %v9803_v2 = vld [vmem:[%s13290_s11 + $0xc] sm:$0xf] }
 0x927   :  { %v10955_v43 = vunpack.i.h.bf16 %v12649_v29  ;;  %v10954_v49 = vunpack.i.l.bf16 %v12649_v29  ;;  %9800 = vmatmul.mubr.msk.f32.vlgmr.msra.gmra.mrb[42].mxu0 %vm487_vm3, %v9799_v47  ;;  %10334 = vmatprep.subr.bf16.mxu1 %v10333_v0  ;;  %v10963_v10 = vpop.permute.xlu0 %10962  ;;  %v10968_v56 = vpop.permute.xlu1 %10967  ;;  %v5839_v16 = vsel %vm1286_vm6, %v10879_v62, %v10880_v52  ;;  %v5841_v14 = vsel %vm1286_vm6, %v10949_v39, %v10950_v44 }
 0x928   :  { %10332 = vmatpush1.bf16.msra.mxu0 %v10331_v58  ;;  %10336 = vmatpush1.bf16.msra.mxu1 %v10335_v27  ;;  %v10965_v36 = vunpack.i.h.bf16 %v10963_v10  ;;  %v10964_v57 = vunpack.i.l.bf16 %v10963_v10  ;;  %v5843_v30 = vsel %vm1286_vm6, %v10959_v48, %v10960_v25  ;;  %v12697_v29 = vsel %vm1487_vm7, %v10885_v60, %v10889_v7  ;;  %v9807_v25 = vld [vmem:[%s13290_s11 + $0x10] sm:$0xf] }
 0x929   :  { %v10970_v9 = vunpack.i.h.bf16 %v10968_v56  ;;  %v13292_v33 = vpack.c.bf16 %v12474_v18, %v12458_v8  ;;  %v13293_v15 = vpack.c.bf16 %v12478_v31, %v12462_v13  ;;  %v6050_v62 = vsel %vm1487_vm7, %v10884_v11, %v10885_v60  ;;  %5509 = vmatprep.mubr.f32.mxu0 %v12391_v1 }
 0x92a   :  { %v6052_v19 = vsel %vm1487_vm7, %v10889_v7, %v10890_v6  ;;  %v12710_v17 = vsel %vm1688_vm8, %v10895_v34, %v10899_v4  ;;  %v5842_v52 = vsel %vm1286_vm6, %v10950_v44, %v10959_v48  ;;  %v5840_v12 = vsel %vm1286_vm6, %v10955_v43, %v10949_v39 }
 0x92b   :  { %10338 = vmatprep.subr.bf16.mxu0 %v13292_v33  ;;  %10342 = vmatprep.subr.bf16.mxu1 %v13293_v15  ;;  %v10969_v8 = vunpack.i.l.bf16 %v10968_v56  ;;  %v10900_v13 = vunpack.i.h.bf16 %v12582_v53  ;;  %v10983_v18 = vpop.permute.xlu0 %10982  ;;  %v10973_v31 = vpop.permute.xlu1 %10972  ;;  %v10345_v28 = vpack.c.bf16 %v5841_v14, %v5837_v45  ;;  %v10349_v47 = vpack.c.bf16 %v5843_v30, %v5839_v16 }
 0x92c   :  { %9804 = vmatmul.mubr.msk.f32.vlgmr.msra.gmra.mrb[44].mxu0 %vm487_vm3, %v9803_v2  ;;  %9805 = vmatmul.mubr.msk.f32.vlgmr.msra.gmra.mrb[56].mxu1 %vm487_vm3, %v9803_v2  ;;  %v12721_v6 = vsel %vm1688_vm8, %v10894_v55, %v10895_v34  ;;  %v5836_v26 = vsel %vm1286_vm6, %v10954_v49, %v10874_v46  ;;  %v13294_v23 = vpack.c.bf16 %v12472_v61, %v12456_v35  ;;  %v10975_v32 = vunpack.i.h.bf16 %v10973_v31  ;;  %v9811_v49 = vld [vmem:[%s13290_s11 + $0x14] sm:$0xf] }
 0x92d   :  { %v13295_v3 = vpack.c.bf16 %v12476_v5, %v12460_v40  ;;  %v10974_v27 = vunpack.i.l.bf16 %v10973_v31  ;;  %v6054_v48 = vsel %vm1487_vm7, %v10964_v57, %v10965_v36  ;;  %v6053_v44 = vsel %vm1487_vm7, %v10970_v9, %v10964_v57  ;;  %5686 = vmatprep.mubr.f32.mxu0 %v12391_v1  ;;  %5757 = vmatprep.mubr.f32.mxu1 %v12391_v1 }
 0x92e   :  { %10340 = vmatpush1.bf16.msra.mxu0 %v13294_v23  ;;  %v10984_v39 = vunpack.i.l.bf16 %v10983_v18  ;;  %v10347_v24 = vpack.c.bf16 %v5840_v12, %v5836_v26  ;;  %v10351_v46 = vpack.c.bf16 %v5842_v52, %v12666_v20  ;;  %v6049_v35 = vsel %vm1487_vm7, %v10969_v8, %v10884_v11 }
 0x92f   :  { %10344 = vmatpush1.bf16.msra.mxu1 %v13295_v3  ;;  %10346 = vmatprep.subr.bf16.mxu0 %v10345_v28  ;;  %v6055_v61 = vsel %vm1487_vm7, %v10965_v36, %v10974_v27  ;;  %v6056_v40 = vsel %vm1487_vm7, %v10974_v27, %v10975_v32  ;;  %v10985_v5 = vunpack.i.h.bf16 %v10983_v18  ;;  %v10988_v7 = vpop.permute.xlu0 %10987  ;;  %v10978_v60 = vpop.permute.xlu1 %10977  ;;  %v10353_v0 = vpack.c.bf16 %v6054_v48, %v6050_v62  ;;  %v9815_v62 = vld [vmem:[%s13290_s11 + $0x18] sm:$0xf]  ;;  %v9819_v32 = vld [vmem:[%s13290_s11 + $0x1c] sm:$0xf] }
 0x930   :  { %10350 = vmatprep.subr.bf16.mxu1 %v10349_v47  ;;  %v10357_v20 = vpack.c.bf16 %v6056_v40, %v6052_v19  ;;  %v10359_v11 = vpack.c.bf16 %v6055_v61, %v12697_v29  ;;  %v10990_v34 = vunpack.i.h.bf16 %v10988_v7  ;;  %v10989_v58 = vunpack.i.l.bf16 %v10988_v7  ;;  %v9798_v61 = vld [vmem:[%s11439_s9 + $0x1] ss:$8 sm:$0xf] }
 0x931   :  { %9808 = vmatmul.mubr.msk.f32.vlgmr.msra.gmra.mrb[46].mxu0 %vm487_vm3, %v9807_v25  ;;  %v10980_v45 = vunpack.i.h.bf16 %v10978_v60  ;;  %v10979_v43 = vunpack.i.l.bf16 %v10978_v60  ;;  %v10905_v10 = vunpack.i.h.bf16 %v12589_v21  ;;  %v6262_v56 = vsel %vm1688_vm8, %v10984_v39, %v10894_v55 }
 0x932   :  { %9809 = vmatmul.mubr.msk.f32.vlgmr.msra.gmra.mrb[58].mxu1 %vm487_vm3, %v9807_v25  ;;  %10348 = vmatpush1.bf16.msra.mxu0 %v10347_v24  ;;  %v10355_v16 = vpack.c.bf16 %v6053_v44, %v6049_v35  ;;  %v6265_v36 = vsel %vm1688_vm8, %v10899_v4, %v10900_v13  ;;  %v10904_v57 = vunpack.i.l.bf16 %v12589_v21  ;;  %v6269_v21 = vsel %vm1688_vm8, %v10989_v58, %v10990_v34  ;;  %v9823_v24 = vld [vmem:[%s13290_s11 + $0x20] sm:$0xf] }
 0x933   :  { %10352 = vmatpush1.bf16.msra.mxu1 %v10351_v46  ;;  %10354 = vmatprep.subr.bf16.mxu0 %v10353_v0  ;;  %v6268_v2 = vsel %vm1688_vm8, %v10980_v45, %v10989_v58  ;;  %v6266_v14 = vsel %vm1688_vm8, %v10985_v5, %v10979_v43  ;;  %v6267_v22 = vsel %vm1688_vm8, %v10979_v43, %v10980_v45  ;;  %v10993_v55 = vpop.permute.xlu0 %10992  ;;  %v11003_v53 = vpop.permute.xlu1 %11002  ;;  %v4948_v35 = vld [vmem:[%s11439_s9] ss:$8 sm:$0xf]  ;;  %vm7488_vm0 = vcmask 72704  }
 0x934   :  { %5919 = vmatprep.mubr.f32.mxu0 %v12391_v1  ;;  %5990 = vmatprep.mubr.f32.mxu1 %v12391_v1  ;;  %v10361_v4 = vpack.c.bf16 %v6267_v22, %v12721_v6  ;;  %v10363_v30 = vpack.c.bf16 %v6266_v14, %v6262_v56  ;;  %v10995_v29 = vunpack.i.h.bf16 %v10993_v55  ;;  %v10994_v9 = vunpack.i.l.bf16 %v10993_v55 }
 0x935   :  { %10358 = vmatprep.subr.bf16.mxu1 %v10357_v20  ;;  %9812 = vmatmul.mubr.msk.f32.vlgmr.msra.gmra.mrb[48].mxu0 %vm487_vm3, %v9811_v49  ;;  %v11005_v33 = vunpack.i.h.bf16 %v11003_v53  ;;  %v11004_v15 = vunpack.i.l.bf16 %v11003_v53  ;;  %v10365_v19 = vpack.c.bf16 %v6269_v21, %v6265_v36  ;;  %v10367_v52 = vpack.c.bf16 %v6268_v2, %v12710_v17 }
 0x936   :  { %9813 = vmatmul.mubr.msk.f32.vlgmr.msra.gmra.mrb[60].mxu1 %vm487_vm3, %v9811_v49  ;;  %10356 = vmatpush1.bf16.msra.mxu0 %v10355_v16  ;;  %v6476_v13 = vsel %vm1889_vm9, %v10904_v57, %v10905_v10  ;;  %v6480_v18 = vsel %vm1889_vm9, %v10994_v9, %v10995_v29  ;;  %v4961_v5 = vrot.slane %v4948_v35, %v11877_v38  ;;  %v9802_v49 = vld [vmem:[%s11439_s9 + $0x2] ss:$8 sm:$0xf]  ;;  %vm8145_vm4 = vcmask 982016  }
 0x937   :  { %10360 = vmatpush1.bf16.msra.mxu1 %v10359_v11  ;;  %6132 = vmatprep.mubr.f32.mxu0 %v12391_v1  ;;  %v6479_v12 = vsel %vm1889_vm9, %v11005_v33, %v10994_v9  ;;  %v6475_v8 = vsel %vm1889_vm9, %v11004_v15, %v10904_v57  ;;  %v10998_v31 = vpop.permute.xlu0 %10997  ;;  %v11008_v28 = vpop.permute.xlu1 %11007  ;;  %v10369_v47 = vpack.c.bf16 %v6480_v18, %v6476_v13  ;;  %vm8240_vm7 = vcmask 973824  }
 0x938   :  { %6203 = vmatprep.mubr.f32.mxu1 %v12391_v1  ;;  %10362 = vmatprep.subr.bf16.mxu0 %v10361_v4  ;;  %v10371_v6 = vpack.c.bf16 %v6479_v12, %v6475_v8  ;;  %v11000_v17 = vunpack.i.h.bf16 %v10998_v31  ;;  %v10999_v26 = vunpack.i.l.bf16 %v10998_v31  ;;  %v11010_v23 = vunpack.i.h.bf16 %v11008_v28  ;;  %v9806_v8 = vld [vmem:[%s11439_s9 + $0x3] ss:$8 sm:$0xf] }
 0x939   :  { %9816 = vmatmul.mubr.msk.f32.vlgmr.msra.gmra.mrb[50].mxu0 %vm487_vm3, %v9815_v62  ;;  %10366 = vmatprep.subr.bf16.mxu1 %v10365_v19  ;;  %v11009_v3 = vunpack.i.l.bf16 %v11008_v28  ;;  %v4965_v0 = vrot.slane %v4948_v35, %v11882_v42  ;;  %v4953_v20 = vrot.slane %v4948_v35, %v11875_v37  ;;  %v5166_v34 = vrot.slane %v9798_v61, %v11875_v37 }
 0x93a   :  { %9817 = vmatmul.mubr.msk.f32.vlgmr.msra.gmra.mrb[62].mxu1 %vm487_vm3, %v9815_v62  ;;  %10364 = vmatpush1.bf16.msra.mxu0 %v10363_v30  ;;  %v6477_v27 = vsel %vm1889_vm9, %v10905_v10, %v10999_v26  ;;  %v6478_v48 = vsel %vm1889_vm9, %v10999_v26, %v11000_v17  ;;  %v5174_v58 = vrot.slane %v9798_v61, %v11877_v38 }
 0x93b   :  { %10368 = vmatpush1.bf16.msra.mxu1 %v10367_v52  ;;  %6345 = vmatprep.mubr.f32.mxu0 %v12391_v1  ;;  %v6481_v25 = vsel %vm1889_vm9, %v10995_v29, %v11009_v3  ;;  %v6482_v44 = vsel %vm1889_vm9, %v11009_v3, %v11010_v23  ;;  %v4957_v45 = vrot.slane %v4948_v35, %v11880_v41 }
 0x93c   :  { %6416 = vmatprep.mubr.f32.mxu1 %v12391_v1  ;;  %10370 = vmatprep.subr.bf16.mxu0 %v10369_v47  ;;  %v10375_v39 = vpack.c.bf16 %v6481_v25, %v6477_v27  ;;  %v10373_v46 = vpack.c.bf16 %v6482_v44, %v6478_v48  ;;  %v5178_v43 = vrot.slane %v9798_v61, %v11882_v42  ;;  %v9810_v48 = vld [vmem:[%s11439_s9 + $0x4] ss:$8 sm:$0xf] }
 0x93d   :  { %9820 = vmatmul.mubr.msk.f32.vlgmr.msra.gmra.mrb[52].mxu0 %vm487_vm3, %v9819_v32  ;;  %v5387_v53 = vrot.slane %v9802_v49, %v11877_v38  ;;  %v5391_v29 = vrot.slane %v9802_v49, %v11882_v42  ;;  %v5379_v15 = vrot.slane %v9802_v49, %v11875_v37  ;;  %v5383_v12 = vrot.slane %v9802_v49, %v11880_v41 }
 0x93e   :  { %9821 = vmatmul.mubr.msk.f32.vlgmr.msra.gmra.mrb[64].mxu1 %vm487_vm3, %v9819_v32  ;;  %10372 = vmatpush1.bf16.msra.mxu0 %v10371_v6  ;;  %v5592_v26 = vrot.slane %v9806_v8, %v11875_v37  ;;  %v5600_v23 = vrot.slane %v9806_v8, %v11877_v38  ;;  %v5596_v27 = vrot.slane %v9806_v8, %v11880_v41 }
 0x93f   :  { %6558 = vmatprep.mubr.f32.mxu0 %v12391_v1  ;;  %6629 = vmatprep.mubr.f32.mxu1 %v12391_v1  ;;  %v5604_v25 = vrot.slane %v9806_v8, %v11882_v42 }
 0x940   :  { %10374 = vmatprep.subr.bf16.mxu1 %v10373_v46 }
 0x941   :  { %9824 = vmatmul.mubr.msk.f32.vlgmr.msra.gmra.mrb[54].mxu0 %vm487_vm3, %v9823_v24  ;;  %10376 = vmatpush1.bf16.msra.mxu1 %v10375_v39 }
 0x942   :  { %6862 = vmatprep.mubr.f32.mxu0 %v12391_v1 }
 0x944   :  { %9825 = vmatmul.mubr.msk.f32.vlgmr.msra.gmra.mrb[66].mxu1 %vm487_vm3, %v9823_v24 }
 0x945   :  { %6933 = vmatprep.mubr.f32.mxu1 %v12391_v1  ;;  %v5170_v1 = vrot.slane %v9798_v61, %v11880_v41 }
 0x9ef   :  { %v4943_v40 = vpop.f32.mrb[50].mxu1 }
 0x9f0   :  { %v4872_v7 = vpop.f32.mrb[38].mxu0  ;;  %v4945_v60 = vpop.f32.mrb[51].mxu1  ;;  %v4972_v10 = vmul.f32 %v4961_v5, %v4943_v40 }
 0x9f1   :  { %v4874_v11 = vpop.f32.mrb[39].mxu0  ;;  %v4973_v56 = vmul.f32 %v4965_v0, %v4945_v60  ;;  %v4970_v57 = vmul.f32 %v4953_v20, %v4872_v7  ;;  %v5769_v7 = vrot.slane %v9810_v48, %v11875_v37  ;;  %v5777_v60 = vrot.slane %v9810_v48, %v11877_v38 }
 0x9f2   :  { %v4971_v4 = vmul.f32 %v4957_v45, %v4874_v11  ;;  %v5773_v11 = vrot.slane %v9810_v48, %v11880_v41 }
 0x9f4   :  { %v5085_v16 = vpop.f32.mrb[40].mxu0  ;;  %v5156_v36 = vpop.f32.mrb[52].mxu1 }
 0x9f5   :  { %v5183_v2 = vmul.f32 %v5166_v34, %v5085_v16  ;;  %v5185_v14 = vmul.f32 %v5174_v58, %v5156_v36  ;;  %v5087_v22 = vpop.f32.mrb[41].mxu0  ;;  %v5158_v55 = vpop.f32.mrb[53].mxu1  ;;  %v5781_v34 = vrot.slane %v9810_v48, %v11882_v42  ;;  %v9814_v58 = vld [vmem:[%s11439_s9 + $0x5] ss:$8 sm:$0xf] }
 0x9f6   :  { %v5184_v21 = vmul.f32 %v5170_v1, %v5087_v22  ;;  %v5186_v30 = vmul.f32 %v5178_v43, %v5158_v55  ;;  %v6010_v22 = vrot.slane %v9814_v58, %v11877_v38 }
 0x9f7   :  { %v5187_v9 = vadd.f32 %v5183_v2, %v4970_v57  ;;  %v5189_v33 = vadd.f32 %v5185_v14, %v4972_v10  ;;  %v6002_v14 = vrot.slane %v9814_v58, %v11875_v37 }
 0x9f8   :  { %v5188_v62 = vadd.f32 %v5184_v21, %v4971_v4  ;;  %v5190_v19 = vadd.f32 %v5186_v30, %v4973_v56  ;;  %v5369_v52 = vpop.f32.mrb[54].mxu1  ;;  %v6006_v4 = vrot.slane %v9814_v58, %v11880_v41  ;;  %v6014_v21 = vrot.slane %v9814_v58, %v11882_v42  ;;  %v9818_v30 = vld [vmem:[%s11439_s9 + $0x6] ss:$8 sm:$0xf] }
 0x9f9   :  { %v5398_v13 = vmul.f32 %v5387_v53, %v5369_v52  ;;  %v5371_v18 = vpop.f32.mrb[55].mxu1 }
 0x9fa   :  { %v5298_v31 = vpop.f32.mrb[42].mxu0  ;;  %v5399_v28 = vmul.f32 %v5391_v29, %v5371_v18  ;;  %v6215_v18 = vrot.slane %v9818_v30, %v11875_v37 }
 0x9fb   :  { %v5396_v47 = vmul.f32 %v5379_v15, %v5298_v31  ;;  %v5402_v6 = vadd.f32 %v5398_v13, %v5189_v33  ;;  %v5300_v17 = vpop.f32.mrb[43].mxu0  ;;  %v6223_v31 = vrot.slane %v9818_v30, %v11877_v38 }
 0x9fc   :  { %v5397_v3 = vmul.f32 %v5383_v12, %v5300_v17  ;;  %v5403_v32 = vadd.f32 %v5399_v28, %v5190_v19  ;;  %v6227_v17 = vrot.slane %v9818_v30, %v11882_v42 }
 0x9fd   :  { %v5400_v44 = vadd.f32 %v5396_v47, %v5187_v9 }
 0x9fe   :  { %v5401_v39 = vadd.f32 %v5397_v3, %v5188_v62 }
 0x9ff   :  { %v5511_v24 = vpop.f32.mrb[44].mxu0  ;;  %v5582_v46 = vpop.f32.mrb[56].mxu1 }
 0xa00   :  { %v5609_v35 = vmul.f32 %v5592_v26, %v5511_v24  ;;  %v5611_v61 = vmul.f32 %v5600_v23, %v5582_v46  ;;  %v5513_v40 = vpop.f32.mrb[45].mxu0  ;;  %v5584_v5 = vpop.f32.mrb[57].mxu1  ;;  %v9822_v26 = vld [vmem:[%s11439_s9 + $0x7] ss:$8 sm:$0xf] }
 0xa01   :  { %v5610_v0 = vmul.f32 %v5596_v27, %v5513_v40  ;;  %v5612_v20 = vmul.f32 %v5604_v25, %v5584_v5  ;;  %v6436_v5 = vrot.slane %v9822_v26, %v11877_v38 }
 0xa02   :  { %v5613_v45 = vadd.f32 %v5609_v35, %v5400_v44  ;;  %v5615_v1 = vadd.f32 %v5611_v61, %v5402_v6  ;;  %v6219_v6 = vrot.slane %v9818_v30, %v11880_v41  ;;  %v6428_v35 = vrot.slane %v9822_v26, %v11875_v37 }
 0xa03   :  { %v5614_v43 = vadd.f32 %v5610_v0, %v5401_v39  ;;  %v5616_v49 = vadd.f32 %v5612_v20, %v5403_v32 }
 0xa04   :  { %v5688_v10 = vpop.f32.mrb[46].mxu0 }
 0xa05   :  { %v5759_v56 = vpop.f32.mrb[58].mxu1  ;;  %v5786_v16 = vmul.f32 %v5769_v7, %v5688_v10  ;;  %v5690_v57 = vpop.f32.mrb[47].mxu0  ;;  %v6432_v7 = vrot.slane %v9822_v26, %v11880_v41 }
 0xa06   :  { %v5788_v36 = vmul.f32 %v5777_v60, %v5759_v56  ;;  %v5761_v2 = vpop.f32.mrb[59].mxu1  ;;  %v5787_v55 = vmul.f32 %v5773_v11, %v5690_v57  ;;  %v9826_v60 = vld [vmem:[%s11439_s9 + $0x20] ss:$8 sm:$0xf]  ;;  %v6440_v11 = vrot.slane %v9822_v26, %v11882_v42  ;;  %s13296_s9 = sld [smem:[#allocation38_spill]] }
 0xa07   :  { %v5789_v53 = vmul.f32 %v5781_v34, %v5761_v2  ;;  %v5790_v29 = vadd.f32 %v5786_v16, %v5613_v45  ;;  %v6641_v10 = vrot.slane %v9826_v60, %v11875_v37  ;;  %v6645_v57 = vrot.slane %v9826_v60, %v11880_v41 }
 0xa08   :  { %v5792_v9 = vadd.f32 %v5788_v36, %v5615_v1  ;;  %v5791_v33 = vadd.f32 %v5787_v55, %v5614_v43  ;;  %v5921_v62 = vpop.f32.mrb[48].mxu0 }
 0xa09   :  { %v5793_v15 = vadd.f32 %v5789_v53, %v5616_v49  ;;  %v5992_v19 = vpop.f32.mrb[60].mxu1  ;;  %v6019_v52 = vmul.f32 %v6002_v14, %v5921_v62  ;;  %v5923_v8 = vpop.f32.mrb[49].mxu0 }
 0xa0a   :  { %v6021_v12 = vmul.f32 %v6010_v22, %v5992_v19  ;;  %v5994_v13 = vpop.f32.mrb[61].mxu1  ;;  %v6020_v28 = vmul.f32 %v6006_v4, %v5923_v8  ;;  %v6649_v4 = vrot.slane %v9826_v60, %v11877_v38 }
 0xa0b   :  { %v6022_v47 = vmul.f32 %v6014_v21, %v5994_v13  ;;  %v6023_v23 = vadd.f32 %v6019_v52, %v5790_v29 }
 0xa0c   :  { %v6025_v3 = vadd.f32 %v6021_v12, %v5792_v9  ;;  %v6024_v32 = vadd.f32 %v6020_v28, %v5791_v33  ;;  %v6134_v25 = vpop.f32.mrb[50].mxu0  ;;  %v6653_v9 = vrot.slane %v9826_v60, %v11882_v42 }
 0xa0d   :  { %v6026_v27 = vadd.f32 %v6022_v47, %v5793_v15  ;;  %v6205_v48 = vpop.f32.mrb[62].mxu1  ;;  %v6232_v44 = vmul.f32 %v6215_v18, %v6134_v25  ;;  %v6136_v24 = vpop.f32.mrb[51].mxu0 }
 0xa0e   :  { %v6234_v39 = vmul.f32 %v6223_v31, %v6205_v48  ;;  %v6207_v46 = vpop.f32.mrb[63].mxu1  ;;  %v6233_v61 = vmul.f32 %v6219_v6, %v6136_v24 }
 0xa0f   :  { %v6235_v40 = vmul.f32 %v6227_v17, %v6207_v46  ;;  %v6236_v0 = vadd.f32 %v6232_v44, %v6023_v23  ;;  %v6766_v46 = vld [vmem:[%s13296_s9] sm:$0xff] }
 0xa10   :  { %v6238_v20 = vadd.f32 %v6234_v39, %v6025_v3  ;;  %v6237_v34 = vadd.f32 %v6233_v61, %v6024_v32  ;;  %v6347_v45 = vpop.f32.mrb[52].mxu0  ;;  %v6747_v61 = vld [vmem:[%s13289_s19 + $0x8] sm:$0xff] }
 0xa11   :  { %v6239_v58 = vadd.f32 %v6235_v40, %v6026_v27  ;;  %v6445_v1 = vmul.f32 %v6428_v35, %v6347_v45  ;;  %v6418_v43 = vpop.f32.mrb[64].mxu1  ;;  %v6349_v49 = vpop.f32.mrb[53].mxu0  ;;  %v6767_v35 = vld [vmem:[%s13296_s9 + $0x8] sm:$0xff] }
 0xa12   :  { %v6447_v56 = vmul.f32 %v6436_v5, %v6418_v43  ;;  %v6446_v16 = vmul.f32 %v6432_v7, %v6349_v49  ;;  %v6420_v36 = vpop.f32.mrb[65].mxu1  ;;  %v6694_v40 = vpop.xlane.xlu0 %6693 }
 0xa13   :  { %v6449_v2 = vadd.f32 %v6445_v1, %v6236_v0  ;;  %v6448_v14 = vmul.f32 %v6440_v11, %v6420_v36  ;;  %v6700_v7 = vmul.f32 0.001953125, %v6694_v40  ;;  %v6751_v11 = vpop.permute.xlu1 %6750 }
 0xa14   :  { %v6451_v22 = vadd.f32 %v6447_v56, %v6238_v20  ;;  %v6450_v55 = vadd.f32 %v6446_v16, %v6237_v34  ;;  %v6560_v53 = vpop.f32.mrb[54].mxu0 }
 0xa15   :  { %v6452_v21 = vadd.f32 %v6448_v14, %v6239_v58  ;;  %v6658_v30 = vmul.f32 %v6641_v10, %v6560_v53  ;;  %v6562_v29 = vpop.f32.mrb[55].mxu0  ;;  %v6722_v0 = vmul.f32 %v6700_v7, %v6700_v7  ;;  %v6730_v36 = vsub.f32 %v12536_v63, %v6700_v7 }
 0xa16   :  { %v6659_v33 = vmul.f32 %v6645_v57, %v6562_v29  ;;  %v6714_v5 = vpop.xlane.xlu0 %6713  ;;  %v6731_v57 = vsub.f32 %v12538_v50, %v6700_v7  ;;  %v6733_v14 = vsub.f32 %v12551_v54, %v6700_v7 }
 0xa17   :  { %v6662_v15 = vadd.f32 %v6658_v30, %v6449_v2  ;;  %v6631_v62 = vpop.f32.mrb[66].mxu1  ;;  %v6720_v60 = vmul.f32 0.001953125, %v6714_v5  ;;  %v6732_v2 = vsub.f32 %v12546_v51, %v6700_v7  ;;  %v6794_v7 = vld [vmem:[#allocation12] sm:$0xff] }
 0xa18   :  { %v6663_v19 = vadd.f32 %v6659_v33, %v6450_v55  ;;  %v6660_v52 = vmul.f32 %v6649_v4, %v6631_v62  ;;  %v6633_v12 = vpop.f32.mrb[67].mxu1 }
 0xa19   :  { %v6670_v8 = vrot.slane %v6662_v15, 4  ;;  %v6661_v41 = vmul.f32 %v6653_v9, %v6633_v12  ;;  %v6724_v20 = vsub.f32 %v6720_v60, %v6722_v0  ;;  %v7057_v60 = vld [vmem:[#allocation4] sm:$0x1] }
 0xa1a   :  { %v6671_v13 = vrot.slane %v6663_v19, 4  ;;  %v6664_v18 = vadd.f32 %v6660_v52, %v6451_v22  ;;  %v7058_v0 = vsub.f32 0.0, %v7057_v60 }
 0xa1b   :  { %6678 = vst [vmem:[#allocation2 + $0x20] sm:$0xf0] %v6670_v8  ;;  %v6665_v31 = vadd.f32 %v6661_v41, %v6452_v21  ;;  %v6726_v34 = vadd.f32 1e-05, %v6724_v20 }
 0xa1c   :  { %6679 = vst [vmem:[#allocation2 + $0x28] sm:$0xf0] %v6671_v13  ;;  %v6672_v28 = vrot.slane %v6664_v18, 4  ;;  %v7059_v20 = vmul.f32 1.442695, %v7058_v0 }
 0xa1d   :  { %v6673_v38 = vrot.slane %v6665_v31, 4  ;;  %11187 = vrsqrt.f32 %v6726_v34 }
 0xa1e   :  { %6680 = vst [vmem:[#allocation2 + $0x30] sm:$0xf0] %v6672_v28 }
 0xa1f   :  { %6681 = vst [vmem:[#allocation2 + $0x38] sm:$0xf0] %v6673_v38 }
 0xa22   :  { %v6686_v47 = vld [vmem:[#allocation2 + $0x20] sm:$0xff] }
 0xa23   :  { %v6687_v42 = vld [vmem:[#allocation2 + $0x28] sm:$0xff]  ;;  %v6706_v6 = vmul.f32 %v6686_v47, %v6686_v47 }
 0xa24   :  { %v6695_v17 = vadd.f32 %v6687_v42, %v6686_v47  ;;  %v6707_v26 = vmul.f32 %v6687_v42, %v6687_v42 }
 0xa25   :  { %v6688_v23 = vld [vmem:[#allocation2 + $0x30] sm:$0xff] }
 0xa26   :  { %v6689_v3 = vld [vmem:[#allocation2 + $0x38] sm:$0xff]  ;;  %v6696_v32 = vadd.f32 %v6695_v17, %v6688_v23  ;;  %v6708_v27 = vmul.f32 %v6688_v23, %v6688_v23  ;;  %v6715_v25 = vadd.f32 %v6707_v26, %v6706_v6 }
 0xa27   :  { %v6709_v48 = vmul.f32 %v6689_v3, %v6689_v3  ;;  %v11188_v16 = vpop.eup %11187 }
 0xa28   :  { %v6697_v44 = vadd.f32 %v6696_v32, %v6689_v3  ;;  %v6716_v39 = vadd.f32 %v6715_v25, %v6708_v27  ;;  %v6738_v22 = vmul.f32 %v11188_v16, %v6730_v36  ;;  %v6739_v55 = vmul.f32 %v11188_v16, %v6731_v57  ;;  %v7112_v57 = vld [vmem:[#allocation5 + $0x88] sm:$0xff] }
 0xa29   :  { %v6740_v53 = vmul.f32 %v11188_v16, %v6732_v2  ;;  %v6741_v4 = vmul.f32 %v11188_v16, %v6733_v14  ;;  %v7095_v2 = vld [vmem:[#allocation5] sm:$0xff] }
 0xa2a   :  { %6698 = vadd.xlane.f32.xlu1 %v6697_v44  ;;  %v6717_v24 = vadd.f32 %v6716_v39, %v6709_v48  ;;  %v6758_v62 = vmul.f32 %v6751_v11, %v6738_v22  ;;  %v6759_v19 = vmul.f32 %v6751_v11, %v6739_v55  ;;  %v7096_v22 = vld [vmem:[#allocation5 + $0x8] sm:$0xff]  ;;  %v7143_v55 = vld [vmem:[#allocation5 + $0x180] sm:$0xff] }
 0xa2b   :  { %v6760_v52 = vmul.f32 %v6751_v11, %v6740_v53  ;;  %v6761_v63 = vmul.f32 %v6751_v11, %v6741_v4  ;;  %v7144_v53 = vld [vmem:[#allocation5 + $0x188] sm:$0xff]  ;;  %v10387_v4 = vpack.c.bf16 %v7096_v22, %v7095_v2  ;;  %v7121_v2 = vld [vmem:[#allocation5 + $0xd0] sm:$0xff] }
 0xa2c   :  { %6718 = vadd.xlane.f32.xlu0 %v6717_v24 }
 0xa3b   :  { %6770 = vperm.xlu1 %10610, %v6766_v46  }
 0xa3f   :  { %6775 = vperm.xlu1 %10610, %v6767_v35  }
 0xa42   :  { %6755 = vperm.xlu0 %10609, %v6747_v61  }
 0xab7   :  { %v6699_v58 = vpop.xlane.xlu1 %6698 }
 0xab8   :  { %v6701_v45 = vmul.f32 0.001953125, %v6699_v58 }
 0xab9   :  { %v6719_v1 = vpop.xlane.xlu0 %6718 }
 0xaba   :  { %v6721_v43 = vmul.f32 0.001953125, %v6719_v1  ;;  %v6723_v49 = vmul.f32 %v6701_v45, %v6701_v45  ;;  %v6734_v30 = vsub.f32 %v6686_v47, %v6701_v45  ;;  %v6735_v29 = vsub.f32 %v6687_v42, %v6701_v45 }
 0xabb   :  { %v6771_v21 = vpop.permute.xlu1 %6770  ;;  %v6736_v9 = vsub.f32 %v6688_v23, %v6701_v45  ;;  %v6737_v33 = vsub.f32 %v6689_v3, %v6701_v45 }
 0xabc   :  { %v6725_v10 = vsub.f32 %v6721_v43, %v6723_v49  ;;  %v6778_v41 = vadd.f32 %v6771_v21, %v6758_v62  ;;  %v6779_v54 = vadd.f32 %v6771_v21, %v6759_v19  ;;  %v6780_v13 = vadd.f32 %v6771_v21, %v6760_v52  ;;  %v7097_v62 = vld [vmem:[#allocation5 + $0x10] sm:$0xff]  ;;  %v7098_v19 = vld [vmem:[#allocation5 + $0x18] sm:$0xff] }
 0xabd   :  { %v6781_v18 = vadd.f32 %v6771_v21, %v6761_v63  ;;  %v10417_v21 = vpack.c.bf16 %v7144_v53, %v7143_v55  ;;  %v10391_v63 = vpack.c.bf16 %v7098_v19, %v7097_v62  ;;  %v7105_v55 = vld [vmem:[#allocation5 + $0x50] sm:$0xff]  ;;  %v7106_v53 = vld [vmem:[#allocation5 + $0x58] sm:$0xff]  ;;  %v7123_v62 = vld [vmem:[#allocation5 + $0xe0] sm:$0xff] }
 0xabe   :  { %v6727_v56 = vadd.f32 1e-05, %v6725_v10  ;;  %v6786_v32 = vmax.f32 %v6778_v41, 0.0  ;;  %v6788_v27 = vmax.f32 %v6780_v13, 0.0  ;;  %v6787_v25 = vmax.f32 %v6779_v54, 0.0  ;;  %v12857_v10 = vld [vmem:[#allocation3] sm:$0xff] }
 0xabf   :  { %v6776_v6 = vpop.permute.xlu1 %6775  ;;  %v6789_v48 = vmax.f32 %v6781_v18, 0.0  ;;  %v7130_v41 = vld [vmem:[#allocation5 + $0x118] sm:$0xff]  ;;  %v7115_v54 = vld [vmem:[#allocation5 + $0xa0] sm:$0xff]  ;;  %v7116_v13 = vld [vmem:[#allocation5 + $0xa8] sm:$0xff] }
 0xac0   :  { %11189 = vrsqrt.f32 %v6727_v56  ;;  %v7124_v19 = vld [vmem:[#allocation5 + $0xe8] sm:$0xff] }
 0xac1   :  { %v6756_v31 = vpop.permute.xlu0 %6755  ;;  %11191 = vpow2.f32 %v7059_v20  ;;  %v7103_v20 = vld [vmem:[#allocation5 + $0x40] sm:$0xff] }
 0xaca   :  { %v11190_v15 = vpop.eup %11189 }
 0xacb   :  { %v6742_v12 = vmul.f32 %v11190_v15, %v6734_v30  ;;  %v6743_v50 = vmul.f32 %v11190_v15, %v6735_v29  ;;  %v6744_v8 = vmul.f32 %v11190_v15, %v6736_v9  ;;  %v6745_v51 = vmul.f32 %v11190_v15, %v6737_v33  ;;  %v11192_v11 = vpop.eup %11191  ;;  %v7127_v30 = vld [vmem:[#allocation5 + $0x100] sm:$0xff]  ;;  %v7128_v29 = vld [vmem:[#allocation5 + $0x108] sm:$0xff]  ;;  %v7113_v9 = vld [vmem:[#allocation5 + $0x90] sm:$0xff] }
 0xacc   :  { %v7061_v34 = vadd.f32 1.0, %v11192_v11  ;;  %v10419_v33 = vpack.c.bf16 %v7128_v29, %v7127_v30  ;;  %v7114_v15 = vld [vmem:[#allocation5 + $0x98] sm:$0xff]  ;;  %v7104_v11 = vld [vmem:[#allocation5 + $0x48] sm:$0xff]  ;;  %v7137_v29 = vld [vmem:[#allocation5 + $0x150] sm:$0xff] }
 0xacd   :  { %v6762_v28 = vmul.f32 %v6756_v31, %v6742_v12  ;;  %v6763_v38 = vmul.f32 %v6756_v31, %v6743_v50  ;;  %v6764_v47 = vmul.f32 %v6756_v31, %v6744_v8  ;;  %v6765_v42 = vmul.f32 %v6756_v31, %v6745_v51  ;;  %v7145_v12 = vld [vmem:[#allocation5 + $0x190] sm:$0xff]  ;;  %v7146_v50 = vld [vmem:[#allocation5 + $0x198] sm:$0xff] }
 0xace   :  { %11193 = vrcp.f32 %v7061_v34  ;;  %v10389_v52 = vpack.c.bf16 %v7114_v15, %v7113_v9  ;;  %v7129_v8 = vld [vmem:[#allocation5 + $0x110] sm:$0xff]  ;;  %v10421_v51 = vpack.c.bf16 %v7146_v50, %v7145_v12  ;;  %v10393_v31 = vpack.c.bf16 %v7116_v13, %v7115_v54  ;;  %v7151_v34 = vld [vmem:[#allocation5 + $0x1c0] sm:$0xff]  ;;  %v7154_v30 = vld [vmem:[#allocation5 + $0x1d8] sm:$0xff] }
 0xacf   :  { %v6782_v17 = vadd.f32 %v6776_v6, %v6762_v28  ;;  %v6784_v26 = vadd.f32 %v6776_v6, %v6764_v47  ;;  %v6783_v23 = vadd.f32 %v6776_v6, %v6763_v38  ;;  %v6785_v3 = vadd.f32 %v6776_v6, %v6765_v42  ;;  %v7099_v28 = vld [vmem:[#allocation5 + $0x20] sm:$0xff]  ;;  %v7100_v38 = vld [vmem:[#allocation5 + $0x28] sm:$0xff]  ;;  %v7138_v9 = vld [vmem:[#allocation5 + $0x158] sm:$0xff] }
 0xad0   :  { %v10423_v18 = vpack.c.bf16 %v7130_v41, %v7129_v8  ;;  %v7147_v47 = vld [vmem:[#allocation5 + $0x1a0] sm:$0xff]  ;;  %v7148_v42 = vld [vmem:[#allocation5 + $0x1a8] sm:$0xff]  ;;  %v10439_v15 = vpack.c.bf16 %v7138_v9, %v7137_v29 }
 0xad1   :  { %v6790_v44 = vmax.f32 %v6782_v17, 0.0  ;;  %v6792_v39 = vmax.f32 %v6784_v26, 0.0  ;;  %v6791_v24 = vmax.f32 %v6783_v23, 0.0  ;;  %v6793_v46 = vmax.f32 %v6785_v3, 0.0  ;;  %v7131_v6 = vld [vmem:[#allocation5 + $0x120] sm:$0xff]  ;;  %v7132_v17 = vld [vmem:[#allocation5 + $0x128] sm:$0xff] }
 0xad2   :  { %v10395_v26 = vpack.c.bf16 %v7100_v38, %v7099_v28  ;;  %v10425_v23 = vpack.c.bf16 %v7148_v42, %v7147_v47  ;;  %v7117_v3 = vld [vmem:[#allocation5 + $0xb0] sm:$0xff]  ;;  %v7108_v12 = vld [vmem:[#allocation5 + $0x68] sm:$0xff]  ;;  %v7155_v50 = vld [vmem:[#allocation5 + $0x1e0] sm:$0xff] }
 0xad3   :  { %v10377_v35 = vpack.c.bf16 %v6791_v24, %v6787_v25  ;;  %v10381_v61 = vpack.c.bf16 %v6793_v46, %v6789_v48  ;;  %v10379_v40 = vpack.c.bf16 %v6790_v44, %v6786_v32  ;;  %v10383_v5 = vpack.c.bf16 %v6792_v39, %v6788_v27  ;;  %v7118_v32 = vld [vmem:[#allocation5 + $0xb8] sm:$0xff]  ;;  %v7101_v27 = vld [vmem:[#allocation5 + $0x30] sm:$0xff]  ;;  %v7156_v41 = vld [vmem:[#allocation5 + $0x1e8] sm:$0xff] }
 0xad4   :  { %v10427_v25 = vpack.c.bf16 %v7132_v17, %v7131_v6  ;;  %v10397_v48 = vpack.c.bf16 %v7118_v32, %v7117_v3  ;;  %v7102_v44 = vld [vmem:[#allocation5 + $0x38] sm:$0xff]  ;;  %v7149_v39 = vld [vmem:[#allocation5 + $0x1b0] sm:$0xff]  ;;  %v7139_v54 = vld [vmem:[#allocation5 + $0x160] sm:$0xff] }
 0xad5   :  { %10378 = vmatprep.subr.bf16.mxu0 %v10377_v35  ;;  %10382 = vmatprep.subr.bf16.mxu1 %v10381_v61  ;;  %v7150_v24 = vld [vmem:[#allocation5 + $0x1b8] sm:$0xff]  ;;  %v7133_v35 = vld [vmem:[#allocation5 + $0x130] sm:$0xff]  ;;  %v7140_v13 = vld [vmem:[#allocation5 + $0x168] sm:$0xff] }
 0xad6   :  { %10380 = vmatpush1.bf16.msra.mxu0 %v10379_v40  ;;  %10384 = vmatpush1.bf16.msra.mxu1 %v10383_v5  ;;  %v10429_v46 = vpack.c.bf16 %v7150_v24, %v7149_v39  ;;  %v7134_v61 = vld [vmem:[#allocation5 + $0x138] sm:$0xff]  ;;  %v7119_v40 = vld [vmem:[#allocation5 + $0xc0] sm:$0xff]  ;;  %v7120_v5 = vld [vmem:[#allocation5 + $0xc8] sm:$0xff]  ;;  %v10443_v28 = vpack.c.bf16 %v7140_v13, %v7139_v54 }
 0xad7   :  { %10418 = vmatprep.subr.bf16.mxu1 %v10417_v21  ;;  %v10431_v60 = vpack.c.bf16 %v7134_v61, %v7133_v35  ;;  %v10401_v0 = vpack.c.bf16 %v7120_v5, %v7119_v40  ;;  %v10407_v21 = vpack.c.bf16 %v7106_v53, %v7105_v55  ;;  %v7125_v47 = vld [vmem:[#allocation5 + $0xf0] sm:$0xff]  ;;  %v7126_v42 = vld [vmem:[#allocation5 + $0xf8] sm:$0xff] }
 0xad8   :  { %v11194_v49 = vpop.eup %11193  ;;  %v7110_v3 = vld [vmem:[#allocation5 + $0x78] sm:$0xff]  ;;  %v7157_v32 = vld [vmem:[#allocation5 + $0x1f0] sm:$0xff] }
 0xad9   :  { %9827 = vmatmul.mubr.msk.f32.vlgmr.msra.gmra.mrb[56].mxu0 %vm487_vm3, %v6794_v7  ;;  %9828 = vmatmul.mubr.msk.f32.vlgmr.msra.gmra.mrb[68].mxu1 %vm487_vm3, %v6794_v7  ;;  %v7068_v56 = vrot.slane %v11194_v49, %v11875_v37  ;;  %v7077_v16 = vsub.f32 1.0, %v11194_v49  ;;  %v10399_v7 = vpack.c.bf16 %v7102_v44, %v7101_v27  ;;  %v10403_v49 = vpack.c.bf16 %v7104_v11, %v7103_v20  ;;  %v7141_v44 = vld [vmem:[#allocation5 + $0x170] sm:$0xff]  ;;  %v7142_v39 = vld [vmem:[#allocation5 + $0x178] sm:$0xff] }
 0xada   :  { %10420 = vmatpush3.bf16.msra.mxu1 %v10419_v33  ;;  %v10447_v35 = vpack.c.bf16 %v7142_v39, %v7141_v44 }
 0xadb   :  { %v7082_v36 = vrot.slane %v7077_v16, %v11875_v37  ;;  %v7111_v37 = vld [vmem:[#allocation5 + $0x80] sm:$0xff]  ;;  %10422 = vmatprep.subr.bf16.mxu1 %v10421_v51 }
 0xadc   :  { %v10385_v14 = vpack.c.bf16 %v7112_v57, %v7111_v37  ;;  %v7135_v16 = vld [vmem:[#allocation5 + $0x140] sm:$0xff] }
 0xade   :  { %10386 = vmatprep.subr.bf16.mxu0 %v10385_v14  ;;  %10424 = vmatpush3.bf16.msra.mxu1 %v10423_v18  ;;  %v7122_v14 = vld [vmem:[#allocation5 + $0xd8] sm:$0xff] }
 0xadf   :  { %10388 = vmatpush3.bf16.msra.mxu0 %v10387_v4  ;;  %10426 = vmatprep.subr.bf16.mxu1 %v10425_v23  ;;  %v10405_v22 = vpack.c.bf16 %v7122_v14, %v7121_v2  ;;  %v7153_v4 = vld [vmem:[#allocation5 + $0x1d0] sm:$0xff] }
 0xae0   :  { %10390 = vmatprep.subr.bf16.mxu0 %v10389_v52  ;;  %v10437_v33 = vpack.c.bf16 %v7154_v30, %v7153_v4  ;;  %v10409_v52 = vpack.c.bf16 %v7124_v19, %v7123_v62  ;;  %v7109_v23 = vld [vmem:[#allocation5 + $0x70] sm:$0xff] }
 0xae2   :  { %10428 = vmatpush3.bf16.msra.mxu1 %v10427_v25  ;;  %v10415_v25 = vpack.c.bf16 %v7110_v3, %v7109_v23 }
 0xae3   :  { %10392 = vmatpush3.bf16.msra.mxu0 %v10391_v63  ;;  %10430 = vmatprep.subr.bf16.mxu1 %v10429_v46  ;;  %v7107_v63 = vld [vmem:[#allocation5 + $0x60] sm:$0xff] }
 0xae4   :  { %10394 = vmatprep.subr.bf16.mxu0 %v10393_v31  ;;  %v10411_v51 = vpack.c.bf16 %v7108_v12, %v7107_v63  ;;  %v10441_v31 = vpack.c.bf16 %v7156_v41, %v7155_v50 }
 0xae6   :  { %10432 = vmatpush3.bf16.msra.mxu1 %v10431_v60 }
 0xae7   :  { %10396 = vmatpush3.bf16.msra.mxu0 %v10395_v26  ;;  %v10413_v26 = vpack.c.bf16 %v7126_v42, %v7125_v47 }
 0xae8   :  { %10398 = vmatprep.subr.bf16.mxu0 %v10397_v48  ;;  %v7158_v48 = vld [vmem:[#allocation5 + $0x1f8] sm:$0xff] }
 0xae9   :  { %v10445_v46 = vpack.c.bf16 %v7158_v48, %v7157_v32 }
 0xaeb   :  { %10400 = vmatpush3.bf16.msra.mxu0 %v10399_v7 }
 0xaec   :  { %10402 = vmatprep.subr.bf16.mxu0 %v10401_v0 }
 0xaef   :  { %10404 = vmatpush3.bf16.msra.mxu0 %v10403_v49 }
 0xaf0   :  { %10406 = vmatprep.subr.bf16.mxu0 %v10405_v22 }
 0xaf3   :  { %10408 = vmatpush3.bf16.msra.mxu0 %v10407_v21 }
 0xaf4   :  { %10410 = vmatprep.subr.bf16.mxu0 %v10409_v52 }
 0xaf7   :  { %10412 = vmatpush3.bf16.msra.mxu0 %v10411_v51 }
 0xaf8   :  { %10414 = vmatprep.subr.bf16.mxu0 %v10413_v26 }
 0xafb   :  { %10416 = vmatpush3.bf16.msra.mxu0 %v10415_v25 }
 0xbac   :  { %v12842_v58 = vpop.f32.mrb[56].mxu0  ;;  %v12844_v45 = vpop.f32.mrb[68].mxu1 }
 0xbad   :  { %6942 = vst [vmem:[#allocation3 + $0x18] sm:$0xff] %v12844_v45  ;;  %v12847_v1 = vpop.f32.mrb[57].mxu0  ;;  %v12849_v43 = vpop.f32.mrb[69].mxu1  ;;  %6958 = vrot.lane.b32.xlu1 %v12844_v45, %s11413_s12 }
 0xbae   :  { %6941 = vst [vmem:[#allocation3 + $0x10] sm:$0xff] %v12847_v1  ;;  %6943 = vst [vmem:[#allocation3 + $0x20] sm:$0xff] %v12849_v43  ;;  %6956 = vrot.lane.b32.xlu0 %v12847_v1, %s11413_s12 }
 0xbb1   :  { %6962 = vrot.lane.b32.xlu1 %v12857_v10, %s11413_s12 }
 0xbb2   :  { %6960 = vrot.lane.b32.xlu0 %v12849_v43, %s11413_s12 }
 0xbb5   :  { %7070 = vperm.xlu1 %10610, %v7068_v56   ;;  %v7152_v56 = vld [vmem:[#allocation5 + $0x1c8] sm:$0xff] }
 0xbb6   :  { %6954 = vrot.lane.b32.xlu0 %v12842_v58, %s11413_s12  ;;  %v10433_v37 = vpack.c.bf16 %v7152_v56, %v7151_v34 }
 0xbb8   :  { %10434 = vmatprep.subr.bf16.mxu1 %v10433_v37 }
 0xbb9   :  { %7009 = vrot.lane.b32.xlu1 %v12842_v58, %s11415_s10 }
 0xbba   :  { %7013 = vrot.lane.b32.xlu0 %v12844_v45, %s11415_s10 }
 0xbbd   :  { %7035 = vrot.lane.b32.xlu1 %v12844_v45, %s11416_s7 }
 0xbbe   :  { %7017 = vrot.lane.b32.xlu0 %v12857_v10, %s11415_s10 }
 0xbc1   :  { %7039 = vrot.lane.b32.xlu1 %v12857_v10, %s11416_s7 }
 0xbc2   :  { %7084 = vperm.xlu0 %10609, %v7082_v36   ;;  %v7136_v36 = vld [vmem:[#allocation5 + $0x148] sm:$0xff] }
 0xbc3   :  { %v10435_v57 = vpack.c.bf16 %v7136_v36, %v7135_v16 }
 0xbc5   :  { %7011 = vrot.lane.b32.xlu1 %v12847_v1, %s11415_s10  ;;  %10436 = vmatpush3.bf16.msra.mxu1 %v10435_v57 }
 0xbc6   :  { %7031 = vrot.lane.b32.xlu0 %v12842_v58, %s11416_s7  ;;  %10438 = vmatprep.subr.bf16.mxu1 %v10437_v33 }
 0xbc9   :  { %7015 = vrot.lane.b32.xlu1 %v12849_v43, %s11415_s10  ;;  %10440 = vmatpush3.bf16.msra.mxu1 %v10439_v15 }
 0xbca   :  { %7033 = vrot.lane.b32.xlu0 %v12847_v1, %s11416_s7  ;;  %10442 = vmatprep.subr.bf16.mxu1 %v10441_v31 }
 0xbcd   :  { %10444 = vmatpush3.bf16.msra.mxu1 %v10443_v28 }
 0xbce   :  { %7037 = vrot.lane.b32.xlu0 %v12849_v43, %s11416_s7  ;;  %10446 = vmatprep.subr.bf16.mxu1 %v10445_v46 }
 0xbd1   :  { %10448 = vmatpush3.bf16.msra.mxu1 %v10447_v35 }
 0xc1f   :  { %v6959_v8 = vpop.permute.xlu1 %6958 }
 0xc20   :  { %v6957_v18 = vpop.permute.xlu0 %6956 }
 0xc21   :  { %v6965_v38 = vsel %vm1286_vm6, %v6957_v18, %v6959_v8 }
 0xc22   :  { %v12889_v6 = vmax.f32 %v12847_v1, %v6965_v38  ;;  %v7006_v17 = vadd.f32 %v6965_v38, %v12847_v1 }
 0xc23   :  { %v6963_v27 = vpop.permute.xlu1 %6962 }
 0xc24   :  { %6985 = vrot.lane.b32.xlu1 %v12889_v6, %s11415_s10  ;;  %v6961_v24 = vpop.permute.xlu0 %6960  ;;  %v6977_v34 = vmax.f32 %v12857_v10, %v6963_v27 }
 0xc25   :  { %v6966_v61 = vsel %vm1286_vm6, %v6959_v8, %v6961_v24  ;;  %v6967_v40 = vsel %vm1286_vm6, %v6961_v24, %v6963_v27 }
 0xc26   :  { %v12897_v5 = vmax.f32 %v12844_v45, %v6966_v61  ;;  %v12900_v7 = vmax.f32 %v12849_v43, %v6967_v40  ;;  %v7007_v60 = vadd.f32 %v6966_v61, %v12844_v45  ;;  %v7008_v0 = vadd.f32 %v6967_v40, %v12849_v43 }
 0xc28   :  { %6989 = vrot.lane.b32.xlu1 %v12900_v7, %s11415_s10  ;;  %6987 = vrot.lane.b32.xlu0 %v12897_v5, %s11415_s10  ;;  %v6955_v20 = vpop.permute.xlu0 %6954 }
 0xc29   :  { %v6964_v11 = vsel %vm1286_vm6, %v6955_v20, %v6957_v18 }
 0xc2a   :  { %v6972_v49 = vmax.f32 %v12842_v58, %v6964_v11  ;;  %v7005_v56 = vadd.f32 %v6964_v11, %v12842_v58 }
 0xc2c   :  { %6991 = vrot.lane.b32.xlu0 %v6977_v34, %s11415_s10  ;;  %6983 = vrot.lane.b32.xlu1 %v6972_v49, %s11415_s10  ;;  %v7014_v43 = vpop.permute.xlu0 %7013  ;;  %s13307_s10 = sld [smem:[#allocation39_spill]] }
 0xc30   :  { %v7018_v36 = vpop.permute.xlu0 %7017 }
 0xc34   :  { %v7071_v45 = vpop.permute.xlu1 %7070 }
 0xc38   :  { %v7010_v16 = vpop.permute.xlu1 %7009 }
 0xc3c   :  { %v7036_v37 = vpop.permute.xlu1 %7035 }
 0xc40   :  { %v7040_v2 = vpop.permute.xlu1 %7039 }
 0xc41   :  { %v7085_v57 = vpop.permute.xlu0 %7084 }
 0xc44   :  { %v7012_v22 = vpop.permute.xlu1 %7011 }
 0xc45   :  { %v7032_v14 = vpop.permute.xlu0 %7031  ;;  %v7020_v53 = vsel %vm1688_vm8, %v7012_v22, %v7014_v43  ;;  %v7019_v29 = vsel %vm1688_vm8, %v7010_v16, %v7012_v22 }
 0xc46   :  { %v7028_v58 = vadd.f32 %v7020_v53, %v7006_v17  ;;  %v7027_v63 = vadd.f32 %v7019_v29, %v7005_v56 }
 0xc48   :  { %v7016_v4 = vpop.permute.xlu1 %7015 }
 0xc49   :  { %v7034_v55 = vpop.permute.xlu0 %7033  ;;  %v7022_v9 = vsel %vm1688_vm8, %v7016_v4, %v7018_v36  ;;  %v7021_v33 = vsel %vm1688_vm8, %v7014_v43, %v7016_v4 }
 0xc4a   :  { %v7042_v21 = vsel %vm1889_vm9, %v7034_v55, %v7036_v37  ;;  %v7041_v19 = vsel %vm1889_vm9, %v7032_v14, %v7034_v55  ;;  %v7030_v12 = vadd.f32 %v7022_v9, %v7008_v0  ;;  %v7029_v8 = vadd.f32 %v7021_v33, %v7007_v60  ;;  %v7330_v14 = vld [vmem:[#allocation9] sm:$0xff] }
 0xc4b   :  { %v7050_v15 = vadd.f32 %v7042_v21, %v7028_v58  ;;  %v7049_v51 = vadd.f32 %v7041_v19, %v7027_v63 }
 0xc4d   :  { %v7038_v30 = vpop.permute.xlu0 %7037  ;;  %v7054_v41 = vmul.f32 0.25, %v7050_v15  ;;  %v7053_v17 = vmul.f32 0.25, %v7049_v51 }
 0xc4e   :  { %v7044_v52 = vsel %vm1889_vm9, %v7038_v30, %v7040_v2  ;;  %v7043_v50 = vsel %vm1889_vm9, %v7036_v37, %v7038_v30  ;;  %v7322_v37 = vld [vmem:[%s13297_s16] sm:$0xff] }
 0xc4f   :  { %v7052_v54 = vadd.f32 %v7044_v52, %v7030_v12  ;;  %v7051_v31 = vadd.f32 %v7043_v50, %v7029_v8  ;;  %v7088_v26 = vmul.f32 %v7085_v57, %v7054_v41  ;;  %v7087_v61 = vmul.f32 %v7085_v57, %v7053_v17  ;;  %v7439_v2 = vld [vmem:[%s13299_s15] sm:$0xff] }
 0xc50   :  { %v7331_v12 = vld [vmem:[#allocation9 + $0x8] sm:$0xff] }
 0xc51   :  { %v7056_v23 = vmul.f32 0.25, %v7052_v54  ;;  %v7055_v25 = vmul.f32 0.25, %v7051_v31  ;;  %v7453_v54 = vld [vmem:[%s13300_s17] sm:$0xff] }
 0xc53   :  { %v7089_v60 = vmul.f32 %v7085_v57, %v7055_v25 }
 0xc96   :  { %v6986_v62 = vpop.permute.xlu1 %6985 }
 0xc9a   :  { %v6990_v13 = vpop.permute.xlu1 %6989  ;;  %v6988_v18 = vpop.permute.xlu0 %6987 }
 0xc9b   :  { %v6994_v28 = vsel %vm1688_vm8, %v6986_v62, %v6988_v18  ;;  %v6995_v38 = vsel %vm1688_vm8, %v6988_v18, %v6990_v13  ;;  %v7440_v18 = vld [vmem:[%s13299_s15 + $0x8] sm:$0xff] }
 0xc9c   :  { %v7002_v47 = vmax.f32 %v12889_v6, %v6994_v28  ;;  %v7003_v42 = vmax.f32 %v12897_v5, %v6995_v38  ;;  %v7090_v6 = vmul.f32 %v7085_v57, %v7056_v23  ;;  %v7315_v57 = vld [vmem:[%s13298_s21] sm:$0xff] }
 0xc9e   :  { %v7074_v3 = vmul.f32 %v7071_v45, %v7002_v47  ;;  %v6984_v32 = vpop.permute.xlu1 %6983  ;;  %v6992_v27 = vpop.permute.xlu0 %6991  ;;  %v7075_v35 = vmul.f32 %v7071_v45, %v7003_v42 }
 0xc9f   :  { %v6993_v48 = vsel %vm1688_vm8, %v6984_v32, %v6986_v62  ;;  %v6996_v44 = vsel %vm1688_vm8, %v6990_v13, %v6992_v27  ;;  %v7454_v13 = vld [vmem:[%s13300_s17 + $0x8] sm:$0xff] }
 0xca0   :  { %v7001_v39 = vmax.f32 %v6972_v49, %v6993_v48  ;;  %v7004_v24 = vmax.f32 %v12900_v7, %v6996_v44  ;;  %v7092_v46 = vadd.f32 %v7088_v26, %v7074_v3  ;;  %v7093_v11 = vadd.f32 %v7089_v60, %v7075_v35 }
 0xca2   :  { %v7073_v40 = vmul.f32 %v7071_v45, %v7001_v39  ;;  %v7076_v5 = vmul.f32 %v7071_v45, %v7004_v24  ;;  %7223 = vmatprep.mubr.f32.mxu0 %v7092_v46 }
 0xca4   :  { %v7091_v0 = vadd.f32 %v7087_v61, %v7073_v40  ;;  %v7094_v20 = vadd.f32 %v7090_v6, %v7076_v5 }
 0xca6   :  { %7224 = vmatmul.mubr.f32.vlgmr.msra.gmra.mrb[58].mxu0 %v7091_v0  ;;  %7293 = vmatprep.mubr.f32.mxu1 %v7094_v20 }
 0xca7   :  { %7294 = vmatmul.mubr.f32.vlgmr.msra.gmra.mrb[70].mxu1 %v7093_v11  ;;  %10043 = vmatprep.mubr.msk.f32.mxu0 %vm2141_vm10, %v7330_v14 }
 0xca8   :  { %10050 = vmatprep.mubr.msk.f32.mxu1 %vm11421_vm15, %v12857_v10 }
 0xd79   :  { %v9920_v34 = vpop.f32.mrb[58].mxu0 }
 0xd7a   :  { %v9921_v49 = vpop.f32.mrb[59].mxu0  ;;  %v9955_v7 = vpop.f32.mrb[70].mxu1 }
 0xd7b   :  { %v9922_v56 = vadd.f32 %v9921_v49, %v9920_v34  ;;  %v9956_v43 = vpop.f32.mrb[71].mxu1 }
 0xd7c   :  { %v9957_v16 = vadd.f32 %v9956_v43, %v9955_v7  ;;  %v11419_v7 = vmov 0.0|0.0  }
 0xd7d   :  { %10449 = vmatprep.subr.bf16.mxu1 %v11419_v7 }
 0xd7e   :  { %v12929_v36 = vadd.f32 %v9957_v16, %v9922_v56 }
 0xd80   :  { %7299 = vst [vmem:[#allocation2] sm:$0xff] %v12929_v36  ;;  %7301 = vadd.xlane.f32.xlu0 %v12929_v36  ;;  %v12935_v45 = vmul.f32 %v12929_v36, %v12929_v36 }
 0xd82   :  { %7306 = vadd.xlane.f32.xlu1 %v12935_v45 }
 0xd93   :  { %7325 = vperm.xlu1 %10610, %v7322_v37  }
 0xd96   :  { %7318 = vperm.xlu0 %10609, %v7315_v57  }
 0xd97   :  { %7443 = vperm.xlu1 %10610, %v7439_v2  }
 0xe0d   :  { %v7302_v22 = vpop.xlane.xlu0 %7301 }
 0xe0e   :  { %v7304_v55 = vmul.f32 0.0078125, %v7302_v22  ;;  %v8356_v22 = vld [vmem:[%s13301_s22] sm:$0xff] }
 0xe0f   :  { %v7307_v53 = vpop.xlane.xlu1 %7306 }
 0xe10   :  { %v7309_v4 = vmul.f32 %v7304_v55, %v7304_v55  ;;  %v7308_v21 = vmul.f32 0.0078125, %v7307_v53  ;;  %v7313_v29 = vsub.f32 %v12929_v36, %v7304_v55 }
 0xe12   :  { %v7310_v58 = vsub.f32 %v7308_v21, %v7309_v4 }
 0xe13   :  { %v7326_v19 = vpop.permute.xlu1 %7325 }
 0xe14   :  { %v7311_v30 = vadd.f32 1e-05, %v7310_v58 }
 0xe15   :  { %v7319_v15 = vpop.permute.xlu0 %7318 }
 0xe16   :  { %11195 = vrsqrt.f32 %v7311_v30 }
 0xe17   :  { %v7444_v31 = vpop.permute.xlu1 %7443 }
 0xe20   :  { %v11196_v9 = vpop.eup %11195 }
 0xe21   :  { %v7314_v33 = vmul.f32 %v11196_v9, %v7313_v29 }
 0xe23   :  { %v7321_v62 = vmul.f32 %v7319_v15, %v7314_v33 }
 0xe25   :  { %v7328_v52 = vadd.f32 %v7326_v19, %v7321_v62 }
 0xe27   :  { %v7329_v63 = vmax.f32 %v7328_v52, 0.0 }
 0xe29   :  { %10041 = vmatprep.subr.mxu0 %v7329_v63 }
 0xe2a   :  { %10042 = vmatpush3.msra.mxu0 %v7329_v63 }
 0xe2b   :  { %10044 = vmatmul.mubr.msk.f32.vlgmr.msra.gmra.mrb[60].mxu0 %vm2141_vm10, %v7331_v12  ;;  %10452 = vmatprep.subr.bf16.mxu0 %v11419_v7 }
 0xe2c   :  { %10057 = vmatprep.mubr.msk.f32.mxu0 %vm11421_vm15, %v12857_v10 }
 0xefe   :  { %v10045_v50 = vpop.f32.mrb[60].mxu0 }
 0xeff   :  { %7415 = vadd.xlane.f32.xlu1 %v10045_v50  ;;  %v7404_v8 = vpop.f32.mrb[61].mxu0  ;;  %v7420_v51 = vmul.f32 %v10045_v50, %v10045_v50 }
 0xf00   :  { %7413 = vadd.xlane.f32.xlu0 %v7404_v8  ;;  %v7419_v41 = vmul.f32 %v7404_v8, %v7404_v8 }
 0xf04   :  { %7423 = vadd.xlane.f32.xlu0 %v7420_v51 }
 0xf08   :  { %7421 = vadd.xlane.f32.xlu0 %v7419_v41 }
 0xf10   :  { %7457 = vperm.xlu1 %10610, %v7453_v54  }
 0xf14   :  { %7462 = vperm.xlu1 %10610, %v7454_v13  }
 0xf1e   :  { %7448 = vperm.xlu0 %10609, %v7440_v18  }
 0xf8c   :  { %v7416_v28 = vpop.xlane.xlu1 %7415 }
 0xf8d   :  { %v7414_v38 = vpop.xlane.xlu0 %7413  ;;  %v7418_v47 = vmul.f32 0.0078125, %v7416_v28 }
 0xf8e   :  { %v7417_v26 = vmul.f32 0.0078125, %v7414_v38 }
 0xf8f   :  { %v7428_v17 = vmul.f32 %v7418_v47, %v7418_v47  ;;  %v7436_v46 = vsub.f32 %v10045_v50, %v7418_v47 }
 0xf90   :  { %v7427_v27 = vmul.f32 %v7417_v26, %v7417_v26  ;;  %v7458_v24 = vpop.permute.xlu1 %7457  ;;  %v7435_v40 = vsub.f32 %v7404_v8, %v7417_v26  ;;  %v7475_v8 = vld [vmem:[%s13302_s28] sm:$0xf] }
 0xf91   :  { %v7424_v42 = vpop.xlane.xlu0 %7423 }
 0xf92   :  { %v7426_v23 = vmul.f32 0.0078125, %v7424_v42  ;;  %v9833_v42 = vld [vmem:[%s13302_s28 + $0x4] sm:$0xf] }
 0xf94   :  { %v7430_v3 = vsub.f32 %v7426_v23, %v7428_v17  ;;  %v7463_v0 = vpop.permute.xlu1 %7462 }
 0xf95   :  { %v7422_v32 = vpop.xlane.xlu0 %7421 }
 0xf96   :  { %v7432_v25 = vadd.f32 1e-05, %v7430_v3  ;;  %v7425_v48 = vmul.f32 0.0078125, %v7422_v32 }
 0xf98   :  { %11197 = vrsqrt.f32 %v7432_v25  ;;  %v7429_v44 = vsub.f32 %v7425_v48, %v7427_v27 }
 0xf9a   :  { %v7431_v39 = vadd.f32 1e-05, %v7429_v44 }
 0xf9c   :  { %11199 = vrsqrt.f32 %v7431_v39  ;;  %v9836_v39 = vld [vmem:[%s13302_s28 + $0x8] sm:$0xf] }
 0xf9d   :  { %v7449_v6 = vpop.permute.xlu0 %7448 }
 0xfa2   :  { %v11198_v35 = vpop.eup %11197 }
 0xfa3   :  { %v7438_v61 = vmul.f32 %v11198_v35, %v7436_v46 }
 0xfa5   :  { %v7452_v5 = vmul.f32 %v7449_v6, %v7438_v61 }
 0xfa6   :  { %v11200_v60 = vpop.eup %11199 }
 0xfa7   :  { %v7437_v20 = vmul.f32 %v11200_v60, %v7435_v40  ;;  %v7466_v11 = vadd.f32 %v7463_v0, %v7452_v5 }
 0xfa9   :  { %v7451_v34 = vmul.f32 %v7444_v31, %v7437_v20  ;;  %v12947_v49 = vmax.f32 %v7466_v11, 0.0  ;;  %v9839_v20 = vld [vmem:[%s13302_s28 + $0xc] sm:$0xf]  ;;  %v9842_v11 = vld [vmem:[%s13302_s28 + $0x10] sm:$0xf] }
 0xfab   :  { %v7465_v56 = vadd.f32 %v7458_v24, %v7451_v34  ;;  %v11011_v43 = vpack.i.bf16 %v12947_v49, %v12857_v10 }
 0xfad   :  { %v12953_v16 = vmax.f32 %v7465_v56, 0.0  ;;  %11012 = vrot.lane.b32.xlu1 %v11011_v43, %s11420_s18 }
 0xfaf   :  { %v11046_v37 = vpack.i.bf16 %v12953_v16, %v12857_v10  ;;  %v11066_v57 = vpack.i.bf16 %v12847_v1, %v12953_v16  ;;  %v10462_v2 = vpack.c.bf16 %v12947_v49, %v12953_v16  ;;  %v12972_v1 = vld [vmem:[#allocation3 + $0x40] sm:$0xff] }
 0xfb0   :  { %v11031_v14 = vpack.i.bf16 %v12972_v1, %v12947_v49 }
 0xfb1   :  { %11047 = vrot.lane.b32.xlu0 %v11046_v37, %s11420_s18  ;;  %11017 = vrot.lane.b32.xlu1 %v11011_v43, %s11403_s26 }
 0xfb5   :  { %11052 = vrot.lane.b32.xlu0 %v11046_v37, %s11403_s26  ;;  %11022 = vrot.lane.b32.xlu1 %v11011_v43, %s11422_s23 }
 0xfb9   :  { %11057 = vrot.lane.b32.xlu0 %v11046_v37, %s11422_s23  ;;  %11027 = vrot.lane.b32.xlu1 %v11011_v43, %s11412_s4 }
 0xfbd   :  { %11062 = vrot.lane.b32.xlu0 %v11046_v37, %s11412_s4  ;;  %11032 = vrot.lane.b32.xlu1 %v11031_v14, %s11413_s12 }
 0xfc1   :  { %11067 = vrot.lane.b32.xlu0 %v11066_v57, %s11413_s12  ;;  %11037 = vrot.lane.b32.xlu1 %v11031_v14, %s11423_s0 }
 0xfc5   :  { %11072 = vrot.lane.b32.xlu0 %v11066_v57, %s11423_s0  ;;  %11042 = vrot.lane.b32.xlu1 %v11031_v14, %s11424_s1 }
 0xfc9   :  { %11077 = vrot.lane.b32.xlu0 %v11066_v57, %s11424_s1  ;;  %11087 = vrot.lane.b32.xlu1 %v11031_v14, %s11425_s27 }
 0xfcd   :  { %11082 = vrot.lane.b32.xlu0 %v11066_v57, %s11425_s27  ;;  %8360 = vperm.xlu1 %10610, %v8356_v22  }
 0xfec   :  { %8328 = vadd.xlane.f32.xlu0 %v12929_v36 }
 0xff0   :  { %8337 = vadd.xlane.f32.xlu0 %v12935_v45 }
0x101f   :  { %v11013_v55 = vpop.permute.xlu1 %11012 }
0x1020   :  { %v11015_v53 = vunpack.i.h.bf16 %v11013_v55  ;;  %v11014_v4 = vunpack.i.l.bf16 %v11013_v55 }
0x1022   :  { %v7490_v9 = vsel %vm7488_vm0, %v11014_v4, %v11015_v53 }
0x1023   :  { %v11048_v21 = vpop.permute.xlu0 %11047  ;;  %v11018_v58 = vpop.permute.xlu1 %11017 }
0x1024   :  { %v11050_v30 = vunpack.i.h.bf16 %v11048_v21  ;;  %v11049_v29 = vunpack.i.l.bf16 %v11048_v21  ;;  %v11020_v15 = vunpack.i.h.bf16 %v11018_v58  ;;  %v11019_v62 = vunpack.i.l.bf16 %v11018_v58 }
0x1026   :  { %v7489_v33 = vsel %vm7488_vm0, %v11049_v29, %v11050_v30  ;;  %v7584_v51 = vsel %vm2141_vm10, %v11019_v62, %v11020_v15  ;;  %v9848_v15 = vld [vmem:[%s13302_s28 + $0x18] sm:$0xf] }
0x1027   :  { %v10450_v19 = vpack.c.bf16 %v7490_v9, %v7489_v33  ;;  %v11053_v52 = vpop.permute.xlu0 %11052  ;;  %v11023_v63 = vpop.permute.xlu1 %11022 }
0x1028   :  { %v11055_v12 = vunpack.i.h.bf16 %v11053_v52  ;;  %v11054_v50 = vunpack.i.l.bf16 %v11053_v52  ;;  %v11025_v54 = vunpack.i.h.bf16 %v11023_v63  ;;  %v11024_v13 = vunpack.i.l.bf16 %v11023_v63 }
0x1029   :  { %10451 = vmatpush3.bf16.msra.mxu1 %v10450_v19 }
0x102a   :  { %v7583_v41 = vsel %vm2141_vm10, %v11054_v50, %v11055_v12  ;;  %10455 = vmatprep.subr.bf16.mxu1 %v11419_v7  ;;  %v7679_v17 = vsel %vm7677_vm1, %v11024_v13, %v11025_v54 }
0x102b   :  { %v10453_v18 = vpack.c.bf16 %v7584_v51, %v7583_v41  ;;  %v11058_v31 = vpop.permute.xlu0 %11057  ;;  %v11028_v28 = vpop.permute.xlu1 %11027  ;;  %v9851_v41 = vld [vmem:[%s13302_s28 + $0x1c] sm:$0xf] }
0x102c   :  { %v11060_v38 = vunpack.i.h.bf16 %v11058_v31  ;;  %v11059_v47 = vunpack.i.l.bf16 %v11058_v31  ;;  %10051 = vmatmul.mubr.msk.f32.vlgmr.msra.gmra.mrb[72].mxu1 %vm487_vm3, %v7475_v8  ;;  %v11030_v23 = vunpack.i.h.bf16 %v11028_v28  ;;  %v11029_v3 = vunpack.i.l.bf16 %v11028_v28  ;;  %v9854_v31 = vld [vmem:[%s13302_s28 + $0x20] sm:$0xf] }
0x102d   :  { %10454 = vmatpush3.bf16.msra.mxu0 %v10453_v18  ;;  %10064 = vmatprep.mubr.msk.f32.mxu1 %vm11421_vm15, %v12857_v10 }
0x102e   :  { %v7678_v26 = vsel %vm7677_vm1, %v11059_v47, %v11060_v38  ;;  %10458 = vmatprep.subr.bf16.mxu0 %v11419_v7  ;;  %v7773_v24 = vsel %vm889_vm5, %v11029_v3, %v11030_v23  ;;  %v13050_v38 = vld [vmem:[%s13303_s24] ss:$0 sm:$0xff] }
0x102f   :  { %v10456_v32 = vpack.c.bf16 %v7679_v17, %v7678_v26  ;;  %v11063_v27 = vpop.permute.xlu0 %11062  ;;  %v11033_v25 = vpop.permute.xlu1 %11032 }
0x1030   :  { %v11065_v48 = vunpack.i.h.bf16 %v11063_v27  ;;  %v11064_v44 = vunpack.i.l.bf16 %v11063_v27  ;;  %10058 = vmatmul.mubr.msk.f32.vlgmr.msra.gmra.mrb[62].mxu0 %vm487_vm3, %v9833_v42  ;;  %v11035_v35 = vunpack.i.h.bf16 %v11033_v25  ;;  %v11034_v61 = vunpack.i.l.bf16 %v11033_v25  ;;  %v13053_v42 = vld [vmem:[%s13303_s24 + $0x1] ss:$0 sm:$0xff] }
0x1031   :  { %10457 = vmatpush3.bf16.msra.mxu1 %v10456_v32  ;;  %10071 = vmatprep.mubr.msk.f32.mxu0 %vm11421_vm15, %v12857_v10  ;;  %v13058_v32 = vld [vmem:[%s13303_s24 + $0x2] ss:$0 sm:$0xff] }
0x1032   :  { %v7772_v46 = vsel %vm889_vm5, %v11064_v44, %v11065_v48  ;;  %10461 = vmatprep.subr.bf16.mxu1 %v11419_v7  ;;  %v7957_v34 = vsel %vm1286_vm6, %v11034_v61, %v11035_v35  ;;  %v13062_v44 = vld [vmem:[%s13303_s24 + $0x3] ss:$0 sm:$0xff] }
0x1033   :  { %v10459_v6 = vpack.c.bf16 %v7773_v24, %v7772_v46  ;;  %v11068_v40 = vpop.permute.xlu0 %11067  ;;  %v11038_v5 = vpop.permute.xlu1 %11037 }
0x1034   :  { %v11070_v60 = vunpack.i.h.bf16 %v11068_v40  ;;  %v11069_v0 = vunpack.i.l.bf16 %v11068_v40  ;;  %10065 = vmatmul.mubr.msk.f32.vlgmr.msra.gmra.mrb[74].mxu1 %vm487_vm3, %v9836_v39  ;;  %v11040_v43 = vunpack.i.h.bf16 %v11038_v5  ;;  %v11039_v37 = vunpack.i.l.bf16 %v11038_v5  ;;  %v13065_v39 = vld [vmem:[%s13303_s24 + $0x4] ss:$0 sm:$0xff] }
0x1035   :  { %10460 = vmatpush3.bf16.msra.mxu0 %v10459_v6  ;;  %10463 = vmatpush3.bf16.msra.mxu1 %v10462_v2  ;;  %v9845_v2 = vld [vmem:[%s13302_s28 + $0x14] sm:$0xf] }
0x1036   :  { %v7956_v56 = vsel %vm1286_vm6, %v11069_v0, %v11070_v60  ;;  %10464 = vmatprep.subr.bf16.mxu0 %v11419_v7  ;;  %10078 = vmatprep.mubr.msk.f32.mxu1 %vm11421_vm15, %v12857_v10  ;;  %v8052_v55 = vsel %vm8050_vm2, %v11039_v37, %v11040_v43  ;;  %v13070_v60 = vld [vmem:[%s13303_s24 + $0x5] ss:$0 sm:$0xff]  ;;  %v13074_v43 = vld [vmem:[%s13303_s24 + $0x6] ss:$0 sm:$0xff] }
0x1037   :  { %v10465_v57 = vpack.c.bf16 %v7957_v34, %v7956_v56  ;;  %v11073_v14 = vpop.permute.xlu0 %11072  ;;  %v11043_v22 = vpop.permute.xlu1 %11042  ;;  %10467 = vmatprep.subr.bf16.mxu1 %v11419_v7 }
0x1038   :  { %v11075_v49 = vunpack.i.h.bf16 %v11073_v14  ;;  %v11074_v16 = vunpack.i.l.bf16 %v11073_v14  ;;  %10072 = vmatmul.mubr.msk.f32.vlgmr.msra.gmra.mrb[64].mxu0 %vm487_vm3, %v9839_v20  ;;  %10079 = vmatmul.mubr.msk.f32.vlgmr.msra.gmra.mrb[76].mxu1 %vm487_vm3, %v9842_v11  ;;  %v11045_v4 = vunpack.i.h.bf16 %v11043_v22  ;;  %v11044_v21 = vunpack.i.l.bf16 %v11043_v22 }
0x1039   :  { %10466 = vmatpush3.bf16.msra.mxu0 %v10465_v57  ;;  %10085 = vmatprep.mubr.msk.f32.mxu0 %vm11421_vm15, %v12857_v10 }
0x103a   :  { %v8051_v53 = vsel %vm8050_vm2, %v11074_v16, %v11075_v49  ;;  %10470 = vmatprep.subr.bf16.mxu0 %v11419_v7  ;;  %10092 = vmatprep.mubr.msk.f32.mxu1 %vm11421_vm15, %v12857_v10  ;;  %v8147_v62 = vsel %vm8145_vm4, %v11044_v21, %v11045_v4  ;;  %v13078_v49 = vld [vmem:[%s13303_s24 + $0x7] ss:$0 sm:$0xff]  ;;  %v13082_v4 = vld [vmem:[%s13303_s24 + $0x8] ss:$0 sm:$0xff] }
0x103b   :  { %v10468_v58 = vpack.c.bf16 %v8052_v55, %v8051_v53  ;;  %v11078_v30 = vpop.permute.xlu0 %11077  ;;  %v11088_v29 = vpop.permute.xlu1 %11087 }
0x103c   :  { %v11080_v9 = vunpack.i.h.bf16 %v11078_v30  ;;  %v11079_v33 = vunpack.i.l.bf16 %v11078_v30  ;;  %10086 = vmatmul.mubr.msk.f32.vlgmr.msra.gmra.mrb[66].mxu0 %vm487_vm3, %v9845_v2  ;;  %v11090_v52 = vunpack.i.h.bf16 %v11088_v29  ;;  %v11089_v63 = vunpack.i.l.bf16 %v11088_v29 }
0x103d   :  { %10469 = vmatpush3.bf16.msra.mxu1 %v10468_v58  ;;  %10099 = vmatprep.mubr.msk.f32.mxu0 %vm11421_vm15, %v12857_v10 }
0x103e   :  { %v8146_v19 = vsel %vm8145_vm4, %v11079_v33, %v11080_v9  ;;  %10473 = vmatprep.subr.bf16.mxu1 %v11419_v7  ;;  %v8242_v54 = vsel %vm8240_vm7, %v11089_v63, %v11090_v52  ;;  %v8370_v52 = vld [vmem:[%s13304_s20] sm:$0xff]  ;;  %v8371_v63 = vld [vmem:[%s13304_s20 + $0x8] sm:$0xf] }
0x103f   :  { %v10471_v12 = vpack.c.bf16 %v8147_v62, %v8146_v19  ;;  %v11083_v50 = vpop.permute.xlu0 %11082 }
0x1040   :  { %v11085_v8 = vunpack.i.h.bf16 %v11083_v50  ;;  %v11084_v51 = vunpack.i.l.bf16 %v11083_v50  ;;  %10093 = vmatmul.mubr.msk.f32.vlgmr.msra.gmra.mrb[78].mxu1 %vm487_vm3, %v9848_v15  ;;  %v8498_v50 = vld [vmem:[%s13305_s5] sm:$0xff] }
0x1041   :  { %10472 = vmatpush3.bf16.msra.mxu0 %v10471_v12  ;;  %10106 = vmatprep.mubr.msk.f32.mxu1 %vm11421_vm15, %v12857_v10  ;;  %v8357_v12 = vld [vmem:[%s13301_s22 + $0x8] sm:$0xf] }
0x1042   :  { %v8241_v13 = vsel %vm8240_vm7, %v11084_v51, %v11085_v8  ;;  %v8386_v8 = vld [vmem:[#allocation10] sm:$0xff] }
0x1043   :  { %v10474_v18 = vpack.c.bf16 %v8242_v54, %v8241_v13 }
0x1044   :  { %10100 = vmatmul.mubr.msk.f32.vlgmr.msra.gmra.mrb[68].mxu0 %vm487_vm3, %v9851_v41 }
0x1045   :  { %10475 = vmatpush3.bf16.msra.mxu1 %v10474_v18  ;;  %10113 = vmatprep.mubr.msk.f32.mxu0 %vm4461_vm14, %v8386_v8 }
0x1046   :  { %10482 = vmatprep.subr.bf16.mxu1 %v11419_v7 }
0x1048   :  { %10107 = vmatmul.mubr.msk.f32.vlgmr.msra.gmra.mrb[80].mxu1 %vm487_vm3, %v9854_v31 }
0x1049   :  { %10120 = vmatprep.mubr.msk.f32.mxu1 %vm11421_vm15, %v12857_v10 }
0x1079   :  { %v8329_v51 = vpop.xlane.xlu0 %8328 }
0x107a   :  { %v8333_v54 = vmul.f32 0.0078125, %v8329_v51 }
0x107c   :  { %v8344_v18 = vmul.f32 %v8333_v54, %v8333_v54 }
0x107d   :  { %v8338_v41 = vpop.xlane.xlu0 %8337 }
0x107e   :  { %v8342_v13 = vmul.f32 0.0078125, %v8338_v41 }
0x1080   :  { %v8346_v31 = vsub.f32 %v8342_v13, %v8344_v18 }
0x10ff   :  { %v7562_v28 = vpop.f32.mrb[72].mxu1 }
0x1100   :  { %v10052_v47 = vpop.f32.mrb[73].mxu1  ;;  %v7571_v17 = vmul.f32 %v13050_v38, %v7562_v28  ;;  %v8361_v28 = vpop.permute.xlu1 %8360 }
0x1101   :  { %v8348_v47 = vadd.f32 1e-05, %v8346_v31 }
0x1103   :  { %v7656_v26 = vpop.f32.mrb[62].mxu0  ;;  %11201 = vrsqrt.f32 %v8348_v47 }
0x1104   :  { %v7665_v23 = vmul.f32 %v13053_v42, %v7656_v26  ;;  %v10059_v3 = vpop.f32.mrb[63].mxu0 }
0x1106   :  { %v7666_v27 = vadd.f32 %v7665_v23, %v7571_v17 }
0x1107   :  { %v7751_v25 = vpop.f32.mrb[74].mxu1 }
0x1108   :  { %v7760_v48 = vmul.f32 %v13058_v32, %v7751_v25  ;;  %v10066_v10 = vpop.f32.mrb[75].mxu1 }
0x110a   :  { %v7761_v24 = vadd.f32 %v7760_v48, %v7666_v27 }
0x110b   :  { %v7845_v46 = vpop.f32.mrb[64].mxu0  ;;  %v7927_v35 = vpop.f32.mrb[76].mxu1 }
0x110c   :  { %v7854_v61 = vmul.f32 %v13062_v44, %v7845_v46  ;;  %v7936_v6 = vmul.f32 %v13065_v39, %v7927_v35  ;;  %v10073_v40 = vpop.f32.mrb[65].mxu0  ;;  %v10080_v5 = vpop.f32.mrb[77].mxu1 }
0x110d   :  { %v11202_v10 = vpop.eup %11201 }
0x110e   :  { %v7855_v0 = vadd.f32 %v7854_v61, %v7761_v24  ;;  %v8352_v24 = vsub.f32 %v12929_v36, %v8333_v54 }
0x110f   :  { %v8029_v20 = vpop.f32.mrb[66].mxu0 }
0x1110   :  { %v7937_v11 = vadd.f32 %v7936_v6, %v7855_v0  ;;  %v8038_v34 = vmul.f32 %v13070_v60, %v8029_v20  ;;  %v10087_v56 = vpop.f32.mrb[67].mxu0  ;;  %v8354_v46 = vmul.f32 %v11202_v10, %v8352_v24 }
0x1112   :  { %v8039_v37 = vadd.f32 %v8038_v34, %v7937_v11  ;;  %v8368_v40 = vmul.f32 %v8361_v28, %v8354_v46 }
0x1113   :  { %v8124_v57 = vpop.f32.mrb[78].mxu1 }
0x1114   :  { %v8133_v14 = vmul.f32 %v13074_v43, %v8124_v57  ;;  %v10094_v22 = vpop.f32.mrb[79].mxu1 }
0x1115   :  { %v8387_v22 = vld [vmem:[#allocation10 + $0x8] sm:$0xff] }
0x1116   :  { %v8134_v16 = vadd.f32 %v8133_v14, %v8039_v37 }
0x1117   :  { %v8219_v2 = vpop.f32.mrb[68].mxu0 }
0x1118   :  { %v8228_v55 = vmul.f32 %v13078_v49, %v8219_v2  ;;  %v10101_v53 = vpop.f32.mrb[69].mxu0 }
0x111a   :  { %v8229_v21 = vadd.f32 %v8228_v55, %v8134_v16  ;;  %v13099_v16 = vld [vmem:[#allocation3] sm:$0xff] }
0x111b   :  { %v8314_v58 = vpop.f32.mrb[80].mxu1 }
0x111c   :  { %v8323_v30 = vmul.f32 %v13082_v4, %v8314_v58  ;;  %v10108_v29 = vpop.f32.mrb[81].mxu1  ;;  %v8513_v58 = vld [vmem:[%s13306_s2 + $0x8] sm:$0xff] }
0x111e   :  { %v8324_v9 = vadd.f32 %v8323_v30, %v8229_v21  ;;  %v8512_v21 = vld [vmem:[%s13306_s2] sm:$0xff]  ;;  %v8499_v30 = vld [vmem:[%s13305_s5 + $0x8] sm:$0xff] }
0x1120   :  { %8325 = vst [vmem:[#allocation2 + $0x20] sm:$0xf] %v8324_v9 }
0x1127   :  { %v8327_v33 = vld [vmem:[#allocation2 + $0x20] sm:$0xf] }
0x1128   :  { %v8330_v15 = vsel %vm4351_vm11, %v8327_v33, 0.0  ;;  %v8336_v62 = vmul.f32 %v8327_v33, %v8327_v33 }
0x1129   :  { %8331 = vadd.xlane.f32.xlu1 %v8330_v15 }
0x112a   :  { %v8339_v19 = vsel %vm4351_vm11, %v8336_v62, 0.0 }
0x112b   :  { %8340 = vadd.xlane.f32.xlu0 %v8339_v19 }
0x113a   :  { %8374 = vperm.xlu1 %10610, %v8370_v52  }
0x113e   :  { %8379 = vperm.xlu1 %10610, %v8371_v63  }
0x1141   :  { %8365 = vperm.xlu0 %10609, %v8357_v12  }
0x1142   :  { %8502 = vperm.xlu1 %10610, %v8498_v50  }
0x11b6   :  { %v8332_v17 = vpop.xlane.xlu1 %8331 }
0x11b7   :  { %v8334_v26 = vmul.f32 0.0078125, %v8332_v17 }
0x11b8   :  { %v8341_v23 = vpop.xlane.xlu0 %8340 }
0x11b9   :  { %v8345_v3 = vmul.f32 %v8334_v26, %v8334_v26  ;;  %v8343_v27 = vmul.f32 0.0078125, %v8341_v23  ;;  %v8353_v61 = vsub.f32 %v8327_v33, %v8334_v26 }
0x11ba   :  { %v8375_v35 = vpop.permute.xlu1 %8374 }
0x11bb   :  { %v8347_v25 = vsub.f32 %v8343_v27, %v8345_v3  ;;  %v8382_v20 = vadd.f32 %v8375_v35, %v8368_v40 }
0x11bd   :  { %v8349_v48 = vadd.f32 1e-05, %v8347_v25  ;;  %v8384_v37 = vmax.f32 %v8382_v20, 0.0 }
0x11be   :  { %v8380_v34 = vpop.permute.xlu1 %8379 }
0x11bf   :  { %11203 = vrsqrt.f32 %v8349_v48 }
0x11c0   :  { %v8366_v0 = vpop.permute.xlu0 %8365 }
0x11c2   :  { %v8503_v29 = vpop.permute.xlu1 %8502 }
0x11c9   :  { %v11204_v6 = vpop.eup %11203 }
0x11ca   :  { %v8355_v5 = vmul.f32 %v11204_v6, %v8353_v61 }
0x11cc   :  { %v8369_v11 = vmul.f32 %v8366_v0, %v8355_v5  ;;  %v8996_v0 = vld [vmem:[#allocation3 + $0x10] sm:$0xff] }
0x11ce   :  { %v8383_v56 = vadd.f32 %v8380_v34, %v8369_v11 }
0x11d0   :  { %v8385_v57 = vmax.f32 %v8383_v56, 0.0 }
0x11d2   :  { %v10476_v14 = vpack.c.bf16 %v8385_v57, %v8384_v37 }
0x11d4   :  { %10478 = vmatprep.subr.msk.bf16.mxu0 %vm12377_vm13, %v10476_v14 }
0x11d5   :  { %10481 = vmatpush3.bf16.msk.msra.mxu0 %vm12377_vm13, %v10476_v14 }
0x11d6   :  { %10485 = vmatprep.subr.bf16.mxu0 %v11419_v7 }
0x11d8   :  { %10114 = vmatmul.mubr.msk.f32.vlgmr.msra.gmra.mrb[70].mxu0 %vm4461_vm14, %v8387_v22 }
0x11d9   :  { %10127 = vmatprep.mubr.msk.f32.mxu0 %vm11421_vm15, %v13099_v16 }
0x12ab   :  { %v10115_v2 = vpop.f32.mrb[70].mxu0 }
0x12ac   :  { %8474 = vadd.xlane.f32.xlu1 %v10115_v2  ;;  %v8463_v55 = vpop.f32.mrb[71].mxu0  ;;  %v8479_v53 = vmul.f32 %v10115_v2, %v10115_v2 }
0x12ad   :  { %8472 = vadd.xlane.f32.xlu0 %v8463_v55  ;;  %v8478_v59 = vmul.f32 %v8463_v55, %v8463_v55 }
0x12b1   :  { %8482 = vadd.xlane.f32.xlu0 %v8479_v53 }
0x12b5   :  { %8480 = vadd.xlane.f32.xlu0 %v8478_v59 }
0x12bd   :  { %8516 = vperm.xlu1 %10610, %v8512_v21  }
0x12c1   :  { %8521 = vperm.xlu1 %10610, %v8513_v58  }
0x12cb   :  { %8507 = vperm.xlu0 %10609, %v8499_v30  }
0x1339   :  { %v8475_v9 = vpop.xlane.xlu1 %8474 }
0x133a   :  { %v8473_v33 = vpop.xlane.xlu0 %8472  ;;  %v8477_v15 = vmul.f32 0.0078125, %v8475_v9 }
0x133b   :  { %v8476_v52 = vmul.f32 0.0078125, %v8473_v33 }
0x133c   :  { %v8487_v19 = vmul.f32 %v8477_v15, %v8477_v15  ;;  %v8495_v31 = vsub.f32 %v10115_v2, %v8477_v15 }
0x133d   :  { %v8486_v8 = vmul.f32 %v8476_v52, %v8476_v52  ;;  %v8517_v18 = vpop.permute.xlu1 %8516  ;;  %v8494_v26 = vsub.f32 %v8463_v55, %v8476_v52 }
0x133e   :  { %v8483_v62 = vpop.xlane.xlu0 %8482 }
0x133f   :  { %v8485_v63 = vmul.f32 0.0078125, %v8483_v62 }
0x1341   :  { %v8489_v12 = vsub.f32 %v8485_v63, %v8487_v19  ;;  %v8522_v27 = vpop.permute.xlu1 %8521 }
0x1342   :  { %v8481_v50 = vpop.xlane.xlu0 %8480 }
0x1343   :  { %v8491_v51 = vadd.f32 1e-05, %v8489_v12  ;;  %v8484_v41 = vmul.f32 0.0078125, %v8481_v50 }
0x1345   :  { %11205 = vrsqrt.f32 %v8491_v51  ;;  %v8488_v54 = vsub.f32 %v8484_v41, %v8486_v8 }
0x1347   :  { %v8490_v13 = vadd.f32 1e-05, %v8488_v54 }
0x1349   :  { %11207 = vrsqrt.f32 %v8490_v13 }
0x134a   :  { %v8508_v17 = vpop.permute.xlu0 %8507 }
0x134f   :  { %v11206_v28 = vpop.eup %11205 }
0x1350   :  { %v8497_v47 = vmul.f32 %v11206_v28, %v8495_v31 }
0x1352   :  { %v8511_v23 = vmul.f32 %v8508_v17, %v8497_v47 }
0x1353   :  { %v11208_v3 = vpop.eup %11207 }
0x1354   :  { %v8496_v25 = vmul.f32 %v11208_v3, %v8494_v26  ;;  %v8525_v48 = vadd.f32 %v8522_v27, %v8511_v23 }
0x1356   :  { %v8510_v10 = vmul.f32 %v8503_v29, %v8496_v25  ;;  %v13106_v24 = vmax.f32 %v8525_v48, 0.0 }
0x1358   :  { %v8524_v46 = vadd.f32 %v8517_v18, %v8510_v10  ;;  %v11091_v35 = vpack.i.bf16 %v13106_v24, %v13099_v16  ;;  %v11111_v5 = vpack.i.bf16 %v12972_v1, %v13106_v24  ;;  %v9411_v1 = vld [vmem:[%s13307_s10] sm:$0xff] }
0x135a   :  { %v13110_v61 = vmax.f32 %v8524_v46, 0.0  ;;  %11092 = vrot.lane.b32.xlu1 %v11091_v35, %s11420_s18 }
0x135c   :  { %8528 = vst [vmem:[#allocation3 + $0x8] sm:$0xff] %v13110_v61  ;;  %v11126_v6 = vpack.i.bf16 %v13110_v61, %v13099_v16  ;;  %v10495_v40 = vpack.c.bf16 %v13106_v24, %v13110_v61  ;;  %v11146_v20 = vpack.i.bf16 %v8996_v0, %v13110_v61 }
0x135e   :  { %11127 = vrot.lane.b32.xlu0 %v11126_v6, %s11420_s18  ;;  %11097 = vrot.lane.b32.xlu1 %v11091_v35, %s11403_s26 }
0x1362   :  { %11132 = vrot.lane.b32.xlu0 %v11126_v6, %s11403_s26  ;;  %11102 = vrot.lane.b32.xlu1 %v11091_v35, %s11422_s23  ;;  %s13308_s26 = sld [smem:[#allocation36_spill]] }
0x1366   :  { %11137 = vrot.lane.b32.xlu0 %v11126_v6, %s11422_s23  ;;  %11107 = vrot.lane.b32.xlu1 %v11091_v35, %s11412_s4 }
0x1368   :  { %v9862_v8 = vld [vmem:[%s13308_s26 + $0x4] sm:$0xf]  ;;  %v9865_v26 = vld [vmem:[%s13308_s26 + $0x8] sm:$0xf]  ;;  %v9871_v0 = vld [vmem:[%s13308_s26 + $0x10] sm:$0xf] }
0x136a   :  { %11142 = vrot.lane.b32.xlu0 %v11126_v6, %s11412_s4  ;;  %11112 = vrot.lane.b32.xlu1 %v11111_v5, %s11413_s12  ;;  %s13309_s4 = sld [smem:[#allocation20_spill]] }
0x136e   :  { %11147 = vrot.lane.b32.xlu0 %v11146_v20, %s11413_s12  ;;  %11117 = vrot.lane.b32.xlu1 %v11111_v5, %s11423_s0 }
0x1372   :  { %11152 = vrot.lane.b32.xlu0 %v11146_v20, %s11423_s0  ;;  %11122 = vrot.lane.b32.xlu1 %v11111_v5, %s11424_s1 }
0x1376   :  { %11157 = vrot.lane.b32.xlu0 %v11146_v20, %s11424_s1  ;;  %11167 = vrot.lane.b32.xlu1 %v11111_v5, %s11425_s27  ;;  %v9868_v5 = vld [vmem:[%s13308_s26 + $0xc] sm:$0xf] }
0x137a   :  { %11162 = vrot.lane.b32.xlu0 %v11146_v20, %s11425_s27  ;;  %9415 = vperm.xlu1 %10610, %v9411_v1  }
0x1399   :  { %9385 = vadd.xlane.f32.xlu0 %v12929_v36 }
0x139d   :  { %9393 = vadd.xlane.f32.xlu0 %v12935_v45  ;;  %v8534_v45 = vld [vmem:[%s13308_s26] sm:$0xf] }
0x13cc   :  { %v11093_v11 = vpop.permute.xlu1 %11092 }
0x13cd   :  { %v11095_v34 = vunpack.i.h.bf16 %v11093_v11  ;;  %v11094_v56 = vunpack.i.l.bf16 %v11093_v11 }
0x13cf   :  { %v8548_v2 = vsel %vm7488_vm0, %v11094_v56, %v11095_v34 }
0x13d0   :  { %v11128_v37 = vpop.permute.xlu0 %11127  ;;  %v11098_v57 = vpop.permute.xlu1 %11097 }
0x13d1   :  { %v11130_v14 = vunpack.i.h.bf16 %v11128_v37  ;;  %v11129_v22 = vunpack.i.l.bf16 %v11128_v37  ;;  %v11100_v53 = vunpack.i.h.bf16 %v11098_v57  ;;  %v11099_v59 = vunpack.i.l.bf16 %v11098_v57 }
0x13d3   :  { %v8547_v55 = vsel %vm7488_vm0, %v11129_v22, %v11130_v14  ;;  %v8642_v9 = vsel %vm2141_vm10, %v11099_v59, %v11100_v53 }
0x13d4   :  { %v10483_v21 = vpack.c.bf16 %v8548_v2, %v8547_v55  ;;  %v11133_v58 = vpop.permute.xlu0 %11132  ;;  %v11103_v30 = vpop.permute.xlu1 %11102 }
0x13d5   :  { %v11135_v36 = vunpack.i.h.bf16 %v11133_v58  ;;  %v11134_v29 = vunpack.i.l.bf16 %v11133_v58  ;;  %v11105_v15 = vunpack.i.h.bf16 %v11103_v30  ;;  %v11104_v62 = vunpack.i.l.bf16 %v11103_v30 }
0x13d6   :  { %10484 = vmatpush3.bf16.msra.mxu1 %v10483_v21 }
0x13d7   :  { %v8641_v33 = vsel %vm2141_vm10, %v11134_v29, %v11135_v36  ;;  %10488 = vmatprep.subr.bf16.mxu1 %v11419_v7  ;;  %v8736_v51 = vsel %vm7677_vm1, %v11104_v62, %v11105_v15  ;;  %v9877_v36 = vld [vmem:[%s13308_s26 + $0x18] sm:$0xf] }
0x13d8   :  { %v10486_v19 = vpack.c.bf16 %v8642_v9, %v8641_v33  ;;  %v11138_v52 = vpop.permute.xlu0 %11137  ;;  %v11108_v63 = vpop.permute.xlu1 %11107 }
0x13d9   :  { %v11140_v12 = vunpack.i.h.bf16 %v11138_v52  ;;  %v11139_v50 = vunpack.i.l.bf16 %v11138_v52  ;;  %10121 = vmatmul.mubr.msk.f32.vlgmr.msra.gmra.mrb[82].mxu1 %vm487_vm3, %v8534_v45  ;;  %v11110_v54 = vunpack.i.h.bf16 %v11108_v63  ;;  %v11109_v13 = vunpack.i.l.bf16 %v11108_v63  ;;  %v9880_v63 = vld [vmem:[%s13308_s26 + $0x1c] sm:$0xf] }
0x13da   :  { %10487 = vmatpush3.bf16.msra.mxu0 %v10486_v19  ;;  %10134 = vmatprep.mubr.msk.f32.mxu1 %vm11421_vm15, %v13099_v16 }
0x13db   :  { %v8735_v41 = vsel %vm7677_vm1, %v11139_v50, %v11140_v12  ;;  %10491 = vmatprep.subr.bf16.mxu0 %v11419_v7  ;;  %v8830_v23 = vsel %vm889_vm5, %v11109_v13, %v11110_v54  ;;  %v9443_v54 = vld [vmem:[%s13309_s4 + $0x10] sm:$0xff] }
0x13dc   :  { %v10489_v18 = vpack.c.bf16 %v8736_v51, %v8735_v41  ;;  %v11143_v31 = vpop.permute.xlu0 %11142  ;;  %v11113_v28 = vpop.permute.xlu1 %11112  ;;  %v9441_v51 = vld [vmem:[%s13309_s4] sm:$0xff]  ;;  %v9442_v41 = vld [vmem:[%s13309_s4 + $0x8] sm:$0xff] }
0x13dd   :  { %v11145_v47 = vunpack.i.h.bf16 %v11143_v31  ;;  %v11144_v17 = vunpack.i.l.bf16 %v11143_v31  ;;  %10128 = vmatmul.mubr.msk.f32.vlgmr.msra.gmra.mrb[72].mxu0 %vm487_vm3, %v9862_v8  ;;  %v11115_v27 = vunpack.i.h.bf16 %v11113_v28  ;;  %v11114_v25 = vunpack.i.l.bf16 %v11113_v28  ;;  %v9883_v8 = vld [vmem:[%s13308_s26 + $0x20] sm:$0xf] }
0x13de   :  { %10490 = vmatpush3.bf16.msra.mxu1 %v10489_v18  ;;  %10141 = vmatprep.mubr.msk.f32.mxu0 %vm11421_vm15, %v13099_v16  ;;  %v10509_v13 = vpack.c.bf16 %v9442_v41, %v9441_v51  ;;  %v9444_v18 = vld [vmem:[%s13309_s4 + $0x18] sm:$0xff]  ;;  %v9455_v51 = vld [vmem:[%s13309_s4 + $0x70] sm:$0xff] }
0x13df   :  { %v8829_v3 = vsel %vm889_vm5, %v11144_v17, %v11145_v47  ;;  %10494 = vmatprep.subr.bf16.mxu1 %v11419_v7  ;;  %v9014_v20 = vsel %vm1286_vm6, %v11114_v25, %v11115_v27  ;;  %v10513_v31 = vpack.c.bf16 %v9444_v18, %v9443_v54  ;;  %v9456_v41 = vld [vmem:[%s13309_s4 + $0x78] sm:$0xff]  ;;  %vm9629_vm5 = vcmask 9216  }
0x13e0   :  { %v10492_v48 = vpack.c.bf16 %v8830_v23, %v8829_v3  ;;  %v11148_v10 = vpop.permute.xlu0 %11147  ;;  %v11118_v46 = vpop.permute.xlu1 %11117  ;;  %v10537_v54 = vpack.c.bf16 %v9456_v41, %v9455_v51 }
0x13e1   :  { %v11150_v35 = vunpack.i.h.bf16 %v11148_v10  ;;  %v11149_v6 = vunpack.i.l.bf16 %v11148_v10  ;;  %10135 = vmatmul.mubr.msk.f32.vlgmr.msra.gmra.mrb[84].mxu1 %vm487_vm3, %v9865_v26  ;;  %v11120_v11 = vunpack.i.h.bf16 %v11118_v46  ;;  %v11119_v34 = vunpack.i.l.bf16 %v11118_v46 }
0x13e2   :  { %10493 = vmatpush3.bf16.msra.mxu0 %v10492_v48  ;;  %10496 = vmatpush3.bf16.msra.mxu1 %v10495_v40  ;;  %v9874_v40 = vld [vmem:[%s13308_s26 + $0x14] sm:$0xf] }
0x13e3   :  { %v9013_v1 = vsel %vm1286_vm6, %v11149_v6, %v11150_v35  ;;  %10497 = vmatprep.subr.bf16.mxu0 %v11419_v7  ;;  %10148 = vmatprep.mubr.msk.f32.mxu1 %vm11421_vm15, %v13099_v16  ;;  %v9108_v14 = vsel %vm8050_vm2, %v11119_v34, %v11120_v11  ;;  %vm9627_vm6 = vcmask 15360  }
0x13e4   :  { %v10498_v56 = vpack.c.bf16 %v9014_v20, %v9013_v1  ;;  %v11153_v37 = vpop.permute.xlu0 %11152  ;;  %v11123_v57 = vpop.permute.xlu1 %11122  ;;  %10500 = vmatprep.subr.bf16.mxu1 %v11419_v7 }
0x13e5   :  { %v11155_v24 = vunpack.i.h.bf16 %v11153_v37  ;;  %v11154_v61 = vunpack.i.l.bf16 %v11153_v37  ;;  %10142 = vmatmul.mubr.msk.f32.vlgmr.msra.gmra.mrb[74].mxu0 %vm487_vm3, %v9868_v5  ;;  %10149 = vmatmul.mubr.msk.f32.vlgmr.msra.gmra.mrb[86].mxu1 %vm487_vm3, %v9871_v0  ;;  %v11125_v2 = vunpack.i.h.bf16 %v11123_v57  ;;  %v11124_v55 = vunpack.i.l.bf16 %v11123_v57 }
0x13e6   :  { %10499 = vmatpush3.bf16.msra.mxu0 %v10498_v56  ;;  %10155 = vmatprep.mubr.msk.f32.mxu0 %vm11421_vm15, %v13099_v16 }
0x13e7   :  { %v9107_v22 = vsel %vm8050_vm2, %v11154_v61, %v11155_v24  ;;  %10503 = vmatprep.subr.bf16.mxu0 %v11419_v7  ;;  %10162 = vmatprep.mubr.msk.f32.mxu1 %vm11421_vm15, %v13099_v16  ;;  %v9202_v29 = vsel %vm8145_vm4, %v11124_v55, %v11125_v2 }
0x13e8   :  { %v10501_v53 = vpack.c.bf16 %v9108_v14, %v9107_v22  ;;  %v11158_v59 = vpop.permute.xlu0 %11157  ;;  %v11168_v21 = vpop.permute.xlu1 %11167 }
0x13e9   :  { %v11160_v58 = vunpack.i.h.bf16 %v11158_v59  ;;  %v11159_v30 = vunpack.i.l.bf16 %v11158_v59  ;;  %10156 = vmatmul.mubr.msk.f32.vlgmr.msra.gmra.mrb[76].mxu0 %vm487_vm3, %v9874_v40  ;;  %v11170_v9 = vunpack.i.h.bf16 %v11168_v21  ;;  %v11169_v33 = vunpack.i.l.bf16 %v11168_v21  ;;  %v9445_v59 = vld [vmem:[%s13309_s4 + $0x20] sm:$0xff] }
0x13ea   :  { %10502 = vmatpush3.bf16.msra.mxu1 %v10501_v53  ;;  %10169 = vmatprep.mubr.msk.f32.mxu0 %vm11421_vm15, %v13099_v16  ;;  %v9425_v53 = vld [vmem:[%s11607_s13] sm:$0xff] }
0x13eb   :  { %v9201_v45 = vsel %vm8145_vm4, %v11159_v30, %v11160_v58  ;;  %10506 = vmatprep.subr.bf16.mxu1 %v11419_v7  ;;  %v9296_v12 = vsel %vm8240_vm7, %v11169_v33, %v11170_v9  ;;  %v9426_v58 = vld [vmem:[%s11607_s13 + $0x8] sm:$0xff]  ;;  %v9447_v30 = vld [vmem:[%s13309_s4 + $0x30] sm:$0xff]  ;;  %v9449_v33 = vld [vmem:[%s13309_s4 + $0x40] sm:$0xff] }
0x13ec   :  { %v10504_v15 = vpack.c.bf16 %v9202_v29, %v9201_v45  ;;  %v11163_v62 = vpop.permute.xlu0 %11162  ;;  %v9412_v29 = vld [vmem:[%s13307_s10 + $0x8] sm:$0xff] }
0x13ed   :  { %v11165_v19 = vunpack.i.h.bf16 %v11163_v62  ;;  %v11164_v52 = vunpack.i.l.bf16 %v11163_v62  ;;  %10163 = vmatmul.mubr.msk.f32.vlgmr.msra.gmra.mrb[88].mxu1 %vm487_vm3, %v9877_v36  ;;  %v9448_v36 = vld [vmem:[%s13309_s4 + $0x38] sm:$0xff]  ;;  %v9535_v9 = vld [vmem:[%s11617_s30 + $0x8] sm:$0x3]  ;;  %v9534_v62 = vld [vmem:[%s11617_s30] sm:$0xff] }
0x13ee   :  { %10505 = vmatpush3.bf16.msra.mxu0 %v10504_v15  ;;  %10176 = vmatprep.mubr.msk.f32.mxu1 %vm11421_vm15, %v13099_v16  ;;  %v10521_v45 = vpack.c.bf16 %v9448_v36, %v9447_v30  ;;  %v9450_v15 = vld [vmem:[%s13309_s4 + $0x48] sm:$0xff] }
0x13ef   :  { %v9295_v50 = vsel %vm8240_vm7, %v11164_v52, %v11165_v19  ;;  %10510 = vmatprep.subr.bf16.mxu0 %v10509_v13  ;;  %v10525_v19 = vpack.c.bf16 %v9450_v15, %v9449_v33  ;;  %v9451_v52 = vld [vmem:[%s13309_s4 + $0x50] sm:$0xff] }
0x13f0   :  { %v10507_v7 = vpack.c.bf16 %v9296_v12, %v9295_v50  ;;  %v9453_v50 = vld [vmem:[%s13309_s4 + $0x60] sm:$0xff] }
0x13f1   :  { %10170 = vmatmul.mubr.msk.f32.vlgmr.msra.gmra.mrb[78].mxu0 %vm487_vm3, %v9880_v63  ;;  %v9452_v63 = vld [vmem:[%s13309_s4 + $0x58] sm:$0xff] }
0x13f2   :  { %10508 = vmatpush3.bf16.msra.mxu1 %v10507_v7  ;;  %10512 = vmatpush3.bf16.msra.mxu0 %v10509_v13  ;;  %v10529_v12 = vpack.c.bf16 %v9452_v63, %v9451_v52  ;;  %v9454_v7 = vld [vmem:[%s13309_s4 + $0x68] sm:$0xff] }
0x13f3   :  { %10514 = vmatprep.subr.bf16.mxu0 %v10513_v31 }
0x13f5   :  { %10177 = vmatmul.mubr.msk.f32.vlgmr.msra.gmra.mrb[90].mxu1 %vm487_vm3, %v9883_v8  ;;  %v10533_v8 = vpack.c.bf16 %v9454_v7, %v9453_v50 }
0x13f6   :  { %10516 = vmatpush3.bf16.msra.mxu0 %v10513_v31 }
0x1426   :  { %v9386_v13 = vpop.xlane.xlu0 %9385 }
0x1427   :  { %v9389_v31 = vmul.f32 0.0078125, %v9386_v13 }
0x142a   :  { %v9394_v18 = vpop.xlane.xlu0 %9393 }
0x14ac   :  { %v8620_v16 = vpop.f32.mrb[82].mxu1 }
0x14ad   :  { %v10122_v28 = vpop.f32.mrb[83].mxu1  ;;  %v8629_v47 = vmul.f32 %v13050_v38, %v8620_v16  ;;  %v9397_v16 = vmul.f32 0.0078125, %v9394_v18 }
0x14ae   :  { %v9399_v28 = vmul.f32 %v9389_v31, %v9389_v31 }
0x14b0   :  { %v8714_v17 = vpop.f32.mrb[72].mxu0 }
0x14b1   :  { %v8723_v26 = vmul.f32 %v13053_v42, %v8714_v17  ;;  %v10129_v23 = vpop.f32.mrb[73].mxu0 }
0x14b2   :  { %v9416_v23 = vpop.permute.xlu1 %9415 }
0x14b3   :  { %v8724_v3 = vadd.f32 %v8723_v26, %v8629_v47  ;;  %v9401_v47 = vsub.f32 %v9397_v16, %v9399_v28 }
0x14b4   :  { %v8808_v27 = vpop.f32.mrb[84].mxu1 }
0x14b5   :  { %v8817_v25 = vmul.f32 %v13058_v32, %v8808_v27  ;;  %v10136_v48 = vpop.f32.mrb[85].mxu1  ;;  %v9403_v17 = vadd.f32 1e-05, %v9401_v47 }
0x14b7   :  { %v8818_v10 = vadd.f32 %v8817_v25, %v8724_v3  ;;  %11209 = vrsqrt.f32 %v9403_v17  ;;  %v11221_v3 = vld [vmem:[#allocation2] sm:$0xff] }
0x14b8   :  { %v8902_v46 = vpop.f32.mrb[74].mxu0  ;;  %v8984_v35 = vpop.f32.mrb[86].mxu1  ;;  %v9407_v27 = vsub.f32 %v11221_v3, %v9389_v31 }
0x14b9   :  { %v8911_v6 = vmul.f32 %v13062_v44, %v8902_v46  ;;  %v8993_v5 = vmul.f32 %v13065_v39, %v8984_v35  ;;  %v10143_v0 = vpop.f32.mrb[75].mxu0  ;;  %v10150_v20 = vpop.f32.mrb[87].mxu1 }
0x14bb   :  { %v8912_v1 = vadd.f32 %v8911_v6, %v8818_v10 }
0x14bc   :  { %v9086_v38 = vpop.f32.mrb[76].mxu0 }
0x14bd   :  { %v8994_v11 = vadd.f32 %v8993_v5, %v8912_v1  ;;  %v9095_v42 = vmul.f32 %v13070_v60, %v9086_v38  ;;  %v10157_v34 = vpop.f32.mrb[77].mxu0 }
0x14bf   :  { %v9096_v56 = vadd.f32 %v9095_v42, %v8994_v11 }
0x14c0   :  { %v9180_v37 = vpop.f32.mrb[88].mxu1 }
0x14c1   :  { %v9189_v32 = vmul.f32 %v13074_v43, %v9180_v37  ;;  %v10164_v57 = vpop.f32.mrb[89].mxu1  ;;  %v11210_v26 = vpop.eup %11209 }
0x14c2   :  { %v9409_v25 = vmul.f32 %v11210_v26, %v9407_v27 }
0x14c3   :  { %v9190_v24 = vadd.f32 %v9189_v32, %v9096_v56 }
0x14c4   :  { %v9274_v61 = vpop.f32.mrb[78].mxu0  ;;  %v9423_v5 = vmul.f32 %v9416_v23, %v9409_v25 }
0x14c5   :  { %v9283_v44 = vmul.f32 %v13078_v49, %v9274_v61  ;;  %v10171_v39 = vpop.f32.mrb[79].mxu0 }
0x14c7   :  { %v9284_v40 = vadd.f32 %v9283_v44, %v9190_v24  ;;  %v9532_v44 = vld [vmem:[#allocation13] sm:$0xff] }
0x14c8   :  { %v9368_v14 = vpop.f32.mrb[90].mxu1  ;;  %10218 = vmatprep.mubr.msk.f32.mxu1 %vm487_vm3, %v9532_v44 }
0x14c9   :  { %v9377_v22 = vmul.f32 %v13082_v4, %v9368_v14  ;;  %v10178_v60 = vpop.f32.mrb[91].mxu1  ;;  %v9446_v4 = vld [vmem:[%s13309_s4 + $0x28] sm:$0xff] }
0x14ca   :  { %v10517_v21 = vpack.c.bf16 %v9446_v4, %v9445_v59 }
0x14cb   :  { %v9378_v2 = vadd.f32 %v9377_v22, %v9284_v40  ;;  %v9533_v22 = vld [vmem:[#allocation13 + $0x8] sm:$0x3] }
0x14cc   :  { %10518 = vmatprep.subr.bf16.mxu0 %v10517_v21 }
0x14cd   :  { %v9380_v55 = vrot.slane %v9378_v2, 4  ;;  %10520 = vmatpush3.bf16.msra.mxu0 %v10517_v21 }
0x14ce   :  { %10522 = vmatprep.subr.bf16.mxu0 %v10521_v45 }
0x14cf   :  { %9382 = vst [vmem:[#allocation2 + $0x20] sm:$0xf0] %v9380_v55 }
0x14d1   :  { %10524 = vmatpush3.bf16.msra.mxu0 %v10521_v45 }
0x14d2   :  { %10526 = vmatprep.subr.bf16.mxu0 %v10525_v19 }
0x14d5   :  { %10528 = vmatpush3.bf16.msra.mxu0 %v10525_v19 }
0x14d6   :  { %v13210_v43 = vld [vmem:[#allocation2 + $0x20] sm:$0xff]  ;;  %10530 = vmatprep.subr.bf16.mxu0 %v10529_v12 }
0x14d7   :  { %9387 = vadd.xlane.f32.xlu1 %v13210_v43  ;;  %v9392_v49 = vmul.f32 %v13210_v43, %v13210_v43 }
0x14d9   :  { %9395 = vadd.xlane.f32.xlu0 %v9392_v49  ;;  %10532 = vmatpush3.bf16.msra.mxu0 %v10529_v12 }
0x14da   :  { %10534 = vmatprep.subr.bf16.mxu0 %v10533_v8 }
0x14dd   :  { %10536 = vmatpush3.bf16.msra.mxu0 %v10533_v8 }
0x14de   :  { %10538 = vmatprep.subr.bf16.mxu0 %v10537_v54 }
0x14e1   :  { %10540 = vmatpush3.bf16.msra.mxu0 %v10537_v54 }
0x14e8   :  { %9429 = vperm.xlu1 %10610, %v9425_v53  }
0x14ec   :  { %9434 = vperm.xlu1 %10610, %v9426_v58  }
0x14ef   :  { %9420 = vperm.xlu0 %10609, %v9412_v29  }
0x14f0   :  { %9543 = vperm.xlu1 %10610, %v9535_v9  }
0x14f3   :  { %9538 = vperm.xlu0 %10609, %v9534_v62  }
0x1564   :  { %v9388_v48 = vpop.xlane.xlu1 %9387 }
0x1565   :  { %v9390_v10 = vmul.f32 0.0078125, %v9388_v48 }
0x1566   :  { %v9396_v46 = vpop.xlane.xlu0 %9395 }
0x1567   :  { %v9400_v35 = vmul.f32 %v9390_v10, %v9390_v10  ;;  %v9398_v6 = vmul.f32 0.0078125, %v9396_v46  ;;  %v9408_v42 = vsub.f32 %v13210_v43, %v9390_v10 }
0x1568   :  { %v9430_v0 = vpop.permute.xlu1 %9429 }
0x1569   :  { %v9402_v20 = vsub.f32 %v9398_v6, %v9400_v35  ;;  %v9437_v1 = vadd.f32 %v9430_v0, %v9423_v5 }
0x156b   :  { %v9404_v38 = vadd.f32 1e-05, %v9402_v20  ;;  %v9439_v11 = vmax.f32 %v9437_v1, 0.0 }
0x156c   :  { %v9435_v57 = vpop.permute.xlu1 %9434 }
0x156d   :  { %11211 = vrsqrt.f32 %v9404_v38  ;;  %10211 = vmatprep.mubr.f32.mxu0 %v9439_v11 }
0x156e   :  { %v9421_v37 = vpop.permute.xlu0 %9420 }
0x1570   :  { %v9544_v60 = vpop.permute.xlu1 %9543 }
0x1572   :  { %v9539_v55 = vpop.permute.xlu0 %9538 }
0x1577   :  { %v11212_v34 = vpop.eup %11211 }
0x1578   :  { %v9410_v56 = vmul.f32 %v11212_v34, %v9408_v42 }
0x157a   :  { %v9424_v32 = vmul.f32 %v9421_v37, %v9410_v56 }
0x157c   :  { %v9438_v24 = vadd.f32 %v9435_v57, %v9424_v32 }
0x157e   :  { %v9440_v61 = vmax.f32 %v9438_v24, 0.0 }
0x1580   :  { %10212 = vmatmul.mubr.f32.vlgmr.msra.gmra.mrb[80].mxu0 %v9440_v61 }
0x1653   :  { %v10213_v39 = vpop.f32.mrb[80].mxu0 }
0x1654   :  { %v9523_v40 = vpop.f32.mrb[81].mxu0 }
0x1655   :  { %v10541_v14 = vpack.c.bf16 %v10213_v39, %v9523_v40 }
0x1657   :  { %10542 = vmatprep.subr.bf16.mxu1 %v10541_v14 }
0x1658   :  { %10544 = vmatpush3.bf16.msra.mxu1 %v10541_v14 }
0x165b   :  { %10219 = vmatmul.mubr.msk.f32.vlgmr.msra.gmra.mrb[92].mxu1 %vm487_vm3, %v9533_v22 }
0x172e   :  { %v10220_v2 = vpop.f32.mrb[92].mxu1 }
0x172f   :  { %v9624_v43 = vadd.f32 %v10220_v2, %v9544_v60  ;;  %v9618_v49 = vpop.f32.mrb[93].mxu1 }
0x1730   :  { %v9619_v53 = vadd.f32 %v9618_v49, %v9539_v55 }
0x1731   :  { %9630 = vst.msk [vmem:[%s11622_s6 + $0x8] sm:$0x3] %vm9629_vm5, %v9624_v43 }
0x1732   :  { %9628 = vst.msk [vmem:[%s11622_s6] sm:$0xff] %vm9627_vm6, %v9619_v53 }
0x1733   :  { %9635 = vsyncpa [#allocation6], 1 }
0x1734   :  { %9636 = vsyncpa [#allocation8], 1 }
0x1735   :  { %9637 = vsyncpa [#allocation11], 1 }
0x1736   :  { %9638 = vsyncpa [#allocation14], 1 }

</bundles_post_ra>
